<compile_context>
chip_gen: v5e
topology: v5e:2x2
jax: 0.10.0
libtpu: 0.0.40
codegen_flags: <defaults>
</compile_context>

<pallas_src>
import math
import functools

import jax
import jax.numpy as jnp
from jax.experimental import pallas as pl
from jax.experimental.pallas import tpu as pltpu

_LN_EPS = 1e-6
_GELU_C = math.sqrt(2.0 / math.pi)
_NEG_INF = -1e18  # plain Python float (jnp scalars get captured as kernel constants)


# ----------------------------------------------------------------------------
# In-kernel helpers
# ----------------------------------------------------------------------------


def _ln(x, g, b):
    mu = jnp.mean(x, axis=-1, keepdims=True)
    var = jnp.mean((x - mu) ** 2, axis=-1, keepdims=True)
    return (x - mu) * jax.lax.rsqrt(var + _LN_EPS) * g + b


def _split_heads(x2d, L, Bt, heads, dk):
    # (L*Bt, heads*dk) rows in (l, b) order  ->  (Bt*heads, L, dk)
    x4 = x2d.reshape(L, Bt, heads, dk)
    return jnp.transpose(x4, (1, 2, 0, 3)).reshape(Bt * heads, L, dk)


def _merge_heads(x3d, L, Bt, heads, dk):
    # (Bt*heads, L, dk)  ->  (L*Bt, heads*dk) rows in (l, b) order
    x4 = x3d.reshape(Bt, heads, L, dk)
    return jnp.transpose(x4, (2, 0, 1, 3)).reshape(L * Bt, heads * dk)


def _mha(q2d, k2d, v2d, add_mask, *, heads, dk, Lq, Lk, Bt):
    # Batched multi-head attention over all heads and all tiled batch elements.
    #   q2d: (Lq*Bt, D)   k2d/v2d: (Lk*Bt, D)   rows ordered (position, batch)
    #   add_mask: (Bt, 1 or Lq, Lk) additive f32
    qh = _split_heads(q2d, Lq, Bt, heads, dk).astype(jnp.bfloat16)   # (Bt*H, Lq, dk)
    kh = _split_heads(k2d, Lk, Bt, heads, dk).astype(jnp.bfloat16)   # (Bt*H, Lk, dk)
    vh = _split_heads(v2d, Lk, Bt, heads, dk).astype(jnp.bfloat16)   # (Bt*H, Lk, dk)

    # scores = q @ k^T  (scale already folded into the query weights)
    s = jax.lax.dot_general(qh, kh, (((2,), (2,)), ((0,), (0,))),
                            preferred_element_type=jnp.float32)      # (Bt*H, Lq, Lk)
    s = (s.reshape(Bt, heads, Lq, Lk) + add_mask[:, None, :, :]
         ).reshape(Bt * heads, Lq, Lk)

    m = jnp.max(s, axis=-1, keepdims=True)
    p = jnp.exp(s - m)
    denom = jnp.sum(p, axis=-1, keepdims=True)
    p = p * pl.reciprocal(denom, approx=True)

    ctx = jax.lax.dot_general(p.astype(jnp.bfloat16), vh,
                              (((2,), (1,)), ((0,), (0,))),
                              preferred_element_type=jnp.float32)     # (Bt*H, Lq, dk)
    return _merge_heads(ctx, Lq, Bt, heads, dk)                       # (Lq*Bt, D)


# ----------------------------------------------------------------------------
# Fused decoder-layer kernel (bt batch elements per grid step)
# ----------------------------------------------------------------------------


def _decoder_layer_kernel(
    x_ref, mem_ref, tpad_ref, spad_ref,
    ln_g_ref, ln_b_ref,
    wqkv_ref, bqkv_ref, wo1_ref, bo1_ref,
    wq2_ref, bq2_ref, wkv2_ref, bkv2_ref, wo2_ref, bo2_ref,
    w1_ref, b1_ref, w2_ref, b2_ref,
    fln_g_ref, fln_b_ref,
    o_ref, *, heads, apply_final_ln,
):
    x_nat = x_ref[...]                      # (Lq, Bt, D) f32 — native (len, batch, D)
    Lq, Bt, D = x_nat.shape
    Lk = mem_ref.shape[0]
    dk = D // heads

    # Row-wise ops (LN / projections / FFN) are order agnostic: flatten to
    # (Lq*Bt, D) so the matmul M dimension is bt*Lq rows.
    x = x_nat.reshape(Lq * Bt, D)
    ln_g = ln_g_ref[...]                    # (3, D)
    ln_b = ln_b_ref[...]                    # (3, D)

    # ---------------- self attention ----------------
    h1 = _ln(x, ln_g[0:1, :], ln_b[0:1, :])
    qkv = (jnp.dot(h1.astype(jnp.bfloat16), wqkv_ref[...],
                   preferred_element_type=jnp.float32) + bqkv_ref[...])   # (R, 3D)
    q, k, v = qkv[:, :D], qkv[:, D:2 * D], qkv[:, 2 * D:]

    # dec mask = causal OR key-pad, folded into a single additive where.
    rows = jax.lax.broadcasted_iota(jnp.int32, (Lq, Lq), 0)
    cols = jax.lax.broadcasted_iota(jnp.int32, (Lq, Lq), 1)
    dec_add = jnp.where((cols > rows)[None, :, :], _NEG_INF,
                        tpad_ref[...][:, None, :])                        # (Bt, Lq, Lq)

    ctx = _mha(q, k, v, dec_add, heads=heads, dk=dk, Lq=Lq, Lk=Lq, Bt=Bt)
    x = x + (jnp.dot(ctx.astype(jnp.bfloat16), wo1_ref[...],
                     preferred_element_type=jnp.float32) + bo1_ref[...])

    # ---------------- context attention ----------------
    h2 = _ln(x, ln_g[1:2, :], ln_b[1:2, :])
    q2 = (jnp.dot(h2.astype(jnp.bfloat16), wq2_ref[...],
                  preferred_element_type=jnp.float32) + bq2_ref[...])     # (R, D)
    mem = mem_ref[...].reshape(Lk * Bt, D)                                # bf16 rows (l, b)
    kv2 = (jnp.dot(mem, wkv2_ref[...],
                   preferred_element_type=jnp.float32) + bkv2_ref[...])   # (Lk*Bt, 2D)
    k2, v2 = kv2[:, :D], kv2[:, D:]
    src_add = spad_ref[...][:, None, :]                                   # (Bt, 1, Lk)

    ctx2 = _mha(q2, k2, v2, src_add, heads=heads, dk=dk, Lq=Lq, Lk=Lk, Bt=Bt)
    x = x + (jnp.dot(ctx2.astype(jnp.bfloat16), wo2_ref[...],
                     preferred_element_type=jnp.float32) + bo2_ref[...])

    # ---------------- feed forward ----------------
    h3 = _ln(x, ln_g[2:3, :], ln_b[2:3, :])
    f = (jnp.dot(h3.astype(jnp.bfloat16), w1_ref[...],
                 preferred_element_type=jnp.float32) + b1_ref[...])       # (R, dff)
    f = 0.5 * f * (1.0 + jnp.tanh(_GELU_C * (f + 0.044715 * f * f * f)))
    f = (jnp.dot(f.astype(jnp.bfloat16), w2_ref[...],
                 preferred_element_type=jnp.float32) + b2_ref[...])       # (R, D)
    x = x + f

    if apply_final_ln:   # decoder's final LayerNorm, fused into the last layer
        x = _ln(x, fln_g_ref[...], fln_b_ref[...])

    o_ref[...] = x.reshape(Lq, Bt, D)


# ----------------------------------------------------------------------------
# Pallas wrapper
# ----------------------------------------------------------------------------


def _wspec(shape):
    zeros = (0,) * len(shape)
    return pl.BlockSpec(shape, lambda b, _z=zeros: _z)   # weights resident across grid


def _pick_bt(batch, tgt_len, target_rows=256):
    # Tile enough batch elements per grid step that the projection/FFN matmuls see
    # M = bt*tgt_len rows (>=256 keeps v6e/v7x MXUs full, >=128 suffices on v5e),
    # with bt a divisor of batch.
    bt = max(1, min(batch, max(1, target_rows // max(1, tgt_len))))
    while batch % bt:
        bt -= 1
    # v7x has 2 TensorCores: prefer >=2 parallel grid steps when splitting still
    # leaves the MXU M dimension well fed.
    if batch // bt == 1 and bt % 2 == 0 and (bt // 2) * tgt_len >= 256:
        bt //= 2
    return bt


def _layer_vmem_limit_bytes(Lq, Lk, bt, D, dff):
    # Explicit scoped-VMEM budget from the computed per-step footprint (matters on
    # v7x where physical VMEM is 64 MiB). Inputs/outputs double-buffered by the
    # default pipeline; generous headroom for attention-score temporaries.
    bf16, f32 = 2, 4
    weights = bf16 * (3 * D * D + 3 * (D * D) + 2 * D * D + D * dff + dff * D)
    biases = f32 * (6 * D + 3 * D + 4 * D + 2 * D + dff + D + 2 * D)
    acts = f32 * (2 * Lq * bt * D) + bf16 * (Lk * bt * D) + f32 * bt * (Lq + Lk)
    pipelined = 2 * (weights + biases + acts)
    return int(min(100 * 2**20, max(32 * 2**20, 4 * pipelined)))


def pallas_decoder_layer(x, mem_bf16, tpad_add, spad_add, lp, fln_g, fln_b,
                         *, heads, bt, apply_final_ln):
    # x: (Lq, B, D) f32 — native layout; mem_bf16: (Lk, B, D) bf16;
    # tpad_add: (B, Lq) f32 additive; spad_add: (B, Lk) f32 additive.
    Lq, B, D = x.shape
    Lk = mem_bf16.shape[0]
    dff = lp["w1"].shape[1]
    kernel = functools.partial(_decoder_layer_kernel, heads=heads,
                               apply_final_ln=apply_final_ln)
    return pl.pallas_call(
        kernel,
        grid=(B // bt,),
        in_specs=[
            pl.BlockSpec((Lq, bt, D), lambda b: (0, b, 0)),     # x   (native layout)
            pl.BlockSpec((Lk, bt, D), lambda b: (0, b, 0)),     # mem (native layout, bf16)
            pl.BlockSpec((bt, Lq), lambda b: (b, 0)),           # tgt key-pad (additive)
            pl.BlockSpec((bt, Lk), lambda b: (b, 0)),           # src key-pad (additive)
            _wspec((3, D)), _wspec((3, D)),
            _wspec((D, 3 * D)), _wspec((1, 3 * D)),
            _wspec((D, D)), _wspec((1, D)),
            _wspec((D, D)), _wspec((1, D)),
            _wspec((D, 2 * D)), _wspec((1, 2 * D)),
            _wspec((D, D)), _wspec((1, D)),
            _wspec((D, dff)), _wspec((1, dff)),
            _wspec((dff, D)), _wspec((1, D)),
            _wspec((1, D)), _wspec((1, D)),
        ],
        out_specs=pl.BlockSpec((Lq, bt, D), lambda b: (0, b, 0)),
        out_shape=jax.ShapeDtypeStruct((Lq, B, D), jnp.float32),
        compiler_params=pltpu.CompilerParams(
            dimension_semantics=("parallel",),
            vmem_limit_bytes=_layer_vmem_limit_bytes(Lq, Lk, bt, D, dff),
        ),
    )(
        x, mem_bf16, tpad_add, spad_add,
        lp["ln_g"], lp["ln_b"],
        lp["wqkv"], lp["bqkv"], lp["wo1"], lp["bo1"],
        lp["wq2"], lp["bq2"], lp["wkv2"], lp["bkv2"], lp["wo2"], lp["bo2"],
        lp["w1"], lp["b1"], lp["w2"], lp["b2"],
        fln_g, fln_b,
    )


# ----------------------------------------------------------------------------
# Model glue (embedding lookup, positional encoding, masks, layer stack)
# ----------------------------------------------------------------------------


def transformer_decoder_forward(params, tgt, memory_bank, state_src, heads, padding_idx):
    # tgt: (tgt_len, B) int32; memory_bank: (src_len, B, D) f32; state_src: (src_len, B)
    tgt_len, B = tgt.shape
    D = params["emb"].shape[1]

    # Embedding + positional encoding directly in the native (tgt_len, B, D)
    # layout: no host-side transposes of the activation / memory tensors.
    emb = params["emb"][tgt]                                           # (Lq, B, D)
    x = emb * jnp.float32(math.sqrt(D)) + params["pe"][:tgt_len, None, :]

    # memory_bank is only ever a bf16 matmul operand inside the kernels.
    mem = memory_bank.astype(jnp.bfloat16)                             # (Lk, B, D)

    # Additive key-pad vectors (tiny (B, L) arrays; no (B, Lq, Lk) masks).
    tpad_add = jnp.where(tgt.T == padding_idx, _NEG_INF, 0.0).astype(jnp.float32)
    spad_add = jnp.where(state_src.T == padding_idx, _NEG_INF, 0.0).astype(jnp.float32)

    bt = _pick_bt(B, tgt_len)
    n_layers = len(params["layers"])
    for li, lp in enumerate(params["layers"]):
        x = pallas_decoder_layer(
            x, mem, tpad_add, spad_add, lp, params["ln_g"], params["ln_b"],
            heads=heads, bt=bt, apply_final_ln=(li == n_layers - 1),
        )
    return x   # (tgt_len, B, D); final LayerNorm already fused into the last layer


# ----------------------------------------------------------------------------
# Deterministic synthetic parameters
# ----------------------------------------------------------------------------


def _make_pe(max_len, dim):
    position = jnp.arange(max_len, dtype=jnp.float32)[:, None]
    div_term = jnp.exp(
        jnp.arange(0, dim, 2, dtype=jnp.float32) * -(math.log(10000.0) / dim)
    )
    pe = jnp.zeros((max_len, dim), jnp.float32)
    pe = pe.at[:, 0::2].set(jnp.sin(position * div_term))
    pe = pe.at[:, 1::2].set(jnp.cos(position * div_term))
    return pe


def init_params(key, num_layers, d_model, heads, d_ff, vocab_size, max_len, padding_idx):
    dk = d_model // heads
    q_scale = 1.0 / math.sqrt(dk)

    def dense(k, din, dout):
        return (
            0.02 * jax.random.normal(k, (din, dout), jnp.float32),
            jnp.zeros((dout,), jnp.float32),
        )

    keys = jax.random.split(key, num_layers + 1)
    emb = 0.02 * jax.random.normal(keys[0], (vocab_size, d_model), jnp.float32)
    emb = emb.at[padding_idx].set(0.0)  # padding row zeroed, as nn.Embedding does

    layers = []
    for li in range(num_layers):
        lk = jax.random.split(keys[1 + li], 10)
        wq, bq = dense(lk[0], d_model, d_model)
        wk, bk = dense(lk[1], d_model, d_model)
        wv, bv = dense(lk[2], d_model, d_model)
        wo1, bo1 = dense(lk[3], d_model, d_model)
        wq2, bq2 = dense(lk[4], d_model, d_model)
        wk2, bk2 = dense(lk[5], d_model, d_model)
        wv2, bv2 = dense(lk[6], d_model, d_model)
        wo2, bo2 = dense(lk[7], d_model, d_model)
        w1, b1 = dense(lk[8], d_model, d_ff)
        w2, b2 = dense(lk[9], d_ff, d_model)

        # Fold the 1/sqrt(dk) attention scale into the query projections.
        wqkv = jnp.concatenate([wq * q_scale, wk, wv], axis=1)        # (D, 3D)
        bqkv = jnp.concatenate([bq * q_scale, bk, bv], axis=0)        # (3D,)
        wkv2 = jnp.concatenate([wk2, wv2], axis=1)                    # (D, 2D)
        bkv2 = jnp.concatenate([bk2, bv2], axis=0)                    # (2D,)

        layers.append(
            dict(
                # LN params: rows 0,1,2 -> layer_norm_1, layer_norm_2, FFN layer_norm.
                ln_g=jnp.ones((3, d_model), jnp.float32),
                ln_b=jnp.zeros((3, d_model), jnp.float32),
                wqkv=wqkv.astype(jnp.bfloat16), bqkv=bqkv.reshape(1, -1),
                wo1=wo1.astype(jnp.bfloat16), bo1=bo1.reshape(1, -1),
                wq2=(wq2 * q_scale).astype(jnp.bfloat16),
                bq2=(bq2 * q_scale).reshape(1, -1),
                wkv2=wkv2.astype(jnp.bfloat16), bkv2=bkv2.reshape(1, -1),
                wo2=wo2.astype(jnp.bfloat16), bo2=bo2.reshape(1, -1),
                w1=w1.astype(jnp.bfloat16), b1=b1.reshape(1, -1),
                w2=w2.astype(jnp.bfloat16), b2=b2.reshape(1, -1),
            )
        )

    return dict(
        emb=emb,
        pe=_make_pe(max_len, d_model),
        layers=layers,
        ln_g=jnp.ones((1, d_model), jnp.float32),
        ln_b=jnp.zeros((1, d_model), jnp.float32),
    )


# ----------------------------------------------------------------------------
# Main
# ----------------------------------------------------------------------------

if __name__ == "__main__":
    num_layers, d_model, heads, d_ff = 2, 32, 4, 64
    vocab_size, padding_idx = 50, 0
    batch, tgt_len, src_len = 2, 8, 16
    max_len = 512  # MAX_SIZE=5000 in the module; 512 suffices for these shapes

    root = jax.random.PRNGKey(0)
    kp, k1, k2, k3 = jax.random.split(root, 4)
    params = init_params(
        kp, num_layers, d_model, heads, d_ff, vocab_size, max_len, padding_idx
    )

    # Inputs (PyTorch layouts):
    tgt = jax.random.randint(k1, (tgt_len, batch), 1, vocab_size, dtype=jnp.int32)
    tgt = tgt.at[-1, 0].set(padding_idx)  # include a pad target token
    src = jax.random.randint(k2, (batch, src_len), 1, vocab_size, dtype=jnp.int32)
    src = src.at[0, -3:].set(padding_idx)  # include pad source tokens
    memory_bank = jax.random.normal(k3, (src_len, batch, d_model), jnp.float32)

    # init_decoder_state: state.src = src.transpose(0, 1) -> (src_len, batch)
    state_src = src.T

    fwd = jax.jit(
        functools.partial(
            transformer_decoder_forward, heads=heads, padding_idx=padding_idx
        )
    )
    out = fwd(params, tgt, memory_bank, state_src)
    jax.block_until_ready(out)

    assert out.shape == (tgt_len, batch, d_model)
    assert bool(jnp.all(jnp.isfinite(out)))
    # TODO(synk): layer_cache / incremental decoding state (step != None) and
    # beam-search DecoderState bookkeeping are host-side features of the PyTorch
    # module and are not reproduced here.
    print("KERNEL_OK")
</pallas_src>

<mosaic_0001>
module attributes {stable_mosaic.version = 11 : i64} {
  func.func @_decoder_layer_kernel(%arg0: i32, %arg1: memref<8x2x32xf32, #tpu.memory_space<vmem>>, %arg2: memref<16x2x32xbf16, #tpu.memory_space<vmem>>, %arg3: memref<2x8xf32, #tpu.memory_space<vmem>>, %arg4: memref<2x16xf32, #tpu.memory_space<vmem>>, %arg5: memref<3x32xf32, #tpu.memory_space<vmem>>, %arg6: memref<3x32xf32, #tpu.memory_space<vmem>>, %arg7: memref<32x96xbf16, #tpu.memory_space<vmem>>, %arg8: memref<1x96xf32, #tpu.memory_space<vmem>>, %arg9: memref<32x32xbf16, #tpu.memory_space<vmem>>, %arg10: memref<1x32xf32, #tpu.memory_space<vmem>>, %arg11: memref<32x32xbf16, #tpu.memory_space<vmem>>, %arg12: memref<1x32xf32, #tpu.memory_space<vmem>>, %arg13: memref<32x64xbf16, #tpu.memory_space<vmem>>, %arg14: memref<1x64xf32, #tpu.memory_space<vmem>>, %arg15: memref<32x32xbf16, #tpu.memory_space<vmem>>, %arg16: memref<1x32xf32, #tpu.memory_space<vmem>>, %arg17: memref<32x64xbf16, #tpu.memory_space<vmem>>, %arg18: memref<1x64xf32, #tpu.memory_space<vmem>>, %arg19: memref<64x32xbf16, #tpu.memory_space<vmem>>, %arg20: memref<1x32xf32, #tpu.memory_space<vmem>>, %arg21: memref<1x32xf32, #tpu.memory_space<vmem>>, %arg22: memref<1x32xf32, #tpu.memory_space<vmem>>, %arg23: memref<8x2x32xf32, #tpu.memory_space<vmem>>) attributes {dimension_semantics = [#tpu.dimension_semantics<parallel>], iteration_bounds = array<i64: 1>, scalar_prefetch = 0 : i64, scratch_operands = 0 : i64, tpu.core_type = #tpu.core_type<tc>, window_params = [{transform_indices = @transform_0, window_bounds = array<i64: 8, 2, 32>}, {transform_indices = @transform_1, window_bounds = array<i64: 16, 2, 32>}, {transform_indices = @transform_2, window_bounds = array<i64: 2, 8>}, {transform_indices = @transform_3, window_bounds = array<i64: 2, 16>}, {pipeline_mode = #tpu.pipeline_mode<synchronous>, transform_indices = @transform_4, window_bounds = array<i64: 3, 32>}, {pipeline_mode = #tpu.pipeline_mode<synchronous>, transform_indices = @transform_5, window_bounds = array<i64: 3, 32>}, {pipeline_mode = #tpu.pipeline_mode<synchronous>, transform_indices = @transform_6, window_bounds = array<i64: 32, 96>}, {pipeline_mode = #tpu.pipeline_mode<synchronous>, transform_indices = @transform_7, window_bounds = array<i64: 1, 96>}, {pipeline_mode = #tpu.pipeline_mode<synchronous>, transform_indices = @transform_8, window_bounds = array<i64: 32, 32>}, {pipeline_mode = #tpu.pipeline_mode<synchronous>, transform_indices = @transform_9, window_bounds = array<i64: 1, 32>}, {pipeline_mode = #tpu.pipeline_mode<synchronous>, transform_indices = @transform_10, window_bounds = array<i64: 32, 32>}, {pipeline_mode = #tpu.pipeline_mode<synchronous>, transform_indices = @transform_11, window_bounds = array<i64: 1, 32>}, {pipeline_mode = #tpu.pipeline_mode<synchronous>, transform_indices = @transform_12, window_bounds = array<i64: 32, 64>}, {pipeline_mode = #tpu.pipeline_mode<synchronous>, transform_indices = @transform_13, window_bounds = array<i64: 1, 64>}, {pipeline_mode = #tpu.pipeline_mode<synchronous>, transform_indices = @transform_14, window_bounds = array<i64: 32, 32>}, {pipeline_mode = #tpu.pipeline_mode<synchronous>, transform_indices = @transform_15, window_bounds = array<i64: 1, 32>}, {pipeline_mode = #tpu.pipeline_mode<synchronous>, transform_indices = @transform_16, window_bounds = array<i64: 32, 64>}, {pipeline_mode = #tpu.pipeline_mode<synchronous>, transform_indices = @transform_17, window_bounds = array<i64: 1, 64>}, {pipeline_mode = #tpu.pipeline_mode<synchronous>, transform_indices = @transform_18, window_bounds = array<i64: 64, 32>}, {pipeline_mode = #tpu.pipeline_mode<synchronous>, transform_indices = @transform_19, window_bounds = array<i64: 1, 32>}, {pipeline_mode = #tpu.pipeline_mode<synchronous>, transform_indices = @transform_20, window_bounds = array<i64: 1, 32>}, {pipeline_mode = #tpu.pipeline_mode<synchronous>, transform_indices = @transform_21, window_bounds = array<i64: 1, 32>}, {transform_indices = @transform_22, window_bounds = array<i64: 8, 2, 32>}]} {
    %c0 = arith.constant 0 : index
    %c0_0 = arith.constant 0 : index
    %c0_1 = arith.constant 0 : index
    %0 = vector.load %arg1[%c0, %c0_0, %c0_1] : memref<8x2x32xf32, #tpu.memory_space<vmem>>, vector<8x2x32xf32>
    %1 = vector.shape_cast %0 : vector<8x2x32xf32> to vector<16x32xf32>
    %c0_2 = arith.constant 0 : index
    %c0_3 = arith.constant 0 : index
    %2 = vector.load %arg5[%c0_2, %c0_3] : memref<3x32xf32, #tpu.memory_space<vmem>>, vector<3x32xf32>
    %c0_4 = arith.constant 0 : index
    %c0_5 = arith.constant 0 : index
    %3 = vector.load %arg6[%c0_4, %c0_5] : memref<3x32xf32, #tpu.memory_space<vmem>>, vector<3x32xf32>
    %4 = vector.extract_strided_slice %2 {offsets = [0, 0], sizes = [1, 32], strides = [1, 1]} : vector<3x32xf32> to vector<1x32xf32>
    %5 = vector.extract_strided_slice %3 {offsets = [0, 0], sizes = [1, 32], strides = [1, 1]} : vector<3x32xf32> to vector<1x32xf32>
    %cst = arith.constant dense<0.000000e+00> : vector<16xf32>
    %6 = vector.multi_reduction <add>, %1, %cst [1] : vector<16x32xf32> to vector<16xf32>
    %7 = vector.shape_cast %6 : vector<16xf32> to vector<16x1xf32>
    %cst_6 = arith.constant 3.200000e+01 : f32
    %8 = vector.broadcast %cst_6 : f32 to vector<16x1xf32>
    %9 = arith.divf %7, %8 : vector<16x1xf32>
    %10 = vector.broadcast %9 : vector<16x1xf32> to vector<16x32xf32>
    %11 = arith.subf %1, %10 : vector<16x32xf32>
    %12 = arith.mulf %11, %11 : vector<16x32xf32>
    %cst_7 = arith.constant dense<0.000000e+00> : vector<16xf32>
    %13 = vector.multi_reduction <add>, %12, %cst_7 [1] : vector<16x32xf32> to vector<16xf32>
    %14 = vector.shape_cast %13 : vector<16xf32> to vector<16x1xf32>
    %cst_8 = arith.constant 3.200000e+01 : f32
    %15 = vector.broadcast %cst_8 : f32 to vector<16x1xf32>
    %16 = arith.divf %14, %15 : vector<16x1xf32>
    %17 = vector.broadcast %9 : vector<16x1xf32> to vector<16x32xf32>
    %18 = arith.subf %1, %17 : vector<16x32xf32>
    %cst_9 = arith.constant 9.99999997E-7 : f32
    %19 = vector.broadcast %cst_9 : f32 to vector<16x1xf32>
    %20 = arith.addf %16, %19 : vector<16x1xf32>
    %21 = math.rsqrt %20 : vector<16x1xf32>
    %22 = vector.broadcast %21 : vector<16x1xf32> to vector<16x32xf32>
    %23 = arith.mulf %18, %22 : vector<16x32xf32>
    %24 = vector.broadcast %4 : vector<1x32xf32> to vector<16x32xf32>
    %25 = arith.mulf %23, %24 : vector<16x32xf32>
    %26 = vector.broadcast %5 : vector<1x32xf32> to vector<16x32xf32>
    %27 = arith.addf %25, %26 : vector<16x32xf32>
    %28 = arith.truncf %27 : vector<16x32xf32> to vector<16x32xbf16>
    %c0_10 = arith.constant 0 : index
    %c0_11 = arith.constant 0 : index
    %29 = vector.load %arg7[%c0_10, %c0_11] : memref<32x96xbf16, #tpu.memory_space<vmem>>, vector<32x96xbf16>
    %cst_12 = arith.constant dense<0.000000e+00> : vector<16x96xf32>
    %30 = tpu.matmul %28, %29, %cst_12 {dimension_numbers = #tpu.dot_dimension_numbers<[1], [0], [0], [1], [0, 0, 1, 1], [], []>} : vector<16x32xbf16>, vector<32x96xbf16>, vector<16x96xf32> -> vector<16x96xf32>
    %c0_13 = arith.constant 0 : index
    %c0_14 = arith.constant 0 : index
    %31 = vector.load %arg8[%c0_13, %c0_14] : memref<1x96xf32, #tpu.memory_space<vmem>>, vector<1x96xf32>
    %32 = vector.broadcast %31 : vector<1x96xf32> to vector<16x96xf32>
    %33 = arith.addf %30, %32 : vector<16x96xf32>
    %34 = vector.extract_strided_slice %33 {offsets = [0, 0], sizes = [16, 32], strides = [1, 1]} : vector<16x96xf32> to vector<16x32xf32>
    %35 = vector.extract_strided_slice %33 {offsets = [0, 32], sizes = [16, 32], strides = [1, 1]} : vector<16x96xf32> to vector<16x32xf32>
    %36 = vector.extract_strided_slice %33 {offsets = [0, 64], sizes = [16, 32], strides = [1, 1]} : vector<16x96xf32> to vector<16x32xf32>
    %37 = tpu.iota {dimensions = array<i32: 0>} : vector<8x8xi32>
    %38 = tpu.iota {dimensions = array<i32: 1>} : vector<8x8xi32>
    %39 = arith.cmpi sgt, %38, %37 : vector<8x8xi32>
    %40 = vector.shape_cast %39 : vector<8x8xi1> to vector<1x8x8xi1>
    %c0_15 = arith.constant 0 : index
    %c0_16 = arith.constant 0 : index
    %41 = vector.load %arg3[%c0_15, %c0_16] : memref<2x8xf32, #tpu.memory_space<vmem>>, vector<2x8xf32>
    %42 = vector.shape_cast %41 : vector<2x8xf32> to vector<2x1x8xf32>
    %cst_17 = arith.constant -9.99999984E+17 : f32
    %43 = vector.shape_cast %40 : vector<1x8x8xi1> to vector<1x8x8xi1>
    %44 = vector.broadcast %43 : vector<1x8x8xi1> to vector<2x8x8xi1>
    %45 = vector.broadcast %cst_17 : f32 to vector<2x8x8xf32>
    %46 = vector.shape_cast %42 : vector<2x1x8xf32> to vector<2x1x8xf32>
    %47 = vector.broadcast %46 : vector<2x1x8xf32> to vector<2x8x8xf32>
    %48 = arith.select %44, %45, %47 : vector<2x8x8xi1>, vector<2x8x8xf32>
    %49 = vector.shape_cast %34 : vector<16x32xf32> to vector<8x2x4x8xf32>
    %50 = tpu.transpose %49, [1, 2, 0, 3] : vector<8x2x4x8xf32> -> vector<2x4x8x8xf32>
    %51 = vector.shape_cast %50 : vector<2x4x8x8xf32> to vector<8x8x8xf32>
    %52 = arith.truncf %51 : vector<8x8x8xf32> to vector<8x8x8xbf16>
    %53 = vector.shape_cast %35 : vector<16x32xf32> to vector<8x2x4x8xf32>
    %54 = tpu.transpose %53, [1, 2, 0, 3] : vector<8x2x4x8xf32> -> vector<2x4x8x8xf32>
    %55 = vector.shape_cast %54 : vector<2x4x8x8xf32> to vector<8x8x8xf32>
    %56 = arith.truncf %55 : vector<8x8x8xf32> to vector<8x8x8xbf16>
    %57 = vector.shape_cast %36 : vector<16x32xf32> to vector<8x2x4x8xf32>
    %58 = tpu.transpose %57, [1, 2, 0, 3] : vector<8x2x4x8xf32> -> vector<2x4x8x8xf32>
    %59 = vector.shape_cast %58 : vector<2x4x8x8xf32> to vector<8x8x8xf32>
    %60 = arith.truncf %59 : vector<8x8x8xf32> to vector<8x8x8xbf16>
    %cst_18 = arith.constant dense<0.000000e+00> : vector<8x8x8xf32>
    %61 = tpu.matmul %52, %56, %cst_18 {dimension_numbers = #tpu.dot_dimension_numbers<[2], [2], [1], [1], [0, 0, 0, 1, 1, 1], [0], [0]>} : vector<8x8x8xbf16>, vector<8x8x8xbf16>, vector<8x8x8xf32> -> vector<8x8x8xf32>
    %62 = vector.shape_cast %61 : vector<8x8x8xf32> to vector<2x4x8x8xf32>
    %63 = vector.shape_cast %48 : vector<2x8x8xf32> to vector<2x1x8x8xf32>
    %64 = vector.broadcast %63 : vector<2x1x8x8xf32> to vector<2x4x8x8xf32>
    %65 = arith.addf %62, %64 : vector<2x4x8x8xf32>
    %66 = vector.shape_cast %65 : vector<2x4x8x8xf32> to vector<8x8x8xf32>
    %cst_19 = arith.constant dense<0xFF800000> : vector<8x8xf32>
    %67 = vector.multi_reduction <maximumf>, %66, %cst_19 [2] : vector<8x8x8xf32> to vector<8x8xf32>
    %68 = vector.shape_cast %67 : vector<8x8xf32> to vector<8x8x1xf32>
    %69 = vector.broadcast %68 : vector<8x8x1xf32> to vector<8x8x8xf32>
    %70 = arith.subf %66, %69 : vector<8x8x8xf32>
    %71 = math.exp %70 : vector<8x8x8xf32>
    %cst_20 = arith.constant dense<0.000000e+00> : vector<8x8xf32>
    %72 = vector.multi_reduction <add>, %71, %cst_20 [2] : vector<8x8x8xf32> to vector<8x8xf32>
    %73 = vector.shape_cast %72 : vector<8x8xf32> to vector<8x8x1xf32>
    %74 = tpu.reciprocal %73 {approx = true} : vector<8x8x1xf32> -> vector<8x8x1xf32>
    %75 = vector.broadcast %74 : vector<8x8x1xf32> to vector<8x8x8xf32>
    %76 = arith.mulf %71, %75 : vector<8x8x8xf32>
    %77 = arith.truncf %76 : vector<8x8x8xf32> to vector<8x8x8xbf16>
    %cst_21 = arith.constant dense<0.000000e+00> : vector<8x8x8xf32>
    %78 = tpu.matmul %77, %60, %cst_21 {dimension_numbers = #tpu.dot_dimension_numbers<[2], [1], [1], [2], [0, 0, 0, 1, 1, 2], [0], [0]>} : vector<8x8x8xbf16>, vector<8x8x8xbf16>, vector<8x8x8xf32> -> vector<8x8x8xf32>
    %79 = vector.shape_cast %78 : vector<8x8x8xf32> to vector<2x4x8x8xf32>
    %80 = tpu.transpose %79, [2, 0, 1, 3] : vector<2x4x8x8xf32> -> vector<8x2x4x8xf32>
    %81 = vector.shape_cast %80 : vector<8x2x4x8xf32> to vector<16x32xf32>
    %82 = arith.truncf %81 : vector<16x32xf32> to vector<16x32xbf16>
    %c0_22 = arith.constant 0 : index
    %c0_23 = arith.constant 0 : index
    %83 = vector.load %arg9[%c0_22, %c0_23] : memref<32x32xbf16, #tpu.memory_space<vmem>>, vector<32x32xbf16>
    %cst_24 = arith.constant dense<0.000000e+00> : vector<16x32xf32>
    %84 = tpu.matmul %82, %83, %cst_24 {dimension_numbers = #tpu.dot_dimension_numbers<[1], [0], [0], [1], [0, 0, 1, 1], [], []>} : vector<16x32xbf16>, vector<32x32xbf16>, vector<16x32xf32> -> vector<16x32xf32>
    %c0_25 = arith.constant 0 : index
    %c0_26 = arith.constant 0 : index
    %85 = vector.load %arg10[%c0_25, %c0_26] : memref<1x32xf32, #tpu.memory_space<vmem>>, vector<1x32xf32>
    %86 = vector.broadcast %85 : vector<1x32xf32> to vector<16x32xf32>
    %87 = arith.addf %84, %86 : vector<16x32xf32>
    %88 = arith.addf %1, %87 : vector<16x32xf32>
    %89 = vector.extract_strided_slice %2 {offsets = [1, 0], sizes = [1, 32], strides = [1, 1]} : vector<3x32xf32> to vector<1x32xf32>
    %90 = vector.extract_strided_slice %3 {offsets = [1, 0], sizes = [1, 32], strides = [1, 1]} : vector<3x32xf32> to vector<1x32xf32>
    %cst_27 = arith.constant dense<0.000000e+00> : vector<16xf32>
    %91 = vector.multi_reduction <add>, %88, %cst_27 [1] : vector<16x32xf32> to vector<16xf32>
    %92 = vector.shape_cast %91 : vector<16xf32> to vector<16x1xf32>
    %cst_28 = arith.constant 3.200000e+01 : f32
    %93 = vector.broadcast %cst_28 : f32 to vector<16x1xf32>
    %94 = arith.divf %92, %93 : vector<16x1xf32>
    %95 = vector.broadcast %94 : vector<16x1xf32> to vector<16x32xf32>
    %96 = arith.subf %88, %95 : vector<16x32xf32>
    %97 = arith.mulf %96, %96 : vector<16x32xf32>
    %cst_29 = arith.constant dense<0.000000e+00> : vector<16xf32>
    %98 = vector.multi_reduction <add>, %97, %cst_29 [1] : vector<16x32xf32> to vector<16xf32>
    %99 = vector.shape_cast %98 : vector<16xf32> to vector<16x1xf32>
    %cst_30 = arith.constant 3.200000e+01 : f32
    %100 = vector.broadcast %cst_30 : f32 to vector<16x1xf32>
    %101 = arith.divf %99, %100 : vector<16x1xf32>
    %102 = vector.broadcast %94 : vector<16x1xf32> to vector<16x32xf32>
    %103 = arith.subf %88, %102 : vector<16x32xf32>
    %cst_31 = arith.constant 9.99999997E-7 : f32
    %104 = vector.broadcast %cst_31 : f32 to vector<16x1xf32>
    %105 = arith.addf %101, %104 : vector<16x1xf32>
    %106 = math.rsqrt %105 : vector<16x1xf32>
    %107 = vector.broadcast %106 : vector<16x1xf32> to vector<16x32xf32>
    %108 = arith.mulf %103, %107 : vector<16x32xf32>
    %109 = vector.broadcast %89 : vector<1x32xf32> to vector<16x32xf32>
    %110 = arith.mulf %108, %109 : vector<16x32xf32>
    %111 = vector.broadcast %90 : vector<1x32xf32> to vector<16x32xf32>
    %112 = arith.addf %110, %111 : vector<16x32xf32>
    %113 = arith.truncf %112 : vector<16x32xf32> to vector<16x32xbf16>
    %c0_32 = arith.constant 0 : index
    %c0_33 = arith.constant 0 : index
    %114 = vector.load %arg11[%c0_32, %c0_33] : memref<32x32xbf16, #tpu.memory_space<vmem>>, vector<32x32xbf16>
    %cst_34 = arith.constant dense<0.000000e+00> : vector<16x32xf32>
    %115 = tpu.matmul %113, %114, %cst_34 {dimension_numbers = #tpu.dot_dimension_numbers<[1], [0], [0], [1], [0, 0, 1, 1], [], []>} : vector<16x32xbf16>, vector<32x32xbf16>, vector<16x32xf32> -> vector<16x32xf32>
    %c0_35 = arith.constant 0 : index
    %c0_36 = arith.constant 0 : index
    %116 = vector.load %arg12[%c0_35, %c0_36] : memref<1x32xf32, #tpu.memory_space<vmem>>, vector<1x32xf32>
    %117 = vector.broadcast %116 : vector<1x32xf32> to vector<16x32xf32>
    %118 = arith.addf %115, %117 : vector<16x32xf32>
    %c0_37 = arith.constant 0 : index
    %c0_38 = arith.constant 0 : index
    %c0_39 = arith.constant 0 : index
    %119 = vector.load %arg2[%c0_37, %c0_38, %c0_39] : memref<16x2x32xbf16, #tpu.memory_space<vmem>>, vector<16x2x32xbf16>
    %120 = vector.shape_cast %119 : vector<16x2x32xbf16> to vector<32x32xbf16>
    %c0_40 = arith.constant 0 : index
    %c0_41 = arith.constant 0 : index
    %121 = vector.load %arg13[%c0_40, %c0_41] : memref<32x64xbf16, #tpu.memory_space<vmem>>, vector<32x64xbf16>
    %cst_42 = arith.constant dense<0.000000e+00> : vector<32x64xf32>
    %122 = tpu.matmul %120, %121, %cst_42 {dimension_numbers = #tpu.dot_dimension_numbers<[1], [0], [0], [1], [0, 0, 1, 1], [], []>} : vector<32x32xbf16>, vector<32x64xbf16>, vector<32x64xf32> -> vector<32x64xf32>
    %c0_43 = arith.constant 0 : index
    %c0_44 = arith.constant 0 : index
    %123 = vector.load %arg14[%c0_43, %c0_44] : memref<1x64xf32, #tpu.memory_space<vmem>>, vector<1x64xf32>
    %124 = vector.broadcast %123 : vector<1x64xf32> to vector<32x64xf32>
    %125 = arith.addf %122, %124 : vector<32x64xf32>
    %126 = vector.extract_strided_slice %125 {offsets = [0, 0], sizes = [32, 32], strides = [1, 1]} : vector<32x64xf32> to vector<32x32xf32>
    %127 = vector.extract_strided_slice %125 {offsets = [0, 32], sizes = [32, 32], strides = [1, 1]} : vector<32x64xf32> to vector<32x32xf32>
    %c0_45 = arith.constant 0 : index
    %c0_46 = arith.constant 0 : index
    %128 = vector.load %arg4[%c0_45, %c0_46] : memref<2x16xf32, #tpu.memory_space<vmem>>, vector<2x16xf32>
    %129 = vector.shape_cast %128 : vector<2x16xf32> to vector<2x1x16xf32>
    %130 = vector.shape_cast %118 : vector<16x32xf32> to vector<8x2x4x8xf32>
    %131 = tpu.transpose %130, [1, 2, 0, 3] : vector<8x2x4x8xf32> -> vector<2x4x8x8xf32>
    %132 = vector.shape_cast %131 : vector<2x4x8x8xf32> to vector<8x8x8xf32>
    %133 = arith.truncf %132 : vector<8x8x8xf32> to vector<8x8x8xbf16>
    %134 = vector.shape_cast %126 : vector<32x32xf32> to vector<16x2x4x8xf32>
    %135 = tpu.transpose %134, [1, 2, 0, 3] : vector<16x2x4x8xf32> -> vector<2x4x16x8xf32>
    %136 = vector.shape_cast %135 : vector<2x4x16x8xf32> to vector<8x16x8xf32>
    %137 = arith.truncf %136 : vector<8x16x8xf32> to vector<8x16x8xbf16>
    %138 = vector.shape_cast %127 : vector<32x32xf32> to vector<16x2x4x8xf32>
    %139 = tpu.transpose %138, [1, 2, 0, 3] : vector<16x2x4x8xf32> -> vector<2x4x16x8xf32>
    %140 = vector.shape_cast %139 : vector<2x4x16x8xf32> to vector<8x16x8xf32>
    %141 = arith.truncf %140 : vector<8x16x8xf32> to vector<8x16x8xbf16>
    %cst_47 = arith.constant dense<0.000000e+00> : vector<8x8x16xf32>
    %142 = tpu.matmul %133, %137, %cst_47 {dimension_numbers = #tpu.dot_dimension_numbers<[2], [2], [1], [1], [0, 0, 0, 1, 1, 1], [0], [0]>} : vector<8x8x8xbf16>, vector<8x16x8xbf16>, vector<8x8x16xf32> -> vector<8x8x16xf32>
    %143 = vector.shape_cast %142 : vector<8x8x16xf32> to vector<2x4x8x16xf32>
    %144 = vector.shape_cast %129 : vector<2x1x16xf32> to vector<2x1x1x16xf32>
    %145 = vector.broadcast %144 : vector<2x1x1x16xf32> to vector<2x4x8x16xf32>
    %146 = arith.addf %143, %145 : vector<2x4x8x16xf32>
    %147 = vector.shape_cast %146 : vector<2x4x8x16xf32> to vector<8x8x16xf32>
    %cst_48 = arith.constant dense<0xFF800000> : vector<8x8xf32>
    %148 = vector.multi_reduction <maximumf>, %147, %cst_48 [2] : vector<8x8x16xf32> to vector<8x8xf32>
    %149 = vector.shape_cast %148 : vector<8x8xf32> to vector<8x8x1xf32>
    %150 = vector.broadcast %149 : vector<8x8x1xf32> to vector<8x8x16xf32>
    %151 = arith.subf %147, %150 : vector<8x8x16xf32>
    %152 = math.exp %151 : vector<8x8x16xf32>
    %cst_49 = arith.constant dense<0.000000e+00> : vector<8x8xf32>
    %153 = vector.multi_reduction <add>, %152, %cst_49 [2] : vector<8x8x16xf32> to vector<8x8xf32>
    %154 = vector.shape_cast %153 : vector<8x8xf32> to vector<8x8x1xf32>
    %155 = tpu.reciprocal %154 {approx = true} : vector<8x8x1xf32> -> vector<8x8x1xf32>
    %156 = vector.broadcast %155 : vector<8x8x1xf32> to vector<8x8x16xf32>
    %157 = arith.mulf %152, %156 : vector<8x8x16xf32>
    %158 = arith.truncf %157 : vector<8x8x16xf32> to vector<8x8x16xbf16>
    %cst_50 = arith.constant dense<0.000000e+00> : vector<8x8x8xf32>
    %159 = tpu.matmul %158, %141, %cst_50 {dimension_numbers = #tpu.dot_dimension_numbers<[2], [1], [1], [2], [0, 0, 0, 1, 1, 2], [0], [0]>} : vector<8x8x16xbf16>, vector<8x16x8xbf16>, vector<8x8x8xf32> -> vector<8x8x8xf32>
    %160 = vector.shape_cast %159 : vector<8x8x8xf32> to vector<2x4x8x8xf32>
    %161 = tpu.transpose %160, [2, 0, 1, 3] : vector<2x4x8x8xf32> -> vector<8x2x4x8xf32>
    %162 = vector.shape_cast %161 : vector<8x2x4x8xf32> to vector<16x32xf32>
    %163 = arith.truncf %162 : vector<16x32xf32> to vector<16x32xbf16>
    %c0_51 = arith.constant 0 : index
    %c0_52 = arith.constant 0 : index
    %164 = vector.load %arg15[%c0_51, %c0_52] : memref<32x32xbf16, #tpu.memory_space<vmem>>, vector<32x32xbf16>
    %cst_53 = arith.constant dense<0.000000e+00> : vector<16x32xf32>
    %165 = tpu.matmul %163, %164, %cst_53 {dimension_numbers = #tpu.dot_dimension_numbers<[1], [0], [0], [1], [0, 0, 1, 1], [], []>} : vector<16x32xbf16>, vector<32x32xbf16>, vector<16x32xf32> -> vector<16x32xf32>
    %c0_54 = arith.constant 0 : index
    %c0_55 = arith.constant 0 : index
    %166 = vector.load %arg16[%c0_54, %c0_55] : memref<1x32xf32, #tpu.memory_space<vmem>>, vector<1x32xf32>
    %167 = vector.broadcast %166 : vector<1x32xf32> to vector<16x32xf32>
    %168 = arith.addf %165, %167 : vector<16x32xf32>
    %169 = arith.addf %88, %168 : vector<16x32xf32>
    %170 = vector.extract_strided_slice %2 {offsets = [2, 0], sizes = [1, 32], strides = [1, 1]} : vector<3x32xf32> to vector<1x32xf32>
    %171 = vector.extract_strided_slice %3 {offsets = [2, 0], sizes = [1, 32], strides = [1, 1]} : vector<3x32xf32> to vector<1x32xf32>
    %cst_56 = arith.constant dense<0.000000e+00> : vector<16xf32>
    %172 = vector.multi_reduction <add>, %169, %cst_56 [1] : vector<16x32xf32> to vector<16xf32>
    %173 = vector.shape_cast %172 : vector<16xf32> to vector<16x1xf32>
    %cst_57 = arith.constant 3.200000e+01 : f32
    %174 = vector.broadcast %cst_57 : f32 to vector<16x1xf32>
    %175 = arith.divf %173, %174 : vector<16x1xf32>
    %176 = vector.broadcast %175 : vector<16x1xf32> to vector<16x32xf32>
    %177 = arith.subf %169, %176 : vector<16x32xf32>
    %178 = arith.mulf %177, %177 : vector<16x32xf32>
    %cst_58 = arith.constant dense<0.000000e+00> : vector<16xf32>
    %179 = vector.multi_reduction <add>, %178, %cst_58 [1] : vector<16x32xf32> to vector<16xf32>
    %180 = vector.shape_cast %179 : vector<16xf32> to vector<16x1xf32>
    %cst_59 = arith.constant 3.200000e+01 : f32
    %181 = vector.broadcast %cst_59 : f32 to vector<16x1xf32>
    %182 = arith.divf %180, %181 : vector<16x1xf32>
    %183 = vector.broadcast %175 : vector<16x1xf32> to vector<16x32xf32>
    %184 = arith.subf %169, %183 : vector<16x32xf32>
    %cst_60 = arith.constant 9.99999997E-7 : f32
    %185 = vector.broadcast %cst_60 : f32 to vector<16x1xf32>
    %186 = arith.addf %182, %185 : vector<16x1xf32>
    %187 = math.rsqrt %186 : vector<16x1xf32>
    %188 = vector.broadcast %187 : vector<16x1xf32> to vector<16x32xf32>
    %189 = arith.mulf %184, %188 : vector<16x32xf32>
    %190 = vector.broadcast %170 : vector<1x32xf32> to vector<16x32xf32>
    %191 = arith.mulf %189, %190 : vector<16x32xf32>
    %192 = vector.broadcast %171 : vector<1x32xf32> to vector<16x32xf32>
    %193 = arith.addf %191, %192 : vector<16x32xf32>
    %194 = arith.truncf %193 : vector<16x32xf32> to vector<16x32xbf16>
    %c0_61 = arith.constant 0 : index
    %c0_62 = arith.constant 0 : index
    %195 = vector.load %arg17[%c0_61, %c0_62] : memref<32x64xbf16, #tpu.memory_space<vmem>>, vector<32x64xbf16>
    %cst_63 = arith.constant dense<0.000000e+00> : vector<16x64xf32>
    %196 = tpu.matmul %194, %195, %cst_63 {dimension_numbers = #tpu.dot_dimension_numbers<[1], [0], [0], [1], [0, 0, 1, 1], [], []>} : vector<16x32xbf16>, vector<32x64xbf16>, vector<16x64xf32> -> vector<16x64xf32>
    %c0_64 = arith.constant 0 : index
    %c0_65 = arith.constant 0 : index
    %197 = vector.load %arg18[%c0_64, %c0_65] : memref<1x64xf32, #tpu.memory_space<vmem>>, vector<1x64xf32>
    %198 = vector.broadcast %197 : vector<1x64xf32> to vector<16x64xf32>
    %199 = arith.addf %196, %198 : vector<16x64xf32>
    %cst_66 = arith.constant 5.000000e-01 : f32
    %200 = vector.broadcast %cst_66 : f32 to vector<16x64xf32>
    %201 = arith.mulf %200, %199 : vector<16x64xf32>
    %cst_67 = arith.constant 4.471500e-02 : f32
    %202 = vector.broadcast %cst_67 : f32 to vector<16x64xf32>
    %203 = arith.mulf %202, %199 : vector<16x64xf32>
    %204 = arith.mulf %203, %199 : vector<16x64xf32>
    %205 = arith.mulf %204, %199 : vector<16x64xf32>
    %206 = arith.addf %199, %205 : vector<16x64xf32>
    %cst_68 = arith.constant 0.797884583 : f32
    %207 = vector.broadcast %cst_68 : f32 to vector<16x64xf32>
    %208 = arith.mulf %207, %206 : vector<16x64xf32>
    %209 = math.tanh %208 : vector<16x64xf32>
    %cst_69 = arith.constant 1.000000e+00 : f32
    %210 = vector.broadcast %cst_69 : f32 to vector<16x64xf32>
    %211 = arith.addf %210, %209 : vector<16x64xf32>
    %212 = arith.mulf %201, %211 : vector<16x64xf32>
    %213 = arith.truncf %212 : vector<16x64xf32> to vector<16x64xbf16>
    %c0_70 = arith.constant 0 : index
    %c0_71 = arith.constant 0 : index
    %214 = vector.load %arg19[%c0_70, %c0_71] : memref<64x32xbf16, #tpu.memory_space<vmem>>, vector<64x32xbf16>
    %cst_72 = arith.constant dense<0.000000e+00> : vector<16x32xf32>
    %215 = tpu.matmul %213, %214, %cst_72 {dimension_numbers = #tpu.dot_dimension_numbers<[1], [0], [0], [1], [0, 0, 1, 1], [], []>} : vector<16x64xbf16>, vector<64x32xbf16>, vector<16x32xf32> -> vector<16x32xf32>
    %c0_73 = arith.constant 0 : index
    %c0_74 = arith.constant 0 : index
    %216 = vector.load %arg20[%c0_73, %c0_74] : memref<1x32xf32, #tpu.memory_space<vmem>>, vector<1x32xf32>
    %217 = vector.broadcast %216 : vector<1x32xf32> to vector<16x32xf32>
    %218 = arith.addf %215, %217 : vector<16x32xf32>
    %219 = arith.addf %169, %218 : vector<16x32xf32>
    %220 = vector.shape_cast %219 : vector<16x32xf32> to vector<8x2x32xf32>
    %c0_75 = arith.constant 0 : index
    %c0_76 = arith.constant 0 : index
    %c0_77 = arith.constant 0 : index
    %221 = vector.load %arg23[%c0_75, %c0_76, %c0_77] : memref<8x2x32xf32, #tpu.memory_space<vmem>>, vector<8x2x32xf32>
    tpu.vector_store %arg23[%c0_75, %c0_76, %c0_77], %220 {strides = array<i32>} : memref<8x2x32xf32, #tpu.memory_space<vmem>>, vector<8x2x32xf32>,
    return
  }
  func.func @transform_0(%arg0: i32) -> (i32, i32, i32) {
    %c0_i32 = arith.constant 0 : i32
    %c0_i32_0 = arith.constant 0 : i32
    %c0_i32_1 = arith.constant 0 : i32
    return %c0_i32, %arg0, %c0_i32_0 : i32, i32, i32
  }
  func.func @transform_1(%arg0: i32) -> (i32, i32, i32) {
    %c0_i32 = arith.constant 0 : i32
    %c0_i32_0 = arith.constant 0 : i32
    %c0_i32_1 = arith.constant 0 : i32
    return %c0_i32, %arg0, %c0_i32_0 : i32, i32, i32
  }
  func.func @transform_2(%arg0: i32) -> (i32, i32) {
    %c0_i32 = arith.constant 0 : i32
    %c0_i32_0 = arith.constant 0 : i32
    return %arg0, %c0_i32 : i32, i32
  }
  func.func @transform_3(%arg0: i32) -> (i32, i32) {
    %c0_i32 = arith.constant 0 : i32
    %c0_i32_0 = arith.constant 0 : i32
    return %arg0, %c0_i32 : i32, i32
  }
  func.func @transform_4(%arg0: i32) -> (i32, i32) {
    %c0_i32 = arith.constant 0 : i32
    %c0_i32_0 = arith.constant 0 : i32
    %c0_i32_1 = arith.constant 0 : i32
    return %c0_i32, %c0_i32_0 : i32, i32
  }
  func.func @transform_5(%arg0: i32) -> (i32, i32) {
    %c0_i32 = arith.constant 0 : i32
    %c0_i32_0 = arith.constant 0 : i32
    %c0_i32_1 = arith.constant 0 : i32
    return %c0_i32, %c0_i32_0 : i32, i32
  }
  func.func @transform_6(%arg0: i32) -> (i32, i32) {
    %c0_i32 = arith.constant 0 : i32
    %c0_i32_0 = arith.constant 0 : i32
    %c0_i32_1 = arith.constant 0 : i32
    return %c0_i32, %c0_i32_0 : i32, i32
  }
  func.func @transform_7(%arg0: i32) -> (i32, i32) {
    %c0_i32 = arith.constant 0 : i32
    %c0_i32_0 = arith.constant 0 : i32
    %c0_i32_1 = arith.constant 0 : i32
    return %c0_i32, %c0_i32_0 : i32, i32
  }
  func.func @transform_8(%arg0: i32) -> (i32, i32) {
    %c0_i32 = arith.constant 0 : i32
    %c0_i32_0 = arith.constant 0 : i32
    %c0_i32_1 = arith.constant 0 : i32
    return %c0_i32, %c0_i32_0 : i32, i32
  }
  func.func @transform_9(%arg0: i32) -> (i32, i32) {
    %c0_i32 = arith.constant 0 : i32
    %c0_i32_0 = arith.constant 0 : i32
    %c0_i32_1 = arith.constant 0 : i32
    return %c0_i32, %c0_i32_0 : i32, i32
  }
  func.func @transform_10(%arg0: i32) -> (i32, i32) {
    %c0_i32 = arith.constant 0 : i32
    %c0_i32_0 = arith.constant 0 : i32
    %c0_i32_1 = arith.constant 0 : i32
    return %c0_i32, %c0_i32_0 : i32, i32
  }
  func.func @transform_11(%arg0: i32) -> (i32, i32) {
    %c0_i32 = arith.constant 0 : i32
    %c0_i32_0 = arith.constant 0 : i32
    %c0_i32_1 = arith.constant 0 : i32
    return %c0_i32, %c0_i32_0 : i32, i32
  }
  func.func @transform_12(%arg0: i32) -> (i32, i32) {
    %c0_i32 = arith.constant 0 : i32
    %c0_i32_0 = arith.constant 0 : i32
    %c0_i32_1 = arith.constant 0 : i32
    return %c0_i32, %c0_i32_0 : i32, i32
  }
  func.func @transform_13(%arg0: i32) -> (i32, i32) {
    %c0_i32 = arith.constant 0 : i32
    %c0_i32_0 = arith.constant 0 : i32
    %c0_i32_1 = arith.constant 0 : i32
    return %c0_i32, %c0_i32_0 : i32, i32
  }
  func.func @transform_14(%arg0: i32) -> (i32, i32) {
    %c0_i32 = arith.constant 0 : i32
    %c0_i32_0 = arith.constant 0 : i32
    %c0_i32_1 = arith.constant 0 : i32
    return %c0_i32, %c0_i32_0 : i32, i32
  }
  func.func @transform_15(%arg0: i32) -> (i32, i32) {
    %c0_i32 = arith.constant 0 : i32
    %c0_i32_0 = arith.constant 0 : i32
    %c0_i32_1 = arith.constant 0 : i32
    return %c0_i32, %c0_i32_0 : i32, i32
  }
  func.func @transform_16(%arg0: i32) -> (i32, i32) {
    %c0_i32 = arith.constant 0 : i32
    %c0_i32_0 = arith.constant 0 : i32
    %c0_i32_1 = arith.constant 0 : i32
    return %c0_i32, %c0_i32_0 : i32, i32
  }
  func.func @transform_17(%arg0: i32) -> (i32, i32) {
    %c0_i32 = arith.constant 0 : i32
    %c0_i32_0 = arith.constant 0 : i32
    %c0_i32_1 = arith.constant 0 : i32
    return %c0_i32, %c0_i32_0 : i32, i32
  }
  func.func @transform_18(%arg0: i32) -> (i32, i32) {
    %c0_i32 = arith.constant 0 : i32
    %c0_i32_0 = arith.constant 0 : i32
    %c0_i32_1 = arith.constant 0 : i32
    return %c0_i32, %c0_i32_0 : i32, i32
  }
  func.func @transform_19(%arg0: i32) -> (i32, i32) {
    %c0_i32 = arith.constant 0 : i32
    %c0_i32_0 = arith.constant 0 : i32
    %c0_i32_1 = arith.constant 0 : i32
    return %c0_i32, %c0_i32_0 : i32, i32
  }
  func.func @transform_20(%arg0: i32) -> (i32, i32) {
    %c0_i32 = arith.constant 0 : i32
    %c0_i32_0 = arith.constant 0 : i32
    %c0_i32_1 = arith.constant 0 : i32
    return %c0_i32, %c0_i32_0 : i32, i32
  }
  func.func @transform_21(%arg0: i32) -> (i32, i32) {
    %c0_i32 = arith.constant 0 : i32
    %c0_i32_0 = arith.constant 0 : i32
    %c0_i32_1 = arith.constant 0 : i32
    return %c0_i32, %c0_i32_0 : i32, i32
  }
  func.func @transform_22(%arg0: i32) -> (i32, i32, i32) {
    %c0_i32 = arith.constant 0 : i32
    %c0_i32_0 = arith.constant 0 : i32
    %c0_i32_1 = arith.constant 0 : i32
    return %c0_i32, %arg0, %c0_i32_0 : i32, i32, i32
  }
}

module attributes {stable_mosaic.version = 11 : i64} {
  func.func @_decoder_layer_kernel(%arg0: i32, %arg1: memref<8x2x32xf32, #tpu.memory_space<vmem>>, %arg2: memref<16x2x32xbf16, #tpu.memory_space<vmem>>, %arg3: memref<2x8xf32, #tpu.memory_space<vmem>>, %arg4: memref<2x16xf32, #tpu.memory_space<vmem>>, %arg5: memref<3x32xf32, #tpu.memory_space<vmem>>, %arg6: memref<3x32xf32, #tpu.memory_space<vmem>>, %arg7: memref<32x96xbf16, #tpu.memory_space<vmem>>, %arg8: memref<1x96xf32, #tpu.memory_space<vmem>>, %arg9: memref<32x32xbf16, #tpu.memory_space<vmem>>, %arg10: memref<1x32xf32, #tpu.memory_space<vmem>>, %arg11: memref<32x32xbf16, #tpu.memory_space<vmem>>, %arg12: memref<1x32xf32, #tpu.memory_space<vmem>>, %arg13: memref<32x64xbf16, #tpu.memory_space<vmem>>, %arg14: memref<1x64xf32, #tpu.memory_space<vmem>>, %arg15: memref<32x32xbf16, #tpu.memory_space<vmem>>, %arg16: memref<1x32xf32, #tpu.memory_space<vmem>>, %arg17: memref<32x64xbf16, #tpu.memory_space<vmem>>, %arg18: memref<1x64xf32, #tpu.memory_space<vmem>>, %arg19: memref<64x32xbf16, #tpu.memory_space<vmem>>, %arg20: memref<1x32xf32, #tpu.memory_space<vmem>>, %arg21: memref<1x32xf32, #tpu.memory_space<vmem>>, %arg22: memref<1x32xf32, #tpu.memory_space<vmem>>, %arg23: memref<8x2x32xf32, #tpu.memory_space<vmem>>) attributes {dimension_semantics = [#tpu.dimension_semantics<parallel>], iteration_bounds = array<i64: 1>, scalar_prefetch = 0 : i64, scratch_operands = 0 : i64, tpu.core_type = #tpu.core_type<tc>, window_params = [{transform_indices = @transform_0, window_bounds = array<i64: 8, 2, 32>}, {transform_indices = @transform_1, window_bounds = array<i64: 16, 2, 32>}, {transform_indices = @transform_2, window_bounds = array<i64: 2, 8>}, {transform_indices = @transform_3, window_bounds = array<i64: 2, 16>}, {pipeline_mode = #tpu.pipeline_mode<synchronous>, transform_indices = @transform_4, window_bounds = array<i64: 3, 32>}, {pipeline_mode = #tpu.pipeline_mode<synchronous>, transform_indices = @transform_5, window_bounds = array<i64: 3, 32>}, {pipeline_mode = #tpu.pipeline_mode<synchronous>, transform_indices = @transform_6, window_bounds = array<i64: 32, 96>}, {pipeline_mode = #tpu.pipeline_mode<synchronous>, transform_indices = @transform_7, window_bounds = array<i64: 1, 96>}, {pipeline_mode = #tpu.pipeline_mode<synchronous>, transform_indices = @transform_8, window_bounds = array<i64: 32, 32>}, {pipeline_mode = #tpu.pipeline_mode<synchronous>, transform_indices = @transform_9, window_bounds = array<i64: 1, 32>}, {pipeline_mode = #tpu.pipeline_mode<synchronous>, transform_indices = @transform_10, window_bounds = array<i64: 32, 32>}, {pipeline_mode = #tpu.pipeline_mode<synchronous>, transform_indices = @transform_11, window_bounds = array<i64: 1, 32>}, {pipeline_mode = #tpu.pipeline_mode<synchronous>, transform_indices = @transform_12, window_bounds = array<i64: 32, 64>}, {pipeline_mode = #tpu.pipeline_mode<synchronous>, transform_indices = @transform_13, window_bounds = array<i64: 1, 64>}, {pipeline_mode = #tpu.pipeline_mode<synchronous>, transform_indices = @transform_14, window_bounds = array<i64: 32, 32>}, {pipeline_mode = #tpu.pipeline_mode<synchronous>, transform_indices = @transform_15, window_bounds = array<i64: 1, 32>}, {pipeline_mode = #tpu.pipeline_mode<synchronous>, transform_indices = @transform_16, window_bounds = array<i64: 32, 64>}, {pipeline_mode = #tpu.pipeline_mode<synchronous>, transform_indices = @transform_17, window_bounds = array<i64: 1, 64>}, {pipeline_mode = #tpu.pipeline_mode<synchronous>, transform_indices = @transform_18, window_bounds = array<i64: 64, 32>}, {pipeline_mode = #tpu.pipeline_mode<synchronous>, transform_indices = @transform_19, window_bounds = array<i64: 1, 32>}, {pipeline_mode = #tpu.pipeline_mode<synchronous>, transform_indices = @transform_20, window_bounds = array<i64: 1, 32>}, {pipeline_mode = #tpu.pipeline_mode<synchronous>, transform_indices = @transform_21, window_bounds = array<i64: 1, 32>}, {transform_indices = @transform_22, window_bounds = array<i64: 8, 2, 32>}]} {
    %c0 = arith.constant 0 : index
    %c0_0 = arith.constant 0 : index
    %c0_1 = arith.constant 0 : index
    %0 = vector.load %arg1[%c0, %c0_0, %c0_1] : memref<8x2x32xf32, #tpu.memory_space<vmem>>, vector<8x2x32xf32>
    %1 = vector.shape_cast %0 : vector<8x2x32xf32> to vector<16x32xf32>
    %c0_2 = arith.constant 0 : index
    %c0_3 = arith.constant 0 : index
    %2 = vector.load %arg5[%c0_2, %c0_3] : memref<3x32xf32, #tpu.memory_space<vmem>>, vector<3x32xf32>
    %c0_4 = arith.constant 0 : index
    %c0_5 = arith.constant 0 : index
    %3 = vector.load %arg6[%c0_4, %c0_5] : memref<3x32xf32, #tpu.memory_space<vmem>>, vector<3x32xf32>
    %4 = vector.extract_strided_slice %2 {offsets = [0, 0], sizes = [1, 32], strides = [1, 1]} : vector<3x32xf32> to vector<1x32xf32>
    %5 = vector.extract_strided_slice %3 {offsets = [0, 0], sizes = [1, 32], strides = [1, 1]} : vector<3x32xf32> to vector<1x32xf32>
    %cst = arith.constant dense<0.000000e+00> : vector<16xf32>
    %6 = vector.multi_reduction <add>, %1, %cst [1] : vector<16x32xf32> to vector<16xf32>
    %7 = vector.shape_cast %6 : vector<16xf32> to vector<16x1xf32>
    %cst_6 = arith.constant 3.200000e+01 : f32
    %8 = vector.broadcast %cst_6 : f32 to vector<16x1xf32>
    %9 = arith.divf %7, %8 : vector<16x1xf32>
    %10 = vector.broadcast %9 : vector<16x1xf32> to vector<16x32xf32>
    %11 = arith.subf %1, %10 : vector<16x32xf32>
    %12 = arith.mulf %11, %11 : vector<16x32xf32>
    %cst_7 = arith.constant dense<0.000000e+00> : vector<16xf32>
    %13 = vector.multi_reduction <add>, %12, %cst_7 [1] : vector<16x32xf32> to vector<16xf32>
    %14 = vector.shape_cast %13 : vector<16xf32> to vector<16x1xf32>
    %cst_8 = arith.constant 3.200000e+01 : f32
    %15 = vector.broadcast %cst_8 : f32 to vector<16x1xf32>
    %16 = arith.divf %14, %15 : vector<16x1xf32>
    %17 = vector.broadcast %9 : vector<16x1xf32> to vector<16x32xf32>
    %18 = arith.subf %1, %17 : vector<16x32xf32>
    %cst_9 = arith.constant 9.99999997E-7 : f32
    %19 = vector.broadcast %cst_9 : f32 to vector<16x1xf32>
    %20 = arith.addf %16, %19 : vector<16x1xf32>
    %21 = math.rsqrt %20 : vector<16x1xf32>
    %22 = vector.broadcast %21 : vector<16x1xf32> to vector<16x32xf32>
    %23 = arith.mulf %18, %22 : vector<16x32xf32>
    %24 = vector.broadcast %4 : vector<1x32xf32> to vector<16x32xf32>
    %25 = arith.mulf %23, %24 : vector<16x32xf32>
    %26 = vector.broadcast %5 : vector<1x32xf32> to vector<16x32xf32>
    %27 = arith.addf %25, %26 : vector<16x32xf32>
    %28 = arith.truncf %27 : vector<16x32xf32> to vector<16x32xbf16>
    %c0_10 = arith.constant 0 : index
    %c0_11 = arith.constant 0 : index
    %29 = vector.load %arg7[%c0_10, %c0_11] : memref<32x96xbf16, #tpu.memory_space<vmem>>, vector<32x96xbf16>
    %cst_12 = arith.constant dense<0.000000e+00> : vector<16x96xf32>
    %30 = tpu.matmul %28, %29, %cst_12 {dimension_numbers = #tpu.dot_dimension_numbers<[1], [0], [0], [1], [0, 0, 1, 1], [], []>} : vector<16x32xbf16>, vector<32x96xbf16>, vector<16x96xf32> -> vector<16x96xf32>
    %c0_13 = arith.constant 0 : index
    %c0_14 = arith.constant 0 : index
    %31 = vector.load %arg8[%c0_13, %c0_14] : memref<1x96xf32, #tpu.memory_space<vmem>>, vector<1x96xf32>
    %32 = vector.broadcast %31 : vector<1x96xf32> to vector<16x96xf32>
    %33 = arith.addf %30, %32 : vector<16x96xf32>
    %34 = vector.extract_strided_slice %33 {offsets = [0, 0], sizes = [16, 32], strides = [1, 1]} : vector<16x96xf32> to vector<16x32xf32>
    %35 = vector.extract_strided_slice %33 {offsets = [0, 32], sizes = [16, 32], strides = [1, 1]} : vector<16x96xf32> to vector<16x32xf32>
    %36 = vector.extract_strided_slice %33 {offsets = [0, 64], sizes = [16, 32], strides = [1, 1]} : vector<16x96xf32> to vector<16x32xf32>
    %37 = tpu.iota {dimensions = array<i32: 0>} : vector<8x8xi32>
    %38 = tpu.iota {dimensions = array<i32: 1>} : vector<8x8xi32>
    %39 = arith.cmpi sgt, %38, %37 : vector<8x8xi32>
    %40 = vector.shape_cast %39 : vector<8x8xi1> to vector<1x8x8xi1>
    %c0_15 = arith.constant 0 : index
    %c0_16 = arith.constant 0 : index
    %41 = vector.load %arg3[%c0_15, %c0_16] : memref<2x8xf32, #tpu.memory_space<vmem>>, vector<2x8xf32>
    %42 = vector.shape_cast %41 : vector<2x8xf32> to vector<2x1x8xf32>
    %cst_17 = arith.constant -9.99999984E+17 : f32
    %43 = vector.shape_cast %40 : vector<1x8x8xi1> to vector<1x8x8xi1>
    %44 = vector.broadcast %43 : vector<1x8x8xi1> to vector<2x8x8xi1>
    %45 = vector.broadcast %cst_17 : f32 to vector<2x8x8xf32>
    %46 = vector.shape_cast %42 : vector<2x1x8xf32> to vector<2x1x8xf32>
    %47 = vector.broadcast %46 : vector<2x1x8xf32> to vector<2x8x8xf32>
    %48 = arith.select %44, %45, %47 : vector<2x8x8xi1>, vector<2x8x8xf32>
    %49 = vector.shape_cast %34 : vector<16x32xf32> to vector<8x2x4x8xf32>
    %50 = tpu.transpose %49, [1, 2, 0, 3] : vector<8x2x4x8xf32> -> vector<2x4x8x8xf32>
    %51 = vector.shape_cast %50 : vector<2x4x8x8xf32> to vector<8x8x8xf32>
    %52 = arith.truncf %51 : vector<8x8x8xf32> to vector<8x8x8xbf16>
    %53 = vector.shape_cast %35 : vector<16x32xf32> to vector<8x2x4x8xf32>
    %54 = tpu.transpose %53, [1, 2, 0, 3] : vector<8x2x4x8xf32> -> vector<2x4x8x8xf32>
    %55 = vector.shape_cast %54 : vector<2x4x8x8xf32> to vector<8x8x8xf32>
    %56 = arith.truncf %55 : vector<8x8x8xf32> to vector<8x8x8xbf16>
    %57 = vector.shape_cast %36 : vector<16x32xf32> to vector<8x2x4x8xf32>
    %58 = tpu.transpose %57, [1, 2, 0, 3] : vector<8x2x4x8xf32> -> vector<2x4x8x8xf32>
    %59 = vector.shape_cast %58 : vector<2x4x8x8xf32> to vector<8x8x8xf32>
    %60 = arith.truncf %59 : vector<8x8x8xf32> to vector<8x8x8xbf16>
    %cst_18 = arith.constant dense<0.000000e+00> : vector<8x8x8xf32>
    %61 = tpu.matmul %52, %56, %cst_18 {dimension_numbers = #tpu.dot_dimension_numbers<[2], [2], [1], [1], [0, 0, 0, 1, 1, 1], [0], [0]>} : vector<8x8x8xbf16>, vector<8x8x8xbf16>, vector<8x8x8xf32> -> vector<8x8x8xf32>
    %62 = vector.shape_cast %61 : vector<8x8x8xf32> to vector<2x4x8x8xf32>
    %63 = vector.shape_cast %48 : vector<2x8x8xf32> to vector<2x1x8x8xf32>
    %64 = vector.broadcast %63 : vector<2x1x8x8xf32> to vector<2x4x8x8xf32>
    %65 = arith.addf %62, %64 : vector<2x4x8x8xf32>
    %66 = vector.shape_cast %65 : vector<2x4x8x8xf32> to vector<8x8x8xf32>
    %cst_19 = arith.constant dense<0xFF800000> : vector<8x8xf32>
    %67 = vector.multi_reduction <maximumf>, %66, %cst_19 [2] : vector<8x8x8xf32> to vector<8x8xf32>
    %68 = vector.shape_cast %67 : vector<8x8xf32> to vector<8x8x1xf32>
    %69 = vector.broadcast %68 : vector<8x8x1xf32> to vector<8x8x8xf32>
    %70 = arith.subf %66, %69 : vector<8x8x8xf32>
    %71 = math.exp %70 : vector<8x8x8xf32>
    %cst_20 = arith.constant dense<0.000000e+00> : vector<8x8xf32>
    %72 = vector.multi_reduction <add>, %71, %cst_20 [2] : vector<8x8x8xf32> to vector<8x8xf32>
    %73 = vector.shape_cast %72 : vector<8x8xf32> to vector<8x8x1xf32>
    %74 = tpu.reciprocal %73 {approx = true} : vector<8x8x1xf32> -> vector<8x8x1xf32>
    %75 = vector.broadcast %74 : vector<8x8x1xf32> to vector<8x8x8xf32>
    %76 = arith.mulf %71, %75 : vector<8x8x8xf32>
    %77 = arith.truncf %76 : vector<8x8x8xf32> to vector<8x8x8xbf16>
    %cst_21 = arith.constant dense<0.000000e+00> : vector<8x8x8xf32>
    %78 = tpu.matmul %77, %60, %cst_21 {dimension_numbers = #tpu.dot_dimension_numbers<[2], [1], [1], [2], [0, 0, 0, 1, 1, 2], [0], [0]>} : vector<8x8x8xbf16>, vector<8x8x8xbf16>, vector<8x8x8xf32> -> vector<8x8x8xf32>
    %79 = vector.shape_cast %78 : vector<8x8x8xf32> to vector<2x4x8x8xf32>
    %80 = tpu.transpose %79, [2, 0, 1, 3] : vector<2x4x8x8xf32> -> vector<8x2x4x8xf32>
    %81 = vector.shape_cast %80 : vector<8x2x4x8xf32> to vector<16x32xf32>
    %82 = arith.truncf %81 : vector<16x32xf32> to vector<16x32xbf16>
    %c0_22 = arith.constant 0 : index
    %c0_23 = arith.constant 0 : index
    %83 = vector.load %arg9[%c0_22, %c0_23] : memref<32x32xbf16, #tpu.memory_space<vmem>>, vector<32x32xbf16>
    %cst_24 = arith.constant dense<0.000000e+00> : vector<16x32xf32>
    %84 = tpu.matmul %82, %83, %cst_24 {dimension_numbers = #tpu.dot_dimension_numbers<[1], [0], [0], [1], [0, 0, 1, 1], [], []>} : vector<16x32xbf16>, vector<32x32xbf16>, vector<16x32xf32> -> vector<16x32xf32>
    %c0_25 = arith.constant 0 : index
    %c0_26 = arith.constant 0 : index
    %85 = vector.load %arg10[%c0_25, %c0_26] : memref<1x32xf32, #tpu.memory_space<vmem>>, vector<1x32xf32>
    %86 = vector.broadcast %85 : vector<1x32xf32> to vector<16x32xf32>
    %87 = arith.addf %84, %86 : vector<16x32xf32>
    %88 = arith.addf %1, %87 : vector<16x32xf32>
    %89 = vector.extract_strided_slice %2 {offsets = [1, 0], sizes = [1, 32], strides = [1, 1]} : vector<3x32xf32> to vector<1x32xf32>
    %90 = vector.extract_strided_slice %3 {offsets = [1, 0], sizes = [1, 32], strides = [1, 1]} : vector<3x32xf32> to vector<1x32xf32>
    %cst_27 = arith.constant dense<0.000000e+00> : vector<16xf32>
    %91 = vector.multi_reduction <add>, %88, %cst_27 [1] : vector<16x32xf32> to vector<16xf32>
    %92 = vector.shape_cast %91 : vector<16xf32> to vector<16x1xf32>
    %cst_28 = arith.constant 3.200000e+01 : f32
    %93 = vector.broadcast %cst_28 : f32 to vector<16x1xf32>
    %94 = arith.divf %92, %93 : vector<16x1xf32>
    %95 = vector.broadcast %94 : vector<16x1xf32> to vector<16x32xf32>
    %96 = arith.subf %88, %95 : vector<16x32xf32>
    %97 = arith.mulf %96, %96 : vector<16x32xf32>
    %cst_29 = arith.constant dense<0.000000e+00> : vector<16xf32>
    %98 = vector.multi_reduction <add>, %97, %cst_29 [1] : vector<16x32xf32> to vector<16xf32>
    %99 = vector.shape_cast %98 : vector<16xf32> to vector<16x1xf32>
    %cst_30 = arith.constant 3.200000e+01 : f32
    %100 = vector.broadcast %cst_30 : f32 to vector<16x1xf32>
    %101 = arith.divf %99, %100 : vector<16x1xf32>
    %102 = vector.broadcast %94 : vector<16x1xf32> to vector<16x32xf32>
    %103 = arith.subf %88, %102 : vector<16x32xf32>
    %cst_31 = arith.constant 9.99999997E-7 : f32
    %104 = vector.broadcast %cst_31 : f32 to vector<16x1xf32>
    %105 = arith.addf %101, %104 : vector<16x1xf32>
    %106 = math.rsqrt %105 : vector<16x1xf32>
    %107 = vector.broadcast %106 : vector<16x1xf32> to vector<16x32xf32>
    %108 = arith.mulf %103, %107 : vector<16x32xf32>
    %109 = vector.broadcast %89 : vector<1x32xf32> to vector<16x32xf32>
    %110 = arith.mulf %108, %109 : vector<16x32xf32>
    %111 = vector.broadcast %90 : vector<1x32xf32> to vector<16x32xf32>
    %112 = arith.addf %110, %111 : vector<16x32xf32>
    %113 = arith.truncf %112 : vector<16x32xf32> to vector<16x32xbf16>
    %c0_32 = arith.constant 0 : index
    %c0_33 = arith.constant 0 : index
    %114 = vector.load %arg11[%c0_32, %c0_33] : memref<32x32xbf16, #tpu.memory_space<vmem>>, vector<32x32xbf16>
    %cst_34 = arith.constant dense<0.000000e+00> : vector<16x32xf32>
    %115 = tpu.matmul %113, %114, %cst_34 {dimension_numbers = #tpu.dot_dimension_numbers<[1], [0], [0], [1], [0, 0, 1, 1], [], []>} : vector<16x32xbf16>, vector<32x32xbf16>, vector<16x32xf32> -> vector<16x32xf32>
    %c0_35 = arith.constant 0 : index
    %c0_36 = arith.constant 0 : index
    %116 = vector.load %arg12[%c0_35, %c0_36] : memref<1x32xf32, #tpu.memory_space<vmem>>, vector<1x32xf32>
    %117 = vector.broadcast %116 : vector<1x32xf32> to vector<16x32xf32>
    %118 = arith.addf %115, %117 : vector<16x32xf32>
    %c0_37 = arith.constant 0 : index
    %c0_38 = arith.constant 0 : index
    %c0_39 = arith.constant 0 : index
    %119 = vector.load %arg2[%c0_37, %c0_38, %c0_39] : memref<16x2x32xbf16, #tpu.memory_space<vmem>>, vector<16x2x32xbf16>
    %120 = vector.shape_cast %119 : vector<16x2x32xbf16> to vector<32x32xbf16>
    %c0_40 = arith.constant 0 : index
    %c0_41 = arith.constant 0 : index
    %121 = vector.load %arg13[%c0_40, %c0_41] : memref<32x64xbf16, #tpu.memory_space<vmem>>, vector<32x64xbf16>
    %cst_42 = arith.constant dense<0.000000e+00> : vector<32x64xf32>
    %122 = tpu.matmul %120, %121, %cst_42 {dimension_numbers = #tpu.dot_dimension_numbers<[1], [0], [0], [1], [0, 0, 1, 1], [], []>} : vector<32x32xbf16>, vector<32x64xbf16>, vector<32x64xf32> -> vector<32x64xf32>
    %c0_43 = arith.constant 0 : index
    %c0_44 = arith.constant 0 : index
    %123 = vector.load %arg14[%c0_43, %c0_44] : memref<1x64xf32, #tpu.memory_space<vmem>>, vector<1x64xf32>
    %124 = vector.broadcast %123 : vector<1x64xf32> to vector<32x64xf32>
    %125 = arith.addf %122, %124 : vector<32x64xf32>
    %126 = vector.extract_strided_slice %125 {offsets = [0, 0], sizes = [32, 32], strides = [1, 1]} : vector<32x64xf32> to vector<32x32xf32>
    %127 = vector.extract_strided_slice %125 {offsets = [0, 32], sizes = [32, 32], strides = [1, 1]} : vector<32x64xf32> to vector<32x32xf32>
    %c0_45 = arith.constant 0 : index
    %c0_46 = arith.constant 0 : index
    %128 = vector.load %arg4[%c0_45, %c0_46] : memref<2x16xf32, #tpu.memory_space<vmem>>, vector<2x16xf32>
    %129 = vector.shape_cast %128 : vector<2x16xf32> to vector<2x1x16xf32>
    %130 = vector.shape_cast %118 : vector<16x32xf32> to vector<8x2x4x8xf32>
    %131 = tpu.transpose %130, [1, 2, 0, 3] : vector<8x2x4x8xf32> -> vector<2x4x8x8xf32>
    %132 = vector.shape_cast %131 : vector<2x4x8x8xf32> to vector<8x8x8xf32>
    %133 = arith.truncf %132 : vector<8x8x8xf32> to vector<8x8x8xbf16>
    %134 = vector.shape_cast %126 : vector<32x32xf32> to vector<16x2x4x8xf32>
    %135 = tpu.transpose %134, [1, 2, 0, 3] : vector<16x2x4x8xf32> -> vector<2x4x16x8xf32>
    %136 = vector.shape_cast %135 : vector<2x4x16x8xf32> to vector<8x16x8xf32>
    %137 = arith.truncf %136 : vector<8x16x8xf32> to vector<8x16x8xbf16>
    %138 = vector.shape_cast %127 : vector<32x32xf32> to vector<16x2x4x8xf32>
    %139 = tpu.transpose %138, [1, 2, 0, 3] : vector<16x2x4x8xf32> -> vector<2x4x16x8xf32>
    %140 = vector.shape_cast %139 : vector<2x4x16x8xf32> to vector<8x16x8xf32>
    %141 = arith.truncf %140 : vector<8x16x8xf32> to vector<8x16x8xbf16>
    %cst_47 = arith.constant dense<0.000000e+00> : vector<8x8x16xf32>
    %142 = tpu.matmul %133, %137, %cst_47 {dimension_numbers = #tpu.dot_dimension_numbers<[2], [2], [1], [1], [0, 0, 0, 1, 1, 1], [0], [0]>} : vector<8x8x8xbf16>, vector<8x16x8xbf16>, vector<8x8x16xf32> -> vector<8x8x16xf32>
    %143 = vector.shape_cast %142 : vector<8x8x16xf32> to vector<2x4x8x16xf32>
    %144 = vector.shape_cast %129 : vector<2x1x16xf32> to vector<2x1x1x16xf32>
    %145 = vector.broadcast %144 : vector<2x1x1x16xf32> to vector<2x4x8x16xf32>
    %146 = arith.addf %143, %145 : vector<2x4x8x16xf32>
    %147 = vector.shape_cast %146 : vector<2x4x8x16xf32> to vector<8x8x16xf32>
    %cst_48 = arith.constant dense<0xFF800000> : vector<8x8xf32>
    %148 = vector.multi_reduction <maximumf>, %147, %cst_48 [2] : vector<8x8x16xf32> to vector<8x8xf32>
    %149 = vector.shape_cast %148 : vector<8x8xf32> to vector<8x8x1xf32>
    %150 = vector.broadcast %149 : vector<8x8x1xf32> to vector<8x8x16xf32>
    %151 = arith.subf %147, %150 : vector<8x8x16xf32>
    %152 = math.exp %151 : vector<8x8x16xf32>
    %cst_49 = arith.constant dense<0.000000e+00> : vector<8x8xf32>
    %153 = vector.multi_reduction <add>, %152, %cst_49 [2] : vector<8x8x16xf32> to vector<8x8xf32>
    %154 = vector.shape_cast %153 : vector<8x8xf32> to vector<8x8x1xf32>
    %155 = tpu.reciprocal %154 {approx = true} : vector<8x8x1xf32> -> vector<8x8x1xf32>
    %156 = vector.broadcast %155 : vector<8x8x1xf32> to vector<8x8x16xf32>
    %157 = arith.mulf %152, %156 : vector<8x8x16xf32>
    %158 = arith.truncf %157 : vector<8x8x16xf32> to vector<8x8x16xbf16>
    %cst_50 = arith.constant dense<0.000000e+00> : vector<8x8x8xf32>
    %159 = tpu.matmul %158, %141, %cst_50 {dimension_numbers = #tpu.dot_dimension_numbers<[2], [1], [1], [2], [0, 0, 0, 1, 1, 2], [0], [0]>} : vector<8x8x16xbf16>, vector<8x16x8xbf16>, vector<8x8x8xf32> -> vector<8x8x8xf32>
    %160 = vector.shape_cast %159 : vector<8x8x8xf32> to vector<2x4x8x8xf32>
    %161 = tpu.transpose %160, [2, 0, 1, 3] : vector<2x4x8x8xf32> -> vector<8x2x4x8xf32>
    %162 = vector.shape_cast %161 : vector<8x2x4x8xf32> to vector<16x32xf32>
    %163 = arith.truncf %162 : vector<16x32xf32> to vector<16x32xbf16>
    %c0_51 = arith.constant 0 : index
    %c0_52 = arith.constant 0 : index
    %164 = vector.load %arg15[%c0_51, %c0_52] : memref<32x32xbf16, #tpu.memory_space<vmem>>, vector<32x32xbf16>
    %cst_53 = arith.constant dense<0.000000e+00> : vector<16x32xf32>
    %165 = tpu.matmul %163, %164, %cst_53 {dimension_numbers = #tpu.dot_dimension_numbers<[1], [0], [0], [1], [0, 0, 1, 1], [], []>} : vector<16x32xbf16>, vector<32x32xbf16>, vector<16x32xf32> -> vector<16x32xf32>
    %c0_54 = arith.constant 0 : index
    %c0_55 = arith.constant 0 : index
    %166 = vector.load %arg16[%c0_54, %c0_55] : memref<1x32xf32, #tpu.memory_space<vmem>>, vector<1x32xf32>
    %167 = vector.broadcast %166 : vector<1x32xf32> to vector<16x32xf32>
    %168 = arith.addf %165, %167 : vector<16x32xf32>
    %169 = arith.addf %88, %168 : vector<16x32xf32>
    %170 = vector.extract_strided_slice %2 {offsets = [2, 0], sizes = [1, 32], strides = [1, 1]} : vector<3x32xf32> to vector<1x32xf32>
    %171 = vector.extract_strided_slice %3 {offsets = [2, 0], sizes = [1, 32], strides = [1, 1]} : vector<3x32xf32> to vector<1x32xf32>
    %cst_56 = arith.constant dense<0.000000e+00> : vector<16xf32>
    %172 = vector.multi_reduction <add>, %169, %cst_56 [1] : vector<16x32xf32> to vector<16xf32>
    %173 = vector.shape_cast %172 : vector<16xf32> to vector<16x1xf32>
    %cst_57 = arith.constant 3.200000e+01 : f32
    %174 = vector.broadcast %cst_57 : f32 to vector<16x1xf32>
    %175 = arith.divf %173, %174 : vector<16x1xf32>
    %176 = vector.broadcast %175 : vector<16x1xf32> to vector<16x32xf32>
    %177 = arith.subf %169, %176 : vector<16x32xf32>
    %178 = arith.mulf %177, %177 : vector<16x32xf32>
    %cst_58 = arith.constant dense<0.000000e+00> : vector<16xf32>
    %179 = vector.multi_reduction <add>, %178, %cst_58 [1] : vector<16x32xf32> to vector<16xf32>
    %180 = vector.shape_cast %179 : vector<16xf32> to vector<16x1xf32>
    %cst_59 = arith.constant 3.200000e+01 : f32
    %181 = vector.broadcast %cst_59 : f32 to vector<16x1xf32>
    %182 = arith.divf %180, %181 : vector<16x1xf32>
    %183 = vector.broadcast %175 : vector<16x1xf32> to vector<16x32xf32>
    %184 = arith.subf %169, %183 : vector<16x32xf32>
    %cst_60 = arith.constant 9.99999997E-7 : f32
    %185 = vector.broadcast %cst_60 : f32 to vector<16x1xf32>
    %186 = arith.addf %182, %185 : vector<16x1xf32>
    %187 = math.rsqrt %186 : vector<16x1xf32>
    %188 = vector.broadcast %187 : vector<16x1xf32> to vector<16x32xf32>
    %189 = arith.mulf %184, %188 : vector<16x32xf32>
    %190 = vector.broadcast %170 : vector<1x32xf32> to vector<16x32xf32>
    %191 = arith.mulf %189, %190 : vector<16x32xf32>
    %192 = vector.broadcast %171 : vector<1x32xf32> to vector<16x32xf32>
    %193 = arith.addf %191, %192 : vector<16x32xf32>
    %194 = arith.truncf %193 : vector<16x32xf32> to vector<16x32xbf16>
    %c0_61 = arith.constant 0 : index
    %c0_62 = arith.constant 0 : index
    %195 = vector.load %arg17[%c0_61, %c0_62] : memref<32x64xbf16, #tpu.memory_space<vmem>>, vector<32x64xbf16>
    %cst_63 = arith.constant dense<0.000000e+00> : vector<16x64xf32>
    %196 = tpu.matmul %194, %195, %cst_63 {dimension_numbers = #tpu.dot_dimension_numbers<[1], [0], [0], [1], [0, 0, 1, 1], [], []>} : vector<16x32xbf16>, vector<32x64xbf16>, vector<16x64xf32> -> vector<16x64xf32>
    %c0_64 = arith.constant 0 : index
    %c0_65 = arith.constant 0 : index
    %197 = vector.load %arg18[%c0_64, %c0_65] : memref<1x64xf32, #tpu.memory_space<vmem>>, vector<1x64xf32>
    %198 = vector.broadcast %197 : vector<1x64xf32> to vector<16x64xf32>
    %199 = arith.addf %196, %198 : vector<16x64xf32>
    %cst_66 = arith.constant 5.000000e-01 : f32
    %200 = vector.broadcast %cst_66 : f32 to vector<16x64xf32>
    %201 = arith.mulf %200, %199 : vector<16x64xf32>
    %cst_67 = arith.constant 4.471500e-02 : f32
    %202 = vector.broadcast %cst_67 : f32 to vector<16x64xf32>
    %203 = arith.mulf %202, %199 : vector<16x64xf32>
    %204 = arith.mulf %203, %199 : vector<16x64xf32>
    %205 = arith.mulf %204, %199 : vector<16x64xf32>
    %206 = arith.addf %199, %205 : vector<16x64xf32>
    %cst_68 = arith.constant 0.797884583 : f32
    %207 = vector.broadcast %cst_68 : f32 to vector<16x64xf32>
    %208 = arith.mulf %207, %206 : vector<16x64xf32>
    %209 = math.tanh %208 : vector<16x64xf32>
    %cst_69 = arith.constant 1.000000e+00 : f32
    %210 = vector.broadcast %cst_69 : f32 to vector<16x64xf32>
    %211 = arith.addf %210, %209 : vector<16x64xf32>
    %212 = arith.mulf %201, %211 : vector<16x64xf32>
    %213 = arith.truncf %212 : vector<16x64xf32> to vector<16x64xbf16>
    %c0_70 = arith.constant 0 : index
    %c0_71 = arith.constant 0 : index
    %214 = vector.load %arg19[%c0_70, %c0_71] : memref<64x32xbf16, #tpu.memory_space<vmem>>, vector<64x32xbf16>
    %cst_72 = arith.constant dense<0.000000e+00> : vector<16x32xf32>
    %215 = tpu.matmul %213, %214, %cst_72 {dimension_numbers = #tpu.dot_dimension_numbers<[1], [0], [0], [1], [0, 0, 1, 1], [], []>} : vector<16x64xbf16>, vector<64x32xbf16>, vector<16x32xf32> -> vector<16x32xf32>
    %c0_73 = arith.constant 0 : index
    %c0_74 = arith.constant 0 : index
    %216 = vector.load %arg20[%c0_73, %c0_74] : memref<1x32xf32, #tpu.memory_space<vmem>>, vector<1x32xf32>
    %217 = vector.broadcast %216 : vector<1x32xf32> to vector<16x32xf32>
    %218 = arith.addf %215, %217 : vector<16x32xf32>
    %219 = arith.addf %169, %218 : vector<16x32xf32>
    %c0_75 = arith.constant 0 : index
    %c0_76 = arith.constant 0 : index
    %220 = vector.load %arg21[%c0_75, %c0_76] : memref<1x32xf32, #tpu.memory_space<vmem>>, vector<1x32xf32>
    %c0_77 = arith.constant 0 : index
    %c0_78 = arith.constant 0 : index
    %221 = vector.load %arg22[%c0_77, %c0_78] : memref<1x32xf32, #tpu.memory_space<vmem>>, vector<1x32xf32>
    %cst_79 = arith.constant dense<0.000000e+00> : vector<16xf32>
    %222 = vector.multi_reduction <add>, %219, %cst_79 [1] : vector<16x32xf32> to vector<16xf32>
    %223 = vector.shape_cast %222 : vector<16xf32> to vector<16x1xf32>
    %cst_80 = arith.constant 3.200000e+01 : f32
    %224 = vector.broadcast %cst_80 : f32 to vector<16x1xf32>
    %225 = arith.divf %223, %224 : vector<16x1xf32>
    %226 = vector.broadcast %225 : vector<16x1xf32> to vector<16x32xf32>
    %227 = arith.subf %219, %226 : vector<16x32xf32>
    %228 = arith.mulf %227, %227 : vector<16x32xf32>
    %cst_81 = arith.constant dense<0.000000e+00> : vector<16xf32>
    %229 = vector.multi_reduction <add>, %228, %cst_81 [1] : vector<16x32xf32> to vector<16xf32>
    %230 = vector.shape_cast %229 : vector<16xf32> to vector<16x1xf32>
    %cst_82 = arith.constant 3.200000e+01 : f32
    %231 = vector.broadcast %cst_82 : f32 to vector<16x1xf32>
    %232 = arith.divf %230, %231 : vector<16x1xf32>
    %233 = vector.broadcast %225 : vector<16x1xf32> to vector<16x32xf32>
    %234 = arith.subf %219, %233 : vector<16x32xf32>
    %cst_83 = arith.constant 9.99999997E-7 : f32
    %235 = vector.broadcast %cst_83 : f32 to vector<16x1xf32>
    %236 = arith.addf %232, %235 : vector<16x1xf32>
    %237 = math.rsqrt %236 : vector<16x1xf32>
    %238 = vector.broadcast %237 : vector<16x1xf32> to vector<16x32xf32>
    %239 = arith.mulf %234, %238 : vector<16x32xf32>
    %240 = vector.broadcast %220 : vector<1x32xf32> to vector<16x32xf32>
    %241 = arith.mulf %239, %240 : vector<16x32xf32>
    %242 = vector.broadcast %221 : vector<1x32xf32> to vector<16x32xf32>
    %243 = arith.addf %241, %242 : vector<16x32xf32>
    %244 = vector.shape_cast %243 : vector<16x32xf32> to vector<8x2x32xf32>
    %c0_84 = arith.constant 0 : index
    %c0_85 = arith.constant 0 : index
    %c0_86 = arith.constant 0 : index
    %245 = vector.load %arg23[%c0_84, %c0_85, %c0_86] : memref<8x2x32xf32, #tpu.memory_space<vmem>>, vector<8x2x32xf32>
    tpu.vector_store %arg23[%c0_84, %c0_85, %c0_86], %244 {strides = array<i32>} : memref<8x2x32xf32, #tpu.memory_space<vmem>>, vector<8x2x32xf32>,
    return
  }
  func.func @transform_0(%arg0: i32) -> (i32, i32, i32) {
    %c0_i32 = arith.constant 0 : i32
    %c0_i32_0 = arith.constant 0 : i32
    %c0_i32_1 = arith.constant 0 : i32
    return %c0_i32, %arg0, %c0_i32_0 : i32, i32, i32
  }
  func.func @transform_1(%arg0: i32) -> (i32, i32, i32) {
    %c0_i32 = arith.constant 0 : i32
    %c0_i32_0 = arith.constant 0 : i32
    %c0_i32_1 = arith.constant 0 : i32
    return %c0_i32, %arg0, %c0_i32_0 : i32, i32, i32
  }
  func.func @transform_2(%arg0: i32) -> (i32, i32) {
    %c0_i32 = arith.constant 0 : i32
    %c0_i32_0 = arith.constant 0 : i32
    return %arg0, %c0_i32 : i32, i32
  }
  func.func @transform_3(%arg0: i32) -> (i32, i32) {
    %c0_i32 = arith.constant 0 : i32
    %c0_i32_0 = arith.constant 0 : i32
    return %arg0, %c0_i32 : i32, i32
  }
  func.func @transform_4(%arg0: i32) -> (i32, i32) {
    %c0_i32 = arith.constant 0 : i32
    %c0_i32_0 = arith.constant 0 : i32
    %c0_i32_1 = arith.constant 0 : i32
    return %c0_i32, %c0_i32_0 : i32, i32
  }
  func.func @transform_5(%arg0: i32) -> (i32, i32) {
    %c0_i32 = arith.constant 0 : i32
    %c0_i32_0 = arith.constant 0 : i32
    %c0_i32_1 = arith.constant 0 : i32
    return %c0_i32, %c0_i32_0 : i32, i32
  }
  func.func @transform_6(%arg0: i32) -> (i32, i32) {
    %c0_i32 = arith.constant 0 : i32
    %c0_i32_0 = arith.constant 0 : i32
    %c0_i32_1 = arith.constant 0 : i32
    return %c0_i32, %c0_i32_0 : i32, i32
  }
  func.func @transform_7(%arg0: i32) -> (i32, i32) {
    %c0_i32 = arith.constant 0 : i32
    %c0_i32_0 = arith.constant 0 : i32
    %c0_i32_1 = arith.constant 0 : i32
    return %c0_i32, %c0_i32_0 : i32, i32
  }
  func.func @transform_8(%arg0: i32) -> (i32, i32) {
    %c0_i32 = arith.constant 0 : i32
    %c0_i32_0 = arith.constant 0 : i32
    %c0_i32_1 = arith.constant 0 : i32
    return %c0_i32, %c0_i32_0 : i32, i32
  }
  func.func @transform_9(%arg0: i32) -> (i32, i32) {
    %c0_i32 = arith.constant 0 : i32
    %c0_i32_0 = arith.constant 0 : i32
    %c0_i32_1 = arith.constant 0 : i32
    return %c0_i32, %c0_i32_0 : i32, i32
  }
  func.func @transform_10(%arg0: i32) -> (i32, i32) {
    %c0_i32 = arith.constant 0 : i32
    %c0_i32_0 = arith.constant 0 : i32
    %c0_i32_1 = arith.constant 0 : i32
    return %c0_i32, %c0_i32_0 : i32, i32
  }
  func.func @transform_11(%arg0: i32) -> (i32, i32) {
    %c0_i32 = arith.constant 0 : i32
    %c0_i32_0 = arith.constant 0 : i32
    %c0_i32_1 = arith.constant 0 : i32
    return %c0_i32, %c0_i32_0 : i32, i32
  }
  func.func @transform_12(%arg0: i32) -> (i32, i32) {
    %c0_i32 = arith.constant 0 : i32
    %c0_i32_0 = arith.constant 0 : i32
    %c0_i32_1 = arith.constant 0 : i32
    return %c0_i32, %c0_i32_0 : i32, i32
  }
  func.func @transform_13(%arg0: i32) -> (i32, i32) {
    %c0_i32 = arith.constant 0 : i32
    %c0_i32_0 = arith.constant 0 : i32
    %c0_i32_1 = arith.constant 0 : i32
    return %c0_i32, %c0_i32_0 : i32, i32
  }
  func.func @transform_14(%arg0: i32) -> (i32, i32) {
    %c0_i32 = arith.constant 0 : i32
    %c0_i32_0 = arith.constant 0 : i32
    %c0_i32_1 = arith.constant 0 : i32
    return %c0_i32, %c0_i32_0 : i32, i32
  }
  func.func @transform_15(%arg0: i32) -> (i32, i32) {
    %c0_i32 = arith.constant 0 : i32
    %c0_i32_0 = arith.constant 0 : i32
    %c0_i32_1 = arith.constant 0 : i32
    return %c0_i32, %c0_i32_0 : i32, i32
  }
  func.func @transform_16(%arg0: i32) -> (i32, i32) {
    %c0_i32 = arith.constant 0 : i32
    %c0_i32_0 = arith.constant 0 : i32
    %c0_i32_1 = arith.constant 0 : i32
    return %c0_i32, %c0_i32_0 : i32, i32
  }
  func.func @transform_17(%arg0: i32) -> (i32, i32) {
    %c0_i32 = arith.constant 0 : i32
    %c0_i32_0 = arith.constant 0 : i32
    %c0_i32_1 = arith.constant 0 : i32
    return %c0_i32, %c0_i32_0 : i32, i32
  }
  func.func @transform_18(%arg0: i32) -> (i32, i32) {
    %c0_i32 = arith.constant 0 : i32
    %c0_i32_0 = arith.constant 0 : i32
    %c0_i32_1 = arith.constant 0 : i32
    return %c0_i32, %c0_i32_0 : i32, i32
  }
  func.func @transform_19(%arg0: i32) -> (i32, i32) {
    %c0_i32 = arith.constant 0 : i32
    %c0_i32_0 = arith.constant 0 : i32
    %c0_i32_1 = arith.constant 0 : i32
    return %c0_i32, %c0_i32_0 : i32, i32
  }
  func.func @transform_20(%arg0: i32) -> (i32, i32) {
    %c0_i32 = arith.constant 0 : i32
    %c0_i32_0 = arith.constant 0 : i32
    %c0_i32_1 = arith.constant 0 : i32
    return %c0_i32, %c0_i32_0 : i32, i32
  }
  func.func @transform_21(%arg0: i32) -> (i32, i32) {
    %c0_i32 = arith.constant 0 : i32
    %c0_i32_0 = arith.constant 0 : i32
    %c0_i32_1 = arith.constant 0 : i32
    return %c0_i32, %c0_i32_0 : i32, i32
  }
  func.func @transform_22(%arg0: i32) -> (i32, i32, i32) {
    %c0_i32 = arith.constant 0 : i32
    %c0_i32_0 = arith.constant 0 : i32
    %c0_i32_1 = arith.constant 0 : i32
    return %c0_i32, %arg0, %c0_i32_0 : i32, i32, i32
  }
}

</mosaic_0001>

<bundles_post_ra>
// kernel: transformer_decoder_forward.2
= control target key start
LH: loop header
LB: loop body
LE: loop exit
PB: predicated region body
PF: predicated region fallthrough
CT: control target
= control target key end

     0   :  { %vm109_vm0 = vcmask 261120   ;;  %v5123_v12 = vmov 32.0   ;;  %v5124_v18 = vmov 269488144   ;;  %v5125_v20 = vmov 842150450   ;;  %s7153_s0 = inlined_call_operand.vmem [shape: f32[8,2,32], index: 0, kind: input, shape index: {}]   ;;  %s7154_s20 = inlined_call_operand.vmem [shape: f32[1,32], index: 20, kind: input, shape index: {}]   ;;  %s7155_s21 = inlined_call_operand.vmem [shape: f32[1,32], index: 21, kind: input, shape index: {}]   ;;  %s7156_s7 = inlined_call_operand.vmem [shape: f32[1,96], index: 7, kind: input, shape index: {}]   ;;  %s7157_s6 = inlined_call_operand.vmem [shape: bf16[32,96], index: 6, kind: input, shape index: {}]   ;;  %s7158_s4 = inlined_call_operand.vmem [shape: f32[3,32], index: 4, kind: input, shape index: {}]   ;;  %s7159_s5 = inlined_call_operand.vmem [shape: f32[3,32], index: 5, kind: input, shape index: {}]   ;;  %s7160_s2 = inlined_call_operand.vmem [shape: f32[2,8], index: 2, kind: input, shape index: {}]   ;;  %s7161_s9 = inlined_call_operand.vmem [shape: f32[1,32], index: 9, kind: input, shape index: {}]   ;;  %s7162_s8 = inlined_call_operand.vmem [shape: bf16[32,32], index: 8, kind: input, shape index: {}]   ;;  %s7163_s11 = inlined_call_operand.vmem [shape: f32[1,32], index: 11, kind: input, shape index: {}]   ;;  %s7164_s10 = inlined_call_operand.vmem [shape: bf16[32,32], index: 10, kind: input, shape index: {}]   ;;  %s7165_s12 = inlined_call_operand.vmem [shape: bf16[32,64], index: 12, kind: input, shape index: {}]   ;;  %s7166_s1 = inlined_call_operand.vmem [shape: bf16[16,2,32], index: 1, kind: input, shape index: {}]   ;;  %s7167_s13 = inlined_call_operand.vmem [shape: f32[1,64], index: 13, kind: input, shape index: {}]   ;;  %s7168_s3 = inlined_call_operand.vmem [shape: f32[2,16], index: 3, kind: input, shape index: {}]   ;;  %s7169_s15 = inlined_call_operand.vmem [shape: f32[1,32], index: 15, kind: input, shape index: {}]   ;;  %s7170_s14 = inlined_call_operand.vmem [shape: bf16[32,32], index: 14, kind: input, shape index: {}]   ;;  %s7171_s17 = inlined_call_operand.vmem [shape: f32[1,64], index: 17, kind: input, shape index: {}]   ;;  %s7172_s16 = inlined_call_operand.vmem [shape: bf16[32,64], index: 16, kind: input, shape index: {}]   ;;  %s7173_s19 = inlined_call_operand.vmem [shape: f32[1,32], index: 19, kind: input, shape index: {}]   ;;  %s7174_s18 = inlined_call_operand.vmem [shape: bf16[64,32], index: 18, kind: input, shape index: {}]   ;;  %s7175_s22 = inlined_call_operand.vmem [shape: f32[8,2,32], index: 22, kind: output, shape index: {}]  }
   0x1   :  { %7193 = sst [smem:[#allocation8_spill]] %s7153_s0  ;;  %5037 = vrcp.f32 %v5123_v12  ;;  %v128_v19 = vunpack.c.l.s4 %v5124_v18  ;;  %v132_v21 = vunpack.c.l.s4 %v5125_v20  ;;  %v5126_v22 = vmov 1414812756   ;;  %s5128_s28 = smov 96  }
   0x2   :  { %7194 = sst [smem:[#allocation9_spill]] %s7156_s7  ;;  %v136_v23 = vunpack.c.l.s4 %v5126_v22  ;;  %v5127_v24 = vmov 1987475062   ;;  %s5130_s30 = smov 120   ;;  %vm424_vm8 = vcmask 1047556   ;;  %vm1156_vm9 = vcmask 64512  }
   0x3   :  { %7195 = sst [smem:[#allocation10_spill]] %s7157_s6  ;;  %v140_v25 = vunpack.c.l.s4 %v5127_v24  ;;  %v5305_v27 = vunpack.c.0.s8 %v128_v19  ;;  %v5307_v28 = vunpack.c.0.s8 %v132_v21  ;;  %vm1416_vm11 = vcmask 1043456   ;;  %s5135_s20 = smov 24  }
   0x4   :  { %7196 = sst [smem:[#allocation11_spill]] %s7158_s4  ;;  %v5309_v29 = vunpack.c.0.s8 %v136_v23  ;;  %s5136_s24 = smov 16   ;;  %vm1816_vm12 = vcmask 130048   ;;  %vm1819_vm13 = vcmask 195584  }
   0x5   :  { %7197 = sst [smem:[#allocation12_spill]] %s7159_s5  ;;  %7200 = vst [vmem:[#allocation3_spill] sm:$0xff] %v5305_v27  ;;  %v5311_v30 = vunpack.c.0.s8 %v140_v25  ;;  %s5137_s5 = smov 8  }
   0x6   :  { %s7198_s29 = sld [smem:[#allocation8_spill]]  ;;  %7201 = vst [vmem:[#allocation4_spill] sm:$0xff] %v5307_v28 }
   0x7   :  { %v5038_v13 = vpop.eup %5037  ;;  %7202 = vst [vmem:[#allocation5_spill] sm:$0xff] %v5309_v29  ;;  %s7204_s6 = sld [smem:[#allocation10_spill]] }
   0x8   :  { %v117_v14 = vmul.f32 32.0, %v5038_v13  ;;  %vm121_vm1 = vweird.f32 %v5038_v13  ;;  %7203 = vst [vmem:[#allocation6_spill] sm:$0xff] %v5311_v30  ;;  %s7205_s23 = sld [smem:[#allocation11_spill]] }
   0x9   :  { %s7206_s26 = sld [smem:[#allocation12_spill]] }
   0xa   :  { %v118_v15 = vsub.f32 1.0, %v117_v14  ;;  %s7207_s7 = sld [smem:[#allocation9_spill]] }
   0xc   :  { %v5256_v0 = vld [vmem:[%s7198_s29] sm:$0x3]  ;;  %v5261_v1 = vld [vmem:[%s7198_s29 + $0x2] sm:$0x3]  ;;  %v5266_v2 = vld [vmem:[%s7198_s29 + $0x4] sm:$0x3]  ;;  %v119_v16 = vmul.f32 %v5038_v13, %v118_v15 }
   0xd   :  { %v5271_v3 = vld [vmem:[%s7198_s29 + $0x6] sm:$0x3]  ;;  %90 = vst [vmem:[#allocation1] ss:$4 sm:$0xff] %v5256_v0  ;;  %v5278_v4 = vld [vmem:[%s7198_s29 + $0x8] sm:$0x3] }
   0xe   :  { %92 = vst [vmem:[#allocation1 + $0x1] ss:$4 sm:$0xff] %v5261_v1  ;;  %v5284_v5 = vld [vmem:[%s7198_s29 + $0xa] sm:$0x3]  ;;  %v5290_v6 = vld [vmem:[%s7198_s29 + $0xc] sm:$0x3]  ;;  %v120_v17 = vadd.f32 %v5038_v13, %v119_v16 }
   0xf   :  { %94 = vst [vmem:[#allocation1 + $0x2] ss:$4 sm:$0xff] %v5266_v2  ;;  %v5295_v7 = vld [vmem:[%s7198_s29 + $0xe] sm:$0x3]  ;;  %v80_v16 = vld [vmem:[%s7205_s23] sm:$0x7] }
  0x10   :  { %96 = vst [vmem:[#allocation1 + $0x3] ss:$4 sm:$0xff] %v5271_v3  ;;  %v5303_v26 = vsel %vm121_vm1, %v5038_v13, %v120_v17  ;;  %v4830_v14 = vld [vmem:[%s7204_s6 + $0x8] sm:$0xff]  ;;  %v4829_v18 = vld [vmem:[%s7204_s6] sm:$0xff]  ;;  %v290_v21 = vperm.slane %v80_v16, 0  ;;  %s5129_s29 = smov 104  }
  0x11   :  { %98 = vst [vmem:[#allocation1 + $0x20] ss:$4 sm:$0xff] %v5278_v4  ;;  %379 = vmatpush.bf16.msra.mxu0 %v4830_v14  ;;  %v81_v20 = vld [vmem:[%s7206_s26] sm:$0x7]  ;;  %s5131_s6 = smov 112  }
  0x12   :  { %100 = vst [vmem:[#allocation1 + $0x21] ss:$4 sm:$0xff] %v5284_v5  ;;  %v306_v24 = vperm.slane %v81_v20, 0 }
  0x13   :  { %102 = vst [vmem:[#allocation1 + $0x22] ss:$4 sm:$0xff] %v5290_v6 }
  0x14   :  { %104 = vst [vmem:[#allocation1 + $0x23] ss:$4 sm:$0xff] %v5295_v7 }
  0x15   :  { %7199 = vst [vmem:[#allocation2_spill] sm:$0xff] %v5303_v26  ;;  %380 = vmatpush.bf16.msra.mxu0 %v4829_v18 }
  0x17   :  { %v105_v8 = vld.sshfl [vmem:[#allocation1] sm:$0xff pattern:$0x73625140] }
  0x18   :  { %v110_v9 = vsel %vm109_vm0, %v105_v8, 0.0 }
  0x19   :  { %111 = vadd.xlane.f32.xlu0 %v110_v9 }
  0x1b   :  { %v106_v10 = vld.sshfl [vmem:[#allocation1 + $0x20] sm:$0xff pattern:$0x73625140] }
  0x1c   :  { %v113_v11 = vsel %vm109_vm0, %v106_v10, 0.0 }
  0x21   :  { %114 = vadd.xlane.f32.xlu0 %v113_v11 }
  0x8c   :  { %v112_v31 = vpop.xlane.xlu0 %111 }
  0x8d   :  { %v123_v32 = vmul.f32 %v5303_v26, %v112_v31 }
  0x8f   :  { %v130_v33 = vperm.slane %v123_v32, %v5305_v27  ;;  %v134_v34 = vperm.slane %v123_v32, %v5307_v28  ;;  %v138_v35 = vperm.slane %v123_v32, %v5309_v29  ;;  %v142_v36 = vperm.slane %v123_v32, %v5311_v30 }
  0x90   :  { %v292_v32 = vrot.slane %v290_v21, 2 }
  0x91   :  { %v5319_v37 = vsub.f32 %v5256_v0, %v130_v33  ;;  %v5322_v38 = vsub.f32 %v5261_v1, %v134_v34  ;;  %v5325_v39 = vsub.f32 %v5266_v2, %v138_v35  ;;  %v5328_v40 = vsub.f32 %v5271_v3, %v142_v36 }
  0x92   :  { %v293_v33 = vrot.slane %v290_v21, 4  ;;  %v294_v34 = vrot.slane %v290_v21, 6 }
  0x93   :  { %v175_v41 = vmul.f32 %v5319_v37, %v5319_v37  ;;  %v176_v42 = vmul.f32 %v5322_v38, %v5322_v38  ;;  %v177_v43 = vmul.f32 %v5325_v39, %v5325_v39  ;;  %v178_v44 = vmul.f32 %v5328_v40, %v5328_v40 }
  0x94   :  { %v115_v45 = vpop.xlane.xlu0 %114 }
  0x95   :  { %191 = vst [vmem:[#allocation1] ss:$4 sm:$0xff] %v175_v41  ;;  %v124_v46 = vmul.f32 %v5303_v26, %v115_v45  ;;  %v308_v45 = vrot.slane %v306_v24, 2 }
  0x96   :  { %193 = vst [vmem:[#allocation1 + $0x1] ss:$4 sm:$0xff] %v176_v42 }
  0x97   :  { %195 = vst [vmem:[#allocation1 + $0x2] ss:$4 sm:$0xff] %v177_v43  ;;  %v146_v47 = vperm.slane %v124_v46, %v5305_v27  ;;  %v150_v48 = vperm.slane %v124_v46, %v5307_v28  ;;  %v154_v49 = vperm.slane %v124_v46, %v5309_v29  ;;  %v158_v50 = vperm.slane %v124_v46, %v5311_v30 }
  0x98   :  { %197 = vst [vmem:[#allocation1 + $0x3] ss:$4 sm:$0xff] %v178_v44  ;;  %v309_v46 = vrot.slane %v306_v24, 4 }
  0x99   :  { %v5344_v51 = vsub.f32 %v5278_v4, %v146_v47  ;;  %v5347_v52 = vsub.f32 %v5284_v5, %v150_v48  ;;  %v5350_v53 = vsub.f32 %v5290_v6, %v154_v49  ;;  %v5353_v54 = vsub.f32 %v5295_v7, %v158_v50 }
  0x9b   :  { %v179_v55 = vmul.f32 %v5344_v51, %v5344_v51  ;;  %v180_v56 = vmul.f32 %v5347_v52, %v5347_v52  ;;  %v181_v57 = vmul.f32 %v5350_v53, %v5350_v53  ;;  %v182_v58 = vmul.f32 %v5353_v54, %v5353_v54 }
  0x9d   :  { %199 = vst [vmem:[#allocation1 + $0x20] ss:$4 sm:$0xff] %v179_v55 }
  0x9e   :  { %201 = vst [vmem:[#allocation1 + $0x21] ss:$4 sm:$0xff] %v180_v56  ;;  %v310_v56 = vrot.slane %v306_v24, 6 }
  0x9f   :  { %v206_v59 = vld.sshfl [vmem:[#allocation1] sm:$0xff pattern:$0x73625140]  ;;  %203 = vst [vmem:[#allocation1 + $0x22] ss:$4 sm:$0xff] %v181_v57 }
  0xa0   :  { %205 = vst [vmem:[#allocation1 + $0x23] ss:$4 sm:$0xff] %v182_v58  ;;  %v210_v60 = vsel %vm109_vm0, %v206_v59, 0.0 }
  0xa1   :  { %211 = vadd.xlane.f32.xlu1 %v210_v60 }
  0xa7   :  { %v207_v61 = vld.sshfl [vmem:[#allocation1 + $0x20] sm:$0xff pattern:$0x73625140] }
  0xa8   :  { %v213_v62 = vsel %vm109_vm0, %v207_v61, 0.0 }
  0xa9   :  { %214 = vadd.xlane.f32.xlu1 %v213_v62 }
 0x114   :  { %v212_v63 = vpop.xlane.xlu1 %211 }
 0x115   :  { %v216_v8 = vmul.f32 %v212_v63, %v5303_v26 }
 0x117   :  { %v218_v9 = vadd.f32 1e-06, %v216_v8 }
 0x119   :  { %5039 = vrsqrt.f32 %v218_v9  ;;  %vm226_vm3 = vweird.f32 %v218_v9 }
 0x11c   :  { %v215_v10 = vpop.xlane.xlu1 %214 }
 0x11d   :  { %v217_v11 = vmul.f32 %v215_v10, %v5303_v26 }
 0x11f   :  { %v5040_v12 = vpop.eup %5039  ;;  %v219_v13 = vadd.f32 1e-06, %v217_v11 }
 0x120   :  { %v221_v15 = vmul.f32 %v5040_v12, %v218_v9  ;;  %vm227_vm2 = vweird.f32 %v5040_v12 }
 0x121   :  { %5041 = vrsqrt.f32 %v219_v13  ;;  %vm228_vm4 = vmor %vm226_vm3, %vm227_vm2  ;;  %vm236_vm6 = vweird.f32 %v219_v13 }
 0x122   :  { %v222_v17 = vmul.f32 %v5040_v12, %v221_v15 }
 0x124   :  { %v223_v19 = vmul.f32 0.5, %v222_v17 }
 0x126   :  { %v224_v22 = vsub.f32 1.5, %v223_v19 }
 0x127   :  { %v5042_v23 = vpop.eup %5041 }
 0x128   :  { %v225_v25 = vmul.f32 %v5040_v12, %v224_v22  ;;  %v231_v31 = vmul.f32 %v5042_v23, %v219_v13  ;;  %vm237_vm5 = vweird.f32 %v5042_v23 }
 0x129   :  { %vm238_vm7 = vmor %vm236_vm6, %vm237_vm5 }
 0x12a   :  { %v229_v35 = vsel %vm228_vm4, %v5040_v12, %v225_v25  ;;  %v232_v36 = vmul.f32 %v5042_v23, %v231_v31 }
 0x12b   :  { %v245_v41 = vperm.slane %v229_v35, %v5305_v27  ;;  %v249_v42 = vperm.slane %v229_v35, %v5307_v28  ;;  %v253_v43 = vperm.slane %v229_v35, %v5309_v29  ;;  %v257_v44 = vperm.slane %v229_v35, %v5311_v30 }
 0x12c   :  { %v233_v47 = vmul.f32 0.5, %v232_v36 }
 0x12d   :  { %v282_v48 = vmul.f32 %v245_v41, %v5319_v37  ;;  %v283_v49 = vmul.f32 %v249_v42, %v5322_v38  ;;  %v284_v50 = vmul.f32 %v253_v43, %v5325_v39  ;;  %v285_v55 = vmul.f32 %v257_v44, %v5328_v40 }
 0x12e   :  { %v234_v57 = vsub.f32 1.5, %v233_v47  ;;  %v5132_v44 = vmov 1983009808  }
 0x12f   :  { %v298_v58 = vmul.f32 %v290_v21, %v282_v48  ;;  %v299_v59 = vmul.f32 %v292_v32, %v283_v49  ;;  %v300_v60 = vmul.f32 %v293_v33, %v284_v50  ;;  %v301_v61 = vmul.f32 %v294_v34, %v285_v55 }
 0x130   :  { %v235_v62 = vmul.f32 %v5042_v23, %v234_v57  ;;  %v5133_v57 = vmov 1934713408  }
 0x131   :  { %v314_v63 = vadd.f32 %v306_v24, %v298_v58  ;;  %v315_v8 = vadd.f32 %v308_v45, %v299_v59  ;;  %v316_v9 = vadd.f32 %v309_v46, %v300_v60  ;;  %v317_v37 = vadd.f32 %v310_v56, %v301_v61 }
 0x132   :  { %v239_v10 = vsel %vm238_vm7, %v5042_v23, %v235_v62  ;;  %v453_v58 = vunpack.c.l.s4 %v5133_v57 }
 0x133   :  { %330 = vst [vmem:[#allocation1] ss:$4 sm:$0xff] %v314_v63  ;;  %v261_v38 = vperm.slane %v239_v10, %v5305_v27  ;;  %v265_v39 = vperm.slane %v239_v10, %v5307_v28  ;;  %v269_v40 = vperm.slane %v239_v10, %v5309_v29  ;;  %v273_v11 = vperm.slane %v239_v10, %v5311_v30 }
 0x134   :  { %332 = vst [vmem:[#allocation1 + $0x1] ss:$4 sm:$0xff] %v315_v8  ;;  %v5431_v8 = vunpack.c.0.s8 %v453_v58 }
 0x135   :  { %334 = vst [vmem:[#allocation1 + $0x2] ss:$4 sm:$0xff] %v316_v9  ;;  %v286_v12 = vmul.f32 %v261_v38, %v5344_v51  ;;  %v287_v13 = vmul.f32 %v265_v39, %v5347_v52  ;;  %v288_v14 = vmul.f32 %v269_v40, %v5350_v53  ;;  %v289_v15 = vmul.f32 %v273_v11, %v5353_v54  ;;  %v5030_v54 = vld [vmem:[%s7207_s7] ss:$0 sm:$0xff] }
 0x136   :  { %336 = vst [vmem:[#allocation1 + $0x3] ss:$4 sm:$0xff] %v317_v37 }
 0x137   :  { %v302_v16 = vmul.f32 %v290_v21, %v286_v12  ;;  %v303_v17 = vmul.f32 %v292_v32, %v287_v13  ;;  %v304_v18 = vmul.f32 %v293_v33, %v288_v14  ;;  %v305_v19 = vmul.f32 %v294_v34, %v289_v15 }
 0x139   :  { %v318_v20 = vadd.f32 %v306_v24, %v302_v16  ;;  %v319_v22 = vadd.f32 %v308_v45, %v303_v17  ;;  %v320_v23 = vadd.f32 %v309_v46, %v304_v18  ;;  %v321_v25 = vadd.f32 %v310_v56, %v305_v19 }
 0x13a   :  { %v429_v45 = vunpack.c.l.s4 %v5132_v44 }
 0x13b   :  { %338 = vst [vmem:[#allocation1 + $0x20] ss:$4 sm:$0xff] %v318_v20 }
 0x13c   :  { %340 = vst [vmem:[#allocation1 + $0x21] ss:$4 sm:$0xff] %v319_v22  ;;  %v5421_v48 = vunpack.c.0.s8 %v429_v45 }
 0x13d   :  { %342 = vst [vmem:[#allocation1 + $0x22] ss:$4 sm:$0xff] %v320_v23  ;;  %v345_v51 = vld.sshfl [vmem:[#allocation1] sm:$0xff pattern:$0x73625140] }
 0x13e   :  { %344 = vst [vmem:[#allocation1 + $0x23] ss:$4 sm:$0xff] %v321_v25 }
 0x145   :  { %v346_v31 = vld.sshfl [vmem:[#allocation1 + $0x20] sm:$0xff pattern:$0x73625140] }
 0x146   :  { %v349_v52 = vpack.c.bf16 %v346_v31, %v345_v51 }
 0x148   :  { %4733 = vmatmul.msk.bf16.vlgmr.msra.gmra.mxu0 %vm109_vm0, %v349_v52 }
 0x1c5   :  { %v382_v53 = vpop.f32.mrf.mxu0 }
 0x1c6   :  { %v383_v32 = vadd.f32 %v5030_v54, %v382_v53 }
 0x1c8   :  { %v426_v47 = vrot.slane %v383_v32, 4 }
 0x1cd   :  { %v384_v21 = vpop.f32.mrf.mxu0 }
 0x1ce   :  { %v385_v24 = vadd.f32 %v5030_v54, %v384_v21 }
 0x1d0   :  { %v5399_v33 = vpack.i.bf16 %v385_v24, %v383_v32  ;;  %v482_v46 = vrot.slane %v385_v24, 4 }
 0x1d2   :  { %4876 = vrot.lane.b32.xlu1 %v5399_v33, %s5128_s28  ;;  %4871 = vrot.lane.b32.xlu0 %v5399_v33, %s5129_s29 }
 0x1d3   :  { %4861 = vrot.lane.b32.xlu2 %v5399_v33, %s5130_s30 }
 0x1db   :  { %4866 = vrot.lane.b32.xlu2 %v5399_v33, %s5131_s6 }
 0x22d   :  { %v5409_v34 = vpop.permute.xlu2 %4861 }
 0x22e   :  { %v4864_v35 = vunpack.i.h.bf16 %v5409_v34  ;;  %v4863_v36 = vunpack.i.l.bf16 %v5409_v34  ;;  %4881 = vrot.lane.b32.xlu2 %v5409_v34, %s5128_s28 }
 0x230   :  { %v494_v10 = vrot.slane %v4864_v35, 4  ;;  %v438_v38 = vrot.slane %v4863_v36, 4 }
 0x235   :  { %v5415_v41 = vpop.permute.xlu2 %4866 }
 0x236   :  { %v4869_v42 = vunpack.i.h.bf16 %v5415_v41  ;;  %v4868_v43 = vunpack.i.l.bf16 %v5415_v41  ;;  %4886 = vrot.lane.b32.xlu2 %v5415_v41, %s5128_s28 }
 0x238   :  { %v480_v49 = vrot.slane %v4869_v42, 4  ;;  %v423_v50 = vrot.slane %v4868_v43, 4  ;;  %v483_v55 = vsel %vm424_vm8, %v4869_v42, %v482_v46  ;;  %v427_v56 = vsel %vm424_vm8, %v4868_v43, %v426_v47 }
 0x239   :  { %v491_v60 = vperm.slane %v483_v55, %v5421_v48  ;;  %v435_v62 = vperm.slane %v427_v56, %v5421_v48 }
 0x23a   :  { %v481_v59 = vsel %vm424_vm8, %v480_v49, %v385_v24  ;;  %v425_v61 = vsel %vm424_vm8, %v423_v50, %v383_v32 }
 0x23b   :  { %v487_v39 = vperm.slane %v481_v59, %v5421_v48  ;;  %v431_v40 = vperm.slane %v425_v61, %v5421_v48  ;;  %v518_v11 = vrot.slane %v491_v60, 4  ;;  %v462_v12 = vrot.slane %v435_v62, 4 }
 0x23d   :  { %v506_v22 = vrot.slane %v487_v39, 4  ;;  %v450_v23 = vrot.slane %v431_v40, 4 }
 0x244   :  { %v5429_v63 = vpop.permute.xlu0 %4871 }
 0x245   :  { %v4874_v9 = vunpack.i.h.bf16 %v5429_v63  ;;  %v4873_v37 = vunpack.i.l.bf16 %v5429_v63  ;;  %4891 = vrot.lane.b32.xlu2 %v5429_v63, %s5128_s28 }
 0x247   :  { %v492_v13 = vrot.slane %v4874_v9, 4  ;;  %v436_v14 = vrot.slane %v4873_v37, 4  ;;  %v439_v15 = vsel %vm424_vm8, %v4873_v37, %v438_v38  ;;  %v495_v16 = vsel %vm424_vm8, %v4874_v9, %v494_v10 }
 0x248   :  { %v447_v18 = vperm.slane %v439_v15, %v5421_v48  ;;  %v503_v20 = vperm.slane %v495_v16, %v5421_v48 }
 0x249   :  { %v437_v17 = vsel %vm424_vm8, %v436_v14, %v4863_v36  ;;  %v493_v19 = vsel %vm424_vm8, %v492_v13, %v4864_v35 }
 0x24a   :  { %v443_v25 = vperm.slane %v437_v17, %v5421_v48  ;;  %v499_v51 = vperm.slane %v493_v19, %v5421_v48  ;;  %v460_v31 = vrot.slane %v447_v18, 4  ;;  %v463_v52 = vsel %vm424_vm8, %v447_v18, %v462_v12 }
 0x24b   :  { %v516_v53 = vrot.slane %v503_v20, 4  ;;  %v519_v54 = vsel %vm424_vm8, %v503_v20, %v518_v11  ;;  %v471_v24 = vperm.slane %v463_v52, %v5431_v8 }
 0x24c   :  { %v448_v21 = vrot.slane %v443_v25, 4  ;;  %v451_v32 = vsel %vm424_vm8, %v443_v25, %v450_v23  ;;  %v504_v35 = vrot.slane %v499_v51, 4  ;;  %v461_v42 = vsel %vm424_vm8, %v460_v31, %v435_v62 }
 0x24d   :  { %v459_v36 = vperm.slane %v451_v32, %v5431_v8  ;;  %v507_v43 = vsel %vm424_vm8, %v499_v51, %v506_v22  ;;  %v517_v44 = vsel %vm424_vm8, %v516_v53, %v491_v60  ;;  %v467_v45 = vperm.slane %v461_v42, %v5431_v8 }
 0x24e   :  { %v478_v46 = vrot.slane %v471_v24, 4  ;;  %v505_v47 = vsel %vm424_vm8, %v504_v35, %v487_v39  ;;  %v515_v49 = vperm.slane %v507_v43, %v5431_v8  ;;  %v523_v55 = vperm.slane %v517_v44, %v5431_v8 }
 0x24f   :  { %v474_v50 = vrot.slane %v459_v36, 4  ;;  %v527_v56 = vperm.slane %v519_v54, %v5431_v8  ;;  %v449_v57 = vsel %vm424_vm8, %v448_v21, %v431_v40  ;;  %v476_v58 = vrot.slane %v467_v45, 4 }
 0x250   :  { %v479_v59 = vsel %vm424_vm8, 0.0, %v478_v46  ;;  %v530_v61 = vrot.slane %v515_v49, 4  ;;  %v455_v60 = vperm.slane %v449_v57, %v5431_v8  ;;  %v532_v62 = vrot.slane %v523_v55, 4 }
 0x251   :  { %v534_v9 = vrot.slane %v527_v56, 4  ;;  %v594_v37 = vrot.slane %v479_v59, 4  ;;  %v511_v10 = vperm.slane %v505_v47, %v5431_v8  ;;  %v477_v38 = vsel %vm424_vm8, 0.0, %v476_v58 }
 0x252   :  { %v531_v39 = vsel %vm424_vm8, 0.0, %v530_v61  ;;  %v472_v11 = vrot.slane %v455_v60, 4  ;;  %v536_v12 = vsel %vm424_vm8, %v476_v58, %v455_v60  ;;  %v533_v40 = vsel %vm424_vm8, 0.0, %v532_v62 }
 0x253   :  { %v535_v13 = vsel %vm424_vm8, 0.0, %v534_v9  ;;  %v588_v14 = vrot.slane %v477_v38, 4  ;;  %v528_v15 = vrot.slane %v511_v10, 4  ;;  %v600_v16 = vrot.slane %v533_v40, 4 }
 0x254   :  { %v606_v17 = vrot.slane %v535_v13, 4  ;;  %v540_v18 = vperm.slane %v536_v12, %v5421_v48  ;;  %v541_v19 = vsel %vm424_vm8, %v478_v46, %v459_v36  ;;  %v546_v22 = vsel %vm424_vm8, %v532_v62, %v511_v10 }
 0x255   :  { %v545_v20 = vperm.slane %v541_v19, %v5421_v48  ;;  %v551_v23 = vsel %vm424_vm8, %v534_v9, %v515_v49  ;;  %v473_v25 = vsel %vm424_vm8, 0.0, %v472_v11  ;;  %v550_v51 = vperm.slane %v546_v22, %v5421_v48 }
 0x256   :  { %v555_v31 = vperm.slane %v551_v23, %v5421_v48  ;;  %v558_v52 = vrot.slane %v540_v18, 4  ;;  %v475_v53 = vsel %vm424_vm8, 0.0, %v474_v50  ;;  %v529_v21 = vsel %vm424_vm8, 0.0, %v528_v15 }
 0x257   :  { %v556_v54 = vrot.slane %v545_v20, 4  ;;  %v589_v32 = vsel %vm424_vm8, %v588_v14, %v473_v25  ;;  %v595_v24 = vsel %vm424_vm8, %v594_v37, %v475_v53  ;;  %v570_v42 = vrot.slane %v550_v51, 4 }
 0x258   :  { %v568_v35 = vrot.slane %v555_v31, 4  ;;  %v559_v36 = vsel %vm424_vm8, %v545_v20, %v558_v52  ;;  %v593_v43 = vperm.slane %v589_v32, %v5421_v48  ;;  %v599_v46 = vperm.slane %v595_v24, %v5421_v48 }
 0x259   :  { %v557_v44 = vsel %vm424_vm8, %v556_v54, %v540_v18  ;;  %v567_v45 = vperm.slane %v559_v36, %v5431_v8  ;;  %v601_v47 = vsel %vm424_vm8, %v600_v16, %v529_v21  ;;  %v571_v55 = vsel %vm424_vm8, %v555_v31, %v570_v42  ;;  %v4877_v36 = vpop.permute.xlu1 %4876 }
 0x25a   :  { %v563_v49 = vperm.slane %v557_v44, %v5431_v8  ;;  %v569_v50 = vsel %vm424_vm8, %v568_v35, %v550_v51  ;;  %v605_v56 = vperm.slane %v601_v47, %v5421_v48  ;;  %v579_v58 = vperm.slane %v571_v55, %v5431_v8 }
 0x25b   :  { %v575_v57 = vperm.slane %v569_v50, %v5431_v8  ;;  %v586_v59 = vrot.slane %v567_v45, 4  ;;  %v607_v61 = vsel %vm424_vm8, %v606_v17, %v531_v39  ;;  %v612_v9 = vrot.slane %v599_v46, 4 }
 0x25c   :  { %v582_v60 = vrot.slane %v563_v49, 4  ;;  %v611_v62 = vperm.slane %v607_v61, %v5421_v48  ;;  %v614_v37 = vrot.slane %v593_v43, 4  ;;  %v584_v38 = vrot.slane %v579_v58, 4 }
 0x25d   :  { %v580_v10 = vrot.slane %v575_v57, 4  ;;  %v5496_v11 = vsel %vm424_vm8, %v579_v58, %v586_v59  ;;  %v626_v12 = vrot.slane %v605_v56, 4  ;;  %v613_v13 = vsel %vm424_vm8, %v612_v9, %v593_v43 }
 0x25e   :  { %v5499_v40 = vsel %vm424_vm8, %v575_v57, %v582_v60  ;;  %v624_v14 = vrot.slane %v611_v62, 4  ;;  %v5506_v39 = vsel %vm424_vm8, %v584_v38, %v567_v45  ;;  %v619_v16 = vperm.slane %v613_v13, %v5431_v8 }
 0x25f   :  { %v5503_v15 = vsel %vm424_vm8, %v580_v10, %v563_v49  ;;  %v615_v18 = vsel %vm424_vm8, %v599_v46, %v614_v37  ;;  %v627_v23 = vsel %vm424_vm8, %v611_v62, %v626_v12  ;;  %v4878_v43 = vunpack.i.l.bf16 %v4877_v36 }
 0x260   :  { %v625_v17 = vsel %vm424_vm8, %v624_v14, %v605_v56  ;;  %v638_v20 = vrot.slane %v619_v16, 4  ;;  %v623_v22 = vperm.slane %v615_v18, %v5431_v8  ;;  %v635_v25 = vperm.slane %v627_v23, %v5431_v8 }
 0x261   :  { %v631_v19 = vperm.slane %v625_v17, %v5431_v8  ;;  %v4879_v45 = vunpack.i.h.bf16 %v4877_v36  ;;  %v678_v47 = vrot.slane %v4878_v43, 4 }
 0x262   :  { %v642_v52 = vrot.slane %v623_v22, 4  ;;  %v640_v53 = vrot.slane %v635_v25, 4 }
 0x263   :  { %v636_v51 = vrot.slane %v631_v19, 4  ;;  %v5516_v31 = vsel %vm424_vm8, %v631_v19, %v638_v20  ;;  %v734_v50 = vrot.slane %v4879_v45, 4 }
 0x264   :  { %v5522_v21 = vsel %vm424_vm8, %v635_v25, %v642_v52  ;;  %v5525_v32 = vsel %vm424_vm8, %v640_v53, %v623_v22 }
 0x265   :  { %v5519_v54 = vsel %vm424_vm8, %v636_v51, %v619_v16 }
 0x288   :  { %v4882_v24 = vpop.permute.xlu2 %4881 }
 0x289   :  { %v4884_v55 = vunpack.i.h.bf16 %v4882_v24  ;;  %v4883_v56 = vunpack.i.l.bf16 %v4882_v24 }
 0x28b   :  { %v746_v60 = vrot.slane %v4884_v55, 4  ;;  %v690_v62 = vrot.slane %v4883_v56, 4 }
 0x290   :  { %v4887_v35 = vpop.permute.xlu2 %4886 }
 0x291   :  { %v4888_v42 = vunpack.i.l.bf16 %v4887_v35  ;;  %v4889_v44 = vunpack.i.h.bf16 %v4887_v35 }
 0x293   :  { %v676_v46 = vrot.slane %v4888_v42, 4  ;;  %v732_v49 = vrot.slane %v4889_v44, 4  ;;  %v679_v57 = vsel %vm424_vm8, %v4888_v42, %v678_v47  ;;  %v735_v58 = vsel %vm424_vm8, %v4889_v44, %v734_v50 }
 0x294   :  { %v687_v9 = vperm.slane %v679_v57, %v5421_v48  ;;  %v743_v10 = vperm.slane %v735_v58, %v5421_v48 }
 0x295   :  { %v677_v59 = vsel %vm424_vm8, %v676_v46, %v4878_v43  ;;  %v733_v61 = vsel %vm424_vm8, %v732_v49, %v4879_v45 }
 0x296   :  { %v683_v38 = vperm.slane %v677_v59, %v5421_v48  ;;  %v739_v14 = vperm.slane %v733_v61, %v5421_v48  ;;  %v714_v20 = vrot.slane %v687_v9, 4  ;;  %v770_v25 = vrot.slane %v743_v10, 4 }
 0x298   :  { %v702_v51 = vrot.slane %v683_v38, 4  ;;  %v758_v43 = vrot.slane %v739_v14, 4 }
 0x29f   :  { %v4892_v37 = vpop.permute.xlu2 %4891 }
 0x2a0   :  { %v4894_v12 = vunpack.i.h.bf16 %v4892_v37  ;;  %v4893_v13 = vunpack.i.l.bf16 %v4892_v37 }
 0x2a2   :  { %v744_v16 = vrot.slane %v4894_v12, 4  ;;  %v688_v17 = vrot.slane %v4893_v13, 4  ;;  %v691_v18 = vsel %vm424_vm8, %v4893_v13, %v690_v62  ;;  %v747_v19 = vsel %vm424_vm8, %v4894_v12, %v746_v60 }
 0x2a3   :  { %v699_v22 = vperm.slane %v691_v18, %v5421_v48  ;;  %v755_v23 = vperm.slane %v747_v19, %v5421_v48 }
 0x2a4   :  { %v689_v52 = vsel %vm424_vm8, %v688_v17, %v4883_v56  ;;  %v745_v53 = vsel %vm424_vm8, %v744_v16, %v4884_v55 }
 0x2a5   :  { %v695_v24 = vperm.slane %v689_v52, %v5421_v48  ;;  %v712_v35 = vrot.slane %v699_v22, 4  ;;  %v715_v36 = vsel %vm424_vm8, %v699_v22, %v714_v20  ;;  %v751_v42 = vperm.slane %v745_v53, %v5421_v48 }
 0x2a6   :  { %v723_v44 = vperm.slane %v715_v36, %v5431_v8  ;;  %v768_v45 = vrot.slane %v755_v23, 4  ;;  %v771_v46 = vsel %vm424_vm8, %v755_v23, %v770_v25 }
 0x2a7   :  { %v700_v47 = vrot.slane %v695_v24, 4  ;;  %v703_v49 = vsel %vm424_vm8, %v695_v24, %v702_v51  ;;  %v713_v50 = vsel %vm424_vm8, %v712_v35, %v687_v9  ;;  %v756_v56 = vrot.slane %v751_v42, 4 }
 0x2a8   :  { %v711_v55 = vperm.slane %v703_v49, %v5431_v8  ;;  %v719_v57 = vperm.slane %v713_v50, %v5431_v8  ;;  %v730_v58 = vrot.slane %v723_v44, 4  ;;  %v759_v59 = vsel %vm424_vm8, %v751_v42, %v758_v43 }
 0x2a9   :  { %v701_v61 = vsel %vm424_vm8, %v700_v47, %v683_v38  ;;  %v757_v60 = vsel %vm424_vm8, %v756_v56, %v739_v14  ;;  %v767_v62 = vperm.slane %v759_v59, %v5431_v8  ;;  %v769_v37 = vsel %vm424_vm8, %v768_v45, %v743_v10 }
 0x2aa   :  { %v707_v12 = vperm.slane %v701_v61, %v5431_v8  ;;  %v726_v13 = vrot.slane %v711_v55, 4  ;;  %v728_v9 = vrot.slane %v719_v57, 4  ;;  %v731_v16 = vsel %vm424_vm8, 0.0, %v730_v58 }
 0x2ab   :  { %v763_v17 = vperm.slane %v757_v60, %v5431_v8  ;;  %v775_v18 = vperm.slane %v769_v37, %v5431_v8  ;;  %v779_v19 = vperm.slane %v771_v46, %v5431_v8  ;;  %v782_v20 = vrot.slane %v767_v62, 4 }
 0x2ac   :  { %v729_v38 = vsel %vm424_vm8, 0.0, %v728_v9  ;;  %v846_v14 = vrot.slane %v731_v16, 4  ;;  %v788_v22 = vsel %vm424_vm8, %v728_v9, %v707_v12  ;;  %v793_v10 = vsel %vm424_vm8, %v730_v58, %v711_v55 }
 0x2ad   :  { %v780_v23 = vrot.slane %v763_v17, 4  ;;  %v783_v25 = vsel %vm424_vm8, 0.0, %v782_v20  ;;  %v784_v51 = vrot.slane %v775_v18, 4  ;;  %v786_v52 = vrot.slane %v779_v19, 4 }
 0x2ae   :  { %v840_v53 = vrot.slane %v729_v38, 4  ;;  %v792_v24 = vperm.slane %v788_v22, %v5421_v48  ;;  %v797_v35 = vperm.slane %v793_v10, %v5421_v48  ;;  %v724_v36 = vrot.slane %v707_v12, 4 }
 0x2af   :  { %v785_v42 = vsel %vm424_vm8, 0.0, %v784_v51  ;;  %v787_v43 = vsel %vm424_vm8, 0.0, %v786_v52  ;;  %v798_v44 = vsel %vm424_vm8, %v784_v51, %v763_v17  ;;  %v803_v45 = vsel %vm424_vm8, %v786_v52, %v767_v62 }
 0x2b0   :  { %v852_v46 = vrot.slane %v785_v42, 4  ;;  %v858_v47 = vrot.slane %v787_v43, 4  ;;  %v802_v49 = vperm.slane %v798_v44, %v5421_v48  ;;  %v807_v50 = vperm.slane %v803_v45, %v5421_v48 }
 0x2b1   :  { %v808_v56 = vrot.slane %v797_v35, 4  ;;  %v810_v55 = vrot.slane %v792_v24, 4  ;;  %v725_v57 = vsel %vm424_vm8, 0.0, %v724_v36  ;;  %v727_v58 = vsel %vm424_vm8, 0.0, %v726_v13 }
 0x2b2   :  { %v820_v59 = vrot.slane %v807_v50, 4  ;;  %v822_v61 = vrot.slane %v802_v49, 4  ;;  %v781_v60 = vsel %vm424_vm8, 0.0, %v780_v23  ;;  %v841_v37 = vsel %vm424_vm8, %v840_v53, %v725_v57 }
 0x2b3   :  { %v809_v62 = vsel %vm424_vm8, %v808_v56, %v792_v24  ;;  %v811_v12 = vsel %vm424_vm8, %v797_v35, %v810_v55  ;;  %v845_v9 = vperm.slane %v841_v37, %v5421_v48  ;;  %v847_v16 = vsel %vm424_vm8, %v846_v14, %v727_v58 }
 0x2b4   :  { %v815_v17 = vperm.slane %v809_v62, %v5431_v8  ;;  %v821_v18 = vsel %vm424_vm8, %v820_v59, %v802_v49  ;;  %v819_v13 = vperm.slane %v811_v12, %v5431_v8  ;;  %v823_v19 = vsel %vm424_vm8, %v807_v50, %v822_v61 }
 0x2b5   :  { %v827_v20 = vperm.slane %v821_v18, %v5431_v8  ;;  %v831_v38 = vperm.slane %v823_v19, %v5431_v8  ;;  %v851_v22 = vperm.slane %v847_v16, %v5421_v48  ;;  %v853_v10 = vsel %vm424_vm8, %v852_v46, %v781_v60 }
 0x2b6   :  { %v834_v23 = vrot.slane %v815_v17, 4  ;;  %v838_v51 = vrot.slane %v819_v13, 4  ;;  %v857_v14 = vperm.slane %v853_v10, %v5421_v48  ;;  %v859_v52 = vsel %vm424_vm8, %v858_v47, %v783_v25 }
 0x2b7   :  { %v832_v53 = vrot.slane %v827_v20, 4  ;;  %v836_v24 = vrot.slane %v831_v38, 4  ;;  %v863_v35 = vperm.slane %v859_v52, %v5421_v48  ;;  %v864_v36 = vrot.slane %v851_v22, 4 }
 0x2b8   :  { %v835_v42 = vsel %vm424_vm8, %v827_v20, %v834_v23  ;;  %v839_v43 = vsel %vm424_vm8, %v831_v38, %v838_v51  ;;  %v866_v44 = vrot.slane %v845_v9, 4  ;;  %v878_v45 = vrot.slane %v857_v14, 4 }
 0x2b9   :  { %v833_v49 = vsel %vm424_vm8, %v832_v53, %v815_v17  ;;  %v897_v46 = vpack.c.bf16 %v835_v42, %v835_v42  ;;  %v837_v50 = vsel %vm424_vm8, %v836_v24, %v819_v13  ;;  %v899_v56 = vpack.c.bf16 %v839_v43, %v839_v43 }
 0x2ba   :  { %v896_v55 = vpack.c.bf16 %v833_v49, %v833_v49  ;;  %v898_v57 = vpack.c.bf16 %v837_v50, %v837_v50  ;;  %v865_v25 = vsel %vm424_vm8, %v864_v36, %v845_v9  ;;  %v876_v47 = vrot.slane %v863_v35, 4 }
 0x2bb   :  { %v1180_v58 = vsel %vm1156_vm9, %v897_v46, 0  ;;  %v1218_v59 = vsel %vm1156_vm9, %v899_v56, 0  ;;  %v871_v61 = vperm.slane %v865_v25, %v5431_v8  ;;  %v867_v60 = vsel %vm424_vm8, %v851_v22, %v866_v44 }
 0x2bc   :  { %v1161_v37 = vsel %vm1156_vm9, %v896_v55, 0  ;;  %1189 = vmatpush.bf16.xpose.msra.mxu2 %v1180_v58  ;;  %v1199_v62 = vsel %vm1156_vm9, %v898_v57, 0  ;;  %1227 = vmatpush.bf16.xpose.msrb.mxu0 %v1218_v59  ;;  %v877_v12 = vsel %vm424_vm8, %v876_v47, %v857_v14  ;;  %v875_v16 = vperm.slane %v867_v60, %v5431_v8 }
 0x2bd   :  { %1170 = vmatpush.bf16.xpose.msra.mxu1 %v1161_v37  ;;  %1208 = vmatpush.bf16.xpose.msra.mxu3 %v1199_v62  ;;  %v883_v9 = vperm.slane %v877_v12, %v5431_v8  ;;  %v890_v17 = vrot.slane %v871_v61, 4  ;;  %v879_v18 = vsel %vm424_vm8, %v863_v35, %v878_v45  ;;  %v647_v52 = vpack.c.bf16 %v5496_v11, %v5496_v11 }
 0x2be   :  { %v887_v13 = vperm.slane %v879_v18, %v5431_v8  ;;  %v894_v19 = vrot.slane %v875_v16, 4  ;;  %v644_v36 = vpack.c.bf16 %v5503_v15, %v5503_v15  ;;  %v645_v44 = vpack.c.bf16 %v5499_v40, %v5499_v40 }
 0x2bf   :  { %v888_v20 = vrot.slane %v883_v9, 4  ;;  %v891_v38 = vsel %vm424_vm8, %v883_v9, %v890_v17  ;;  %v646_v15 = vpack.c.bf16 %v5506_v39, %v5506_v39  ;;  %v651_v40 = vpack.c.bf16 %v5522_v21, %v5522_v21 }
 0x2c0   :  { %v901_v22 = vpack.c.bf16 %v891_v38, %v891_v38  ;;  %v892_v10 = vrot.slane %v887_v13, 4  ;;  %v895_v23 = vsel %vm424_vm8, %v887_v13, %v894_v19  ;;  %v648_v49 = vpack.c.bf16 %v5519_v54, %v5519_v54  ;;  %v392_v54 = vld [vmem:[%s7160_s2] sm:$0x3]  ;;  %s5134_s2 = smov 64  }
 0x2c1   :  { %v889_v51 = vsel %vm424_vm8, %v888_v20, %v871_v61  ;;  %v903_v14 = vpack.c.bf16 %v895_v23, %v895_v23  ;;  %v649_v46 = vpack.c.bf16 %v5516_v31, %v5516_v31  ;;  %v650_v39 = vpack.c.bf16 %v5525_v32, %v5525_v32 }
 0x2c2   :  { %v900_v53 = vpack.c.bf16 %v889_v51, %v889_v51  ;;  %v1256_v24 = vsel %vm1156_vm9, %v901_v22, 0  ;;  %v893_v35 = vsel %vm424_vm8, %v892_v10, %v875_v16  ;;  %v387_v50 = vlaneseq }
 0x2c3   :  { %v902_v42 = vpack.c.bf16 %v893_v35, %v893_v35  ;;  %v1294_v43 = vsel %vm1156_vm9, %v903_v14, 0  ;;  %4737 = vmatmul.msk.bf16.vlgmr.msrb.gmra.mxu0 %vm1156_vm9, %v647_v52  ;;  %4735 = vmatmul.msk.bf16.vlgmr.msra.gmra.mxu2 %vm1156_vm9, %v645_v44  ;;  %v397_v55 = vperm.slane %v392_v54, 0  ;;  %v394_v61 = vrot.slane %v392_v54, 1 }
 0x2c4   :  { %1265 = vmatpush.bf16.xpose.msrb.mxu2 %v1256_v24  ;;  %v1237_v45 = vsel %vm1156_vm9, %v900_v53, 0  ;;  %1303 = vmatpush.bf16.xpose.msra.mxu0 %v1294_v43  ;;  %v388_v56 = vshrl.u32 %v387_v50, 7  ;;  %v390_v21 = vand.u32 127, %v387_v50 }
 0x2c5   :  { %4734 = vmatmul.msk.bf16.vlgmr.msra.gmra.mxu1 %vm1156_vm9, %v644_v36  ;;  %v1275_v11 = vsel %vm1156_vm9, %v902_v42, 0  ;;  %4736 = vmatmul.msk.bf16.vlgmr.msra.gmra.mxu3 %vm1156_vm9, %v646_v15  ;;  %v398_v17 = vperm.slane %v394_v61, 0 }
 0x2c6   :  { %1246 = vmatpush.bf16.xpose.msrb.mxu1 %v1237_v45  ;;  %1284 = vmatpush.bf16.xpose.msrb.mxu3 %v1275_v11  ;;  %vm391_vm10 = vcmp.gt.s32.totalorder %v390_v21, %v388_v56 }
 0x2c7   :  { %v401_v31 = vsel %vm391_vm10, -1e+18, %v397_v55  ;;  %v402_v19 = vsel %vm391_vm10, -1e+18, %v398_v17 }
 0x2d3   :  { %4741 = vmatmul.msk.bf16.vlgmr.msra.gmra.mxu0 %vm1156_vm9, %v651_v40  ;;  %4739 = vmatmul.msk.bf16.vlgmr.msrb.gmra.mxu2 %vm1156_vm9, %v649_v46 }
 0x2d5   :  { %4738 = vmatmul.msk.bf16.vlgmr.msrb.gmra.mxu1 %vm1156_vm9, %v648_v49  ;;  %4740 = vmatmul.msk.bf16.vlgmr.msrb.gmra.mxu3 %vm1156_vm9, %v650_v39 }
 0x340   :  { %v1229_v57 = vpop.f32.mrf.mxu0 }
 0x341   :  { %v1312_v47 = vadd.f32 %v1229_v57, %v401_v31 }
 0x342   :  { %v1172_v25 = vpop.f32.mrf.mxu1 }
 0x343   :  { %v1309_v58 = vadd.f32 %v1172_v25, %v401_v31  ;;  %v1326_v59 = vsel %vm1156_vm9, %v1312_v47, -inf }
 0x344   :  { %1327 = vmax.xlane.f32.xlu1 %v1326_v59 }
 0x345   :  { %v1317_v32 = vsel %vm1156_vm9, %v1309_v58, -inf }
 0x346   :  { %1318 = vmax.xlane.f32.xlu0 %v1317_v32  ;;  %v1191_v60 = vpop.f32.mrf.mxu2 }
 0x347   :  { %v1310_v62 = vadd.f32 %v1191_v60, %v401_v31 }
 0x348   :  { %v1231_v37 = vpop.f32.mrf.mxu0  ;;  %v1210_v16 = vpop.f32.mrf.mxu3 }
 0x349   :  { %v1311_v9 = vadd.f32 %v1210_v16, %v401_v31  ;;  %v1320_v18 = vsel %vm1156_vm9, %v1310_v62, -inf }
 0x34a   :  { %v1174_v12 = vpop.f32.mrf.mxu1 }
 0x34b   :  { %v1323_v13 = vsel %vm1156_vm9, %v1311_v9, -inf }
 0x34c   :  { %1324 = vmax.xlane.f32.xlu2 %v1323_v13 }
 0x34e   :  { %1321 = vmax.xlane.f32.xlu0 %v1320_v18  ;;  %v1193_v20 = vpop.f32.mrf.mxu2 }
 0x350   :  { %v1305_v38 = vpop.f32.mrf.mxu0  ;;  %v1212_v23 = vpop.f32.mrf.mxu3 }
 0x351   :  { %v1316_v10 = vadd.f32 %v1305_v38, %v402_v19 }
 0x352   :  { %v1248_v22 = vpop.f32.mrf.mxu1 }
 0x353   :  { %v5648_v51 = vadd.f32 %v1248_v22, %v402_v19  ;;  %v1338_v14 = vsel %vm1156_vm9, %v1316_v10, -inf }
 0x355   :  { %v1329_v52 = vsel %vm1156_vm9, %v5648_v51, -inf }
 0x356   :  { %1339 = vmax.xlane.f32.xlu0 %v1338_v14  ;;  %1330 = vmax.xlane.f32.xlu2 %v1329_v52  ;;  %v1267_v53 = vpop.f32.mrf.mxu2 }
 0x357   :  { %v1314_v35 = vadd.f32 %v1267_v53, %v402_v19 }
 0x358   :  { %v1307_v24 = vpop.f32.mrf.mxu0  ;;  %v1286_v42 = vpop.f32.mrf.mxu3 }
 0x359   :  { %v1315_v43 = vadd.f32 %v1286_v42, %v402_v19  ;;  %v1332_v45 = vsel %vm1156_vm9, %v1314_v35, -inf }
 0x35a   :  { %v1250_v36 = vpop.f32.mrf.mxu1 }
 0x35b   :  { %v1335_v44 = vsel %vm1156_vm9, %v1315_v43, -inf }
 0x35c   :  { %1336 = vmax.xlane.f32.xlu1 %v1335_v44 }
 0x35e   :  { %1333 = vmax.xlane.f32.xlu2 %v1332_v45  ;;  %v1269_v11 = vpop.f32.mrf.mxu2 }
 0x360   :  { %v1288_v15 = vpop.f32.mrf.mxu3 }
 0x36a   :  { %4901 = vrot.lane.b32.xlu0 %v5409_v34, %s5134_s2 }
 0x372   :  { %4911 = vrot.lane.b32.xlu0 %v5429_v63, %s5134_s2 }
 0x375   :  { %4896 = vrot.lane.b32.xlu1 %v5399_v33, %s5134_s2 }
 0x376   :  { %4906 = vrot.lane.b32.xlu2 %v5415_v41, %s5134_s2 }
 0x3b7   :  { %v1328_v40 = vpop.xlane.xlu1 %1327 }
 0x3b8   :  { %v1344_v46 = vsub.f32 %v1312_v47, %v1328_v40 }
 0x3b9   :  { %v1319_v49 = vpop.xlane.xlu0 %1318 }
 0x3ba   :  { %v1355_v39 = vmul.f32 1.442695, %v1344_v46  ;;  %v1341_v31 = vsub.f32 %v1309_v58, %v1319_v49 }
 0x3bc   :  { %5043 = vpow2.f32 %v1355_v39  ;;  %v1349_v33 = vmul.f32 1.442695, %v1341_v31 }
 0x3bf   :  { %v1325_v56 = vpop.xlane.xlu2 %1324 }
 0x3c0   :  { %v1343_v55 = vsub.f32 %v1311_v9, %v1325_v56 }
 0x3c1   :  { %v1322_v50 = vpop.xlane.xlu0 %1321 }
 0x3c2   :  { %v1342_v21 = vsub.f32 %v1310_v62, %v1322_v50  ;;  %v5659_v54 = vpop.eup %5043  ;;  %v1353_v63 = vmul.f32 1.442695, %v1343_v55 }
 0x3c3   :  { %v1374_v34 = vsel %vm1156_vm9, %v5659_v54, 0.0 }
 0x3c4   :  { %v1351_v57 = vmul.f32 1.442695, %v1342_v21  ;;  %1375 = vadd.xlane.f32.xlu0 %v1374_v34 }
 0x3c6   :  { %5045 = vpow2.f32 %v1351_v57 }
 0x3c7   :  { %5047 = vpow2.f32 %v1353_v63 }
 0x3c8   :  { %5049 = vpow2.f32 %v1349_v33 }
 0x3c9   :  { %v1340_v41 = vpop.xlane.xlu0 %1339  ;;  %v1331_v25 = vpop.xlane.xlu2 %1330 }
 0x3ca   :  { %v1348_v59 = vsub.f32 %v1316_v10, %v1340_v41  ;;  %v1345_v17 = vsub.f32 %v5648_v51, %v1331_v25 }
 0x3cc   :  { %v5663_v47 = vpop.eup %5045  ;;  %v1363_v60 = vmul.f32 1.442695, %v1348_v59  ;;  %v1357_v20 = vmul.f32 1.442695, %v1345_v17 }
 0x3cd   :  { %v5665_v32 = vpop.eup %5047  ;;  %v1368_v58 = vsel %vm1156_vm9, %v5663_v47, 0.0 }
 0x3ce   :  { %1369 = vadd.xlane.f32.xlu1 %v1368_v58  ;;  %v1371_v61 = vsel %vm1156_vm9, %v5665_v32, 0.0  ;;  %v5671_v37 = vpop.eup %5049  ;;  %5051 = vpow2.f32 %v1363_v60 }
 0x3cf   :  { %1372 = vadd.xlane.f32.xlu2 %v1371_v61  ;;  %v1337_v62 = vpop.xlane.xlu1 %1336  ;;  %v1365_v19 = vsel %vm1156_vm9, %v5671_v37, 0.0 }
 0x3d0   :  { %v1347_v16 = vsub.f32 %v1315_v43, %v1337_v62 }
 0x3d1   :  { %v1334_v12 = vpop.xlane.xlu2 %1333 }
 0x3d2   :  { %v1346_v9 = vsub.f32 %v1314_v35, %v1334_v12  ;;  %v1361_v18 = vmul.f32 1.442695, %v1347_v16 }
 0x3d4   :  { %v1359_v13 = vmul.f32 1.442695, %v1346_v9  ;;  %5053 = vpow2.f32 %v1361_v18  ;;  %v5676_v38 = vpop.eup %5051 }
 0x3d5   :  { %v1386_v23 = vsel %vm1156_vm9, %v5676_v38, 0.0 }
 0x3d6   :  { %1366 = vadd.xlane.f32.xlu1 %v1365_v19  ;;  %5055 = vpow2.f32 %v1359_v13 }
 0x3d7   :  { %5057 = vpow2.f32 %v1357_v20 }
 0x3d9   :  { %v4907_v35 = vpop.permute.xlu2 %4906 }
 0x3da   :  { %v5678_v10 = vpop.eup %5053  ;;  %v4909_v45 = vunpack.i.h.bf16 %v4907_v35  ;;  %v4908_v40 = vunpack.i.l.bf16 %v4907_v35 }
 0x3db   :  { %v1383_v51 = vsel %vm1156_vm9, %v5678_v10, 0.0 }
 0x3dc   :  { %v4902_v22 = vpop.permute.xlu0 %4901  ;;  %v5682_v14 = vpop.eup %5055  ;;  %1384 = vadd.xlane.f32.xlu0 %v1383_v51  ;;  %v984_v31 = vrot.slane %v4909_v45, 4  ;;  %v928_v33 = vrot.slane %v4908_v40, 4 }
 0x3dd   :  { %v1380_v52 = vsel %vm1156_vm9, %v5682_v14, 0.0  ;;  %v4903_v53 = vunpack.i.l.bf16 %v4902_v22  ;;  %v5688_v24 = vpop.eup %5057  ;;  %v4904_v36 = vunpack.i.h.bf16 %v4902_v22 }
 0x3de   :  { %1387 = vadd.xlane.f32.xlu1 %v1386_v23  ;;  %1381 = vadd.xlane.f32.xlu2 %v1380_v52  ;;  %v1377_v15 = vsel %vm1156_vm9, %v5688_v24, 0.0 }
 0x3df   :  { %v942_v11 = vrot.slane %v4903_v53, 4  ;;  %v998_v49 = vrot.slane %v4904_v36, 4 }
 0x3e4   :  { %v4912_v42 = vpop.permute.xlu0 %4911 }
 0x3e5   :  { %v4914_v43 = vunpack.i.h.bf16 %v4912_v42  ;;  %v4913_v44 = vunpack.i.l.bf16 %v4912_v42 }
 0x3e6   :  { %1378 = vadd.xlane.f32.xlu2 %v1377_v15 }
 0x3e7   :  { %v996_v46 = vrot.slane %v4914_v43, 4  ;;  %v940_v39 = vrot.slane %v4913_v44, 4  ;;  %v943_v50 = vsel %vm424_vm8, %v4913_v44, %v942_v11  ;;  %v999_v55 = vsel %vm424_vm8, %v4914_v43, %v998_v49  ;;  %v4897_v63 = vpop.permute.xlu1 %4896 }
 0x3e8   :  { %v951_v41 = vperm.slane %v943_v50, %v5421_v48  ;;  %v4899_v25 = vunpack.i.h.bf16 %v4897_v63  ;;  %v4898_v59 = vunpack.i.l.bf16 %v4897_v63  ;;  %v1007_v61 = vperm.slane %v999_v55, %v5421_v48 }
 0x3e9   :  { %v941_v56 = vsel %vm424_vm8, %v940_v39, %v4903_v53  ;;  %v997_v21 = vsel %vm424_vm8, %v996_v46, %v4904_v36 }
 0x3ea   :  { %v947_v57 = vperm.slane %v941_v56, %v5421_v48  ;;  %v1003_v34 = vperm.slane %v997_v21, %v5421_v48  ;;  %v986_v62 = vrot.slane %v4899_v25, 4  ;;  %v929_v12 = vsel %vm424_vm8, %v928_v33, %v4898_v59 }
 0x3eb   :  { %v930_v16 = vrot.slane %v4898_v59, 4  ;;  %v985_v9 = vsel %vm424_vm8, %v984_v31, %v4899_v25  ;;  %v935_v17 = vperm.slane %v929_v12, %v5421_v48  ;;  %v964_v13 = vrot.slane %v951_v41, 4 }
 0x3ec   :  { %v952_v58 = vrot.slane %v947_v57, 4  ;;  %v1008_v60 = vrot.slane %v1003_v34, 4  ;;  %v991_v18 = vperm.slane %v985_v9, %v5421_v48  ;;  %v987_v20 = vsel %vm424_vm8, %v4909_v45, %v986_v62 }
 0x3ed   :  { %v931_v19 = vsel %vm424_vm8, %v4908_v40, %v930_v16  ;;  %v954_v51 = vrot.slane %v935_v17, 4  ;;  %v995_v52 = vperm.slane %v987_v20, %v5421_v48  ;;  %v1020_v53 = vrot.slane %v1007_v61, 4 }
 0x3ee   :  { %v939_v22 = vperm.slane %v931_v19, %v5421_v48  ;;  %v953_v23 = vsel %vm424_vm8, %v952_v58, %v935_v17  ;;  %v1009_v36 = vsel %vm424_vm8, %v1008_v60, %v991_v18  ;;  %v1010_v42 = vrot.slane %v991_v18, 4 }
 0x3ef   :  { %v959_v35 = vperm.slane %v953_v23, %v5431_v8  ;;  %v955_v43 = vsel %vm424_vm8, %v947_v57, %v954_v51  ;;  %v1015_v45 = vperm.slane %v1009_v36, %v5431_v8  ;;  %v1021_v56 = vsel %vm424_vm8, %v1020_v53, %v995_v52 }
 0x3f0   :  { %v965_v44 = vsel %vm424_vm8, %v964_v13, %v939_v22  ;;  %v966_v11 = vrot.slane %v939_v22, 4  ;;  %v963_v15 = vperm.slane %v955_v43, %v5431_v8  ;;  %v1011_v46 = vsel %vm424_vm8, %v1003_v34, %v1010_v42 }
 0x3f1   :  { %v971_v40 = vperm.slane %v965_v44, %v5431_v8  ;;  %v976_v49 = vrot.slane %v959_v35, 4  ;;  %v1019_v50 = vperm.slane %v1011_v46, %v5431_v8  ;;  %v1022_v21 = vrot.slane %v995_v52, 4 }
 0x3f2   :  { %v967_v39 = vsel %vm424_vm8, %v951_v41, %v966_v11  ;;  %v978_v57 = vrot.slane %v963_v15, 4  ;;  %v1027_v25 = vperm.slane %v1021_v56, %v5431_v8  ;;  %v1032_v59 = vrot.slane %v1015_v45, 4 }
 0x3f3   :  { %v975_v55 = vperm.slane %v967_v39, %v5431_v8  ;;  %v977_v31 = vsel %vm424_vm8, 0.0, %v976_v49  ;;  %v980_v63 = vrot.slane %v971_v40, 4  ;;  %v1023_v33 = vsel %vm424_vm8, %v1007_v61, %v1022_v21 }
 0x3f4   :  { %v1034_v58 = vrot.slane %v1019_v50, 4  ;;  %v979_v34 = vsel %vm424_vm8, 0.0, %v978_v57  ;;  %v1031_v62 = vperm.slane %v1023_v33, %v5431_v8  ;;  %v1033_v12 = vsel %vm424_vm8, 0.0, %v1032_v59 }
 0x3f5   :  { %v981_v41 = vsel %vm424_vm8, 0.0, %v980_v63  ;;  %v982_v60 = vrot.slane %v975_v55, 4  ;;  %v1036_v9 = vrot.slane %v1027_v25, 4  ;;  %v1040_v17 = vsel %vm424_vm8, %v980_v63, %v959_v35 }
 0x3f6   :  { %v1035_v16 = vsel %vm424_vm8, 0.0, %v1034_v58  ;;  %v1038_v18 = vrot.slane %v1031_v62, 4  ;;  %v1092_v13 = vrot.slane %v981_v41, 4  ;;  %v1044_v19 = vperm.slane %v1040_v17, %v5421_v48 }
 0x3f7   :  { %v983_v61 = vsel %vm424_vm8, 0.0, %v982_v60  ;;  %v1037_v20 = vsel %vm424_vm8, 0.0, %v1036_v9  ;;  %v1050_v22 = vsel %vm424_vm8, %v1036_v9, %v1015_v45  ;;  %v1045_v51 = vsel %vm424_vm8, %v982_v60, %v963_v15 }
 0x3f8   :  { %v1098_v23 = vrot.slane %v983_v61, 4  ;;  %v1039_v52 = vsel %vm424_vm8, 0.0, %v1038_v18  ;;  %v1054_v53 = vperm.slane %v1050_v22, %v5421_v48  ;;  %v1104_v36 = vrot.slane %v1037_v20, 4 }
 0x3f9   :  { %v1049_v35 = vperm.slane %v1045_v51, %v5421_v48  ;;  %v1110_v42 = vrot.slane %v1039_v52, 4  ;;  %v1055_v43 = vsel %vm424_vm8, %v1038_v18, %v1019_v50  ;;  %v1062_v44 = vrot.slane %v1044_v19, 4 }
 0x3fa   :  { %v1093_v11 = vsel %vm424_vm8, %v1092_v13, %v977_v31  ;;  %v1105_v40 = vsel %vm424_vm8, %v1104_v36, %v1033_v12  ;;  %v1059_v45 = vperm.slane %v1055_v43, %v5421_v48  ;;  %v1074_v49 = vrot.slane %v1054_v53, 4 }
 0x3fb   :  { %v1060_v15 = vrot.slane %v1049_v35, 4  ;;  %v1063_v46 = vsel %vm424_vm8, %v1049_v35, %v1062_v44  ;;  %v1097_v39 = vperm.slane %v1093_v11, %v5421_v48  ;;  %v1099_v56 = vsel %vm424_vm8, %v1098_v23, %v979_v34 }
 0x3fc   :  { %v1109_v21 = vperm.slane %v1105_v40, %v5421_v48  ;;  %v1071_v55 = vperm.slane %v1063_v46, %v5431_v8  ;;  %v1075_v50 = vsel %vm424_vm8, %v1059_v45, %v1074_v49  ;;  %v1072_v57 = vrot.slane %v1059_v45, 4 }
 0x3fd   :  { %v1061_v31 = vsel %vm424_vm8, %v1060_v15, %v1044_v19  ;;  %v1083_v63 = vperm.slane %v1075_v50, %v5431_v8  ;;  %v1103_v25 = vperm.slane %v1099_v56, %v5421_v48  ;;  %v1111_v59 = vsel %vm424_vm8, %v1110_v42, %v1035_v16 }
 0x3fe   :  { %v1067_v33 = vperm.slane %v1061_v31, %v5431_v8  ;;  %v1090_v58 = vrot.slane %v1071_v55, 4  ;;  %v1073_v34 = vsel %vm424_vm8, %v1072_v57, %v1054_v53  ;;  %v1115_v41 = vperm.slane %v1111_v59, %v5421_v48 }
 0x3ff   :  { %v1118_v60 = vrot.slane %v1097_v39, 4  ;;  %v1088_v62 = vrot.slane %v1083_v63, 4  ;;  %v1079_v12 = vperm.slane %v1073_v34, %v5431_v8  ;;  %v1130_v17 = vrot.slane %v1109_v21, 4 }
 0x400   :  { %v1086_v9 = vrot.slane %v1067_v33, 4  ;;  %v1091_v61 = vsel %vm424_vm8, %v1083_v63, %v1090_v58  ;;  %v1116_v13 = vrot.slane %v1103_v25, 4  ;;  %v1128_v19 = vrot.slane %v1115_v41, 4 }
 0x401   :  { %v1119_v18 = vsel %vm424_vm8, %v1103_v25, %v1118_v60  ;;  %v1089_v20 = vsel %vm424_vm8, %v1088_v62, %v1071_v55  ;;  %v1151_v16 = vpack.c.bf16 %v1091_v61, %v1091_v61  ;;  %v1084_v22 = vrot.slane %v1079_v12, 4 }
 0x402   :  { %v1087_v23 = vsel %vm424_vm8, %v1079_v12, %v1086_v9  ;;  %v1150_v51 = vpack.c.bf16 %v1089_v20, %v1089_v20  ;;  %v1127_v53 = vperm.slane %v1119_v18, %v5431_v8  ;;  %v1131_v36 = vsel %vm424_vm8, %v1115_v41, %v1130_v17 }
 0x403   :  { %v1149_v52 = vpack.c.bf16 %v1087_v23, %v1087_v23  ;;  %v1475_v35 = vsel %vm1416_vm11, %v1151_v16, 0  ;;  %v1085_v42 = vsel %vm424_vm8, %v1084_v22, %v1067_v33  ;;  %v1139_v43 = vperm.slane %v1131_v36, %v5431_v8 }
 0x404   :  { %v1117_v44 = vsel %vm424_vm8, %v1116_v13, %v1097_v39  ;;  %v1456_v11 = vsel %vm1416_vm11, %v1150_v51, 0  ;;  %1484 = vmatpush.bf16.msrb.mxu0 %v1475_v35  ;;  %v1148_v40 = vpack.c.bf16 %v1085_v42, %v1085_v42  ;;  %v1146_v49 = vrot.slane %v1127_v53, 4 }
 0x405   :  { %v1437_v45 = vsel %vm1416_vm11, %v1149_v52, 0  ;;  %1465 = vmatpush.bf16.msra.mxu3 %v1456_v11  ;;  %v1144_v15 = vrot.slane %v1139_v43, 4  ;;  %v1123_v46 = vperm.slane %v1117_v44, %v5431_v8  ;;  %v1129_v56 = vsel %vm424_vm8, %v1128_v19, %v1109_v21 }
 0x406   :  { %1446 = vmatpush.bf16.msra.mxu2 %v1437_v45  ;;  %v1418_v55 = vsel %vm1416_vm11, %v1148_v40, 0  ;;  %v1147_v50 = vsel %vm424_vm8, %v1139_v43, %v1146_v49  ;;  %v1135_v39 = vperm.slane %v1129_v56, %v5431_v8 }
 0x407   :  { %1427 = vmatpush.bf16.msra.mxu1 %v1418_v55  ;;  %v1145_v31 = vsel %vm424_vm8, %v1144_v15, %v1127_v53  ;;  %v1155_v57 = vpack.c.bf16 %v1147_v50, %v1147_v50  ;;  %v1142_v63 = vrot.slane %v1123_v46, 4 }
 0x408   :  { %v1154_v33 = vpack.c.bf16 %v1145_v31, %v1145_v31  ;;  %v1140_v25 = vrot.slane %v1135_v39, 4 }
 0x409   :  { %v1551_v59 = vsel %vm1416_vm11, %v1155_v57, 0  ;;  %v1143_v58 = vsel %vm424_vm8, %v1135_v39, %v1142_v63 }
 0x40a   :  { %v1532_v34 = vsel %vm1416_vm11, %v1154_v33, 0  ;;  %1560 = vmatpush.bf16.msra.mxu0 %v1551_v59  ;;  %v1141_v21 = vsel %vm424_vm8, %v1140_v25, %v1123_v46  ;;  %v1153_v41 = vpack.c.bf16 %v1143_v58, %v1143_v58 }
 0x40b   :  { %1541 = vmatpush.bf16.msrb.mxu3 %v1532_v34  ;;  %v1152_v60 = vpack.c.bf16 %v1141_v21, %v1141_v21 }
 0x40c   :  { %v1513_v62 = vsel %vm1416_vm11, %v1153_v41, 0 }
 0x40d   :  { %v1494_v12 = vsel %vm1416_vm11, %v1152_v60, 0  ;;  %1522 = vmatpush.bf16.msrb.mxu2 %v1513_v62  ;;  %vm4712_vm11 = vcmask 254976  }
 0x40e   :  { %1503 = vmatpush.bf16.msrb.mxu1 %v1494_v12 }
 0x437   :  { %v1376_v9 = vpop.xlane.xlu0 %1375 }
 0x438   :  { %5059 = vrcp.f32 %v1376_v9 }
 0x43e   :  { %v5060_v17 = vpop.eup %5059 }
 0x43f   :  { %v1400_v61 = vmul.f32 %v5060_v17, %v5659_v54 }
 0x441   :  { %v1370_v18 = vpop.xlane.xlu1 %1369  ;;  %v1408_v13 = vpack.c.bf16 %v1400_v61, %v1400_v61 }
 0x442   :  { %5061 = vrcp.f32 %v1370_v18  ;;  %v1373_v19 = vpop.xlane.xlu2 %1372 }
 0x443   :  { %5063 = vrcp.f32 %v1373_v19  ;;  %4745 = vmatmul.msk.bf16.vlgmr.msrb.gmra.mxu0 %vm1156_vm9, %v1408_v13 }
 0x448   :  { %v5062_v20 = vpop.eup %5061 }
 0x449   :  { %v5064_v16 = vpop.eup %5063  ;;  %v1398_v22 = vmul.f32 %v5062_v20, %v5663_v47  ;;  %v1367_v23 = vpop.xlane.xlu1 %1366 }
 0x44a   :  { %v1399_v51 = vmul.f32 %v5064_v16, %v5665_v32  ;;  %5065 = vrcp.f32 %v1367_v23 }
 0x44b   :  { %v1406_v52 = vpack.c.bf16 %v1398_v22, %v1398_v22 }
 0x44c   :  { %v1407_v53 = vpack.c.bf16 %v1399_v51, %v1399_v51 }
 0x44d   :  { %4743 = vmatmul.msk.bf16.vlgmr.msra.gmra.mxu2 %vm1156_vm9, %v1406_v52 }
 0x44e   :  { %4744 = vmatmul.msk.bf16.vlgmr.msra.gmra.mxu3 %vm1156_vm9, %v1407_v53 }
 0x44f   :  { %v1385_v42 = vpop.xlane.xlu0 %1384 }
 0x450   :  { %v5066_v54 = vpop.eup %5065 }
 0x451   :  { %v1397_v36 = vmul.f32 %v5066_v54, %v5671_v37  ;;  %v1388_v35 = vpop.xlane.xlu1 %1387  ;;  %v1382_v44 = vpop.xlane.xlu2 %1381 }
 0x452   :  { %5067 = vrcp.f32 %v1388_v35 }
 0x453   :  { %v1405_v43 = vpack.c.bf16 %v1397_v36, %v1397_v36  ;;  %5069 = vrcp.f32 %v1385_v42 }
 0x454   :  { %5071 = vrcp.f32 %v1382_v44 }
 0x455   :  { %4742 = vmatmul.msk.bf16.vlgmr.msra.gmra.mxu1 %vm1156_vm9, %v1405_v43 }
 0x458   :  { %v5068_v47 = vpop.eup %5067 }
 0x459   :  { %v5070_v32 = vpop.eup %5069  ;;  %v1404_v11 = vmul.f32 %v5068_v47, %v5676_v38  ;;  %v1379_v37 = vpop.xlane.xlu2 %1378 }
 0x45a   :  { %v5072_v40 = vpop.eup %5071  ;;  %v1403_v45 = vmul.f32 %v5070_v32, %v5678_v10  ;;  %5073 = vrcp.f32 %v1379_v37 }
 0x45b   :  { %v1412_v49 = vpack.c.bf16 %v1404_v11, %v1404_v11  ;;  %v1402_v15 = vmul.f32 %v5072_v40, %v5682_v14 }
 0x45c   :  { %v1411_v46 = vpack.c.bf16 %v1403_v45, %v1403_v45 }
 0x45d   :  { %v1410_v56 = vpack.c.bf16 %v1402_v15, %v1402_v15  ;;  %4749 = vmatmul.msk.bf16.vlgmr.msra.gmra.mxu0 %vm1156_vm9, %v1412_v49 }
 0x45e   :  { %4748 = vmatmul.msk.bf16.vlgmr.msrb.gmra.mxu3 %vm1156_vm9, %v1411_v46 }
 0x45f   :  { %4747 = vmatmul.msk.bf16.vlgmr.msrb.gmra.mxu2 %vm1156_vm9, %v1410_v56 }
 0x460   :  { %v5074_v55 = vpop.eup %5073 }
 0x461   :  { %v1401_v50 = vmul.f32 %v5074_v55, %v5688_v24 }
 0x463   :  { %v1409_v38 = vpack.c.bf16 %v1401_v50, %v1401_v50 }
 0x465   :  { %4746 = vmatmul.msk.bf16.vlgmr.msrb.gmra.mxu1 %vm1156_vm9, %v1409_v38 }
 0x4c0   :  { %v1486_v10 = vpop.f32.mrf.mxu0 }
 0x4c1   :  { %v1578_v31 = vrot.slane %v1486_v10, 4 }
 0x4c8   :  { %v1488_v39 = vpop.f32.mrf.mxu0 }
 0x4d0   :  { %v1448_v14 = vpop.f32.mrf.mxu2 }
 0x4d1   :  { %v1579_v57 = vsel %vm424_vm8, %v1578_v31, %v1448_v14  ;;  %v1580_v63 = vrot.slane %v1448_v14, 4  ;;  %v1467_v33 = vpop.f32.mrf.mxu3 }
 0x4d2   :  { %v1585_v25 = vperm.slane %v1579_v57, %v5421_v48  ;;  %v1566_v59 = vrot.slane %v1467_v33, 4  ;;  %v1429_v58 = vpop.f32.mrf.mxu1 }
 0x4d3   :  { %v1581_v34 = vsel %vm424_vm8, %v1486_v10, %v1580_v63  ;;  %v1568_v21 = vrot.slane %v1429_v58, 4 }
 0x4d4   :  { %v1589_v24 = vperm.slane %v1581_v34, %v5421_v48  ;;  %v1590_v41 = vrot.slane %v1585_v25, 4  ;;  %v1567_v60 = vsel %vm424_vm8, %v1566_v59, %v1429_v58 }
 0x4d5   :  { %v1569_v62 = vsel %vm424_vm8, %v1467_v33, %v1568_v21  ;;  %v1573_v12 = vperm.slane %v1567_v60, %v5421_v48 }
 0x4d6   :  { %v1602_v9 = vrot.slane %v1589_v24, 4  ;;  %v1577_v17 = vperm.slane %v1569_v62, %v5421_v48 }
 0x4d7   :  { %v1591_v61 = vsel %vm424_vm8, %v1590_v41, %v1573_v12  ;;  %v1592_v18 = vrot.slane %v1573_v12, 4 }
 0x4d8   :  { %v1603_v13 = vsel %vm424_vm8, %v1602_v9, %v1577_v17  ;;  %v1604_v19 = vrot.slane %v1577_v17, 4  ;;  %v1450_v20 = vpop.f32.mrf.mxu2  ;;  %v1597_v22 = vperm.slane %v1591_v61, %v5431_v8 }
 0x4d9   :  { %v1593_v16 = vsel %vm424_vm8, %v1585_v25, %v1592_v18  ;;  %v1469_v23 = vpop.f32.mrf.mxu3  ;;  %v1609_v52 = vperm.slane %v1603_v13, %v5431_v8 }
 0x4da   :  { %v1605_v51 = vsel %vm424_vm8, %v1589_v24, %v1604_v19  ;;  %v1431_v53 = vpop.f32.mrf.mxu1  ;;  %v1562_v54 = vpop.f32.mrf.mxu0  ;;  %v1601_v36 = vperm.slane %v1593_v16, %v5431_v8  ;;  %v1614_v42 = vrot.slane %v1597_v22, 4 }
 0x4db   :  { %v1613_v35 = vperm.slane %v1605_v51, %v5431_v8  ;;  %v1618_v43 = vrot.slane %v1609_v52, 4  ;;  %v1634_v11 = vrot.slane %v1562_v54, 4 }
 0x4dc   :  { %v1616_v44 = vrot.slane %v1601_v36, 4  ;;  %v1615_v32 = vsel %vm424_vm8, 0.0, %v1614_v42 }
 0x4dd   :  { %v1620_v47 = vrot.slane %v1613_v35, 4  ;;  %v1619_v45 = vsel %vm424_vm8, 0.0, %v1618_v43  ;;  %v1678_v38 = vrot.slane %v1615_v32, 4 }
 0x4de   :  { %v1617_v55 = vsel %vm424_vm8, 0.0, %v1616_v44  ;;  %v1734_v31 = vrot.slane %v1619_v45, 4 }
 0x4df   :  { %v1621_v50 = vsel %vm424_vm8, 0.0, %v1620_v47  ;;  %v1690_v58 = vrot.slane %v1617_v55, 4  ;;  %v1679_v12 = vsel %vm424_vm8, %v1678_v38, %v1597_v22 }
 0x4e0   :  { %v1746_v34 = vrot.slane %v1621_v50, 4  ;;  %v1735_v9 = vsel %vm424_vm8, %v1734_v31, %v1609_v52  ;;  %v1683_v22 = vperm.slane %v1679_v12, %v5421_v48 }
 0x4e1   :  { %v1543_v40 = vpop.f32.mrf.mxu3  ;;  %v1691_v16 = vsel %vm424_vm8, %v1690_v58, %v1601_v36  ;;  %v1739_v52 = vperm.slane %v1735_v9, %v5421_v48 }
 0x4e2   :  { %v1524_v49 = vpop.f32.mrf.mxu2  ;;  %v1622_v15 = vrot.slane %v1543_v40, 4  ;;  %v1564_v37 = vpop.f32.mrf.mxu0  ;;  %v1747_v43 = vsel %vm424_vm8, %v1746_v34, %v1613_v35  ;;  %v1704_v55 = vrot.slane %v1683_v22, 4 }
 0x4e3   :  { %v1635_v46 = vsel %vm424_vm8, %v1634_v11, %v1524_v49  ;;  %v1636_v56 = vrot.slane %v1524_v49, 4  ;;  %v1505_v39 = vpop.f32.mrf.mxu1  ;;  %v1695_v11 = vperm.slane %v1691_v16, %v5421_v48  ;;  %v1751_v35 = vperm.slane %v1747_v43, %v5421_v48 }
 0x4e4   :  { %v1641_v10 = vperm.slane %v1635_v46, %v5421_v48  ;;  %v1623_v57 = vsel %vm424_vm8, %v1622_v15, %v1505_v39  ;;  %v1624_v63 = vrot.slane %v1505_v39, 4 }
 0x4e5   :  { %v1637_v14 = vsel %vm424_vm8, %v1562_v54, %v1636_v56  ;;  %v1629_v59 = vperm.slane %v1623_v57, %v5421_v48  ;;  %v1716_v57 = vrot.slane %v1695_v11, 4 }
 0x4e6   :  { %v1645_v33 = vperm.slane %v1637_v14, %v5421_v48  ;;  %v1646_v25 = vrot.slane %v1641_v10, 4  ;;  %v1625_v21 = vsel %vm424_vm8, %v1543_v40, %v1624_v63 }
 0x4e7   :  { %v1633_v41 = vperm.slane %v1625_v21, %v5421_v48  ;;  %v1648_v62 = vrot.slane %v1629_v59, 4  ;;  %v1772_v21 = vrot.slane %v1751_v35, 4 }
 0x4e8   :  { %v1658_v24 = vrot.slane %v1645_v33, 4  ;;  %v1647_v60 = vsel %vm424_vm8, %v1646_v25, %v1629_v59 }
 0x4e9   :  { %v1653_v17 = vperm.slane %v1647_v60, %v5431_v8  ;;  %v1545_v61 = vpop.f32.mrf.mxu3  ;;  %v1649_v18 = vsel %vm424_vm8, %v1641_v10, %v1648_v62  ;;  %v1660_v19 = vrot.slane %v1633_v41, 4  ;;  %v1760_v10 = vrot.slane %v1739_v52, 4 }
 0x4ea   :  { %v1659_v13 = vsel %vm424_vm8, %v1658_v24, %v1633_v41  ;;  %v1526_v20 = vpop.f32.mrf.mxu2  ;;  %v1657_v23 = vperm.slane %v1649_v18, %v5431_v8 }
 0x4eb   :  { %v1665_v51 = vperm.slane %v1659_v13, %v5431_v8  ;;  %v1670_v53 = vrot.slane %v1653_v17, 4  ;;  %v1661_v54 = vsel %vm424_vm8, %v1645_v33, %v1660_v19  ;;  %v1507_v42 = vpop.f32.mrf.mxu1 }
 0x4ec   :  { %v1669_v44 = vperm.slane %v1661_v54, %v5431_v8  ;;  %v1672_v32 = vrot.slane %v1657_v23, 4 }
 0x4ed   :  { %v1671_v47 = vsel %vm424_vm8, 0.0, %v1670_v53  ;;  %v1674_v36 = vrot.slane %v1665_v51, 4 }
 0x4ee   :  { %v1684_v40 = vrot.slane %v1671_v47, 4  ;;  %v1673_v45 = vsel %vm424_vm8, 0.0, %v1672_v32  ;;  %v1676_v15 = vrot.slane %v1669_v44, 4 }
 0x4ef   :  { %v1675_v49 = vsel %vm424_vm8, 0.0, %v1674_v36  ;;  %v1696_v46 = vrot.slane %v1673_v45, 4 }
 0x4f0   :  { %v1685_v37 = vsel %vm424_vm8, %v1684_v40, %v1653_v17  ;;  %v1740_v56 = vrot.slane %v1675_v49, 4  ;;  %v1677_v50 = vsel %vm424_vm8, 0.0, %v1676_v15 }
 0x4f1   :  { %v1689_v38 = vperm.slane %v1685_v37, %v5421_v48  ;;  %v1697_v39 = vsel %vm424_vm8, %v1696_v46, %v1657_v23  ;;  %v1752_v14 = vrot.slane %v1677_v50, 4 }
 0x4f2   :  { %v1741_v31 = vsel %vm424_vm8, %v1740_v56, %v1665_v51  ;;  %v1701_v33 = vperm.slane %v1697_v39, %v5421_v48  ;;  %v4831_v39 = vld [vmem:[%s7162_s8] sm:$0xff] }
 0x4f3   :  { %v1702_v63 = vrot.slane %v1689_v38, 4  ;;  %v1705_v25 = vsel %vm424_vm8, %v1689_v38, %v1704_v55  ;;  %v1745_v59 = vperm.slane %v1741_v31, %v5421_v48  ;;  %v1753_v34 = vsel %vm424_vm8, %v1752_v14, %v1669_v44 }
 0x4f4   :  { %v1713_v58 = vperm.slane %v1705_v25, %v5431_v8  ;;  %v1717_v24 = vsel %vm424_vm8, %v1701_v33, %v1716_v57  ;;  %v1757_v41 = vperm.slane %v1753_v34, %v5421_v48  ;;  %v1714_v13 = vrot.slane %v1701_v33, 4 }
 0x4f5   :  { %v1761_v60 = vsel %vm424_vm8, %v1745_v59, %v1760_v10  ;;  %v1703_v62 = vsel %vm424_vm8, %v1702_v63, %v1683_v22  ;;  %v1725_v12 = vperm.slane %v1717_v24, %v5431_v8  ;;  %v1758_v19 = vrot.slane %v1745_v59, 4  ;;  %v4832_v10 = vld [vmem:[%s7162_s8 + $0x8] sm:$0xff] }
 0x4f6   :  { %v1732_v9 = vrot.slane %v1713_v58, 4  ;;  %v1769_v17 = vperm.slane %v1761_v60, %v5431_v8  ;;  %v1709_v61 = vperm.slane %v1703_v62, %v5431_v8  ;;  %v1773_v18 = vsel %vm424_vm8, %v1757_v41, %v1772_v21  ;;  %1852 = vmatpush.bf16.msra.mxu1 %v4832_v10 }
 0x4f7   :  { %v1770_v20 = vrot.slane %v1757_v41, 4  ;;  %v1781_v16 = vperm.slane %v1773_v18, %v5431_v8  ;;  %v1730_v51 = vrot.slane %v1725_v12, 4  ;;  %v1715_v53 = vsel %vm424_vm8, %v1714_v13, %v1695_v11 }
 0x4f8   :  { %v1788_v23 = vrot.slane %v1769_v17, 4  ;;  %v1759_v22 = vsel %vm424_vm8, %v1758_v19, %v1739_v52  ;;  %v1733_v42 = vsel %vm424_vm8, %v1725_v12, %v1732_v9  ;;  %v1721_v47 = vperm.slane %v1715_v53, %v5431_v8 }
 0x4f9   :  { %v1771_v54 = vsel %vm424_vm8, %v1770_v20, %v1751_v35  ;;  %v1786_v44 = vrot.slane %v1781_v16, 4  ;;  %v1728_v36 = vrot.slane %v1709_v61, 4  ;;  %v1765_v40 = vperm.slane %v1759_v22, %v5431_v8 }
 0x4fa   :  { %v1789_v43 = vsel %vm424_vm8, %v1781_v16, %v1788_v23  ;;  %v1777_v45 = vperm.slane %v1771_v54, %v5431_v8  ;;  %v1731_v49 = vsel %vm424_vm8, %v1730_v51, %v1713_v58  ;;  %v1726_v52 = vrot.slane %v1721_v47, 4  ;;  %1853 = vmatpush.bf16.msra.mxu1 %v4831_v39 }
 0x4fb   :  { %v4925_v32 = vpack.i.bf16 %v1789_v43, %v1733_v42  ;;  %v1787_v11 = vsel %vm424_vm8, %v1786_v44, %v1769_v17  ;;  %v1784_v46 = vrot.slane %v1765_v40, 4  ;;  %v1729_v35 = vsel %vm424_vm8, %v1721_v47, %v1728_v36  ;;  %v5031_v17 = vld [vmem:[%s7161_s9] ss:$0 sm:$0xff] }
 0x4fc   :  { %v4920_v15 = vpack.i.bf16 %v1787_v11, %v1731_v49  ;;  %v1782_v37 = vrot.slane %v1777_v45, 4  ;;  %v1727_v56 = vsel %vm424_vm8, %v1726_v52, %v1709_v61 }
 0x4fd   :  { %4926 = vrot.lane.b32.xlu2 %v4925_v32, %s5135_s20  ;;  %v1785_v55 = vsel %vm424_vm8, %v1777_v45, %v1784_v46 }
 0x4fe   :  { %4921 = vrot.lane.b32.xlu1 %v4920_v15, %s5136_s24  ;;  %v1783_v50 = vsel %vm424_vm8, %v1782_v37, %v1765_v40  ;;  %v4915_v38 = vpack.i.bf16 %v1785_v55, %v1729_v35 }
 0x500   :  { %4916 = vrot.lane.b32.xlu0 %v4915_v38, %s5137_s5 }
 0x557   :  { %v4927_v14 = vpop.permute.xlu2 %4926 }
 0x558   :  { %v4929_v58 = vunpack.i.h.bf16 %v4927_v14  ;;  %v4928_v34 = vunpack.i.l.bf16 %v4927_v14 }
 0x570   :  { %v4922_v31 = vpop.permute.xlu1 %4921 }
 0x571   :  { %v4924_v57 = vunpack.i.h.bf16 %v4922_v31  ;;  %v4923_v63 = vunpack.i.l.bf16 %v4922_v31 }
 0x572   :  { %v4917_v33 = vpop.permute.xlu0 %4916 }
 0x573   :  { %v4919_v25 = vunpack.i.h.bf16 %v4917_v33  ;;  %v4918_v59 = vunpack.i.l.bf16 %v4917_v33 }
 0x575   :  { %v1815_v21 = vsel %vm1156_vm9, %v1783_v50, %v4919_v25  ;;  %v1814_v24 = vsel %vm1156_vm9, %v1727_v56, %v4918_v59 }
 0x576   :  { %v1818_v41 = vsel %vm1816_vm12, %v1815_v21, %v4924_v57  ;;  %v1817_v60 = vsel %vm1816_vm12, %v1814_v24, %v4923_v63 }
 0x577   :  { %v1821_v62 = vsel %vm1819_vm13, %v1818_v41, %v4929_v58  ;;  %v1820_v12 = vsel %vm1819_vm13, %v1817_v60, %v4928_v34 }
 0x578   :  { %v1822_v9 = vpack.c.bf16 %v1821_v62, %v1820_v12 }
 0x57a   :  { %4758 = vmatmul.msk.bf16.vlgmr.msra.gmra.mxu1 %vm109_vm0, %v1822_v9 }
 0x5f7   :  { %v1855_v61 = vpop.f32.mrf.mxu1 }
 0x5f8   :  { %v1856_v18 = vadd.f32 %v5031_v17, %v1855_v61 }
 0x5fa   :  { %v1862_v13 = vrot.slane %v1856_v18, 2  ;;  %v1863_v19 = vrot.slane %v1856_v18, 4  ;;  %v1864_v20 = vrot.slane %v1856_v18, 6  ;;  %v5896_v16 = vadd.f32 %v1856_v18, %v5256_v0 }
 0x5fc   :  { %v5899_v23 = vadd.f32 %v1862_v13, %v5261_v1  ;;  %v5902_v51 = vadd.f32 %v1863_v19, %v5266_v2  ;;  %v5905_v53 = vadd.f32 %v1864_v20, %v5271_v3  ;;  %1890 = vst [vmem:[#allocation1] ss:$4 sm:$0xff] %v5896_v16  ;;  %v4834_v20 = vld [vmem:[%s7164_s10 + $0x8] sm:$0xff] }
 0x5fd   :  { %2171 = vmatpush.bf16.msra.mxu2 %v4834_v20 }
 0x5fe   :  { %1892 = vst [vmem:[#allocation1 + $0x1] ss:$4 sm:$0xff] %v5899_v23 }
 0x5ff   :  { %1894 = vst [vmem:[#allocation1 + $0x2] ss:$4 sm:$0xff] %v5902_v51  ;;  %v1857_v22 = vpop.f32.mrf.mxu1 }
 0x600   :  { %1896 = vst [vmem:[#allocation1 + $0x3] ss:$4 sm:$0xff] %v5905_v53  ;;  %v1858_v0 = vadd.f32 %v5031_v17, %v1857_v22 }
 0x602   :  { %v1865_v54 = vrot.slane %v1858_v0, 2  ;;  %v1866_v42 = vrot.slane %v1858_v0, 4  ;;  %v1867_v1 = vrot.slane %v1858_v0, 6  ;;  %v5912_v43 = vadd.f32 %v1858_v0, %v5278_v4 }
 0x604   :  { %v5915_v2 = vadd.f32 %v1865_v54, %v5284_v5  ;;  %v5918_v3 = vadd.f32 %v1866_v42, %v5290_v6  ;;  %v5921_v44 = vadd.f32 %v1867_v1, %v5295_v7  ;;  %1898 = vst [vmem:[#allocation1 + $0x20] ss:$4 sm:$0xff] %v5912_v43  ;;  %v4833_v54 = vld [vmem:[%s7164_s10] sm:$0xff] }
 0x605   :  { %v5119_v1 = vld [vmem:[%s7205_s23] sm:$0x7]  ;;  %2172 = vmatpush.bf16.msra.mxu2 %v4833_v54 }
 0x606   :  { %7208 = vst [vmem:[#allocation7_spill] sm:$0xff] %v5921_v44 }
 0x607   :  { %1900 = vst [vmem:[#allocation1 + $0x21] ss:$4 sm:$0xff] %v5915_v2  ;;  %v1905_v47 = vld.sshfl [vmem:[#allocation1] sm:$0xff pattern:$0x73625140] }
 0x608   :  { %1902 = vst [vmem:[#allocation1 + $0x22] ss:$4 sm:$0xff] %v5918_v3  ;;  %v1909_v4 = vsel %vm109_vm0, %v1905_v47, 0.0  ;;  %v2082_v47 = vperm.slane %v5119_v1, 1 }
 0x609   :  { %1904 = vst [vmem:[#allocation1 + $0x23] ss:$4 sm:$0xff] %v5921_v44  ;;  %1910 = vadd.xlane.f32.xlu0 %v1909_v4  ;;  %v4836_v4 = vld [vmem:[%s7165_s12 + $0x8] sm:$0xff] }
 0x60a   :  { %2266 = vmatpush.bf16.msra.mxu3 %v4836_v4 }
 0x610   :  { %v1906_v5 = vld.sshfl [vmem:[#allocation1 + $0x20] sm:$0xff pattern:$0x73625140] }
 0x611   :  { %v1912_v32 = vsel %vm109_vm0, %v1906_v5, 0.0 }
 0x612   :  { %1913 = vadd.xlane.f32.xlu1 %v1912_v32 }
 0x67c   :  { %v1911_v6 = vpop.xlane.xlu0 %1910 }
 0x67d   :  { %v1915_v7 = vmul.f32 %v1911_v6, %v5303_v26  ;;  %v5120_v6 = vld [vmem:[%s7206_s26] sm:$0x7] }
 0x67f   :  { %v1922_v36 = vperm.slane %v1915_v7, %v5305_v27  ;;  %v1926_v40 = vperm.slane %v1915_v7, %v5307_v28  ;;  %v1930_v45 = vperm.slane %v1915_v7, %v5309_v29  ;;  %v1934_v49 = vperm.slane %v1915_v7, %v5311_v30 }
 0x680   :  { %v2098_v7 = vperm.slane %v5120_v6, 1 }
 0x681   :  { %v5935_v11 = vsub.f32 %v5896_v16, %v1922_v36  ;;  %v5938_v52 = vsub.f32 %v5899_v23, %v1926_v40  ;;  %v5941_v15 = vsub.f32 %v5902_v51, %v1930_v45  ;;  %v5944_v37 = vsub.f32 %v5905_v53, %v1934_v49  ;;  %v4835_v45 = vld [vmem:[%s7165_s12] sm:$0xff] }
 0x682   :  { %v2084_v49 = vrot.slane %v2082_v47, 2  ;;  %2267 = vmatpush.bf16.msra.mxu3 %v4835_v45 }
 0x683   :  { %v1967_v46 = vmul.f32 %v5935_v11, %v5935_v11  ;;  %v1968_v56 = vmul.f32 %v5938_v52, %v5938_v52  ;;  %v1969_v35 = vmul.f32 %v5941_v15, %v5941_v15  ;;  %v1970_v55 = vmul.f32 %v5944_v37, %v5944_v37 }
 0x685   :  { %v1914_v50 = vpop.xlane.xlu1 %1913  ;;  %1983 = vst [vmem:[#allocation1] ss:$4 sm:$0xff] %v1967_v46  ;;  %v2085_v46 = vrot.slane %v2082_v47, 4 }
 0x686   :  { %v1916_v38 = vmul.f32 %v1914_v50, %v5303_v26  ;;  %1985 = vst [vmem:[#allocation1 + $0x1] ss:$4 sm:$0xff] %v1968_v56  ;;  %v2086_v56 = vrot.slane %v2082_v47, 6 }
 0x687   :  { %1987 = vst [vmem:[#allocation1 + $0x2] ss:$4 sm:$0xff] %v1969_v35 }
 0x688   :  { %v1938_v10 = vperm.slane %v1916_v38, %v5305_v27  ;;  %v1942_v39 = vperm.slane %v1916_v38, %v5307_v28  ;;  %v1946_v31 = vperm.slane %v1916_v38, %v5309_v29  ;;  %v1950_v14 = vperm.slane %v1916_v38, %v5311_v30  ;;  %1989 = vst [vmem:[#allocation1 + $0x3] ss:$4 sm:$0xff] %v1970_v55 }
 0x68a   :  { %v5960_v57 = vsub.f32 %v5912_v43, %v1938_v10  ;;  %v5963_v63 = vsub.f32 %v5915_v2, %v1942_v39  ;;  %v5966_v33 = vsub.f32 %v5918_v3, %v1946_v31  ;;  %v5969_v25 = vsub.f32 %v5921_v44, %v1950_v14 }
 0x68b   :  { %v2100_v31 = vrot.slane %v2098_v7, 2  ;;  %v2101_v14 = vrot.slane %v2098_v7, 4 }
 0x68c   :  { %v1971_v59 = vmul.f32 %v5960_v57, %v5960_v57  ;;  %v1972_v58 = vmul.f32 %v5963_v63, %v5963_v63  ;;  %v1973_v34 = vmul.f32 %v5966_v33, %v5966_v33  ;;  %v1974_v21 = vmul.f32 %v5969_v25, %v5969_v25 }
 0x68e   :  { %1991 = vst [vmem:[#allocation1 + $0x20] ss:$4 sm:$0xff] %v1971_v59 }
 0x68f   :  { %1993 = vst [vmem:[#allocation1 + $0x21] ss:$4 sm:$0xff] %v1972_v58  ;;  %v1998_v24 = vld.sshfl [vmem:[#allocation1] sm:$0xff pattern:$0x73625140] }
 0x690   :  { %1995 = vst [vmem:[#allocation1 + $0x22] ss:$4 sm:$0xff] %v1973_v34  ;;  %v2002_v41 = vsel %vm109_vm0, %v1998_v24, 0.0 }
 0x691   :  { %1997 = vst [vmem:[#allocation1 + $0x23] ss:$4 sm:$0xff] %v1974_v21  ;;  %2003 = vadd.xlane.f32.xlu2 %v2002_v41  ;;  %v2102_v41 = vrot.slane %v2098_v7, 6 }
 0x698   :  { %v1999_v60 = vld.sshfl [vmem:[#allocation1 + $0x20] sm:$0xff pattern:$0x73625140] }
 0x699   :  { %v2005_v62 = vsel %vm109_vm0, %v1999_v60, 0.0 }
 0x69a   :  { %2006 = vadd.xlane.f32.xlu0 %v2005_v62 }
 0x704   :  { %v2004_v12 = vpop.xlane.xlu2 %2003 }
 0x705   :  { %v2008_v9 = vmul.f32 %v2004_v12, %v5303_v26 }
 0x707   :  { %v2010_v17 = vadd.f32 1e-06, %v2008_v9 }
 0x709   :  { %5075 = vrsqrt.f32 %v2010_v17  ;;  %vm2018_vm15 = vweird.f32 %v2010_v17 }
 0x70d   :  { %v2007_v61 = vpop.xlane.xlu0 %2006 }
 0x70e   :  { %v2009_v18 = vmul.f32 %v2007_v61, %v5303_v26 }
 0x70f   :  { %v5076_v13 = vpop.eup %5075 }
 0x710   :  { %v2011_v19 = vadd.f32 1e-06, %v2009_v18  ;;  %v2013_v22 = vmul.f32 %v5076_v13, %v2010_v17  ;;  %vm2019_vm14 = vweird.f32 %v5076_v13 }
 0x711   :  { %vm2020_vm1 = vmor %vm2018_vm15, %vm2019_vm14 }
 0x712   :  { %5077 = vrsqrt.f32 %v2011_v19  ;;  %v2014_v0 = vmul.f32 %v5076_v13, %v2013_v22  ;;  %vm2028_vm3 = vweird.f32 %v2011_v19 }
 0x714   :  { %v2015_v42 = vmul.f32 0.5, %v2014_v0 }
 0x716   :  { %v2016_v5 = vsub.f32 1.5, %v2015_v42 }
 0x718   :  { %v5078_v32 = vpop.eup %5077  ;;  %v2017_v36 = vmul.f32 %v5076_v13, %v2016_v5 }
 0x719   :  { %v2023_v40 = vmul.f32 %v5078_v32, %v2011_v19  ;;  %vm2029_vm2 = vweird.f32 %v5078_v32 }
 0x71a   :  { %v2021_v35 = vsel %vm2020_vm1, %v5076_v13, %v2017_v36  ;;  %vm2030_vm4 = vmor %vm2028_vm3, %vm2029_vm2 }
 0x71b   :  { %v2024_v55 = vmul.f32 %v5078_v32, %v2023_v40  ;;  %v2037_v50 = vperm.slane %v2021_v35, %v5305_v27  ;;  %v2041_v38 = vperm.slane %v2021_v35, %v5307_v28  ;;  %v2045_v10 = vperm.slane %v2021_v35, %v5309_v29 }
 0x71c   :  { %v2049_v39 = vperm.slane %v2021_v35, %v5311_v30 }
 0x71d   :  { %v2025_v59 = vmul.f32 0.5, %v2024_v55  ;;  %v2074_v58 = vmul.f32 %v2037_v50, %v5935_v11  ;;  %v2075_v34 = vmul.f32 %v2041_v38, %v5938_v52  ;;  %v2076_v21 = vmul.f32 %v2045_v10, %v5941_v15  ;;  %v2185_v55 = vld [vmem:[%s7166_s1 + $0x6] sm:$0x1]  ;;  %v2186_v50 = vld [vmem:[%s7166_s1 + $0x7] sm:$0x1] }
 0x71e   :  { %v2077_v24 = vmul.f32 %v2049_v39, %v5944_v37  ;;  %v2187_v38 = vld [vmem:[%s7166_s1 + $0x8] sm:$0x1]  ;;  %v2188_v10 = vld [vmem:[%s7166_s1 + $0x9] sm:$0x1] }
 0x71f   :  { %v2026_v60 = vsub.f32 1.5, %v2025_v59  ;;  %v2090_v62 = vmul.f32 %v2082_v47, %v2074_v58  ;;  %v2091_v12 = vmul.f32 %v2084_v49, %v2075_v34  ;;  %v2092_v9 = vmul.f32 %v2085_v46, %v2076_v21  ;;  %v2191_v59 = vld [vmem:[%s7166_s1 + $0xc] sm:$0x1]  ;;  %v2192_v58 = vld [vmem:[%s7166_s1 + $0xd] sm:$0x1] }
 0x720   :  { %v2093_v17 = vmul.f32 %v2086_v56, %v2077_v24  ;;  %v2193_v34 = vld [vmem:[%s7166_s1 + $0xe] sm:$0x1]  ;;  %v2194_v21 = vld [vmem:[%s7166_s1 + $0xf] sm:$0x1] }
 0x721   :  { %v2027_v61 = vmul.f32 %v5078_v32, %v2026_v60  ;;  %v2106_v18 = vadd.f32 %v2098_v7, %v2090_v62  ;;  %v2107_v13 = vadd.f32 %v2100_v31, %v2091_v12  ;;  %v2108_v20 = vadd.f32 %v2101_v14, %v2092_v9  ;;  %v5033_v62 = vld [vmem:[%s7167_s13] ss:$0 sm:$0xff] }
 0x722   :  { %v2109_v11 = vadd.f32 %v2102_v41, %v2093_v17 }
 0x723   :  { %v2031_v22 = vsel %vm2030_vm4, %v5078_v32, %v2027_v61  ;;  %2122 = vst [vmem:[#allocation1] ss:$4 sm:$0xff] %v2106_v18 }
 0x724   :  { %v2053_v52 = vperm.slane %v2031_v22, %v5305_v27  ;;  %v2057_v15 = vperm.slane %v2031_v22, %v5307_v28  ;;  %v2061_v37 = vperm.slane %v2031_v22, %v5309_v29  ;;  %v2065_v0 = vperm.slane %v2031_v22, %v5311_v30  ;;  %2124 = vst [vmem:[#allocation1 + $0x1] ss:$4 sm:$0xff] %v2107_v13 }
 0x725   :  { %2126 = vst [vmem:[#allocation1 + $0x2] ss:$4 sm:$0xff] %v2108_v20 }
 0x726   :  { %v2078_v54 = vmul.f32 %v2053_v52, %v5960_v57  ;;  %v2079_v19 = vmul.f32 %v2057_v15, %v5963_v63  ;;  %v2080_v42 = vmul.f32 %v2061_v37, %v5966_v33  ;;  %v2081_v1 = vmul.f32 %v2065_v0, %v5969_v25  ;;  %2128 = vst [vmem:[#allocation1 + $0x3] ss:$4 sm:$0xff] %v2109_v11  ;;  %v2183_v57 = vld [vmem:[%s7166_s1 + $0x4] sm:$0x1]  ;;  %v2179_v33 = vld [vmem:[%s7166_s1] sm:$0x1] }
 0x727   :  { %v2180_v25 = vld [vmem:[%s7166_s1 + $0x1] sm:$0x1]  ;;  %v5032_v15 = vld [vmem:[%s7163_s11] ss:$0 sm:$0xff] }
 0x728   :  { %v2094_v4 = vmul.f32 %v2082_v47, %v2078_v54  ;;  %v2095_v5 = vmul.f32 %v2084_v49, %v2079_v19  ;;  %v2096_v32 = vmul.f32 %v2085_v46, %v2080_v42  ;;  %v2097_v6 = vmul.f32 %v2086_v56, %v2081_v1  ;;  %v2182_v46 = vld [vmem:[%s7166_s1 + $0x3] sm:$0x1]  ;;  %v2184_v56 = vld [vmem:[%s7166_s1 + $0x5] sm:$0x1] }
 0x72a   :  { %v2110_v36 = vadd.f32 %v2098_v7, %v2094_v4  ;;  %v2111_v40 = vadd.f32 %v2100_v31, %v2095_v5  ;;  %v2112_v45 = vadd.f32 %v2101_v14, %v2096_v32  ;;  %v2113_v35 = vadd.f32 %v2102_v41, %v2097_v6  ;;  %v2181_v7 = vld [vmem:[%s7166_s1 + $0x2] sm:$0x1]  ;;  %v2189_v31 = vld [vmem:[%s7166_s1 + $0xa] sm:$0x1]  ;;  %v2190_v14 = vld [vmem:[%s7166_s1 + $0xb] sm:$0x1] }
 0x72c   :  { %2130 = vst [vmem:[#allocation1 + $0x20] ss:$4 sm:$0xff] %v2110_v36 }
 0x72d   :  { %2132 = vst [vmem:[#allocation1 + $0x21] ss:$4 sm:$0xff] %v2111_v40  ;;  %v2137_v63 = vld.sshfl [vmem:[#allocation1] sm:$0xff pattern:$0x73625140] }
 0x72e   :  { %2134 = vst [vmem:[#allocation1 + $0x22] ss:$4 sm:$0xff] %v2112_v45 }
 0x72f   :  { %2136 = vst [vmem:[#allocation1 + $0x23] ss:$4 sm:$0xff] %v2113_v35 }
 0x730   :  { %2216 = vst [vmem:[#allocation1 + $0x4] ss:$9 sm:$0xff] %v2183_v57 }
 0x736   :  { %v2138_v47 = vld.sshfl [vmem:[#allocation1 + $0x20] sm:$0xff pattern:$0x73625140] }
 0x737   :  { %v2141_v49 = vpack.c.bf16 %v2138_v47, %v2137_v63  ;;  %2204 = vst [vmem:[#allocation1] ss:$9 sm:$0xff] %v2179_v33 }
 0x738   :  { %2207 = vst [vmem:[#allocation1 + $0x1] ss:$9 sm:$0xff] %v2180_v25 }
 0x739   :  { %4767 = vmatmul.msk.bf16.vlgmr.msra.gmra.mxu2 %vm109_vm0, %v2141_v49  ;;  %2210 = vst [vmem:[#allocation1 + $0x2] ss:$9 sm:$0xff] %v2181_v7 }
 0x73a   :  { %2213 = vst [vmem:[#allocation1 + $0x3] ss:$9 sm:$0xff] %v2182_v46 }
 0x73b   :  { %2219 = vst [vmem:[#allocation1 + $0x5] ss:$9 sm:$0xff] %v2184_v56 }
 0x73c   :  { %2222 = vst [vmem:[#allocation1 + $0x6] ss:$9 sm:$0xff] %v2185_v55 }
 0x73d   :  { %2225 = vst [vmem:[#allocation1 + $0x7] ss:$9 sm:$0xff] %v2186_v50 }
 0x744   :  { %v2226_v39 = vld [vmem:[#allocation1] sm:$0xff] }
 0x745   :  { %4776 = vmatmul.msk.bf16.vlgmr.msra.gmra.mxu3 %vm109_vm0, %v2226_v39  ;;  %2228 = vst [vmem:[#allocation1] ss:$9 sm:$0xff] %v2187_v38 }
 0x746   :  { %2230 = vst [vmem:[#allocation1 + $0x1] ss:$9 sm:$0xff] %v2188_v10 }
 0x747   :  { %2232 = vst [vmem:[#allocation1 + $0x2] ss:$9 sm:$0xff] %v2189_v31 }
 0x748   :  { %2234 = vst [vmem:[#allocation1 + $0x3] ss:$9 sm:$0xff] %v2190_v14 }
 0x749   :  { %2236 = vst [vmem:[#allocation1 + $0x4] ss:$9 sm:$0xff] %v2191_v59 }
 0x74a   :  { %2238 = vst [vmem:[#allocation1 + $0x5] ss:$9 sm:$0xff] %v2192_v58 }
 0x74b   :  { %2240 = vst [vmem:[#allocation1 + $0x6] ss:$9 sm:$0xff] %v2193_v34 }
 0x74c   :  { %2242 = vst [vmem:[#allocation1 + $0x7] ss:$9 sm:$0xff] %v2194_v21 }
 0x753   :  { %v2243_v24 = vld [vmem:[#allocation1] sm:$0xff] }
 0x755   :  { %4777 = vmatmul.msk.bf16.gmra.mxu3 %vm109_vm0, %v2243_v24 }
 0x7bc   :  { %v2174_v61 = vpop.f32.mrf.mxu2 }
 0x7bd   :  { %v6086_v0 = vadd.f32 %v5032_v15, %v2174_v61 }
 0x7c4   :  { %v2176_v52 = vpop.f32.mrf.mxu2 }
 0x7c5   :  { %v6084_v37 = vadd.f32 %v5032_v15, %v2176_v52 }
 0x7c7   :  { %v4970_v54 = vpack.i.bf16 %v6086_v0, %v6084_v37 }
 0x7c8   :  { %v2269_v41 = vpop.f32.mrf.mxu3 }
 0x7c9   :  { %v6071_v9 = vadd.f32 %v5033_v62, %v2269_v41 }
 0x7d0   :  { %v2271_v60 = vpop.f32.mrf.mxu3 }
 0x7d1   :  { %v2272_v20 = vadd.f32 %v5033_v62, %v2271_v60 }
 0x7d3   :  { %v2626_v25 = vrot.slane %v2272_v20, 4 }
 0x7d8   :  { %v2274_v12 = vpop.f32.mrf.mxu3 }
 0x7d9   :  { %v6073_v17 = vadd.f32 %v5033_v62, %v2274_v12 }
 0x7db   :  { %v4930_v18 = vpack.i.bf16 %v6073_v17, %v6071_v9 }
 0x7dd   :  { %4931 = vrot.lane.b32.xlu2 %v4930_v18, %s5130_s30 }
 0x7e0   :  { %v2276_v13 = vpop.f32.mrf.mxu3 }
 0x7e1   :  { %v2277_v11 = vadd.f32 %v5033_v62, %v2276_v13 }
 0x7e3   :  { %v4940_v22 = vpack.i.bf16 %v2277_v11, %v2272_v20  ;;  %v2738_v38 = vrot.slane %v2277_v11, 4 }
 0x7e5   :  { %4941 = vrot.lane.b32.xlu0 %v4940_v22, %s5131_s6  ;;  %4936 = vrot.lane.b32.xlu1 %v4940_v22, %s5130_s30 }
 0x7e6   :  { %4956 = vrot.lane.b32.xlu2 %v4930_v18, %s5129_s29 }
 0x7ed   :  { %4951 = vrot.lane.b32.xlu1 %v4940_v22, %s5129_s29  ;;  %4946 = vrot.lane.b32.xlu0 %v4930_v18, %s5131_s6 }
 0x7ee   :  { %4971 = vrot.lane.b32.xlu2 %v4970_v54, %s5129_s29 }
 0x7f5   :  { %4966 = vrot.lane.b32.xlu1 %v4970_v54, %s5131_s6  ;;  %4961 = vrot.lane.b32.xlu0 %v4970_v54, %s5130_s30  ;;  %v2682_v54 = vrot.slane %v6073_v17, 4 }
 0x7f6   :  { %4976 = vrot.lane.b32.xlu2 %v4930_v18, %s5128_s28 }
 0x7fd   :  { %4981 = vrot.lane.b32.xlu0 %v4940_v22, %s5128_s28 }
 0x837   :  { %v4932_v19 = vpop.permute.xlu2 %4931 }
 0x838   :  { %v4933_v5 = vunpack.i.l.bf16 %v4932_v19  ;;  %v4934_v32 = vunpack.i.h.bf16 %v4932_v19 }
 0x83a   :  { %v2582_v40 = vrot.slane %v4933_v5, 4  ;;  %v2694_v45 = vrot.slane %v4934_v32, 4 }
 0x840   :  { %v4957_v42 = vpop.permute.xlu2 %4956 }
 0x841   :  { %v6097_v1 = vunpack.i.h.bf16 %v4957_v42  ;;  %v6099_v4 = vunpack.i.l.bf16 %v4957_v42 }
 0x843   :  { %v2692_v6 = vrot.slane %v6097_v1, 4  ;;  %v2580_v36 = vrot.slane %v6099_v4, 4  ;;  %v2583_v35 = vsel %vm424_vm8, %v6099_v4, %v2582_v40  ;;  %v2695_v33 = vsel %vm424_vm8, %v6097_v1, %v2694_v45 }
 0x844   :  { %v6114_v50 = vperm.slane %v2583_v35, %v5421_v48  ;;  %v6117_v10 = vperm.slane %v2695_v33, %v5421_v48 }
 0x845   :  { %v2581_v57 = vsel %vm424_vm8, %v2580_v36, %v4933_v5  ;;  %v2693_v63 = vsel %vm424_vm8, %v2692_v6, %v4934_v32 }
 0x846   :  { %v6123_v58 = vperm.slane %v2581_v57, %v5421_v48  ;;  %v6126_v34 = vperm.slane %v2693_v63, %v5421_v48  ;;  %v2604_v52 = vrot.slane %v6114_v50, 4  ;;  %v2716_v15 = vrot.slane %v6117_v10, 4 }
 0x848   :  { %v6119_v39 = vpop.permute.xlu2 %4971  ;;  %v2592_v19 = vrot.slane %v6123_v58, 4  ;;  %v2704_v35 = vrot.slane %v6126_v34, 4 }
 0x849   :  { %v7181_v61 = vunpack.i.h.bf16 %v6119_v39  ;;  %v7180_v18 = vunpack.i.l.bf16 %v6119_v39  ;;  %v7212_v29 = vunpack.i.l.bf16 %v6119_v39 }
 0x84b   :  { %v6153_v57 = vrot.slane %v7181_v61, 4  ;;  %v6157_v63 = vrot.slane %v7180_v18, 4 }
 0x857   :  { %v6109_v47 = vpop.permute.xlu0 %4941  ;;  %v4937_v7 = vpop.permute.xlu1 %4936 }
 0x858   :  { %v4944_v49 = vunpack.i.h.bf16 %v6109_v47  ;;  %v4943_v46 = vunpack.i.l.bf16 %v6109_v47  ;;  %v4939_v56 = vunpack.i.h.bf16 %v4937_v7  ;;  %v4938_v55 = vunpack.i.l.bf16 %v4937_v7 }
 0x85a   :  { %v2736_v31 = vrot.slane %v4944_v49, 4  ;;  %v2624_v14 = vrot.slane %v4943_v46, 4  ;;  %v2627_v59 = vsel %vm424_vm8, %v4943_v46, %v2626_v25  ;;  %v2739_v60 = vsel %vm424_vm8, %v4944_v49, %v2738_v38 }
 0x85b   :  { %v4985_v62 = vpack.i.bf16 %v4938_v55, %v4933_v5  ;;  %v4995_v12 = vpack.i.bf16 %v4939_v56, %v4934_v32  ;;  %v2635_v22 = vperm.slane %v2627_v59, %v5421_v48  ;;  %v2750_v5 = vrot.slane %v4939_v56, 4 }
 0x85c   :  { %v2737_v41 = vsel %vm424_vm8, %v2736_v31, %v2277_v11  ;;  %v2625_v13 = vsel %vm424_vm8, %v2624_v14, %v2272_v20  ;;  %v2570_v11 = vrot.slane %v6071_v9, 4  ;;  %v2747_v20 = vperm.slane %v2739_v60, %v5421_v48 }
 0x85d   :  { %4986 = vrot.lane.b32.xlu1 %v4985_v62, %s5128_s28  ;;  %4996 = vrot.lane.b32.xlu0 %v4995_v12, %s5128_s28  ;;  %v2743_v42 = vperm.slane %v2737_v41, %v5421_v48  ;;  %v2631_v6 = vperm.slane %v2625_v13, %v5421_v48  ;;  %v2638_v36 = vrot.slane %v4938_v55, 4  ;;  %v2662_v33 = vrot.slane %v2635_v22, 4 }
 0x85e   :  { %v2774_v14 = vrot.slane %v2747_v20, 4 }
 0x85f   :  { %v4952_v32 = vpop.permute.xlu1 %4951  ;;  %v6159_v25 = vpop.permute.xlu0 %4946  ;;  %v2762_v31 = vrot.slane %v2743_v42, 4  ;;  %v2650_v60 = vrot.slane %v2631_v6, 4 }
 0x860   :  { %v6146_v40 = vunpack.i.h.bf16 %v4952_v32  ;;  %v6148_v45 = vunpack.i.l.bf16 %v4952_v32  ;;  %v4949_v13 = vunpack.i.h.bf16 %v6159_v25  ;;  %4991 = vrot.lane.b32.xlu2 %v6159_v25, %s5128_s28 }
 0x862   :  { %v2748_v7 = vrot.slane %v6146_v40, 4  ;;  %v2636_v49 = vrot.slane %v6148_v45, 4  ;;  %v2639_v46 = vsel %vm424_vm8, %v6148_v45, %v2638_v36  ;;  %v2751_v38 = vsel %vm424_vm8, %v6146_v40, %v2750_v5 }
 0x863   :  { %v2647_v59 = vperm.slane %v2639_v46, %v5421_v48  ;;  %v2759_v41 = vperm.slane %v2751_v38, %v5421_v48  ;;  %v4948_v38 = vunpack.i.l.bf16 %v6159_v25 }
 0x864   :  { %v2637_v62 = vsel %vm424_vm8, %v2636_v49, %v4938_v55  ;;  %v2749_v12 = vsel %vm424_vm8, %v2748_v7, %v4939_v56 }
 0x865   :  { %v2643_v32 = vperm.slane %v2637_v62, %v5421_v48  ;;  %v2660_v18 = vrot.slane %v2647_v59, 4  ;;  %v2663_v36 = vsel %vm424_vm8, %v2647_v59, %v2662_v33  ;;  %v2755_v5 = vperm.slane %v2749_v12, %v5421_v48 }
 0x866   :  { %v2671_v61 = vperm.slane %v2663_v36, %v5431_v8  ;;  %v2772_v21 = vrot.slane %v2759_v41, 4  ;;  %v2775_v46 = vsel %vm424_vm8, %v2759_v41, %v2774_v14 }
 0x867   :  { %v2648_v24 = vrot.slane %v2643_v32, 4  ;;  %v2651_v55 = vsel %vm424_vm8, %v2643_v32, %v2650_v60  ;;  %v2661_v56 = vsel %vm424_vm8, %v2660_v18, %v2635_v22  ;;  %v2760_v7 = vrot.slane %v2755_v5, 4 }
 0x868   :  { %v2659_v49 = vperm.slane %v2651_v55, %v5431_v8  ;;  %v2667_v62 = vperm.slane %v2661_v56, %v5431_v8  ;;  %v2678_v33 = vrot.slane %v2671_v61, 4  ;;  %v2763_v59 = vsel %vm424_vm8, %v2755_v5, %v2762_v31 }
 0x869   :  { %v2649_v12 = vsel %vm424_vm8, %v2648_v24, %v2631_v6  ;;  %v2761_v36 = vsel %vm424_vm8, %v2760_v7, %v2743_v42  ;;  %v2771_v14 = vperm.slane %v2763_v59, %v5431_v8  ;;  %v2773_v41 = vsel %vm424_vm8, %v2772_v21, %v2747_v20 }
 0x86a   :  { %v2655_v60 = vperm.slane %v2649_v12, %v5431_v8  ;;  %v2674_v32 = vrot.slane %v2659_v49, 4  ;;  %v2676_v18 = vrot.slane %v2667_v62, 4  ;;  %v2680_v22 = vrot.slane %v4949_v13, 4 }
 0x86b   :  { %v2767_v55 = vperm.slane %v2761_v36, %v5431_v8  ;;  %v2779_v56 = vperm.slane %v2773_v41, %v5431_v8  ;;  %v2783_v61 = vperm.slane %v2775_v46, %v5431_v8  ;;  %v2786_v31 = vrot.slane %v2771_v14, 4 }
 0x86c   :  { %v2672_v5 = vrot.slane %v2655_v60, 4  ;;  %v2679_v24 = vsel %vm424_vm8, 0.0, %v2678_v33  ;;  %v2568_v42 = vrot.slane %v4948_v38, 4  ;;  %v2571_v6 = vsel %vm424_vm8, %v4948_v38, %v2570_v11 }
 0x86d   :  { %v6194_v21 = vsel %vm424_vm8, 0.0, %v2676_v18  ;;  %v2784_v20 = vrot.slane %v2767_v55, 4  ;;  %v2788_v7 = vrot.slane %v2779_v56, 4  ;;  %v2790_v62 = vrot.slane %v2783_v61, 4 }
 0x86e   :  { %v2675_v59 = vsel %vm424_vm8, 0.0, %v2674_v32  ;;  %v2807_v12 = vsel %vm424_vm8, %v2678_v33, %v2659_v49  ;;  %v2681_v46 = vsel %vm424_vm8, %v2680_v22, %v6073_v17  ;;  %v2683_v36 = vsel %vm424_vm8, %v4949_v13, %v2682_v54 }
 0x86f   :  { %v2787_v41 = vsel %vm424_vm8, 0.0, %v2786_v31  ;;  %v2791_v11 = vsel %vm424_vm8, 0.0, %v2790_v62  ;;  %v6206_v38 = vsel %vm424_vm8, %v2676_v18, %v2655_v60  ;;  %v2914_v56 = vrot.slane %v2679_v24, 4 }
 0x870   :  { %v6209_v61 = vsel %vm424_vm8, 0.0, %v2672_v5  ;;  %v6212_v49 = vsel %vm424_vm8, 0.0, %v2784_v20  ;;  %v6215_v33 = vsel %vm424_vm8, 0.0, %v2788_v7  ;;  %v6219_v54 = vperm.slane %v2807_v12, %v5421_v48 }
 0x871   :  { %v2859_v13 = vsel %vm424_vm8, %v2790_v62, %v2771_v14  ;;  %v2970_v32 = vrot.slane %v2791_v11, 4  ;;  %v2687_v60 = vperm.slane %v2681_v46, %v5421_v48  ;;  %v2569_v18 = vsel %vm424_vm8, %v2568_v42, %v6071_v9 }
 0x872   :  { %v2579_v22 = vperm.slane %v2571_v6, %v5421_v48  ;;  %v2691_v31 = vperm.slane %v2683_v36, %v5421_v48  ;;  %v2915_v5 = vsel %vm424_vm8, %v2914_v56, %v2675_v59  ;;  %v2575_v20 = vperm.slane %v2569_v18, %v5421_v48 }
 0x873   :  { %v2706_v24 = vrot.slane %v2687_v60, 4  ;;  %v2705_v12 = vsel %vm424_vm8, %v2704_v35, %v2687_v60  ;;  %v2971_v14 = vsel %vm424_vm8, %v2970_v32, %v2787_v41 }
 0x874   :  { %v2605_v62 = vsel %vm424_vm8, %v2604_v52, %v2579_v22  ;;  %v2606_v9 = vrot.slane %v2579_v22, 4  ;;  %v2711_v42 = vperm.slane %v2705_v12, %v5431_v8  ;;  %v2593_v6 = vsel %vm424_vm8, %v2592_v19, %v2575_v20 }
 0x875   :  { %v2594_v59 = vrot.slane %v2575_v20, 4  ;;  %v2611_v46 = vperm.slane %v2605_v62, %v5431_v8  ;;  %v2707_v35 = vsel %vm424_vm8, %v6126_v34, %v2706_v24  ;;  %v2599_v36 = vperm.slane %v2593_v6, %v5431_v8 }
 0x876   :  { %v2607_v52 = vsel %vm424_vm8, %v6114_v50, %v2606_v9  ;;  %v6249_v41 = vperm.slane %v2707_v35, %v5431_v8  ;;  %v2717_v25 = vsel %vm424_vm8, %v2716_v15, %v2691_v31  ;;  %v2718_v32 = vrot.slane %v2691_v31, 4  ;;  %v4967_v9 = vpop.permute.xlu1 %4966 }
 0x877   :  { %v2595_v19 = vsel %vm424_vm8, %v6123_v58, %v2594_v59  ;;  %v2615_v11 = vperm.slane %v2607_v52, %v5431_v8  ;;  %v2620_v56 = vrot.slane %v2611_v46, 4  ;;  %v2616_v60 = vrot.slane %v2599_v36, 4 }
 0x878   :  { %v2603_v34 = vperm.slane %v2595_v19, %v5431_v8  ;;  %v2723_v18 = vperm.slane %v2717_v25, %v5431_v8  ;;  %v2728_v50 = vrot.slane %v2711_v42, 4  ;;  %v6260_v22 = vsel %vm424_vm8, %v2788_v7, %v2767_v55 }
 0x879   :  { %v2622_v24 = vrot.slane %v2615_v11, 4  ;;  %v2719_v15 = vsel %vm424_vm8, %v6117_v10, %v2718_v32  ;;  %v2730_v20 = vrot.slane %v6249_v41, 4  ;;  %v6266_v58 = vperm.slane %v2859_v13, %v5421_v48 }
 0x87a   :  { %v2618_v12 = vrot.slane %v2603_v34, 4  ;;  %v2727_v62 = vperm.slane %v2719_v15, %v5431_v8  ;;  %v6271_v6 = vperm.slane %v2915_v5, %v5421_v48  ;;  %v6274_v55 = vperm.slane %v2971_v14, %v5421_v48  ;;  %v4962_v5 = vpop.permute.xlu0 %4961 }
 0x87b   :  { %v6277_v7 = vsel %vm424_vm8, 0.0, %v2620_v56  ;;  %v2732_v10 = vrot.slane %v2723_v18, 4  ;;  %v6280_v59 = vsel %vm424_vm8, 0.0, %v2616_v60  ;;  %v6283_v13 = vsel %vm424_vm8, 0.0, %v2622_v24 }
 0x87c   :  { %v6286_v46 = vsel %vm424_vm8, 0.0, %v2728_v50  ;;  %v6289_v35 = vsel %vm424_vm8, 0.0, %v2730_v20  ;;  %v6292_v14 = vsel %vm424_vm8, 0.0, %v2618_v12  ;;  %v2734_v52 = vrot.slane %v2727_v62, 4 }
 0x87d   :  { %v6295_v25 = vsel %vm424_vm8, %v2620_v56, %v2599_v36  ;;  %v4969_v19 = vunpack.i.h.bf16 %v4967_v9  ;;  %v6298_v11 = vsel %vm424_vm8, 0.0, %v2732_v10  ;;  %v6301_v32 = vsel %vm424_vm8, %v2622_v24, %v2603_v34 }
 0x87e   :  { %v4968_v18 = vunpack.i.l.bf16 %v4967_v9  ;;  %v6305_v50 = vsel %vm424_vm8, %v2732_v10, %v2711_v42  ;;  %v7209_v20 = vrot.slane %v6086_v0, 4  ;;  %v4964_v36 = vunpack.i.h.bf16 %v4962_v5 }
 0x87f   :  { %v2300_v15 = vrot.slane %v4969_v19, 4  ;;  %v7210_v31 = vrot.slane %v6084_v37, 4  ;;  %v4963_v24 = vunpack.i.l.bf16 %v4962_v5 }
 0x880   :  { %v2303_v12 = vsel %vm424_vm8, %v4969_v19, %v7209_v20  ;;  %v2356_v62 = vrot.slane %v4968_v18, 4  ;;  %v2313_v10 = vsel %vm424_vm8, %v6153_v57, %v4964_v36  ;;  %v2314_v17 = vrot.slane %v4964_v36, 4 }
 0x881   :  { %v2311_v56 = vperm.slane %v2303_v12, %v5421_v48  ;;  %v2359_v34 = vsel %vm424_vm8, %v4968_v18, %v7210_v31  ;;  %v2301_v9 = vsel %vm424_vm8, %v2300_v15, %v6086_v0  ;;  %v2319_v60 = vperm.slane %v2313_v10, %v5421_v48 }
 0x882   :  { %v2367_v42 = vperm.slane %v2359_v34, %v5421_v48  ;;  %v2307_v19 = vperm.slane %v2301_v9, %v5421_v48  ;;  %v2357_v12 = vsel %vm424_vm8, %v2356_v62, %v6084_v37  ;;  %v7211_v0 = vunpack.i.h.bf16 %v6119_v39 }
 0x883   :  { %v2338_v20 = vrot.slane %v2311_v56, 4  ;;  %v2363_v5 = vperm.slane %v2357_v12, %v5421_v48  ;;  %v2369_v57 = vsel %vm424_vm8, %v6157_v63, %v4963_v24  ;;  %v2324_v34 = vrot.slane %v2319_v60, 4 }
 0x884   :  { %v2315_v18 = vsel %vm424_vm8, %v7211_v0, %v2314_v17  ;;  %v2326_v15 = vrot.slane %v2307_v19, 4  ;;  %v2370_v9 = vrot.slane %v4963_v24, 4  ;;  %v6332_v37 = vsel %vm424_vm8, 0.0, %v2734_v52 }
 0x885   :  { %v2323_v36 = vperm.slane %v2315_v18, %v5421_v48  ;;  %v2382_v62 = vrot.slane %v2363_v5, 4  ;;  %v2394_v10 = vrot.slane %v2367_v42, 4  ;;  %v2375_v31 = vperm.slane %v2369_v57, %v5421_v48 }
 0x886   :  { %v2325_v12 = vsel %vm424_vm8, %v2324_v34, %v2307_v19  ;;  %v2327_v30 = vsel %vm424_vm8, %v2319_v60, %v2326_v15  ;;  %v2371_v28 = vsel %vm424_vm8, %v7212_v29, %v2370_v9 }
 0x887   :  { %v2336_v17 = vrot.slane %v2323_v36, 4  ;;  %v2339_v0 = vsel %vm424_vm8, %v2323_v36, %v2338_v20  ;;  %v2331_v63 = vperm.slane %v2325_v12, %v5431_v8  ;;  %v2335_v18 = vperm.slane %v2327_v30, %v5431_v8 }
 0x888   :  { %v2347_v24 = vperm.slane %v2339_v0, %v5431_v8  ;;  %v2379_v57 = vperm.slane %v2371_v28, %v5421_v48  ;;  %v2380_v19 = vrot.slane %v2375_v31, 4  ;;  %v2383_v60 = vsel %vm424_vm8, %v2375_v31, %v2382_v62 }
 0x889   :  { %v2337_v27 = vsel %vm424_vm8, %v2336_v17, %v2311_v56  ;;  %v2849_v20 = vsel %vm424_vm8, %v2734_v52, %v6249_v41  ;;  %v2350_v15 = vrot.slane %v2335_v18, 4  ;;  %v2391_v39 = vperm.slane %v2383_v60, %v5431_v8 }
 0x88a   :  { %v2343_v36 = vperm.slane %v2337_v27, %v5431_v8  ;;  %v2354_v30 = vrot.slane %v2347_v24, 4  ;;  %v2381_v34 = vsel %vm424_vm8, %v2380_v19, %v2363_v5  ;;  %v2392_v12 = vrot.slane %v2379_v57, 4 }
 0x88b   :  { %v2395_v29 = vsel %vm424_vm8, %v2379_v57, %v2394_v10  ;;  %v2348_v28 = vrot.slane %v2331_v63, 4  ;;  %v2387_v62 = vperm.slane %v2381_v34, %v5431_v8  ;;  %v2406_v52 = vrot.slane %v2391_v39, 4 }
 0x88c   :  { %v2352_v9 = vrot.slane %v2343_v36, 4  ;;  %v2355_v31 = vsel %vm424_vm8, 0.0, %v2354_v30  ;;  %v2393_v41 = vsel %vm424_vm8, %v2392_v12, %v2367_v42  ;;  %v2403_v27 = vperm.slane %v2395_v29, %v5431_v8 }
 0x88d   :  { %v2399_v0 = vperm.slane %v2393_v41, %v5431_v8  ;;  %v2417_v10 = vsel %vm424_vm8, %v2354_v30, %v2335_v18  ;;  %v2351_v24 = vsel %vm424_vm8, 0.0, %v2350_v15  ;;  %v2404_v57 = vrot.slane %v2387_v62, 4 }
 0x88e   :  { %v2353_v17 = vsel %vm424_vm8, 0.0, %v2352_v9  ;;  %v2410_v19 = vrot.slane %v2403_v27, 4  ;;  %v2412_v60 = vsel %vm424_vm8, %v2352_v9, %v2331_v63  ;;  %v6365_v42 = vperm.slane %v2417_v10, %v5421_v48 }
 0x88f   :  { %v2408_v36 = vrot.slane %v2399_v0, 4  ;;  %v2464_v34 = vrot.slane %v2353_v17, 4  ;;  %v2470_v12 = vrot.slane %v2355_v31, 4  ;;  %v2349_v29 = vsel %vm424_vm8, 0.0, %v2348_v28 }
 0x890   :  { %v2407_v5 = vsel %vm424_vm8, 0.0, %v2406_v52  ;;  %v2411_v41 = vsel %vm424_vm8, 0.0, %v2410_v19  ;;  %v2427_v18 = vsel %vm424_vm8, %v2410_v19, %v2391_v39  ;;  %v6373_v30 = vperm.slane %v2412_v60, %v5421_v48 }
 0x891   :  { %v2409_v15 = vsel %vm424_vm8, 0.0, %v2408_v36  ;;  %v2422_v63 = vsel %vm424_vm8, %v2408_v36, %v2387_v62  ;;  %v6377_v9 = vperm.slane %v2427_v18, %v5421_v48  ;;  %v2465_v28 = vsel %vm424_vm8, %v2464_v34, %v2349_v29 }
 0x892   :  { %v6380_v31 = vperm.slane %v2422_v63, %v5421_v48  ;;  %v2471_v27 = vsel %vm424_vm8, %v2470_v12, %v2351_v24  ;;  %v2476_v52 = vrot.slane %v2409_v15, 4  ;;  %v2405_v39 = vsel %vm424_vm8, 0.0, %v2404_v57 }
 0x893   :  { %v2482_v10 = vrot.slane %v2411_v41, 4  ;;  %v6388_v62 = vperm.slane %v2465_v28, %v5421_v48  ;;  %v6391_v19 = vperm.slane %v2471_v27, %v5421_v48  ;;  %v2796_v36 = vperm.slane %v6295_v25, %v5421_v48 }
 0x894   :  { %v2477_v60 = vsel %vm424_vm8, %v2476_v52, %v2405_v39  ;;  %v2801_v12 = vperm.slane %v6301_v32, %v5421_v48  ;;  %v2806_v41 = vperm.slane %v6206_v38, %v5421_v48  ;;  %v2824_v18 = vrot.slane %v6219_v54, 4 }
 0x895   :  { %v6398_v57 = vperm.slane %v2477_v60, %v5421_v48  ;;  %v2483_v34 = vsel %vm424_vm8, %v2482_v10, %v2407_v5  ;;  %v2848_v25 = vperm.slane %v6305_v50, %v5421_v48  ;;  %v2853_v28 = vperm.slane %v2849_v20, %v5421_v48 }
 0x896   :  { %v6404_v29 = vperm.slane %v2483_v34, %v5421_v48  ;;  %v2812_v63 = vrot.slane %v2801_v12, 4  ;;  %v2858_v5 = vperm.slane %v6260_v22, %v5421_v48  ;;  %v2825_v27 = vsel %vm424_vm8, %v2824_v18, %v2806_v41 }
 0x897   :  { %v2876_v52 = vrot.slane %v6266_v58, 4  ;;  %v2814_v38 = vrot.slane %v2796_v36, 4  ;;  %v2831_v10 = vperm.slane %v2825_v27, %v5431_v8  ;;  %v2864_v50 = vrot.slane %v2853_v28, 4 }
 0x898   :  { %v2813_v39 = vsel %vm424_vm8, %v2812_v63, %v2796_v36  ;;  %v2826_v60 = vrot.slane %v2806_v41, 4  ;;  %v2866_v22 = vrot.slane %v2848_v25, 4  ;;  %v2878_v27 = vrot.slane %v2858_v5, 4 }
 0x899   :  { %v2819_v34 = vperm.slane %v2813_v39, %v5431_v8  ;;  %v2877_v20 = vsel %vm424_vm8, %v2876_v52, %v2858_v5  ;;  %v2815_v15 = vsel %vm424_vm8, %v2801_v12, %v2814_v38  ;;  %v2836_v24 = vrot.slane %v2831_v10, 4 }
 0x89a   :  { %v2865_v32 = vsel %vm424_vm8, %v2864_v50, %v2848_v25  ;;  %v2883_v18 = vperm.slane %v2877_v20, %v5431_v8  ;;  %v2823_v0 = vperm.slane %v2815_v15, %v5431_v8  ;;  %v2827_v63 = vsel %vm424_vm8, %v6219_v54, %v2826_v60 }
 0x89b   :  { %v2871_v36 = vperm.slane %v2865_v32, %v5431_v8  ;;  %v2867_v41 = vsel %vm424_vm8, %v2853_v28, %v2866_v22  ;;  %v2837_v52 = vsel %vm424_vm8, %v2836_v24, %v2819_v34  ;;  %v2835_v12 = vperm.slane %v2827_v63, %v5431_v8 }
 0x89c   :  { %v2888_v39 = vrot.slane %v2883_v18, 4  ;;  %v2842_v38 = vrot.slane %v2823_v0, 4  ;;  %v3008_v17 = vpack.c.bf16 %v2837_v52, %v2837_v52  ;;  %v2875_v25 = vperm.slane %v2867_v41, %v5431_v8 }
 0x89d   :  { %v2879_v15 = vsel %vm424_vm8, %v6266_v58, %v2878_v27  ;;  %v2838_v50 = vrot.slane %v2819_v34, 4  ;;  %v2890_v5 = vrot.slane %v2871_v36, 4  ;;  %v2840_v41 = vrot.slane %v2835_v12, 4 }
 0x89e   :  { %v2889_v32 = vsel %vm424_vm8, %v2888_v39, %v2871_v36  ;;  %v2843_v54 = vsel %vm424_vm8, %v2835_v12, %v2842_v38  ;;  %v2887_v28 = vperm.slane %v2879_v15, %v5431_v8  ;;  %v3530_v24 = vunpack.c.l.b16 %v3008_v17 }
 0x89f   :  { %v3009_v60 = vpack.c.bf16 %v2889_v32, %v2889_v32  ;;  %v2894_v20 = vrot.slane %v2875_v25, 4  ;;  %v3014_v22 = vpack.c.bf16 %v2843_v54, %v2843_v54  ;;  %v2839_v63 = vsel %vm424_vm8, %v2831_v10, %v2838_v50 }
 0x8a0   :  { %v2891_v52 = vsel %vm424_vm8, %v2883_v18, %v2890_v5  ;;  %v2892_v56 = vrot.slane %v2887_v28, 4  ;;  %v3010_v27 = vpack.c.bf16 %v2839_v63, %v2839_v63  ;;  %v2841_v15 = vsel %vm424_vm8, %v2840_v41, %v2823_v0 }
 0x8a1   :  { %v3531_v26 = vunpack.c.l.b16 %v3009_v60  ;;  %v2895_v58 = vsel %vm424_vm8, %v2887_v28, %v2894_v20  ;;  %v3602_v34 = vunpack.c.l.b16 %v3014_v22  ;;  %v3011_v38 = vpack.c.bf16 %v2891_v52, %v2891_v52 }
 0x8a2   :  { %v3015_v39 = vpack.c.bf16 %v2895_v58, %v2895_v58  ;;  %v2893_v36 = vsel %vm424_vm8, %v2892_v56, %v2875_v25  ;;  %v3554_v32 = vunpack.c.l.b16 %v3010_v27  ;;  %v3012_v54 = vpack.c.bf16 %v2841_v15, %v2841_v15 }
 0x8a3   :  { %v3532_v17 = vpack.c.b16 %v3531_v26, %v3530_v24  ;;  %v3013_v44 = vpack.c.bf16 %v2893_v36, %v2893_v36  ;;  %v3555_v50 = vunpack.c.l.b16 %v3011_v38  ;;  %v7213_v18 = vrot.slane %v6277_v7, 4 }
 0x8a4   :  { %v3603_v10 = vunpack.c.l.b16 %v3015_v39  ;;  %v7214_v28 = vrot.slane %v6283_v13, 4  ;;  %v3578_v60 = vunpack.c.l.b16 %v3012_v54  ;;  %v7215_v7 = vrot.slane %v6194_v21, 4 }
 0x8a5   :  { %v2897_v12 = vsel %vm424_vm8, %v7213_v18, %v6280_v59  ;;  %v3537_v0 = vsel %vm1156_vm9, %v3532_v17, 0  ;;  %v3579_v56 = vunpack.c.l.b16 %v3013_v44  ;;  %v3556_v24 = vpack.c.b16 %v3555_v50, %v3554_v32 }
 0x8a6   :  { %v2903_v5 = vsel %vm424_vm8, %v7214_v28, %v6292_v14  ;;  %v2901_v26 = vperm.slane %v2897_v12, %v5421_v48  ;;  %3546 = vmatpush.bf16.xpose.msrb.mxu0 %v3537_v0  ;;  %v3604_v25 = vpack.c.b16 %v3603_v10, %v3602_v34  ;;  %v2909_v59 = vsel %vm424_vm8, %v7215_v7, %v6209_v61 }
 0x8a7   :  { %v2907_v20 = vperm.slane %v2903_v5, %v5421_v48  ;;  %v3580_v22 = vpack.c.b16 %v3579_v56, %v3578_v60  ;;  %v2913_v13 = vperm.slane %v2909_v59, %v5421_v48  ;;  %v2932_v14 = vrot.slane %v6271_v6, 4 }
 0x8a8   :  { %v7216_v44 = vrot.slane %v6298_v11, 4  ;;  %v3609_v52 = vsel %vm1156_vm9, %v3604_v25, 0  ;;  %v3561_v41 = vsel %vm1156_vm9, %v3556_v24, 0  ;;  %v7217_v27 = vrot.slane %v6332_v37, 4 }
 0x8a9   :  { %v2920_v58 = vrot.slane %v2907_v20, 4  ;;  %3570 = vmatpush.bf16.xpose.msrb.mxu1 %v3561_v41  ;;  %v3585_v21 = vsel %vm1156_vm9, %v3580_v22, 0  ;;  %v2933_v61 = vsel %vm424_vm8, %v2932_v14, %v2913_v13  ;;  %v2988_v37 = vrot.slane %v6274_v55, 4 }
 0x8aa   :  { %v2953_v63 = vsel %vm424_vm8, %v7216_v44, %v6286_v46  ;;  %v2959_v11 = vsel %vm424_vm8, %v7217_v27, %v6289_v35  ;;  %v7218_v46 = vrot.slane %v6215_v33, 4  ;;  %3594 = vmatpush.bf16.xpose.msrb.mxu2 %v3585_v21  ;;  %v2939_v15 = vperm.slane %v2933_v61, %v5431_v8 }
 0x8ab   :  { %v2957_v34 = vperm.slane %v2953_v63, %v5421_v48  ;;  %v2921_v38 = vsel %vm424_vm8, %v2920_v58, %v2901_v26  ;;  %v2963_v36 = vperm.slane %v2959_v11, %v5421_v48  ;;  %v2922_v54 = vrot.slane %v2901_v26, 4 }
 0x8ac   :  { %v2965_v39 = vsel %vm424_vm8, %v7218_v46, %v6212_v49  ;;  %v2927_v32 = vperm.slane %v2921_v38, %v5431_v8  ;;  %v2934_v35 = vrot.slane %v2913_v13, 4  ;;  %v2944_v10 = vrot.slane %v2939_v15, 4 }
 0x8ad   :  { %v2969_v17 = vperm.slane %v2965_v39, %v5421_v48  ;;  %v2976_v50 = vrot.slane %v2963_v36, 4  ;;  %v2978_v33 = vrot.slane %v2957_v34, 4  ;;  %v2923_v28 = vsel %vm424_vm8, %v2907_v20, %v2922_v54 }
 0x8ae   :  { %3618 = vmatpush.bf16.xpose.msra.mxu0 %v3609_v52  ;;  %v2946_v12 = vrot.slane %v2927_v32, 4  ;;  %v2935_v5 = vsel %vm424_vm8, %v6271_v6, %v2934_v35  ;;  %v2945_v0 = vsel %vm424_vm8, %v2944_v10, %v2927_v32  ;;  %v2931_v26 = vperm.slane %v2923_v28, %v5431_v8 }
 0x8af   :  { %v2990_v18 = vrot.slane %v2969_v17, 4  ;;  %v2989_v49 = vsel %vm424_vm8, %v2988_v37, %v2969_v17  ;;  %v2977_v60 = vsel %vm424_vm8, %v2976_v50, %v2957_v34  ;;  %v3016_v24 = vpack.c.bf16 %v2945_v0, %v2945_v0 }
 0x8b0   :  { %v2995_v56 = vperm.slane %v2989_v49, %v5431_v8  ;;  %v2983_v25 = vperm.slane %v2977_v60, %v5431_v8  ;;  %v2947_v7 = vsel %vm424_vm8, %v2939_v15, %v2946_v12  ;;  %v2943_v59 = vperm.slane %v2935_v5, %v5431_v8 }
 0x8b1   :  { %v3018_v20 = vpack.c.bf16 %v2947_v7, %v2947_v7  ;;  %v2979_v13 = vsel %vm424_vm8, %v2963_v36, %v2978_v33  ;;  %v2991_v6 = vsel %vm424_vm8, %v6274_v55, %v2990_v18  ;;  %v3626_v14 = vunpack.c.l.b16 %v3016_v24 }
 0x8b2   :  { %v3000_v22 = vrot.slane %v2995_v56, 4  ;;  %v3002_v44 = vrot.slane %v2983_v25, 4  ;;  %v2948_v63 = vrot.slane %v2943_v59, 4  ;;  %v2987_v52 = vperm.slane %v2979_v13, %v5431_v8 }
 0x8b3   :  { %v3650_v58 = vunpack.c.l.b16 %v3018_v20  ;;  %v2999_v34 = vperm.slane %v2991_v6, %v5431_v8  ;;  %v7219_v21 = vrot.slane %v6365_v42, 4  ;;  %v7220_v36 = vrot.slane %v6377_v9, 4 }
 0x8b4   :  { %v3001_v41 = vsel %vm424_vm8, %v3000_v22, %v2983_v25  ;;  %v3003_v11 = vsel %vm424_vm8, %v2995_v56, %v3002_v44  ;;  %v2949_v55 = vsel %vm424_vm8, %v2948_v63, %v2931_v26  ;;  %v2950_v54 = vrot.slane %v2931_v26, 4 }
 0x8b5   :  { %v2433_v61 = vsel %vm424_vm8, %v7219_v21, %v6373_v30  ;;  %v3017_v27 = vpack.c.bf16 %v3001_v41, %v3001_v41  ;;  %v3019_v39 = vpack.c.bf16 %v3003_v11, %v3003_v11  ;;  %v3004_v38 = vrot.slane %v2999_v34, 4 }
 0x8b6   :  { %v2439_v46 = vperm.slane %v2433_v61, %v5431_v8  ;;  %v3020_v15 = vpack.c.bf16 %v2949_v55, %v2949_v55  ;;  %v2445_v17 = vsel %vm424_vm8, %v7220_v36, %v6380_v31  ;;  %v3006_v35 = vrot.slane %v2987_v52, 4 }
 0x8b7   :  { %v3627_v32 = vunpack.c.l.b16 %v3017_v27  ;;  %v2451_v37 = vperm.slane %v2445_v17, %v5431_v8  ;;  %v3651_v10 = vunpack.c.l.b16 %v3019_v39  ;;  %v3005_v50 = vsel %vm424_vm8, %v3004_v38, %v2987_v52 }
 0x8b8   :  { %v3674_v33 = vunpack.c.l.b16 %v3020_v15  ;;  %v2458_v18 = vrot.slane %v2439_v46, 4  ;;  %v3021_v12 = vpack.c.bf16 %v3005_v50, %v3005_v50  ;;  %v2951_v5 = vsel %vm424_vm8, %v2943_v59, %v2950_v54 }
 0x8b9   :  { %v3628_v49 = vpack.c.b16 %v3627_v32, %v3626_v14  ;;  %v2456_v28 = vrot.slane %v2451_v37, 4  ;;  %v3652_v0 = vpack.c.b16 %v3651_v10, %v3650_v58  ;;  %v3007_v60 = vsel %vm424_vm8, %v2999_v34, %v3006_v35 }
 0x8ba   :  { %v3022_v56 = vpack.c.bf16 %v2951_v5, %v2951_v5  ;;  %v2459_v25 = vsel %vm424_vm8, %v2451_v37, %v2458_v18  ;;  %v3675_v26 = vunpack.c.l.b16 %v3021_v12  ;;  %v3023_v22 = vpack.c.bf16 %v3007_v60, %v3007_v60 }
 0x8bb   :  { %v3633_v24 = vsel %vm1156_vm9, %v3628_v49, 0  ;;  %v2457_v7 = vsel %vm424_vm8, %v2456_v28, %v2439_v46  ;;  %v3657_v20 = vsel %vm1156_vm9, %v3652_v0, 0  ;;  %v2521_v14 = vpack.c.bf16 %v2459_v25, %v2459_v25  ;;  %v2279_v25 = vld [vmem:[%s7168_s3] sm:$0x3] }
 0x8bc   :  { %3642 = vmatpush.bf16.xpose.msra.mxu1 %v3633_v24  ;;  %v2520_v13 = vpack.c.bf16 %v2457_v7, %v2457_v7  ;;  %v3698_v6 = vunpack.c.l.b16 %v3022_v56  ;;  %3666 = vmatpush.bf16.xpose.msra.mxu2 %v3657_v20  ;;  %v3676_v59 = vpack.c.b16 %v3675_v26, %v3674_v33  ;;  %v3699_v44 = vunpack.c.l.b16 %v3023_v22 }
 0x8bd   :  { %v2434_v63 = vrot.slane %v6373_v30, 4  ;;  %v7221_v52 = vrot.slane %v6380_v31, 4  ;;  %4779 = vmatmul.msk.bf16.vlgmr.msrb.gmra.mxu1 %vm1156_vm9, %v2521_v14  ;;  %v2490_v34 = vrot.slane %v6388_v62, 4  ;;  %v7222_v21 = vrot.slane %v6398_v57, 4 }
 0x8be   :  { %4778 = vmatmul.msk.bf16.vlgmr.msrb.gmra.mxu0 %vm1156_vm9, %v2520_v13  ;;  %v3681_v30 = vsel %vm1156_vm9, %v3676_v59, 0  ;;  %v3700_v27 = vpack.c.b16 %v3699_v44, %v3698_v6  ;;  %v2488_v11 = vrot.slane %v6391_v19, 4  ;;  %v7223_v17 = vrot.slane %v6404_v29, 4 }
 0x8bf   :  { %v2447_v41 = vsel %vm424_vm8, %v6377_v9, %v7221_v52  ;;  %v2503_v61 = vsel %vm424_vm8, %v6404_v29, %v7222_v21  ;;  %v2435_v31 = vsel %vm424_vm8, %v6365_v42, %v2434_v63  ;;  %3690 = vmatpush.bf16.xpose.msrb.mxu3 %v3681_v30  ;;  %v2491_v39 = vsel %vm424_vm8, %v6391_v19, %v2490_v34 }
 0x8c0   :  { %v2455_v58 = vperm.slane %v2447_v41, %v5431_v8  ;;  %v2511_v9 = vperm.slane %v2503_v61, %v5431_v8  ;;  %v2443_v55 = vperm.slane %v2435_v31, %v5431_v8  ;;  %v3705_v38 = vsel %vm1156_vm9, %v3700_v27, 0 }
 0x8c1   :  { %v2499_v15 = vperm.slane %v2491_v39, %v5431_v8  ;;  %v2501_v42 = vsel %vm424_vm8, %v7223_v17, %v6398_v57  ;;  %3714 = vmatpush.bf16.xpose.msrb.mxu0 %v3705_v38  ;;  %v2489_v19 = vsel %vm424_vm8, %v2488_v11, %v6388_v62  ;;  %v3722_v24 = vperm.slane %v2279_v25, 0 }
 0x8c2   :  { %v2460_v46 = vrot.slane %v2455_v58, 4  ;;  %v2516_v36 = vrot.slane %v2511_v9, 4  ;;  %v2507_v37 = vperm.slane %v2501_v42, %v5431_v8  ;;  %v2462_v50 = vrot.slane %v2443_v55, 4 }
 0x8c3   :  { %v2495_v57 = vperm.slane %v2489_v19, %v5431_v8  ;;  %v2518_v0 = vrot.slane %v2499_v15, 4  ;;  %v3721_v59 = vrot.slane %v2279_v25, 1 }
 0x8c4   :  { %v2461_v32 = vsel %vm424_vm8, %v2460_v46, %v2443_v55  ;;  %v2517_v35 = vsel %vm424_vm8, %v2516_v36, %v2499_v15  ;;  %v2512_v33 = vrot.slane %v2507_v37, 4  ;;  %v2463_v29 = vsel %vm424_vm8, %v2455_v58, %v2462_v50 }
 0x8c5   :  { %v2522_v54 = vpack.c.bf16 %v2461_v32, %v2461_v32  ;;  %v2526_v10 = vpack.c.bf16 %v2517_v35, %v2517_v35  ;;  %v2523_v49 = vpack.c.bf16 %v2463_v29, %v2463_v29  ;;  %v2514_v28 = vrot.slane %v2495_v57, 4  ;;  %v6594_v29 = vpop.permute.xlu2 %4976 }
 0x8c6   :  { %v2513_v18 = vsel %vm424_vm8, %v2512_v33, %v2495_v57  ;;  %v2519_v60 = vsel %vm424_vm8, %v2511_v9, %v2518_v0  ;;  %v3723_v63 = vperm.slane %v3721_v59, 0  ;;  %v5010_v50 = vpack.i.bf16 %v6146_v40, %v6097_v1  ;;  %v6590_v33 = vpop.permute.xlu0 %4981 }
 0x8c7   :  { %4780 = vmatmul.msk.bf16.vlgmr.msrb.gmra.mxu2 %vm1156_vm9, %v2522_v54  ;;  %4784 = vmatmul.msk.bf16.vlgmr.msrb.gmra.mxu3 %vm1156_vm9, %v2526_v10  ;;  %v2524_v12 = vpack.c.bf16 %v2513_v18, %v2513_v18  ;;  %v2515_v62 = vsel %vm424_vm8, %v2507_v37, %v2514_v28  ;;  %v2527_v56 = vpack.c.bf16 %v2519_v60, %v2519_v60 }
 0x8c8   :  { %v2525_v5 = vpack.c.bf16 %v2515_v62, %v2515_v62  ;;  %v5005_v10 = vpack.i.bf16 %v6148_v45, %v6099_v4 }
 0x8cd   :  { %4782 = vmatmul.msk.bf16.vlgmr.msra.gmra.mxu1 %vm1156_vm9, %v2524_v12  ;;  %v6598_v45 = vpop.permute.xlu2 %4991 }
 0x8ce   :  { %4781 = vmatmul.msk.bf16.vlgmr.msra.gmra.mxu0 %vm1156_vm9, %v2523_v49  ;;  %v4993_v25 = vunpack.i.l.bf16 %v6598_v45 }
 0x8cf   :  { %v6592_v57 = vpop.permute.xlu0 %4996  ;;  %v6596_v4 = vpop.permute.xlu1 %4986 }
 0x8d7   :  { %4783 = vmatmul.msk.bf16.vlgmr.msra.gmra.mxu2 %vm1156_vm9, %v2525_v5 }
 0x8de   :  { %4785 = vmatmul.msk.bf16.vlgmr.msrb.gmra.mxu0 %vm1156_vm9, %v2527_v56 }
 0x93a   :  { %v3572_v7 = vpop.f32.mrf.mxu1 }
 0x93b   :  { %v3548_v26 = vpop.f32.mrf.mxu0  ;;  %v3727_v22 = vadd.f32 %v3722_v24, %v3572_v7 }
 0x93c   :  { %v3726_v13 = vadd.f32 %v3722_v24, %v3548_v26  ;;  %v4978_v26 = vunpack.i.l.bf16 %v6594_v29 }
 0x93d   :  { %v3737_v20 = vsel %vm1816_vm12, %v3727_v22, -inf }
 0x93e   :  { %3738 = vmax.xlane.f32.xlu0 %v3737_v20  ;;  %v3734_v44 = vsel %vm1816_vm12, %v3726_v13, -inf }
 0x942   :  { %v3574_v14 = vpop.f32.mrf.mxu1 }
 0x943   :  { %v3550_v6 = vpop.f32.mrf.mxu0 }
 0x944   :  { %v3072_v6 = vrot.slane %v4993_v25, 4 }
 0x946   :  { %3735 = vmax.xlane.f32.xlu0 %v3734_v44 }
 0x94a   :  { %v3596_v52 = vpop.f32.mrf.mxu2  ;;  %v3692_v58 = vpop.f32.mrf.mxu3 }
 0x94b   :  { %v3728_v41 = vadd.f32 %v3722_v24, %v3596_v52  ;;  %v6567_v34 = vadd.f32 %v3723_v63, %v3692_v58  ;;  %v3620_v61 = vpop.f32.mrf.mxu0  ;;  %v3644_v30 = vpop.f32.mrf.mxu1 }
 0x94c   :  { %v6572_v31 = vadd.f32 %v3723_v63, %v3644_v30  ;;  %v3729_v11 = vadd.f32 %v3722_v24, %v3620_v61 }
 0x94d   :  { %v3740_v21 = vsel %vm1816_vm12, %v3728_v41, -inf  ;;  %v3752_v27 = vsel %vm1816_vm12, %v6567_v34, -inf }
 0x94e   :  { %3741 = vmax.xlane.f32.xlu1 %v3740_v21  ;;  %3753 = vmax.xlane.f32.xlu2 %v3752_v27  ;;  %v3746_v55 = vsel %vm1816_vm12, %v6572_v31, -inf  ;;  %v3743_v15 = vsel %vm1816_vm12, %v3729_v11, -inf }
 0x952   :  { %v3598_v9 = vpop.f32.mrf.mxu2  ;;  %v3694_v46 = vpop.f32.mrf.mxu3 }
 0x953   :  { %v3622_v39 = vpop.f32.mrf.mxu0  ;;  %v3646_v38 = vpop.f32.mrf.mxu1 }
 0x956   :  { %3747 = vmax.xlane.f32.xlu1 %v3746_v55  ;;  %3744 = vmax.xlane.f32.xlu2 %v3743_v15 }
 0x95a   :  { %v3668_v36 = vpop.f32.mrf.mxu2 }
 0x95b   :  { %v3731_v17 = vadd.f32 %v3723_v63, %v3668_v36  ;;  %v3716_v32 = vpop.f32.mrf.mxu0 }
 0x95c   :  { %v6578_v37 = vadd.f32 %v3723_v63, %v3716_v32  ;;  %v3073_v63 = vsel %vm424_vm8, %v3072_v6, %v4978_v26 }
 0x95d   :  { %v3749_v42 = vsel %vm1816_vm12, %v3731_v17, -inf  ;;  %v3079_v9 = vperm.slane %v3073_v63, %v5421_v48 }
 0x95e   :  { %3750 = vmax.xlane.f32.xlu1 %v3749_v42  ;;  %v3755_v54 = vsel %vm1816_vm12, %v6578_v37, -inf }
 0x95f   :  { %3756 = vmax.xlane.f32.xlu0 %v3755_v54 }
 0x962   :  { %v3670_v35 = vpop.f32.mrf.mxu2 }
 0x963   :  { %v3718_v19 = vpop.f32.mrf.mxu0 }
 0x96e   :  { %5006 = vrot.lane.b32.xlu2 %v5005_v10, %s5128_s28 }
 0x973   :  { %5001 = vrot.lane.b32.xlu0 %v6109_v47, %s5128_s28 }
 0x977   :  { %5011 = vrot.lane.b32.xlu1 %v5010_v50, %s5128_s28 }
 0x9b1   :  { %v3739_v18 = vpop.xlane.xlu0 %3738 }
 0x9b2   :  { %v3759_v49 = vsub.f32 %v3727_v22, %v3739_v18 }
 0x9b4   :  { %v3768_v12 = vmul.f32 1.442695, %v3759_v49 }
 0x9b6   :  { %5079 = vpow2.f32 %v3768_v12 }
 0x9b9   :  { %v3736_v28 = vpop.xlane.xlu0 %3735 }
 0x9ba   :  { %v3758_v60 = vsub.f32 %v3726_v13, %v3736_v28  ;;  %v3074_v13 = vrot.slane %v4978_v26, 4 }
 0x9bc   :  { %v6600_v1 = vpop.eup %5079  ;;  %v3766_v56 = vmul.f32 1.442695, %v3758_v60  ;;  %v3075_v52 = vsel %vm424_vm8, %v4993_v25, %v3074_v13 }
 0x9bd   :  { %v3785_v47 = vsel %vm1816_vm12, %v6600_v1, 0.0 }
 0x9be   :  { %3786 = vadd.xlane.f32.xlu0 %v3785_v47  ;;  %v4989_v47 = vunpack.i.h.bf16 %v6596_v4 }
 0x9c1   :  { %v3742_v40 = vpop.xlane.xlu1 %3741  ;;  %v3754_v5 = vpop.xlane.xlu2 %3753 }
 0x9c2   :  { %v3760_v62 = vsub.f32 %v3728_v41, %v3742_v40  ;;  %v3764_v14 = vsub.f32 %v6567_v34, %v3754_v5  ;;  %v4988_v41 = vunpack.i.l.bf16 %v6596_v4 }
 0x9c4   :  { %v3770_v0 = vmul.f32 1.442695, %v3760_v62  ;;  %v3778_v58 = vmul.f32 1.442695, %v3764_v14  ;;  %v3086_v38 = vrot.slane %v4988_v41, 4 }
 0x9c6   :  { %5081 = vpow2.f32 %v3770_v0 }
 0x9c7   :  { %5083 = vpow2.f32 %v3766_v56 }
 0x9c9   :  { %v3748_v24 = vpop.xlane.xlu1 %3747  ;;  %v3745_v7 = vpop.xlane.xlu2 %3744 }
 0x9ca   :  { %v3761_v20 = vsub.f32 %v3729_v11, %v3745_v7  ;;  %v3762_v34 = vsub.f32 %v6572_v31, %v3748_v24  ;;  %v3083_v11 = vperm.slane %v3075_v52, %v5421_v48  ;;  %v4994_v31 = vunpack.i.h.bf16 %v6598_v45 }
 0x9cc   :  { %v6606_v22 = vpop.eup %5081  ;;  %v3772_v44 = vmul.f32 1.442695, %v3761_v20  ;;  %v3774_v54 = vmul.f32 1.442695, %v3762_v34  ;;  %v3110_v50 = vrot.slane %v3083_v11, 4  ;;  %v3184_v25 = vrot.slane %v4994_v31, 4 }
 0x9cd   :  { %v3788_v59 = vsel %vm1816_vm12, %v6606_v22, 0.0  ;;  %v6614_v61 = vpop.eup %5083 }
 0x9ce   :  { %3789 = vadd.xlane.f32.xlu2 %v3788_v59  ;;  %5085 = vpow2.f32 %v3772_v44  ;;  %v3782_v15 = vsel %vm1816_vm12, %v6614_v61, 0.0  ;;  %v4984_v59 = vunpack.i.h.bf16 %v6590_v33  ;;  %v3142_v44 = vrot.slane %v4989_v47, 4 }
 0x9cf   :  { %5087 = vpow2.f32 %v3778_v58 }
 0x9d1   :  { %v3751_v21 = vpop.xlane.xlu1 %3750  ;;  %v5007_v27 = vpop.permute.xlu2 %5006 }
 0x9d2   :  { %v3763_v30 = vsub.f32 %v3731_v17, %v3751_v21  ;;  %v5008_v46 = vunpack.i.l.bf16 %v5007_v27  ;;  %v3757_v39 = vpop.xlane.xlu0 %3756  ;;  %v4979_v17 = vunpack.i.h.bf16 %v6594_v29  ;;  %v5009_v18 = vunpack.i.h.bf16 %v5007_v27 }
 0x9d3   :  { %v3765_v36 = vsub.f32 %v6578_v37, %v3757_v39  ;;  %v3098_v29 = vrot.slane %v3079_v9, 4 }
 0x9d4   :  { %v3776_v55 = vmul.f32 1.442695, %v3763_v30  ;;  %v6622_v42 = vpop.eup %5085  ;;  %v3084_v32 = vrot.slane %v5008_v46, 4  ;;  %v3087_v35 = vsel %vm424_vm8, %v5008_v46, %v3086_v38  ;;  %v3186_v45 = vrot.slane %v4979_v17, 4 }
 0x9d5   :  { %v3780_v19 = vmul.f32 1.442695, %v3765_v36  ;;  %v3791_v10 = vsel %vm1816_vm12, %v6622_v42, 0.0  ;;  %v3095_v49 = vperm.slane %v3087_v35, %v5421_v48  ;;  %v6634_v62 = vpop.eup %5087  ;;  %v3140_v24 = vrot.slane %v5009_v18, 4 }
 0x9d6   :  { %5089 = vpow2.f32 %v3776_v55  ;;  %3783 = vadd.xlane.f32.xlu2 %v3782_v15  ;;  %v3085_v37 = vsel %vm424_vm8, %v3084_v32, %v4988_v41  ;;  %3792 = vadd.xlane.f32.xlu1 %v3791_v10  ;;  %v3800_v63 = vsel %vm1816_vm12, %v6634_v62, 0.0  ;;  %v3185_v34 = vsel %vm424_vm8, %v3184_v25, %v4979_v17 }
 0x9d7   :  { %v3091_v12 = vperm.slane %v3085_v37, %v5421_v48  ;;  %5091 = vpow2.f32 %v3780_v19  ;;  %v3108_v40 = vrot.slane %v3095_v49, 4  ;;  %v3111_v28 = vsel %vm424_vm8, %v3095_v49, %v3110_v50 }
 0x9d8   :  { %5093 = vpow2.f32 %v3774_v54  ;;  %v3119_v60 = vperm.slane %v3111_v28, %v5431_v8  ;;  %v3187_v27 = vsel %vm424_vm8, %v4994_v31, %v3186_v45  ;;  %v3141_v46 = vsel %vm424_vm8, %v3140_v24, %v4989_v47 }
 0x9d9   :  { %v3096_v5 = vrot.slane %v3091_v12, 4  ;;  %v3099_v0 = vsel %vm424_vm8, %v3091_v12, %v3098_v29  ;;  %v3109_v7 = vsel %vm424_vm8, %v3108_v40, %v3083_v11  ;;  %v4983_v54 = vunpack.i.l.bf16 %v6590_v33 }
 0x9da   :  { %v3107_v26 = vperm.slane %v3099_v0, %v5431_v8  ;;  %v3115_v20 = vperm.slane %v3109_v7, %v5431_v8  ;;  %v3126_v6 = vrot.slane %v3119_v60, 4  ;;  %v3195_v35 = vperm.slane %v3187_v27, %v5421_v48 }
 0x9db   :  { %v3097_v4 = vsel %vm424_vm8, %v3096_v5, %v3079_v9  ;;  %v3143_v9 = vsel %vm424_vm8, %v5009_v18, %v3142_v44  ;;  %v4999_v19 = vunpack.i.h.bf16 %v6592_v57  ;;  %v3191_v50 = vperm.slane %v3185_v34, %v5421_v48 }
 0x9dc   :  { %v6638_v56 = vpop.eup %5089  ;;  %v3103_v13 = vperm.slane %v3097_v4, %v5431_v8  ;;  %v3122_v41 = vrot.slane %v3107_v26, 4  ;;  %v3124_v58 = vrot.slane %v3115_v20, 4  ;;  %v3127_v21 = vsel %vm424_vm8, 0.0, %v3126_v6 }
 0x9dd   :  { %v3797_v14 = vsel %vm1816_vm12, %v6638_v56, 0.0  ;;  %v6650_v52 = vpop.eup %5091  ;;  %v3301_v30 = vsel %vm424_vm8, %v3126_v6, %v3107_v26  ;;  %v3406_v32 = vrot.slane %v3127_v21, 4  ;;  %v4998_v18 = vunpack.i.l.bf16 %v6592_v57 }
 0x9de   :  { %3798 = vadd.xlane.f32.xlu0 %v3797_v14  ;;  %v6658_v11 = vperm.slane %v3301_v30, %v5421_v48  ;;  %3801 = vadd.xlane.f32.xlu1 %v3800_v63  ;;  %v6660_v55 = vpop.eup %5093  ;;  %v3120_v39 = vrot.slane %v3103_v13, 4  ;;  %v3296_v38 = vsel %vm424_vm8, %v3124_v58, %v3103_v13  ;;  %v3803_v15 = vsel %vm1816_vm12, %v6650_v52, 0.0 }
 0x9df   :  { %v3125_v36 = vsel %vm424_vm8, 0.0, %v3124_v58  ;;  %v6668_v17 = vperm.slane %v3296_v38, %v5421_v48  ;;  %3804 = vadd.xlane.f32.xlu2 %v3803_v15  ;;  %v3123_v10 = vsel %vm424_vm8, 0.0, %v3122_v41  ;;  %v3794_v37 = vsel %vm1816_vm12, %v6660_v55, 0.0 }
 0x9e0   :  { %v3316_v31 = vrot.slane %v6658_v11, 4  ;;  %v6680_v49 = vperm.slane %v3141_v46, %v5421_v48  ;;  %v6683_v29 = vperm.slane %v3143_v9, %v5421_v48  ;;  %v3400_v12 = vrot.slane %v3125_v36, 4 }
 0x9e1   :  { %v3242_v47 = vrot.slane %v4984_v59, 4  ;;  %v3121_v40 = vsel %vm424_vm8, 0.0, %v3120_v39  ;;  %v3407_v57 = vsel %vm424_vm8, %v3406_v32, %v3123_v10  ;;  %v3130_v28 = vrot.slane %v4983_v54, 4 }
 0x9e2   :  { %v3317_v45 = vsel %vm424_vm8, %v3316_v31, %v6668_v17  ;;  %v3222_v5 = vrot.slane %v3195_v35, 4  ;;  %v3254_v0 = vrot.slane %v4999_v19, 4  ;;  %v3210_v24 = vrot.slane %v3191_v50, 4 }
 0x9e3   :  { %v6692_v25 = vperm.slane %v3317_v45, %v5431_v8  ;;  %v3198_v26 = vrot.slane %v4998_v18, 4  ;;  %v3152_v20 = vrot.slane %v6680_v49, 4  ;;  %v3164_v6 = vrot.slane %v6683_v29, 4 }
 0x9e4   :  { %v6697_v14 = vsel %vm424_vm8, %v3400_v12, %v3121_v40  ;;  %v6700_v44 = vperm.slane %v3407_v57, %v5421_v48 }
 0x9e5   :  { %v5002_v60 = vpop.permute.xlu0 %5001  ;;  %v3342_v9 = vrot.slane %v6692_v25, 4 }
 0x9e6   :  { %3795 = vadd.xlane.f32.xlu0 %v3794_v37  ;;  %v5004_v7 = vunpack.i.h.bf16 %v5002_v60  ;;  %v5003_v4 = vunpack.i.l.bf16 %v5002_v60 }
 0x9e8   :  { %v3240_v58 = vrot.slane %v5004_v7, 4  ;;  %v3243_v21 = vsel %vm424_vm8, %v5004_v7, %v3242_v47  ;;  %v3128_v34 = vrot.slane %v5003_v4, 4  ;;  %v3131_v27 = vsel %vm424_vm8, %v5003_v4, %v3130_v28 }
 0x9e9   :  { %v5012_v13 = vpop.permute.xlu1 %5011  ;;  %v6704_v30 = vperm.slane %v3243_v21, %v5421_v48 }
 0x9ea   :  { %v5014_v63 = vunpack.i.h.bf16 %v5012_v13  ;;  %v5013_v41 = vunpack.i.l.bf16 %v5012_v13  ;;  %v3241_v32 = vsel %vm424_vm8, %v3240_v58, %v4984_v59  ;;  %v3129_v47 = vsel %vm424_vm8, %v3128_v34, %v4983_v54 }
 0x9eb   :  { %v3278_v10 = vrot.slane %v6704_v30, 4  ;;  %v3247_v45 = vperm.slane %v3241_v32, %v5421_v48  ;;  %v3135_v60 = vperm.slane %v3129_v47, %v5421_v48 }
 0x9ec   :  { %v3252_v46 = vrot.slane %v5014_v63, 4  ;;  %v3255_v39 = vsel %vm424_vm8, %v5014_v63, %v3254_v0  ;;  %v3196_v38 = vrot.slane %v5013_v41, 4  ;;  %v3199_v15 = vsel %vm424_vm8, %v5013_v41, %v3198_v26 }
 0x9ed   :  { %v6711_v36 = vperm.slane %v3255_v39, %v5421_v48  ;;  %v3207_v31 = vperm.slane %v3199_v15, %v5421_v48  ;;  %v3266_v59 = vrot.slane %v3247_v45, 4  ;;  %v3153_v41 = vsel %vm424_vm8, %v3152_v20, %v3135_v60 }
 0x9ee   :  { %v3253_v37 = vsel %vm424_vm8, %v3252_v46, %v4999_v19  ;;  %v3197_v12 = vsel %vm424_vm8, %v3196_v38, %v4998_v18  ;;  %v3139_v19 = vperm.slane %v3131_v27, %v5421_v48  ;;  %v3154_v58 = vrot.slane %v3135_v60, 4 }
 0x9ef   :  { %v3259_v40 = vperm.slane %v3253_v37, %v5421_v48  ;;  %v3276_v57 = vrot.slane %v6711_v36, 4  ;;  %v3203_v28 = vperm.slane %v3197_v12, %v5421_v48  ;;  %v3220_v0 = vrot.slane %v3207_v31, 4 }
 0x9f0   :  { %v3223_v33 = vsel %vm424_vm8, %v3207_v31, %v3222_v5  ;;  %v3159_v21 = vperm.slane %v3153_v41, %v5431_v8  ;;  %v3165_v34 = vsel %vm424_vm8, %v3164_v6, %v3139_v19  ;;  %v3155_v39 = vsel %vm424_vm8, %v6680_v49, %v3154_v58 }
 0x9f1   :  { %v3264_v26 = vrot.slane %v3259_v40, 4  ;;  %v3208_v18 = vrot.slane %v3203_v28, 4  ;;  %v3211_v7 = vsel %vm424_vm8, %v3203_v28, %v3210_v24  ;;  %v3221_v54 = vsel %vm424_vm8, %v3220_v0, %v3195_v35 }
 0x9f2   :  { %v3219_v4 = vperm.slane %v3211_v7, %v5431_v8  ;;  %v3227_v13 = vperm.slane %v3221_v54, %v5431_v8  ;;  %v3231_v63 = vperm.slane %v3223_v33, %v5431_v8  ;;  %v3166_v38 = vrot.slane %v3139_v19, 4 }
 0x9f3   :  { %v3209_v5 = vsel %vm424_vm8, %v3208_v18, %v3191_v50  ;;  %v3171_v15 = vperm.slane %v3165_v34, %v5431_v8  ;;  %v3176_v31 = vrot.slane %v3159_v21, 4  ;;  %v3163_v60 = vperm.slane %v3155_v39, %v5431_v8 }
 0x9f4   :  { %v3215_v27 = vperm.slane %v3209_v5, %v5431_v8  ;;  %v3234_v24 = vrot.slane %v3219_v4, 4  ;;  %v3236_v46 = vrot.slane %v3227_v13, 4  ;;  %v3238_v35 = vrot.slane %v3231_v63, 4 }
 0x9f5   :  { %v3167_v7 = vsel %vm424_vm8, %v6683_v29, %v3166_v38  ;;  %v3177_v54 = vsel %vm424_vm8, 0.0, %v3176_v31  ;;  %v3178_v41 = vrot.slane %v3163_v60, 4  ;;  %v3180_v5 = vrot.slane %v3171_v15, 4 }
 0x9f6   :  { %v3232_v20 = vrot.slane %v3215_v27, 4  ;;  %v3235_v50 = vsel %vm424_vm8, 0.0, %v3234_v24  ;;  %v3237_v32 = vsel %vm424_vm8, 0.0, %v3236_v46  ;;  %v3239_v37 = vsel %vm424_vm8, 0.0, %v3238_v35 }
 0x9f7   :  { %v3348_v6 = vsel %vm424_vm8, %v3236_v46, %v3215_v27  ;;  %v3353_v12 = vsel %vm424_vm8, %v3238_v35, %v3219_v4  ;;  %v3456_v47 = vrot.slane %v3237_v32, 4  ;;  %v3462_v28 = vrot.slane %v3239_v37, 4 }
 0x9f8   :  { %v3233_v0 = vsel %vm424_vm8, 0.0, %v3232_v20  ;;  %v6748_v49 = vperm.slane %v3348_v6, %v5421_v48  ;;  %v6751_v33 = vperm.slane %v3353_v12, %v5421_v48  ;;  %v3175_v63 = vperm.slane %v3167_v7, %v5431_v8 }
 0x9f9   :  { %v6755_v19 = vsel %vm424_vm8, %v3456_v47, %v3233_v0  ;;  %v3463_v18 = vsel %vm424_vm8, %v3462_v28, %v3235_v50  ;;  %v3265_v58 = vsel %vm424_vm8, %v3264_v26, %v3247_v45  ;;  %v3267_v34 = vsel %vm424_vm8, %v3259_v40, %v3266_v59 }
 0x9fa   :  { %v3368_v4 = vrot.slane %v6751_v33, 4  ;;  %v6763_v13 = vperm.slane %v3463_v18, %v5421_v48  ;;  %v3277_v27 = vsel %vm424_vm8, %v3276_v57, %v6704_v30  ;;  %v3179_v29 = vsel %vm424_vm8, 0.0, %v3178_v41 }
 0x9fb   :  { %v3182_v24 = vrot.slane %v3175_v63, 4  ;;  %v3271_v46 = vperm.slane %v3265_v58, %v5431_v8  ;;  %v3275_v35 = vperm.slane %v3267_v34, %v5431_v8  ;;  %v3181_v39 = vsel %vm424_vm8, 0.0, %v3180_v5 }
 0x9fc   :  { %v3279_v38 = vsel %vm424_vm8, %v6711_v36, %v3278_v10  ;;  %v3283_v45 = vperm.slane %v3277_v27, %v5431_v8  ;;  %v3306_v40 = vsel %vm424_vm8, %v3180_v5, %v3159_v21  ;;  %v3412_v32 = vrot.slane %v3181_v39, 4 }
 0x9fd   :  { %v3183_v57 = vsel %vm424_vm8, 0.0, %v3182_v24  ;;  %v3287_v59 = vperm.slane %v3279_v38, %v5431_v8  ;;  %v3288_v26 = vrot.slane %v3271_v46, 4  ;;  %v3290_v15 = vrot.slane %v3275_v35, 4 }
 0x9fe   :  { %v3292_v31 = vrot.slane %v3283_v45, 4  ;;  %v3310_v20 = vperm.slane %v3306_v40, %v5421_v48  ;;  %v3311_v50 = vsel %vm424_vm8, %v3182_v24, %v3163_v60  ;;  %v3413_v47 = vsel %vm424_vm8, %v3412_v32, %v3177_v54 }
 0x9ff   :  { %v3289_v30 = vsel %vm424_vm8, 0.0, %v3288_v26  ;;  %v3291_v36 = vsel %vm424_vm8, 0.0, %v3290_v15  ;;  %v3294_v10 = vrot.slane %v3287_v59, 4  ;;  %v3315_v37 = vperm.slane %v3311_v50, %v5421_v48 }
 0xa00   :  { %v3293_v21 = vsel %vm424_vm8, 0.0, %v3292_v31  ;;  %v3330_v6 = vrot.slane %v3310_v20, 4  ;;  %v3358_v12 = vsel %vm424_vm8, %v3292_v31, %v3271_v46  ;;  %v3418_v18 = vrot.slane %v3183_v57, 4 }
 0xa01   :  { %v3295_v28 = vsel %vm424_vm8, 0.0, %v3294_v10  ;;  %v3362_v0 = vperm.slane %v3358_v12, %v5421_v48  ;;  %v3363_v60 = vsel %vm424_vm8, %v3294_v10, %v3275_v35  ;;  %v3468_v63 = vrot.slane %v3293_v21, 4 }
 0xa02   :  { %v3367_v7 = vperm.slane %v3363_v60, %v5421_v48  ;;  %v3474_v41 = vrot.slane %v3295_v28, 4  ;;  %v3328_v5 = vrot.slane %v3315_v37, 4  ;;  %v3419_v34 = vsel %vm424_vm8, %v3418_v18, %v3179_v29 }
 0xa03   :  { %v3382_v58 = vrot.slane %v3362_v0, 4  ;;  %v3369_v27 = vsel %vm424_vm8, %v3368_v4, %v6748_v49  ;;  %v3318_v54 = vrot.slane %v6668_v17, 4  ;;  %v3469_v24 = vsel %vm424_vm8, %v3468_v63, %v3289_v30 }
 0xa04   :  { %v3475_v46 = vsel %vm424_vm8, %v3474_v41, %v3291_v36  ;;  %v3329_v35 = vsel %vm424_vm8, %v3328_v5, %v3310_v20  ;;  %v3375_v39 = vperm.slane %v3369_v27, %v5431_v8  ;;  %v3380_v45 = vrot.slane %v3367_v7, 4 }
 0xa05   :  { %v3335_v38 = vperm.slane %v3329_v35, %v5431_v8  ;;  %v3319_v40 = vsel %vm424_vm8, %v6658_v11, %v3318_v54  ;;  %v3331_v29 = vsel %vm424_vm8, %v3315_v37, %v3330_v6  ;;  %v3370_v59 = vrot.slane %v6748_v49, 4 }
 0xa06   :  { %v3394_v57 = vrot.slane %v3375_v39, 4  ;;  %v3327_v4 = vperm.slane %v3319_v40, %v5431_v8  ;;  %v3339_v17 = vperm.slane %v3331_v29, %v5431_v8  ;;  %v3381_v15 = vsel %vm424_vm8, %v3380_v45, %v3362_v0 }
 0xa07   :  { %v3343_v26 = vsel %vm424_vm8, %v3335_v38, %v3342_v9  ;;  %v3383_v31 = vsel %vm424_vm8, %v3367_v7, %v3382_v58  ;;  %v3340_v20 = vrot.slane %v3335_v38, 4  ;;  %v3387_v11 = vperm.slane %v3381_v15, %v5431_v8 }
 0xa08   :  { %v3514_v50 = vpack.c.bf16 %v3343_v26, %v3343_v26  ;;  %v3344_v32 = vrot.slane %v3339_v17, 4  ;;  %v3371_v30 = vsel %vm424_vm8, %v6751_v33, %v3370_v59  ;;  %v3391_v49 = vperm.slane %v3383_v31, %v5431_v8 }
 0xa09   :  { %v3379_v36 = vperm.slane %v3371_v30, %v5431_v8  ;;  %v3346_v10 = vrot.slane %v3327_v4, 4  ;;  %v3341_v9 = vsel %vm424_vm8, %v3340_v20, %v6692_v25  ;;  %v3395_v37 = vsel %vm424_vm8, %v3387_v11, %v3394_v57 }
 0xa0a   :  { %v3854_v21 = vunpack.c.l.b16 %v3514_v50  ;;  %v3345_v6 = vsel %vm424_vm8, %v3344_v32, %v3327_v4  ;;  %v3392_v12 = vrot.slane %v3387_v11, 4  ;;  %v3515_v28 = vpack.c.bf16 %v3395_v37, %v3395_v37 }
 0xa0b   :  { %v3396_v0 = vrot.slane %v3391_v49, 4  ;;  %v3516_v60 = vpack.c.bf16 %v3345_v6, %v3345_v6  ;;  %v3347_v18 = vsel %vm424_vm8, %v3339_v17, %v3346_v10  ;;  %v3398_v33 = vrot.slane %v3379_v36, 4 }
 0xa0c   :  { %v3518_v7 = vpack.c.bf16 %v3347_v18, %v3347_v18  ;;  %v3393_v63 = vsel %vm424_vm8, %v3392_v12, %v3375_v39  ;;  %v3512_v41 = vpack.c.bf16 %v3341_v9, %v3341_v9  ;;  %v3855_v5 = vunpack.c.l.b16 %v3515_v28 }
 0xa0d   :  { %v3397_v58 = vsel %vm424_vm8, %v3396_v0, %v3379_v36  ;;  %v3876_v25 = vunpack.c.l.b16 %v3516_v60  ;;  %v3513_v27 = vpack.c.bf16 %v3393_v63, %v3393_v63  ;;  %v3399_v35 = vsel %vm424_vm8, %v3391_v49, %v3398_v33 }
 0xa0e   :  { %v3517_v54 = vpack.c.bf16 %v3397_v58, %v3397_v58  ;;  %v3898_v38 = vunpack.c.l.b16 %v3518_v7  ;;  %v3832_v45 = vunpack.c.l.b16 %v3512_v41  ;;  %v3856_v40 = vpack.c.b16 %v3855_v5, %v3854_v21 }
 0xa0f   :  { %v3519_v29 = vpack.c.bf16 %v3399_v35, %v3399_v35  ;;  %v3833_v57 = vunpack.c.l.b16 %v3513_v27  ;;  %v3405_v4 = vperm.slane %v6697_v14, %v5421_v48  ;;  %v3417_v39 = vperm.slane %v3413_v47, %v5421_v48 }
 0xa10   :  { %v3877_v17 = vunpack.c.l.b16 %v3517_v54  ;;  %v3423_v59 = vperm.slane %v3419_v34, %v5421_v48  ;;  %v3424_v26 = vrot.slane %v6700_v44, 4  ;;  %3868 = vmatpush.bf16.msrb.mxu2 %v3856_v40  ;;  %v3461_v20 = vperm.slane %v6755_v19, %v5421_v48 }
 0xa11   :  { %v3899_v15 = vunpack.c.l.b16 %v3519_v29  ;;  %v3834_v31 = vpack.c.b16 %v3833_v57, %v3832_v45  ;;  %v3473_v11 = vperm.slane %v3469_v24, %v5421_v48  ;;  %v3479_v14 = vperm.slane %v3475_v46, %v5421_v48 }
 0xa12   :  { %v3878_v50 = vpack.c.b16 %v3877_v17, %v3876_v25  ;;  %v3425_v32 = vsel %vm424_vm8, %v3424_v26, %v3405_v4  ;;  %v3436_v30 = vrot.slane %v3423_v59, 4  ;;  %v3480_v34 = vrot.slane %v6763_v13, 4 }
 0xa13   :  { %v3900_v36 = vpack.c.b16 %v3899_v15, %v3898_v38  ;;  %3846 = vmatpush.bf16.msrb.mxu1 %v3834_v31  ;;  %v3431_v47 = vperm.slane %v3425_v32, %v5431_v8  ;;  %v3426_v49 = vrot.slane %v3405_v4, 4  ;;  %v3492_v9 = vrot.slane %v3479_v14, 4 }
 0xa14   :  { %3890 = vmatpush.bf16.msra.mxu3 %v3878_v50  ;;  %v3437_v10 = vsel %vm424_vm8, %v3436_v30, %v3417_v39  ;;  %v3438_v19 = vrot.slane %v3417_v39, 4  ;;  %v3482_v37 = vrot.slane %v3461_v20, 4  ;;  %v3481_v6 = vsel %vm424_vm8, %v3480_v34, %v3461_v20 }
 0xa15   :  { %3912 = vmatpush.bf16.msra.mxu0 %v3900_v36  ;;  %v3443_v24 = vperm.slane %v3437_v10, %v5431_v8  ;;  %v3450_v21 = vrot.slane %v3431_v47, 4  ;;  %v3427_v46 = vsel %vm424_vm8, %v6700_v44, %v3426_v49  ;;  %v3487_v12 = vperm.slane %v3481_v6, %v5431_v8 }
 0xa16   :  { %v3493_v28 = vsel %vm424_vm8, %v3492_v9, %v3473_v11  ;;  %v3435_v0 = vperm.slane %v3427_v46, %v5431_v8  ;;  %v3439_v60 = vsel %vm424_vm8, %v3423_v59, %v3438_v19  ;;  %v3483_v63 = vsel %vm424_vm8, %v6763_v13, %v3482_v37 }
 0xa17   :  { %v3451_v18 = vsel %vm424_vm8, %v3443_v24, %v3450_v21  ;;  %v3499_v33 = vperm.slane %v3493_v28, %v5431_v8  ;;  %v3447_v7 = vperm.slane %v3439_v60, %v5431_v8  ;;  %v3506_v41 = vrot.slane %v3487_v12, 4 }
 0xa18   :  { %v3522_v5 = vpack.c.bf16 %v3451_v18, %v3451_v18  ;;  %v3491_v44 = vperm.slane %v3483_v63, %v5431_v8  ;;  %v3494_v58 = vrot.slane %v3473_v11, 4  ;;  %v3454_v27 = vrot.slane %v3435_v0, 4 }
 0xa19   :  { %v3452_v25 = vrot.slane %v3447_v7, 4  ;;  %v3448_v54 = vrot.slane %v3443_v24, 4  ;;  %v3504_v35 = vrot.slane %v3499_v33, 4  ;;  %v3507_v38 = vsel %vm424_vm8, %v3499_v33, %v3506_v41 }
 0xa1a   :  { %v3942_v45 = vunpack.c.l.b16 %v3522_v5  ;;  %v3495_v40 = vsel %vm424_vm8, %v3479_v14, %v3494_v58  ;;  %v3510_v29 = vrot.slane %v3491_v44, 4  ;;  %v3523_v57 = vpack.c.bf16 %v3507_v38, %v3507_v38 }
 0xa1b   :  { %v3453_v4 = vsel %vm424_vm8, %v3452_v25, %v3435_v0  ;;  %v3503_v13 = vperm.slane %v3495_v40, %v5431_v8  ;;  %v3455_v17 = vsel %vm424_vm8, %v3447_v7, %v3454_v27  ;;  %v3449_v26 = vsel %vm424_vm8, %v3448_v54, %v3431_v47 }
 0xa1c   :  { %v3524_v39 = vpack.c.bf16 %v3453_v4, %v3453_v4  ;;  %v3526_v59 = vpack.c.bf16 %v3455_v17, %v3455_v17  ;;  %v3505_v15 = vsel %vm424_vm8, %v3504_v35, %v3487_v12  ;;  %v3943_v31 = vunpack.c.l.b16 %v3523_v57 }
 0xa1d   :  { %v3508_v20 = vrot.slane %v3503_v13, 4  ;;  %v3511_v11 = vsel %vm424_vm8, %v3503_v13, %v3510_v29  ;;  %v3520_v50 = vpack.c.bf16 %v3449_v26, %v3449_v26  ;;  %v3521_v30 = vpack.c.bf16 %v3505_v15, %v3505_v15 }
 0xa1e   :  { %v3527_v32 = vpack.c.bf16 %v3511_v11, %v3511_v11  ;;  %v3944_v14 = vpack.c.b16 %v3943_v31, %v3942_v45  ;;  %v3964_v34 = vunpack.c.l.b16 %v3524_v39  ;;  %v3986_v9 = vunpack.c.l.b16 %v3526_v59 }
 0xa1f   :  { %v3509_v36 = vsel %vm424_vm8, %v3508_v20, %v3491_v44  ;;  %v3920_v49 = vunpack.c.l.b16 %v3520_v50  ;;  %v3921_v37 = vunpack.c.l.b16 %v3521_v30 }
 0xa20   :  { %v3525_v10 = vpack.c.bf16 %v3509_v36, %v3509_v36  ;;  %v3987_v19 = vunpack.c.l.b16 %v3527_v32  ;;  %3956 = vmatpush.bf16.msra.mxu2 %v3944_v14 }
 0xa21   :  { %v3922_v21 = vpack.c.b16 %v3921_v37, %v3920_v49 }
 0xa22   :  { %v3965_v47 = vunpack.c.l.b16 %v3525_v10  ;;  %v3988_v24 = vpack.c.b16 %v3987_v19, %v3986_v9 }
 0xa23   :  { %3934 = vmatpush.bf16.msra.mxu1 %v3922_v21 }
 0xa24   :  { %v3966_v6 = vpack.c.b16 %v3965_v47, %v3964_v34  ;;  %4000 = vmatpush.bf16.msrb.mxu0 %v3988_v24 }
 0xa26   :  { %3978 = vmatpush.bf16.msrb.mxu3 %v3966_v6 }
 0xa31   :  { %v3787_v46 = vpop.xlane.xlu0 %3786 }
 0xa32   :  { %5095 = vrcp.f32 %v3787_v46 }
 0xa38   :  { %v5096_v12 = vpop.eup %5095 }
 0xa39   :  { %v3815_v28 = vmul.f32 %v5096_v12, %v6600_v1 }
 0xa3b   :  { %v3823_v0 = vpack.c.bf16 %v3815_v28, %v3815_v28 }
 0xa3d   :  { %4787 = vmatmul.msk.bf16.vlgmr.msrb.gmra.mxu2 %vm1816_vm12, %v3823_v0 }
 0xa41   :  { %v3790_v60 = vpop.xlane.xlu2 %3789 }
 0xa42   :  { %5097 = vrcp.f32 %v3790_v60 }
 0xa48   :  { %v5098_v18 = vpop.eup %5097 }
 0xa49   :  { %v3816_v33 = vmul.f32 %v5098_v18, %v6606_v22  ;;  %v3784_v7 = vpop.xlane.xlu2 %3783  ;;  %v3793_v41 = vpop.xlane.xlu1 %3792 }
 0xa4a   :  { %5099 = vrcp.f32 %v3784_v7 }
 0xa4b   :  { %v3824_v63 = vpack.c.bf16 %v3816_v33, %v3816_v33  ;;  %5101 = vrcp.f32 %v3793_v41 }
 0xa4d   :  { %4788 = vmatmul.msk.bf16.vlgmr.msra.gmra.mxu3 %vm1816_vm12, %v3824_v63 }
 0xa50   :  { %v5100_v5 = vpop.eup %5099 }
 0xa51   :  { %v3814_v44 = vmul.f32 %v5100_v5, %v6614_v61  ;;  %v3799_v58 = vpop.xlane.xlu0 %3798  ;;  %v5102_v1 = vpop.eup %5101 }
 0xa52   :  { %5103 = vrcp.f32 %v3799_v58  ;;  %v3817_v27 = vmul.f32 %v5102_v1, %v6622_v42  ;;  %v3802_v54 = vpop.xlane.xlu1 %3801  ;;  %v3805_v22 = vpop.xlane.xlu2 %3804 }
 0xa53   :  { %v3822_v25 = vpack.c.bf16 %v3814_v44, %v3814_v44  ;;  %5105 = vrcp.f32 %v3802_v54 }
 0xa54   :  { %v3825_v35 = vpack.c.bf16 %v3817_v27, %v3817_v27  ;;  %5107 = vrcp.f32 %v3805_v22 }
 0xa55   :  { %4786 = vmatmul.msk.bf16.vlgmr.msrb.gmra.mxu1 %vm1816_vm12, %v3822_v25 }
 0xa56   :  { %4789 = vmatmul.msk.bf16.vlgmr.msra.gmra.mxu0 %vm1816_vm12, %v3825_v35 }
 0xa58   :  { %v5104_v38 = vpop.eup %5103 }
 0xa59   :  { %v3819_v45 = vmul.f32 %v5104_v38, %v6638_v56  ;;  %v3796_v40 = vpop.xlane.xlu0 %3795  ;;  %v5106_v61 = vpop.eup %5105 }
 0xa5a   :  { %5109 = vrcp.f32 %v3796_v40  ;;  %v3820_v57 = vmul.f32 %v5106_v61, %v6634_v62  ;;  %v5108_v42 = vpop.eup %5107 }
 0xa5b   :  { %v3827_v29 = vpack.c.bf16 %v3819_v45, %v3819_v45  ;;  %v3821_v17 = vmul.f32 %v5108_v42, %v6650_v52 }
 0xa5c   :  { %v3828_v4 = vpack.c.bf16 %v3820_v57, %v3820_v57 }
 0xa5d   :  { %4791 = vmatmul.msk.bf16.vlgmr.msra.gmra.mxu2 %vm1816_vm12, %v3827_v29  ;;  %v3829_v26 = vpack.c.bf16 %v3821_v17, %v3821_v17 }
 0xa5e   :  { %4792 = vmatmul.msk.bf16.vlgmr.msrb.gmra.mxu3 %vm1816_vm12, %v3828_v4 }
 0xa60   :  { %v5110_v13 = vpop.eup %5109 }
 0xa61   :  { %v3818_v39 = vmul.f32 %v5110_v13, %v6660_v55 }
 0xa63   :  { %v3826_v59 = vpack.c.bf16 %v3818_v39, %v3818_v39 }
 0xa65   :  { %4790 = vmatmul.msk.bf16.vlgmr.msra.gmra.mxu1 %vm1816_vm12, %v3826_v59 }
 0xa66   :  { %4793 = vmatmul.msk.bf16.vlgmr.msrb.gmra.mxu0 %vm1816_vm12, %v3829_v26 }
 0xac0   :  { %v3870_v56 = vpop.f32.mrf.mxu2 }
 0xac1   :  { %v4020_v11 = vrot.slane %v3870_v56, 4 }
 0xac8   :  { %v3872_v15 = vpop.f32.mrf.mxu2 }
 0xad0   :  { %v3892_v62 = vpop.f32.mrf.mxu3 }
 0xad1   :  { %v4006_v31 = vrot.slane %v3892_v62, 4 }
 0xad2   :  { %v3848_v20 = vpop.f32.mrf.mxu1 }
 0xad3   :  { %v4007_v50 = vsel %vm424_vm8, %v4006_v31, %v3848_v20  ;;  %v4008_v32 = vrot.slane %v3848_v20, 4  ;;  %v3914_v52 = vpop.f32.mrf.mxu0 }
 0xad4   :  { %v4013_v30 = vperm.slane %v4007_v50, %v5421_v48  ;;  %v4018_v14 = vrot.slane %v3914_v52, 4  ;;  %v4021_v36 = vsel %vm424_vm8, %v3914_v52, %v4020_v11 }
 0xad5   :  { %v4009_v55 = vsel %vm424_vm8, %v3892_v62, %v4008_v32  ;;  %v4029_v49 = vperm.slane %v4021_v36, %v5421_v48 }
 0xad6   :  { %v4017_v34 = vperm.slane %v4009_v55, %v5421_v48  ;;  %v4019_v10 = vsel %vm424_vm8, %v4018_v14, %v3870_v56  ;;  %v4032_v9 = vrot.slane %v4013_v30, 4 }
 0xad7   :  { %v4025_v37 = vperm.slane %v4019_v10, %v5421_v48  ;;  %v4042_v47 = vrot.slane %v4029_v49, 4 }
 0xad8   :  { %v4044_v19 = vrot.slane %v4017_v34, 4  ;;  %v3894_v24 = vpop.f32.mrf.mxu3 }
 0xad9   :  { %v4030_v21 = vrot.slane %v4025_v37, 4  ;;  %v4033_v6 = vsel %vm424_vm8, %v4025_v37, %v4032_v9  ;;  %v4043_v46 = vsel %vm424_vm8, %v4042_v47, %v4017_v34 }
 0xada   :  { %v4045_v12 = vsel %vm424_vm8, %v4029_v49, %v4044_v19  ;;  %v3850_v28 = vpop.f32.mrf.mxu1  ;;  %v4041_v0 = vperm.slane %v4033_v6, %v5431_v8  ;;  %v4049_v18 = vperm.slane %v4043_v46, %v5431_v8 }
 0xadb   :  { %v4031_v60 = vsel %vm424_vm8, %v4030_v21, %v4013_v30  ;;  %v4053_v33 = vperm.slane %v4045_v12, %v5431_v8  ;;  %v3916_v7 = vpop.f32.mrf.mxu0 }
 0xadc   :  { %v4037_v63 = vperm.slane %v4031_v60, %v5431_v8  ;;  %v4056_v41 = vrot.slane %v4041_v0, 4  ;;  %v4058_v5 = vrot.slane %v4049_v18, 4 }
 0xadd   :  { %v4060_v44 = vrot.slane %v4053_v33, 4 }
 0xade   :  { %v4054_v25 = vrot.slane %v4037_v63, 4  ;;  %v4057_v27 = vsel %vm424_vm8, 0.0, %v4056_v41  ;;  %v4059_v38 = vsel %vm424_vm8, 0.0, %v4058_v5 }
 0xadf   :  { %v4061_v45 = vsel %vm424_vm8, 0.0, %v4060_v44  ;;  %v4130_v29 = vrot.slane %v4057_v27, 4  ;;  %v4174_v26 = vrot.slane %v4059_v38, 4 }
 0xae0   :  { %v3958_v58 = vpop.f32.mrf.mxu2  ;;  %v4055_v13 = vsel %vm424_vm8, 0.0, %v4054_v25  ;;  %v4186_v62 = vrot.slane %v4061_v45, 4 }
 0xae1   :  { %v4076_v1 = vrot.slane %v3958_v58, 4  ;;  %v3980_v54 = vpop.f32.mrf.mxu3  ;;  %v4118_v32 = vrot.slane %v4055_v13, 4  ;;  %v4131_v52 = vsel %vm424_vm8, %v4130_v29, %v4041_v0  ;;  %v4175_v10 = vsel %vm424_vm8, %v4174_v26, %v4049_v18 }
 0xae2   :  { %v3936_v35 = vpop.f32.mrf.mxu1  ;;  %v4062_v22 = vrot.slane %v3980_v54, 4  ;;  %v4187_v47 = vsel %vm424_vm8, %v4186_v62, %v4053_v33  ;;  %v4135_v60 = vperm.slane %v4131_v52, %v5421_v48  ;;  %v4179_v18 = vperm.slane %v4175_v10, %v5421_v48 }
 0xae3   :  { %v4064_v40 = vrot.slane %v3936_v35, 4  ;;  %v4002_v61 = vpop.f32.mrf.mxu0  ;;  %v4119_v0 = vsel %vm424_vm8, %v4118_v32, %v4037_v63  ;;  %v4191_v41 = vperm.slane %v4187_v47, %v5421_v48 }
 0xae4   :  { %v4063_v57 = vsel %vm424_vm8, %v4062_v22, %v3936_v35  ;;  %v4074_v4 = vrot.slane %v4002_v61, 4  ;;  %v4077_v42 = vsel %vm424_vm8, %v4002_v61, %v4076_v1  ;;  %v4123_v27 = vperm.slane %v4119_v0, %v5421_v48 }
 0xae5   :  { %v4065_v17 = vsel %vm424_vm8, %v3980_v54, %v4064_v40  ;;  %v4069_v39 = vperm.slane %v4063_v57, %v5421_v48  ;;  %v4085_v59 = vperm.slane %v4077_v42, %v5421_v48  ;;  %v4156_v45 = vrot.slane %v4135_v60, 4 }
 0xae6   :  { %v4073_v56 = vperm.slane %v4065_v17, %v5421_v48  ;;  %v4075_v15 = vsel %vm424_vm8, %v4074_v4, %v3958_v58  ;;  %v4200_v57 = vrot.slane %v4179_v18, 4  ;;  %v4212_v4 = vrot.slane %v4191_v41, 4 }
 0xae7   :  { %v4088_v31 = vrot.slane %v4069_v39, 4  ;;  %v4081_v20 = vperm.slane %v4075_v15, %v5421_v48  ;;  %v4098_v11 = vrot.slane %v4085_v59, 4  ;;  %v4144_v17 = vrot.slane %v4123_v27, 4 }
 0xae8   :  { %v3960_v50 = vpop.f32.mrf.mxu2  ;;  %v4100_v30 = vrot.slane %v4073_v56, 4 }
 0xae9   :  { %v4086_v55 = vrot.slane %v4081_v20, 4  ;;  %v4089_v14 = vsel %vm424_vm8, %v4081_v20, %v4088_v31  ;;  %v4099_v36 = vsel %vm424_vm8, %v4098_v11, %v4073_v56  ;;  %v3982_v34 = vpop.f32.mrf.mxu3 }
 0xaea   :  { %v3938_v49 = vpop.f32.mrf.mxu1  ;;  %v4097_v9 = vperm.slane %v4089_v14, %v5431_v8  ;;  %v4101_v19 = vsel %vm424_vm8, %v4085_v59, %v4100_v30  ;;  %v4105_v37 = vperm.slane %v4099_v36, %v5431_v8 }
 0xaeb   :  { %v4087_v24 = vsel %vm424_vm8, %v4086_v55, %v4069_v39  ;;  %v4109_v21 = vperm.slane %v4101_v19, %v5431_v8  ;;  %v4004_v6 = vpop.f32.mrf.mxu0 }
 0xaec   :  { %v4093_v46 = vperm.slane %v4087_v24, %v5431_v8  ;;  %v4112_v12 = vrot.slane %v4097_v9, 4  ;;  %v4114_v28 = vrot.slane %v4105_v37, 4 }
 0xaed   :  { %v4116_v7 = vrot.slane %v4109_v21, 4 }
 0xaee   :  { %v4110_v5 = vrot.slane %v4093_v46, 4  ;;  %v4113_v33 = vsel %vm424_vm8, 0.0, %v4112_v12  ;;  %v4115_v44 = vsel %vm424_vm8, 0.0, %v4114_v28 }
 0xaef   :  { %v4117_v58 = vsel %vm424_vm8, 0.0, %v4116_v7  ;;  %v4136_v1 = vrot.slane %v4113_v33, 4  ;;  %v4180_v25 = vrot.slane %v4115_v44, 4 }
 0xaf0   :  { %v4111_v63 = vsel %vm424_vm8, 0.0, %v4110_v5  ;;  %v4192_v54 = vrot.slane %v4117_v58, 4 }
 0xaf1   :  { %v4124_v35 = vrot.slane %v4111_v63, 4  ;;  %v4137_v22 = vsel %vm424_vm8, %v4136_v1, %v4097_v9  ;;  %v4181_v38 = vsel %vm424_vm8, %v4180_v25, %v4105_v37  ;;  %v4837_v25 = vld [vmem:[%s7170_s14] sm:$0xff] }
 0xaf2   :  { %v4193_v40 = vsel %vm424_vm8, %v4192_v54, %v4109_v21  ;;  %v4141_v61 = vperm.slane %v4137_v22, %v5421_v48  ;;  %v4185_v29 = vperm.slane %v4181_v38, %v5421_v48 }
 0xaf3   :  { %v4197_v42 = vperm.slane %v4193_v40, %v5421_v48  ;;  %v4125_v13 = vsel %vm424_vm8, %v4124_v35, %v4093_v46 }
 0xaf4   :  { %v4129_v39 = vperm.slane %v4125_v13, %v5421_v48  ;;  %v4157_v59 = vsel %vm424_vm8, %v4141_v61, %v4156_v45  ;;  %v4201_v26 = vsel %vm424_vm8, %v4185_v29, %v4200_v57  ;;  %v4154_v56 = vrot.slane %v4141_v61, 4 }
 0xaf5   :  { %v4165_v15 = vperm.slane %v4157_v59, %v5431_v8  ;;  %v4209_v62 = vperm.slane %v4201_v26, %v5431_v8  ;;  %v4213_v31 = vsel %vm424_vm8, %v4197_v42, %v4212_v4  ;;  %v4198_v20 = vrot.slane %v4185_v29, 4  ;;  %v5034_v59 = vld [vmem:[%s7169_s15] ss:$0 sm:$0xff] }
 0xaf6   :  { %v4145_v11 = vsel %vm424_vm8, %v4129_v39, %v4144_v17  ;;  %v4221_v50 = vperm.slane %v4213_v31, %v5431_v8  ;;  %v4142_v32 = vrot.slane %v4129_v39, 4  ;;  %v4155_v30 = vsel %vm424_vm8, %v4154_v56, %v4135_v60 }
 0xaf7   :  { %v4153_v48 = vperm.slane %v4145_v11, %v5431_v8  ;;  %v4170_v52 = vrot.slane %v4165_v15, 4  ;;  %v4228_v55 = vrot.slane %v4209_v62, 4  ;;  %v4199_v34 = vsel %vm424_vm8, %v4198_v20, %v4179_v18 }
 0xaf8   :  { %v4226_v14 = vrot.slane %v4221_v50, 4  ;;  %v4143_v36 = vsel %vm424_vm8, %v4142_v32, %v4123_v27  ;;  %v4210_v49 = vrot.slane %v4197_v42, 4  ;;  %v4161_v37 = vperm.slane %v4155_v30, %v5431_v8 }
 0xaf9   :  { %v4171_v10 = vsel %vm424_vm8, %v4170_v52, %v4153_v48  ;;  %v4172_v9 = vrot.slane %v4153_v48, 4  ;;  %v4149_v19 = vperm.slane %v4143_v36, %v5431_v8  ;;  %v4229_v24 = vsel %vm424_vm8, %v4221_v50, %v4228_v55 }
 0xafa   :  { %v4227_v47 = vsel %vm424_vm8, %v4226_v14, %v4209_v62  ;;  %v4205_v21 = vperm.slane %v4199_v34, %v5431_v8  ;;  %v4211_v6 = vsel %vm424_vm8, %v4210_v49, %v4191_v41  ;;  %v4166_v41 = vrot.slane %v4161_v37, 4  ;;  %v7224_v14 = vld [vmem:[#allocation7_spill] sm:$0xff] }
 0xafb   :  { %v5020_v46 = vpack.i.bf16 %v4227_v47, %v4171_v10  ;;  %v4173_v12 = vsel %vm424_vm8, %v4165_v15, %v4172_v9  ;;  %v4168_v28 = vrot.slane %v4149_v19, 4  ;;  %v4217_v0 = vperm.slane %v4211_v6, %v5431_v8  ;;  %v4838_v8 = vld [vmem:[%s7170_s14 + $0x8] sm:$0xff]  ;;  %v7227_v47 = vld [vmem:[#allocation4_spill] sm:$0xff] }
 0xafc   :  { %v5025_v60 = vpack.i.bf16 %v4229_v24, %v4173_v12  ;;  %v4224_v18 = vrot.slane %v4205_v21, 4  ;;  %v4167_v58 = vsel %vm424_vm8, %v4166_v41, %v4149_v19  ;;  %4290 = vmatpush.bf16.msrb.mxu1 %v4838_v8  ;;  %v7225_v10 = vld [vmem:[#allocation2_spill] sm:$0xff]  ;;  %v7226_v19 = vld [vmem:[#allocation3_spill] sm:$0xff] }
 0xafd   :  { %5021 = vrot.lane.b32.xlu2 %v5020_v46, %s5136_s24  ;;  %v4169_v7 = vsel %vm424_vm8, %v4161_v37, %v4168_v28  ;;  %v4222_v44 = vrot.slane %v4217_v0, 4  ;;  %v7229_v46 = vld [vmem:[#allocation6_spill] sm:$0xff] }
 0xafe   :  { %5026 = vrot.lane.b32.xlu0 %v5025_v60, %s5135_s20  ;;  %v4225_v5 = vsel %vm424_vm8, %v4217_v0, %v4224_v18 }
 0xaff   :  { %v5015_v33 = vpack.i.bf16 %v4225_v5, %v4169_v7  ;;  %v4223_v1 = vsel %vm424_vm8, %v4222_v44, %v4205_v21  ;;  %v7228_v21 = vld [vmem:[#allocation5_spill] sm:$0xff] }
 0xb00   :  { %4291 = vmatpush.bf16.msrb.mxu1 %v4837_v25 }
 0xb01   :  { %5016 = vrot.lane.b32.xlu1 %v5015_v33, %s5137_s5 }
 0xb57   :  { %v5022_v27 = vpop.permute.xlu2 %5021 }
 0xb58   :  { %v5024_v38 = vunpack.i.h.bf16 %v5022_v27  ;;  %v5023_v45 = vunpack.i.l.bf16 %v5022_v27 }
 0xb70   :  { %v5027_v63 = vpop.permute.xlu0 %5026 }
 0xb71   :  { %v5029_v40 = vunpack.i.h.bf16 %v5027_v63  ;;  %v5028_v61 = vunpack.i.l.bf16 %v5027_v63 }
 0xb73   :  { %v5017_v54 = vpop.permute.xlu1 %5016 }
 0xb74   :  { %v5019_v35 = vunpack.i.h.bf16 %v5017_v54  ;;  %v5018_v22 = vunpack.i.l.bf16 %v5017_v54 }
 0xb76   :  { %v4255_v29 = vsel %vm1156_vm9, %v4223_v1, %v5019_v35  ;;  %v4254_v57 = vsel %vm1156_vm9, %v4167_v58, %v5018_v22 }
 0xb77   :  { %v4257_v4 = vsel %vm1816_vm12, %v4255_v29, %v5024_v38  ;;  %v4256_v42 = vsel %vm1816_vm12, %v4254_v57, %v5023_v45 }
 0xb78   :  { %v4259_v13 = vsel %vm1819_vm13, %v4257_v4, %v5029_v40  ;;  %v4258_v17 = vsel %vm1819_vm13, %v4256_v42, %v5028_v61 }
 0xb79   :  { %v4260_v39 = vpack.c.bf16 %v4259_v13, %v4258_v17 }
 0xb7b   :  { %4802 = vmatmul.msk.bf16.vlgmr.msrb.gmra.mxu1 %vm109_vm0, %v4260_v39 }
 0xbf8   :  { %v4293_v26 = vpop.f32.mrf.mxu1 }
 0xbf9   :  { %v4294_v56 = vadd.f32 %v5034_v59, %v4293_v26 }
 0xbfb   :  { %v4300_v15 = vrot.slane %v4294_v56, 2  ;;  %v4301_v62 = vrot.slane %v4294_v56, 4  ;;  %v4302_v31 = vrot.slane %v4294_v56, 6  ;;  %v6979_v20 = vadd.f32 %v4294_v56, %v5896_v16  ;;  %v4840_v56 = vld [vmem:[%s7172_s16 + $0x8] sm:$0xff] }
 0xbfc   :  { %4609 = vmatpush.bf16.msrb.mxu2 %v4840_v56 }
 0xbfd   :  { %v6982_v11 = vadd.f32 %v4300_v15, %v5899_v23  ;;  %v6985_v50 = vadd.f32 %v4301_v62, %v5902_v51  ;;  %v6988_v32 = vadd.f32 %v4302_v31, %v5905_v53  ;;  %4328 = vst [vmem:[#allocation1] ss:$4 sm:$0xff] %v6979_v20 }
 0xbff   :  { %4330 = vst [vmem:[#allocation1 + $0x1] ss:$4 sm:$0xff] %v6982_v11 }
 0xc00   :  { %4332 = vst [vmem:[#allocation1 + $0x2] ss:$4 sm:$0xff] %v6985_v50  ;;  %v4295_v30 = vpop.f32.mrf.mxu1 }
 0xc01   :  { %4334 = vst [vmem:[#allocation1 + $0x3] ss:$4 sm:$0xff] %v6988_v32  ;;  %v4296_v16 = vadd.f32 %v5034_v59, %v4295_v30  ;;  %v4839_v30 = vld [vmem:[%s7172_s16] sm:$0xff] }
 0xc02   :  { %4610 = vmatpush.bf16.msrb.mxu2 %v4839_v30 }
 0xc03   :  { %v4303_v48 = vrot.slane %v4296_v16, 2  ;;  %v4304_v52 = vrot.slane %v4296_v16, 4  ;;  %v4305_v23 = vrot.slane %v4296_v16, 6  ;;  %v6995_v55 = vadd.f32 %v4296_v16, %v5912_v43 }
 0xc05   :  { %v6998_v51 = vadd.f32 %v4303_v48, %v5915_v2  ;;  %v7001_v53 = vadd.f32 %v4304_v52, %v5918_v3  ;;  %v7004_v36 = vadd.f32 %v4305_v23, %v7224_v14  ;;  %4336 = vst [vmem:[#allocation1 + $0x20] ss:$4 sm:$0xff] %v6995_v55  ;;  %v5121_v52 = vld [vmem:[%s7205_s23] sm:$0x7] }
 0xc06   :  { %v4520_v23 = vperm.slane %v5121_v52, 2 }
 0xc07   :  { %4338 = vst [vmem:[#allocation1 + $0x21] ss:$4 sm:$0xff] %v6998_v51 }
 0xc08   :  { %4340 = vst [vmem:[#allocation1 + $0x22] ss:$4 sm:$0xff] %v7001_v53  ;;  %v4343_v34 = vld.sshfl [vmem:[#allocation1] sm:$0xff pattern:$0x73625140] }
 0xc09   :  { %4342 = vst [vmem:[#allocation1 + $0x23] ss:$4 sm:$0xff] %v7004_v36  ;;  %v4347_v43 = vsel %vm109_vm0, %v4343_v34, 0.0 }
 0xc0a   :  { %4348 = vadd.xlane.f32.xlu1 %v4347_v43  ;;  %v5122_v43 = vld [vmem:[%s7206_s26] sm:$0x7] }
 0xc10   :  { %v4344_v2 = vld.sshfl [vmem:[#allocation1 + $0x20] sm:$0xff pattern:$0x73625140] }
 0xc11   :  { %v4350_v49 = vsel %vm109_vm0, %v4344_v2, 0.0  ;;  %v4536_v2 = vperm.slane %v5122_v43, 2  ;;  %v4842_v43 = vld [vmem:[%s7174_s18 + $0x8] sm:$0xff] }
 0xc12   :  { %4351 = vadd.xlane.f32.xlu0 %v4350_v49 }
 0xc7d   :  { %v4349_v3 = vpop.xlane.xlu1 %4348 }
 0xc7e   :  { %v4353_v9 = vmul.f32 %v4349_v3, %v7225_v10 }
 0xc80   :  { %v4360_v37 = vperm.slane %v4353_v9, %v7226_v19  ;;  %v4364_v24 = vperm.slane %v4353_v9, %v7227_v47  ;;  %v4368_v6 = vperm.slane %v4353_v9, %v7228_v21  ;;  %v4372_v12 = vperm.slane %v4353_v9, %v7229_v46 }
 0xc81   :  { %v4523_v9 = vrot.slane %v4520_v23, 4 }
 0xc82   :  { %v7018_v28 = vsub.f32 %v6979_v20, %v4360_v37  ;;  %v7021_v0 = vsub.f32 %v6982_v11, %v4364_v24  ;;  %v7024_v60 = vsub.f32 %v6985_v50, %v4368_v6  ;;  %v7027_v18 = vsub.f32 %v6988_v32, %v4372_v12 }
 0xc83   :  { %v4524_v37 = vrot.slane %v4520_v23, 6 }
 0xc84   :  { %v4405_v7 = vmul.f32 %v7018_v28, %v7018_v28  ;;  %v4406_v5 = vmul.f32 %v7021_v0, %v7021_v0  ;;  %v4407_v33 = vmul.f32 %v7024_v60, %v7024_v60  ;;  %v4408_v41 = vmul.f32 %v7027_v18, %v7027_v18 }
 0xc85   :  { %v4352_v44 = vpop.xlane.xlu0 %4351 }
 0xc86   :  { %4421 = vst [vmem:[#allocation1] ss:$4 sm:$0xff] %v4405_v7  ;;  %v4354_v58 = vmul.f32 %v4352_v44, %v7225_v10  ;;  %v4539_v44 = vrot.slane %v4536_v2, 4 }
 0xc87   :  { %4423 = vst [vmem:[#allocation1 + $0x1] ss:$4 sm:$0xff] %v4406_v5 }
 0xc88   :  { %4425 = vst [vmem:[#allocation1 + $0x2] ss:$4 sm:$0xff] %v4407_v33  ;;  %v4376_v1 = vperm.slane %v4354_v58, %v7226_v19  ;;  %v4380_v8 = vperm.slane %v4354_v58, %v7227_v47  ;;  %v4384_v25 = vperm.slane %v4354_v58, %v7228_v21  ;;  %v4388_v27 = vperm.slane %v4354_v58, %v7229_v46 }
 0xc89   :  { %4427 = vst [vmem:[#allocation1 + $0x3] ss:$4 sm:$0xff] %v4408_v41  ;;  %v4538_v41 = vrot.slane %v4536_v2, 2 }
 0xc8a   :  { %v7043_v63 = vsub.f32 %v6995_v55, %v4376_v1  ;;  %v7046_v54 = vsub.f32 %v6998_v51, %v4380_v8  ;;  %v7049_v35 = vsub.f32 %v7001_v53, %v4384_v25  ;;  %v7052_v22 = vsub.f32 %v7004_v36, %v4388_v27 }
 0xc8c   :  { %v4409_v38 = vmul.f32 %v7043_v63, %v7043_v63  ;;  %v4410_v45 = vmul.f32 %v7046_v54, %v7046_v54  ;;  %v4411_v40 = vmul.f32 %v7049_v35, %v7049_v35  ;;  %v4412_v61 = vmul.f32 %v7052_v22, %v7052_v22 }
 0xc8e   :  { %4429 = vst [vmem:[#allocation1 + $0x20] ss:$4 sm:$0xff] %v4409_v38  ;;  %v4540_v38 = vrot.slane %v4536_v2, 6 }
 0xc8f   :  { %4431 = vst [vmem:[#allocation1 + $0x21] ss:$4 sm:$0xff] %v4410_v45 }
 0xc90   :  { %4433 = vst [vmem:[#allocation1 + $0x22] ss:$4 sm:$0xff] %v4411_v40  ;;  %v4436_v29 = vld.sshfl [vmem:[#allocation1] sm:$0xff pattern:$0x73625140] }
 0xc91   :  { %4435 = vst [vmem:[#allocation1 + $0x23] ss:$4 sm:$0xff] %v4412_v61  ;;  %v4440_v57 = vsel %vm109_vm0, %v4436_v29, 0.0 }
 0xc92   :  { %4441 = vadd.xlane.f32.xlu2 %v4440_v57 }
 0xc98   :  { %v4437_v4 = vld.sshfl [vmem:[#allocation1 + $0x20] sm:$0xff pattern:$0x73625140] }
 0xc99   :  { %v4443_v42 = vsel %vm109_vm0, %v4437_v4, 0.0 }
 0xc9a   :  { %4444 = vadd.xlane.f32.xlu1 %v4443_v42 }
 0xd05   :  { %v4442_v13 = vpop.xlane.xlu2 %4441 }
 0xd06   :  { %v4446_v17 = vmul.f32 %v4442_v13, %v7225_v10 }
 0xd08   :  { %v4448_v39 = vadd.f32 1e-06, %v4446_v17 }
 0xd0a   :  { %5111 = vrsqrt.f32 %v4448_v39  ;;  %vm4456_vm6 = vweird.f32 %v4448_v39 }
 0xd0d   :  { %v4445_v59 = vpop.xlane.xlu1 %4444 }
 0xd0e   :  { %v4447_v26 = vmul.f32 %v4445_v59, %v7225_v10  ;;  %v4522_v10 = vrot.slane %v4520_v23, 2 }
 0xd10   :  { %v5112_v15 = vpop.eup %5111  ;;  %v4449_v62 = vadd.f32 1e-06, %v4447_v26 }
 0xd11   :  { %v4451_v31 = vmul.f32 %v5112_v15, %v4448_v39  ;;  %vm4457_vm5 = vweird.f32 %v5112_v15 }
 0xd12   :  { %5113 = vrsqrt.f32 %v4449_v62  ;;  %vm4458_vm7 = vmor %vm4456_vm6, %vm4457_vm5  ;;  %vm4466_vm9 = vweird.f32 %v4449_v62 }
 0xd13   :  { %v4452_v16 = vmul.f32 %v5112_v15, %v4451_v31 }
 0xd15   :  { %v4453_v48 = vmul.f32 0.5, %v4452_v16 }
 0xd17   :  { %v4454_v14 = vsub.f32 1.5, %v4453_v48 }
 0xd18   :  { %v5114_v34 = vpop.eup %5113 }
 0xd19   :  { %v4455_v49 = vmul.f32 %v5112_v15, %v4454_v14  ;;  %v4461_v3 = vmul.f32 %v5114_v34, %v4449_v62  ;;  %vm4467_vm8 = vweird.f32 %v5114_v34 }
 0xd1a   :  { %vm4468_vm10 = vmor %vm4466_vm9, %vm4467_vm8 }
 0xd1b   :  { %v4459_v24 = vsel %vm4458_vm7, %v5112_v15, %v4455_v49  ;;  %v4462_v6 = vmul.f32 %v5114_v34, %v4461_v3  ;;  %v4841_v3 = vld [vmem:[%s7174_s18] sm:$0xff] }
 0xd1c   :  { %v4475_v12 = vperm.slane %v4459_v24, %v7226_v19  ;;  %v4479_v7 = vperm.slane %v4459_v24, %v7227_v47  ;;  %v4483_v5 = vperm.slane %v4459_v24, %v7228_v21  ;;  %v4487_v33 = vperm.slane %v4459_v24, %v7229_v46 }
 0xd1d   :  { %v4463_v58 = vmul.f32 0.5, %v4462_v6 }
 0xd1e   :  { %v4512_v1 = vmul.f32 %v4475_v12, %v7018_v28  ;;  %v4513_v8 = vmul.f32 %v4479_v7, %v7021_v0  ;;  %v4514_v25 = vmul.f32 %v4483_v5, %v7024_v60  ;;  %v4515_v27 = vmul.f32 %v4487_v33, %v7027_v18 }
 0xd1f   :  { %v4464_v45 = vsub.f32 1.5, %v4463_v58 }
 0xd20   :  { %v4528_v40 = vmul.f32 %v4520_v23, %v4512_v1  ;;  %v4529_v61 = vmul.f32 %v4522_v10, %v4513_v8  ;;  %v4530_v29 = vmul.f32 %v4523_v9, %v4514_v25  ;;  %v4531_v57 = vmul.f32 %v4524_v37, %v4515_v27 }
 0xd21   :  { %v4465_v4 = vmul.f32 %v5114_v34, %v4464_v45 }
 0xd22   :  { %v4544_v42 = vadd.f32 %v4536_v2, %v4528_v40  ;;  %v4545_v13 = vadd.f32 %v4538_v41, %v4529_v61  ;;  %v4546_v17 = vadd.f32 %v4539_v44, %v4530_v29  ;;  %v4547_v28 = vadd.f32 %v4540_v38, %v4531_v57  ;;  %v5036_v61 = vld [vmem:[%s7173_s19] ss:$0 sm:$0xff] }
 0xd23   :  { %v4469_v39 = vsel %vm4468_vm10, %v5114_v34, %v4465_v4 }
 0xd24   :  { %4560 = vst [vmem:[#allocation1] ss:$4 sm:$0xff] %v4544_v42  ;;  %v4491_v0 = vperm.slane %v4469_v39, %v7226_v19  ;;  %v4495_v60 = vperm.slane %v4469_v39, %v7227_v47  ;;  %v4499_v18 = vperm.slane %v4469_v39, %v7228_v21  ;;  %v4503_v59 = vperm.slane %v4469_v39, %v7229_v46 }
 0xd25   :  { %4562 = vst [vmem:[#allocation1 + $0x1] ss:$4 sm:$0xff] %v4545_v13 }
 0xd26   :  { %4564 = vst [vmem:[#allocation1 + $0x2] ss:$4 sm:$0xff] %v4546_v17  ;;  %v4516_v26 = vmul.f32 %v4491_v0, %v7043_v63  ;;  %v4517_v56 = vmul.f32 %v4495_v60, %v7046_v54  ;;  %v4518_v15 = vmul.f32 %v4499_v18, %v7049_v35  ;;  %v4519_v62 = vmul.f32 %v4503_v59, %v7052_v22  ;;  %v4844_v35 = vld [vmem:[%s7174_s18 + $0x18] sm:$0xff]  ;;  %v5035_v22 = vld [vmem:[%s7171_s17] ss:$0 sm:$0xff] }
 0xd27   :  { %4566 = vst [vmem:[#allocation1 + $0x3] ss:$4 sm:$0xff] %v4547_v28  ;;  %4680 = vmatpush.bf16.msra.mxu3 %v4844_v35 }
 0xd28   :  { %v4532_v31 = vmul.f32 %v4520_v23, %v4516_v26  ;;  %v4533_v30 = vmul.f32 %v4522_v10, %v4517_v56  ;;  %v4534_v19 = vmul.f32 %v4523_v9, %v4518_v15  ;;  %v4535_v16 = vmul.f32 %v4524_v37, %v4519_v62  ;;  %v4843_v23 = vld [vmem:[%s7174_s18 + $0x10] sm:$0xff] }
 0xd2a   :  { %v4548_v47 = vadd.f32 %v4536_v2, %v4532_v31  ;;  %v4549_v48 = vadd.f32 %v4538_v41, %v4533_v30  ;;  %v4550_v21 = vadd.f32 %v4539_v44, %v4534_v19  ;;  %v4551_v52 = vadd.f32 %v4540_v38, %v4535_v16 }
 0xd2b   :  { %4681 = vmatpush.bf16.msra.mxu3 %v4843_v23 }
 0xd2c   :  { %4568 = vst [vmem:[#allocation1 + $0x20] ss:$4 sm:$0xff] %v4548_v47 }
 0xd2d   :  { %4570 = vst [vmem:[#allocation1 + $0x21] ss:$4 sm:$0xff] %v4549_v48 }
 0xd2e   :  { %4572 = vst [vmem:[#allocation1 + $0x22] ss:$4 sm:$0xff] %v4550_v21  ;;  %v4575_v46 = vld.sshfl [vmem:[#allocation1] sm:$0xff pattern:$0x73625140] }
 0xd2f   :  { %4574 = vst [vmem:[#allocation1 + $0x23] ss:$4 sm:$0xff] %v4551_v52  ;;  %4682 = vmatpush.bf16.msra.mxu3 %v4842_v43 }
 0xd33   :  { %4683 = vmatpush.bf16.msra.mxu3 %v4841_v3 }
 0xd36   :  { %v4576_v63 = vld.sshfl [vmem:[#allocation1 + $0x20] sm:$0xff pattern:$0x73625140] }
 0xd37   :  { %v4579_v54 = vpack.c.bf16 %v4576_v63, %v4575_v46 }
 0xd39   :  { %4811 = vmatmul.msk.bf16.vlgmr.msrb.gmra.mxu2 %vm109_vm0, %v4579_v54  ;;  %vm4672_vm0 = vcmask 523264  }
 0xdbc   :  { %v4612_v14 = vpop.f32.mrf.mxu2 }
 0xdbd   :  { %v4613_v34 = vadd.f32 %v5035_v22, %v4612_v14 }
 0xdbf   :  { %v4619_v2 = vmul.f32 0.044715, %v4613_v34  ;;  %v4617_v8 = vmul.f32 0.5, %v4613_v34 }
 0xdc1   :  { %v4621_v49 = vmul.f32 %v4619_v2, %v4613_v34 }
 0xdc3   :  { %v4623_v10 = vmul.f32 %v4621_v49, %v4613_v34 }
 0xdc4   :  { %v4614_v9 = vpop.f32.mrf.mxu2 }
 0xdc5   :  { %v4625_v37 = vadd.f32 %v4623_v10, %v4613_v34  ;;  %v4615_v24 = vadd.f32 %v5035_v22, %v4614_v9 }
 0xdc7   :  { %v4620_v6 = vmul.f32 0.044715, %v4615_v24  ;;  %v4627_v12 = vmul.f32 0.7978846, %v4625_v37  ;;  %v4618_v25 = vmul.f32 0.5, %v4615_v24 }
 0xdc9   :  { %v4622_v7 = vmul.f32 %v4620_v6, %v4615_v24  ;;  %5115 = vtanh.f32 %v4627_v12 }
 0xdcb   :  { %v4624_v5 = vmul.f32 %v4622_v7, %v4615_v24 }
 0xdcd   :  { %v4626_v33 = vadd.f32 %v4624_v5, %v4615_v24 }
 0xdcf   :  { %v4628_v41 = vmul.f32 0.7978846, %v4626_v33  ;;  %v5116_v44 = vpop.eup %5115 }
 0xdd0   :  { %v4631_v58 = vadd.f32 1.0, %v5116_v44 }
 0xdd1   :  { %5117 = vtanh.f32 %v4628_v41 }
 0xdd2   :  { %v4633_v38 = vmul.f32 %v4631_v58, %v4617_v8 }
 0xdd7   :  { %v5118_v1 = vpop.eup %5117 }
 0xdd8   :  { %v4632_v27 = vadd.f32 1.0, %v5118_v1 }
 0xdda   :  { %v4634_v45 = vmul.f32 %v4632_v27, %v4618_v25 }
 0xddc   :  { %v4635_v40 = vpack.c.bf16 %v4634_v45, %v4633_v38 }
 0xdde   :  { %4828 = vmatmul.msk.bf16.vlgmr.msra.gmra.mxu3 %vm4672_vm0, %v4635_v40 }
 0xe61   :  { %v4685_v29 = vpop.f32.mrf.mxu3 }
 0xe62   :  { %v4686_v57 = vadd.f32 %v5036_v61, %v4685_v29 }
 0xe64   :  { %v4692_v4 = vrot.slane %v4686_v57, 2  ;;  %v4693_v42 = vrot.slane %v4686_v57, 4  ;;  %v4694_v13 = vrot.slane %v4686_v57, 6  ;;  %v4704_v17 = vadd.f32 %v4686_v57, %v6979_v20 }
 0xe66   :  { %v4705_v28 = vadd.f32 %v4692_v4, %v6982_v11  ;;  %v4706_v39 = vadd.f32 %v4693_v42, %v6985_v50  ;;  %v4707_v0 = vadd.f32 %v4694_v13, %v6988_v32  ;;  %4713 = vst.msk [vmem:[%s7175_s22] sm:$0x3] %vm4712_vm11, %v4704_v17 }
 0xe68   :  { %4714 = vst.msk [vmem:[%s7175_s22 + $0x2] sm:$0x3] %vm4712_vm11, %v4705_v28 }
 0xe69   :  { %4715 = vst.msk [vmem:[%s7175_s22 + $0x4] sm:$0x3] %vm4712_vm11, %v4706_v39  ;;  %v4687_v20 = vpop.f32.mrf.mxu3 }
 0xe6a   :  { %4716 = vst.msk [vmem:[%s7175_s22 + $0x6] sm:$0x3] %vm4712_vm11, %v4707_v0  ;;  %v4688_v11 = vadd.f32 %v5036_v61, %v4687_v20 }
 0xe6c   :  { %v4695_v50 = vrot.slane %v4688_v11, 2  ;;  %v4696_v32 = vrot.slane %v4688_v11, 4  ;;  %v4697_v60 = vrot.slane %v4688_v11, 6  ;;  %v4708_v18 = vadd.f32 %v4688_v11, %v6995_v55 }
 0xe6e   :  { %v4709_v59 = vadd.f32 %v4695_v50, %v6998_v51  ;;  %v4710_v26 = vadd.f32 %v4696_v32, %v7001_v53  ;;  %v4711_v56 = vadd.f32 %v4697_v60, %v7004_v36  ;;  %4717 = vst.msk [vmem:[%s7175_s22 + $0x8] sm:$0x3] %vm4712_vm11, %v4708_v18 }
 0xe70   :  { %4718 = vst.msk [vmem:[%s7175_s22 + $0xa] sm:$0x3] %vm4712_vm11, %v4709_v59 }
 0xe71   :  { %4719 = vst.msk [vmem:[%s7175_s22 + $0xc] sm:$0x3] %vm4712_vm11, %v4710_v26 }
 0xe72   :  { %4720 = vst.msk [vmem:[%s7175_s22 + $0xe] sm:$0x3] %vm4712_vm11, %v4711_v56 }

// kernel: transformer_decoder_forward.3
= control target key start
LH: loop header
LB: loop body
LE: loop exit
PB: predicated region body
PF: predicated region fallthrough
CT: control target
= control target key end

     0   :  { %s7505_s0 = inlined_call_operand.vmem [shape: f32[8,2,32], index: 0, kind: input, shape index: {}]   ;;  %s7506_s1 = inlined_call_operand.vmem [shape: bf16[16,2,32], index: 1, kind: input, shape index: {}]   ;;  %s7507_s2 = inlined_call_operand.vmem [shape: f32[2,8], index: 2, kind: input, shape index: {}]   ;;  %s7508_s3 = inlined_call_operand.vmem [shape: f32[2,16], index: 3, kind: input, shape index: {}]   ;;  %s7509_s4 = inlined_call_operand.vmem [shape: f32[3,32], index: 4, kind: input, shape index: {}]   ;;  %s7510_s5 = inlined_call_operand.vmem [shape: f32[3,32], index: 5, kind: input, shape index: {}]   ;;  %s7511_s6 = inlined_call_operand.vmem [shape: bf16[32,96], index: 6, kind: input, shape index: {}]   ;;  %s7512_s7 = inlined_call_operand.vmem [shape: f32[1,96], index: 7, kind: input, shape index: {}]   ;;  %s7513_s8 = inlined_call_operand.vmem [shape: bf16[32,32], index: 8, kind: input, shape index: {}]   ;;  %s7514_s9 = inlined_call_operand.vmem [shape: f32[1,32], index: 9, kind: input, shape index: {}]   ;;  %s7515_s10 = inlined_call_operand.vmem [shape: bf16[32,32], index: 10, kind: input, shape index: {}]   ;;  %s7516_s11 = inlined_call_operand.vmem [shape: f32[1,32], index: 11, kind: input, shape index: {}]   ;;  %s7517_s12 = inlined_call_operand.vmem [shape: bf16[32,64], index: 12, kind: input, shape index: {}]   ;;  %s7518_s13 = inlined_call_operand.vmem [shape: f32[1,64], index: 13, kind: input, shape index: {}]   ;;  %s7519_s14 = inlined_call_operand.vmem [shape: bf16[32,32], index: 14, kind: input, shape index: {}]   ;;  %s7520_s15 = inlined_call_operand.vmem [shape: f32[1,32], index: 15, kind: input, shape index: {}]   ;;  %s7521_s16 = inlined_call_operand.vmem [shape: bf16[32,64], index: 16, kind: input, shape index: {}]   ;;  %s7522_s17 = inlined_call_operand.vmem [shape: f32[1,64], index: 17, kind: input, shape index: {}]   ;;  %s7523_s18 = inlined_call_operand.vmem [shape: bf16[64,32], index: 18, kind: input, shape index: {}]   ;;  %s7524_s19 = inlined_call_operand.vmem [shape: f32[1,32], index: 19, kind: input, shape index: {}]   ;;  %s7525_s20 = inlined_call_operand.vmem [shape: f32[1,32], index: 20, kind: input, shape index: {}]   ;;  %s7526_s21 = inlined_call_operand.vmem [shape: f32[1,32], index: 21, kind: input, shape index: {}]   ;;  %s7527_s22 = inlined_call_operand.hbm [shape: f32[8,2,32], index: 22, kind: output, shape index: {}]  }
   0x1   :  { %7546 = sst [smem:[#allocation11_spill]] %s7505_s0 }
   0x2   :  { %7547 = sst [smem:[#allocation12_spill]] %s7506_s1 }
   0x3   :  { %7548 = sst [smem:[#allocation13_spill]] %s7507_s2 }
   0x4   :  { %7549 = sst [smem:[#allocation14_spill]] %s7508_s3 }
   0x5   :  { %7550 = sst [smem:[#allocation15_spill]] %s7509_s4 }
   0x6   :  { %7551 = sst [smem:[#allocation16_spill]] %s7510_s5 }
   0x7   :  { %7552 = sst [smem:[#allocation17_spill]] %s7511_s6 }
   0x8   :  { %s7553_s29 = sld [smem:[#allocation11_spill]]  ;;  %vm110_vm0 = vcmask 261120  }
   0xe   :  { %v5545_v0 = vld [vmem:[%s7553_s29] sm:$0x3]  ;;  %v5550_v1 = vld [vmem:[%s7553_s29 + $0x2] sm:$0x3]  ;;  %v5555_v2 = vld [vmem:[%s7553_s29 + $0x4] sm:$0x3] }
   0xf   :  { %v5560_v3 = vld [vmem:[%s7553_s29 + $0x6] sm:$0x3]  ;;  %91 = vst [vmem:[#allocation1] ss:$4 sm:$0xff] %v5545_v0  ;;  %v5567_v4 = vld [vmem:[%s7553_s29 + $0x8] sm:$0x3] }
  0x10   :  { %93 = vst [vmem:[#allocation1 + $0x1] ss:$4 sm:$0xff] %v5550_v1  ;;  %v5573_v5 = vld [vmem:[%s7553_s29 + $0xa] sm:$0x3]  ;;  %v5579_v6 = vld [vmem:[%s7553_s29 + $0xc] sm:$0x3] }
  0x11   :  { %95 = vst [vmem:[#allocation1 + $0x2] ss:$4 sm:$0xff] %v5555_v2  ;;  %v5584_v7 = vld [vmem:[%s7553_s29 + $0xe] sm:$0x3] }
  0x12   :  { %97 = vst [vmem:[#allocation1 + $0x3] ss:$4 sm:$0xff] %v5560_v3 }
  0x13   :  { %99 = vst [vmem:[#allocation1 + $0x20] ss:$4 sm:$0xff] %v5567_v4 }
  0x14   :  { %101 = vst [vmem:[#allocation1 + $0x21] ss:$4 sm:$0xff] %v5573_v5 }
  0x15   :  { %103 = vst [vmem:[#allocation1 + $0x22] ss:$4 sm:$0xff] %v5579_v6 }
  0x16   :  { %105 = vst [vmem:[#allocation1 + $0x23] ss:$4 sm:$0xff] %v5584_v7 }
  0x17   :  { %27 = vsyncpa [#allocation3], 0  ;;  %v5409_v12 = vmov 32.0   ;;  %v5410_v18 = vmov 269488144   ;;  %s7559_s4 = sld [smem:[#allocation17_spill]] }
  0x18   :  { %5293 = vrcp.f32 %v5409_v12  ;;  %v129_v19 = vunpack.c.l.s4 %v5410_v18  ;;  %v5411_v20 = vmov 842150450   ;;  %v5412_v22 = vmov 1414812756   ;;  %s7560_s1 = sld [smem:[#allocation15_spill]]  ;;  %s5414_s3 = smov 96  }
  0x19   :  { %v106_v8 = vld.sshfl [vmem:[#allocation1] sm:$0xff pattern:$0x73625140]  ;;  %v133_v21 = vunpack.c.l.s4 %v5411_v20  ;;  %v137_v23 = vunpack.c.l.s4 %v5412_v22  ;;  %v5413_v24 = vmov 1987475062   ;;  %s7561_s26 = sld [smem:[#allocation16_spill]] }
  0x1a   :  { %v111_v9 = vsel %vm110_vm0, %v106_v8, 0.0  ;;  %v141_v25 = vunpack.c.l.s4 %v5413_v24  ;;  %v5594_v27 = vunpack.c.0.s8 %v129_v19  ;;  %s5415_s28 = smov 104   ;;  %s5416_s29 = smov 120   ;;  %vm425_vm8 = vcmask 1047556  }
  0x1b   :  { %112 = vadd.xlane.f32.xlu0 %v111_v9  ;;  %v5596_v28 = vunpack.c.0.s8 %v133_v21  ;;  %v5598_v29 = vunpack.c.0.s8 %v137_v23  ;;  %s5417_s30 = smov 112   ;;  %vm1157_vm9 = vcmask 64512   ;;  %s7562_s0 = sld [smem:[#allocation13_spill]]  ;;  %vm1417_vm11 = vcmask 1043456  }
  0x1c   :  { %7555 = vst [vmem:[#allocation6_spill] sm:$0xff] %v5594_v27  ;;  %v5600_v30 = vunpack.c.0.s8 %v141_v25  ;;  %s5420_s23 = smov 64   ;;  %s5421_s5 = smov 24   ;;  %vm1817_vm12 = vcmask 130048   ;;  %vm1820_vm13 = vcmask 195584  }
  0x1d   :  { %v107_v10 = vld.sshfl [vmem:[#allocation1 + $0x20] sm:$0xff pattern:$0x73625140]  ;;  %7556 = vst [vmem:[#allocation7_spill] sm:$0xff] %v5596_v28  ;;  %s5422_s24 = smov 16   ;;  %s5423_s6 = smov 8  }
  0x1e   :  { %v114_v11 = vsel %vm110_vm0, %v107_v10, 0.0  ;;  %v5294_v13 = vpop.eup %5293  ;;  %7557 = vst [vmem:[#allocation8_spill] sm:$0xff] %v5598_v29  ;;  %v5080_v18 = vld [vmem:[%s7559_s4] sm:$0xff]  ;;  %s7564_s25 = sld [smem:[#allocation12_spill]] }
  0x1f   :  { %v118_v14 = vmul.f32 32.0, %v5294_v13  ;;  %vm122_vm1 = vweird.f32 %v5294_v13  ;;  %7558 = vst [vmem:[#allocation9_spill] sm:$0xff] %v5600_v30  ;;  %v82_v20 = vld [vmem:[%s7561_s26] sm:$0x7] }
  0x20   :  { %v307_v24 = vperm.slane %v82_v20, 0 }
  0x21   :  { %v119_v15 = vsub.f32 1.0, %v118_v14  ;;  %v5081_v14 = vld [vmem:[%s7559_s4 + $0x8] sm:$0xff] }
  0x22   :  { %380 = vmatpush.bf16.msra.mxu0 %v5081_v14 }
  0x23   :  { %115 = vadd.xlane.f32.xlu0 %v114_v11  ;;  %v120_v16 = vmul.f32 %v5294_v13, %v119_v15 }
  0x25   :  { %v121_v17 = vadd.f32 %v5294_v13, %v120_v16  ;;  %v81_v16 = vld [vmem:[%s7560_s1] sm:$0x7] }
  0x26   :  { %v291_v21 = vperm.slane %v81_v16, 0  ;;  %381 = vmatpush.bf16.msra.mxu0 %v5080_v18 }
  0x27   :  { %v5592_v26 = vsel %vm122_vm1, %v5294_v13, %v121_v17 }
  0x28   :  { %7554 = vst [vmem:[#allocation5_spill] sm:$0xff] %v5592_v26 }
  0x8e   :  { %v113_v31 = vpop.xlane.xlu0 %112 }
  0x8f   :  { %v124_v32 = vmul.f32 %v5592_v26, %v113_v31 }
  0x91   :  { %v131_v33 = vperm.slane %v124_v32, %v5594_v27  ;;  %v135_v34 = vperm.slane %v124_v32, %v5596_v28  ;;  %v139_v35 = vperm.slane %v124_v32, %v5598_v29  ;;  %v143_v36 = vperm.slane %v124_v32, %v5600_v30 }
  0x92   :  { %v293_v32 = vrot.slane %v291_v21, 2 }
  0x93   :  { %v5608_v37 = vsub.f32 %v5545_v0, %v131_v33  ;;  %v5611_v38 = vsub.f32 %v5550_v1, %v135_v34  ;;  %v5614_v39 = vsub.f32 %v5555_v2, %v139_v35  ;;  %v5617_v40 = vsub.f32 %v5560_v3, %v143_v36 }
  0x94   :  { %v294_v33 = vrot.slane %v291_v21, 4  ;;  %v295_v34 = vrot.slane %v291_v21, 6 }
  0x95   :  { %v176_v41 = vmul.f32 %v5608_v37, %v5608_v37  ;;  %v177_v42 = vmul.f32 %v5611_v38, %v5611_v38  ;;  %v178_v43 = vmul.f32 %v5614_v39, %v5614_v39  ;;  %v179_v44 = vmul.f32 %v5617_v40, %v5617_v40 }
  0x96   :  { %v116_v45 = vpop.xlane.xlu0 %115 }
  0x97   :  { %192 = vst [vmem:[#allocation1] ss:$4 sm:$0xff] %v176_v41  ;;  %v125_v46 = vmul.f32 %v5592_v26, %v116_v45  ;;  %v309_v45 = vrot.slane %v307_v24, 2 }
  0x98   :  { %194 = vst [vmem:[#allocation1 + $0x1] ss:$4 sm:$0xff] %v177_v42 }
  0x99   :  { %196 = vst [vmem:[#allocation1 + $0x2] ss:$4 sm:$0xff] %v178_v43  ;;  %v147_v47 = vperm.slane %v125_v46, %v5594_v27  ;;  %v151_v48 = vperm.slane %v125_v46, %v5596_v28  ;;  %v155_v49 = vperm.slane %v125_v46, %v5598_v29  ;;  %v159_v50 = vperm.slane %v125_v46, %v5600_v30 }
  0x9a   :  { %198 = vst [vmem:[#allocation1 + $0x3] ss:$4 sm:$0xff] %v179_v44  ;;  %v310_v46 = vrot.slane %v307_v24, 4 }
  0x9b   :  { %v5633_v51 = vsub.f32 %v5567_v4, %v147_v47  ;;  %v5636_v52 = vsub.f32 %v5573_v5, %v151_v48  ;;  %v5639_v53 = vsub.f32 %v5579_v6, %v155_v49  ;;  %v5642_v54 = vsub.f32 %v5584_v7, %v159_v50 }
  0x9d   :  { %v180_v55 = vmul.f32 %v5633_v51, %v5633_v51  ;;  %v181_v56 = vmul.f32 %v5636_v52, %v5636_v52  ;;  %v182_v57 = vmul.f32 %v5639_v53, %v5639_v53  ;;  %v183_v58 = vmul.f32 %v5642_v54, %v5642_v54 }
  0x9f   :  { %200 = vst [vmem:[#allocation1 + $0x20] ss:$4 sm:$0xff] %v180_v55 }
  0xa0   :  { %202 = vst [vmem:[#allocation1 + $0x21] ss:$4 sm:$0xff] %v181_v56  ;;  %v311_v56 = vrot.slane %v307_v24, 6 }
  0xa1   :  { %v207_v59 = vld.sshfl [vmem:[#allocation1] sm:$0xff pattern:$0x73625140]  ;;  %204 = vst [vmem:[#allocation1 + $0x22] ss:$4 sm:$0xff] %v182_v57 }
  0xa2   :  { %206 = vst [vmem:[#allocation1 + $0x23] ss:$4 sm:$0xff] %v183_v58  ;;  %v211_v60 = vsel %vm110_vm0, %v207_v59, 0.0 }
  0xa3   :  { %212 = vadd.xlane.f32.xlu1 %v211_v60 }
  0xa9   :  { %v208_v61 = vld.sshfl [vmem:[#allocation1 + $0x20] sm:$0xff pattern:$0x73625140] }
  0xaa   :  { %v214_v62 = vsel %vm110_vm0, %v208_v61, 0.0 }
  0xab   :  { %215 = vadd.xlane.f32.xlu1 %v214_v62 }
 0x116   :  { %v213_v63 = vpop.xlane.xlu1 %212 }
 0x117   :  { %v217_v8 = vmul.f32 %v213_v63, %v5592_v26 }
 0x119   :  { %v219_v9 = vadd.f32 1e-06, %v217_v8 }
 0x11b   :  { %5295 = vrsqrt.f32 %v219_v9  ;;  %vm227_vm3 = vweird.f32 %v219_v9 }
 0x11e   :  { %v216_v10 = vpop.xlane.xlu1 %215 }
 0x11f   :  { %v218_v11 = vmul.f32 %v216_v10, %v5592_v26 }
 0x121   :  { %v5296_v12 = vpop.eup %5295  ;;  %v220_v13 = vadd.f32 1e-06, %v218_v11 }
 0x122   :  { %v222_v15 = vmul.f32 %v5296_v12, %v219_v9  ;;  %vm228_vm2 = vweird.f32 %v5296_v12 }
 0x123   :  { %5297 = vrsqrt.f32 %v220_v13  ;;  %vm229_vm4 = vmor %vm227_vm3, %vm228_vm2  ;;  %vm237_vm6 = vweird.f32 %v220_v13 }
 0x124   :  { %v223_v17 = vmul.f32 %v5296_v12, %v222_v15 }
 0x126   :  { %v224_v19 = vmul.f32 0.5, %v223_v17 }
 0x128   :  { %v225_v22 = vsub.f32 1.5, %v224_v19 }
 0x129   :  { %v5298_v23 = vpop.eup %5297 }
 0x12a   :  { %v226_v25 = vmul.f32 %v5296_v12, %v225_v22  ;;  %v232_v31 = vmul.f32 %v5298_v23, %v220_v13  ;;  %vm238_vm5 = vweird.f32 %v5298_v23 }
 0x12b   :  { %vm239_vm7 = vmor %vm237_vm6, %vm238_vm5 }
 0x12c   :  { %v230_v35 = vsel %vm229_vm4, %v5296_v12, %v226_v25  ;;  %v233_v36 = vmul.f32 %v5298_v23, %v232_v31 }
 0x12d   :  { %v246_v41 = vperm.slane %v230_v35, %v5594_v27  ;;  %v250_v42 = vperm.slane %v230_v35, %v5596_v28  ;;  %v254_v43 = vperm.slane %v230_v35, %v5598_v29  ;;  %v258_v44 = vperm.slane %v230_v35, %v5600_v30 }
 0x12e   :  { %v234_v47 = vmul.f32 0.5, %v233_v36 }
 0x12f   :  { %v283_v48 = vmul.f32 %v246_v41, %v5608_v37  ;;  %v284_v49 = vmul.f32 %v250_v42, %v5611_v38  ;;  %v285_v50 = vmul.f32 %v254_v43, %v5614_v39  ;;  %v286_v55 = vmul.f32 %v258_v44, %v5617_v40 }
 0x130   :  { %v235_v57 = vsub.f32 1.5, %v234_v47  ;;  %v5418_v44 = vmov 1983009808  }
 0x131   :  { %v299_v58 = vmul.f32 %v291_v21, %v283_v48  ;;  %v300_v59 = vmul.f32 %v293_v32, %v284_v49  ;;  %v301_v60 = vmul.f32 %v294_v33, %v285_v50  ;;  %v302_v61 = vmul.f32 %v295_v34, %v286_v55 }
 0x132   :  { %v236_v62 = vmul.f32 %v5298_v23, %v235_v57  ;;  %v5419_v57 = vmov 1934713408  }
 0x133   :  { %v315_v63 = vadd.f32 %v307_v24, %v299_v58  ;;  %v316_v8 = vadd.f32 %v309_v45, %v300_v59  ;;  %v317_v9 = vadd.f32 %v310_v46, %v301_v60  ;;  %v318_v37 = vadd.f32 %v311_v56, %v302_v61 }
 0x134   :  { %v240_v10 = vsel %vm239_vm7, %v5298_v23, %v236_v62  ;;  %v454_v58 = vunpack.c.l.s4 %v5419_v57 }
 0x135   :  { %331 = vst [vmem:[#allocation1] ss:$4 sm:$0xff] %v315_v63  ;;  %v262_v38 = vperm.slane %v240_v10, %v5594_v27  ;;  %v266_v39 = vperm.slane %v240_v10, %v5596_v28  ;;  %v270_v40 = vperm.slane %v240_v10, %v5598_v29  ;;  %v274_v11 = vperm.slane %v240_v10, %v5600_v30 }
 0x136   :  { %333 = vst [vmem:[#allocation1 + $0x1] ss:$4 sm:$0xff] %v316_v8  ;;  %v5720_v8 = vunpack.c.0.s8 %v454_v58 }
 0x137   :  { %335 = vst [vmem:[#allocation1 + $0x2] ss:$4 sm:$0xff] %v317_v9  ;;  %v287_v12 = vmul.f32 %v262_v38, %v5633_v51  ;;  %v288_v13 = vmul.f32 %v266_v39, %v5636_v52  ;;  %v289_v14 = vmul.f32 %v270_v40, %v5639_v53  ;;  %v290_v15 = vmul.f32 %v274_v11, %v5642_v54  ;;  %v5284_v54 = vld [vmem:[%s7512_s7] ss:$0 sm:$0xff] }
 0x138   :  { %337 = vst [vmem:[#allocation1 + $0x3] ss:$4 sm:$0xff] %v318_v37 }
 0x139   :  { %v303_v16 = vmul.f32 %v291_v21, %v287_v12  ;;  %v304_v17 = vmul.f32 %v293_v32, %v288_v13  ;;  %v305_v18 = vmul.f32 %v294_v33, %v289_v14  ;;  %v306_v19 = vmul.f32 %v295_v34, %v290_v15 }
 0x13b   :  { %v319_v20 = vadd.f32 %v307_v24, %v303_v16  ;;  %v320_v22 = vadd.f32 %v309_v45, %v304_v17  ;;  %v321_v23 = vadd.f32 %v310_v46, %v305_v18  ;;  %v322_v25 = vadd.f32 %v311_v56, %v306_v19 }
 0x13c   :  { %v430_v45 = vunpack.c.l.s4 %v5418_v44 }
 0x13d   :  { %339 = vst [vmem:[#allocation1 + $0x20] ss:$4 sm:$0xff] %v319_v20 }
 0x13e   :  { %341 = vst [vmem:[#allocation1 + $0x21] ss:$4 sm:$0xff] %v320_v22  ;;  %v5710_v48 = vunpack.c.0.s8 %v430_v45 }
 0x13f   :  { %343 = vst [vmem:[#allocation1 + $0x22] ss:$4 sm:$0xff] %v321_v23  ;;  %v346_v51 = vld.sshfl [vmem:[#allocation1] sm:$0xff pattern:$0x73625140] }
 0x140   :  { %345 = vst [vmem:[#allocation1 + $0x23] ss:$4 sm:$0xff] %v322_v25 }
 0x147   :  { %v347_v31 = vld.sshfl [vmem:[#allocation1 + $0x20] sm:$0xff pattern:$0x73625140] }
 0x148   :  { %v350_v52 = vpack.c.bf16 %v347_v31, %v346_v51 }
 0x14a   :  { %4984 = vmatmul.msk.bf16.vlgmr.msra.gmra.mxu0 %vm110_vm0, %v350_v52 }
 0x1c7   :  { %v383_v53 = vpop.f32.mrf.mxu0 }
 0x1c8   :  { %v384_v32 = vadd.f32 %v5284_v54, %v383_v53 }
 0x1ca   :  { %v427_v47 = vrot.slane %v384_v32, 4 }
 0x1cf   :  { %v385_v21 = vpop.f32.mrf.mxu0 }
 0x1d0   :  { %v386_v24 = vadd.f32 %v5284_v54, %v385_v21 }
 0x1d2   :  { %v5688_v33 = vpack.i.bf16 %v386_v24, %v384_v32  ;;  %v483_v46 = vrot.slane %v386_v24, 4 }
 0x1d4   :  { %5130 = vrot.lane.b32.xlu1 %v5688_v33, %s5414_s3  ;;  %5125 = vrot.lane.b32.xlu0 %v5688_v33, %s5415_s28 }
 0x1d5   :  { %5115 = vrot.lane.b32.xlu2 %v5688_v33, %s5416_s29 }
 0x1dd   :  { %5120 = vrot.lane.b32.xlu2 %v5688_v33, %s5417_s30 }
 0x22f   :  { %v5698_v34 = vpop.permute.xlu2 %5115 }
 0x230   :  { %v5118_v35 = vunpack.i.h.bf16 %v5698_v34  ;;  %v5117_v36 = vunpack.i.l.bf16 %v5698_v34  ;;  %5135 = vrot.lane.b32.xlu2 %v5698_v34, %s5414_s3 }
 0x232   :  { %v495_v10 = vrot.slane %v5118_v35, 4  ;;  %v439_v38 = vrot.slane %v5117_v36, 4 }
 0x237   :  { %v5704_v41 = vpop.permute.xlu2 %5120 }
 0x238   :  { %v5123_v42 = vunpack.i.h.bf16 %v5704_v41  ;;  %v5122_v43 = vunpack.i.l.bf16 %v5704_v41  ;;  %5140 = vrot.lane.b32.xlu2 %v5704_v41, %s5414_s3 }
 0x23a   :  { %v481_v49 = vrot.slane %v5123_v42, 4  ;;  %v424_v50 = vrot.slane %v5122_v43, 4  ;;  %v484_v55 = vsel %vm425_vm8, %v5123_v42, %v483_v46  ;;  %v428_v56 = vsel %vm425_vm8, %v5122_v43, %v427_v47 }
 0x23b   :  { %v492_v60 = vperm.slane %v484_v55, %v5710_v48  ;;  %v436_v62 = vperm.slane %v428_v56, %v5710_v48 }
 0x23c   :  { %v482_v59 = vsel %vm425_vm8, %v481_v49, %v386_v24  ;;  %v426_v61 = vsel %vm425_vm8, %v424_v50, %v384_v32 }
 0x23d   :  { %v488_v39 = vperm.slane %v482_v59, %v5710_v48  ;;  %v432_v40 = vperm.slane %v426_v61, %v5710_v48  ;;  %v519_v11 = vrot.slane %v492_v60, 4  ;;  %v463_v12 = vrot.slane %v436_v62, 4 }
 0x23f   :  { %v507_v22 = vrot.slane %v488_v39, 4  ;;  %v451_v23 = vrot.slane %v432_v40, 4 }
 0x246   :  { %v5718_v63 = vpop.permute.xlu0 %5125 }
 0x247   :  { %v5128_v9 = vunpack.i.h.bf16 %v5718_v63  ;;  %v5127_v37 = vunpack.i.l.bf16 %v5718_v63  ;;  %5145 = vrot.lane.b32.xlu2 %v5718_v63, %s5414_s3 }
 0x249   :  { %v493_v13 = vrot.slane %v5128_v9, 4  ;;  %v437_v14 = vrot.slane %v5127_v37, 4  ;;  %v440_v15 = vsel %vm425_vm8, %v5127_v37, %v439_v38  ;;  %v496_v16 = vsel %vm425_vm8, %v5128_v9, %v495_v10 }
 0x24a   :  { %v448_v18 = vperm.slane %v440_v15, %v5710_v48  ;;  %v504_v20 = vperm.slane %v496_v16, %v5710_v48 }
 0x24b   :  { %v438_v17 = vsel %vm425_vm8, %v437_v14, %v5117_v36  ;;  %v494_v19 = vsel %vm425_vm8, %v493_v13, %v5118_v35 }
 0x24c   :  { %v444_v25 = vperm.slane %v438_v17, %v5710_v48  ;;  %v500_v51 = vperm.slane %v494_v19, %v5710_v48  ;;  %v461_v31 = vrot.slane %v448_v18, 4  ;;  %v464_v52 = vsel %vm425_vm8, %v448_v18, %v463_v12 }
 0x24d   :  { %v517_v53 = vrot.slane %v504_v20, 4  ;;  %v520_v54 = vsel %vm425_vm8, %v504_v20, %v519_v11  ;;  %v472_v24 = vperm.slane %v464_v52, %v5720_v8 }
 0x24e   :  { %v449_v21 = vrot.slane %v444_v25, 4  ;;  %v452_v32 = vsel %vm425_vm8, %v444_v25, %v451_v23  ;;  %v505_v35 = vrot.slane %v500_v51, 4  ;;  %v462_v42 = vsel %vm425_vm8, %v461_v31, %v436_v62 }
 0x24f   :  { %v460_v36 = vperm.slane %v452_v32, %v5720_v8  ;;  %v508_v43 = vsel %vm425_vm8, %v500_v51, %v507_v22  ;;  %v518_v44 = vsel %vm425_vm8, %v517_v53, %v492_v60  ;;  %v468_v45 = vperm.slane %v462_v42, %v5720_v8 }
 0x250   :  { %v479_v46 = vrot.slane %v472_v24, 4  ;;  %v506_v47 = vsel %vm425_vm8, %v505_v35, %v488_v39  ;;  %v516_v49 = vperm.slane %v508_v43, %v5720_v8  ;;  %v524_v55 = vperm.slane %v518_v44, %v5720_v8 }
 0x251   :  { %v475_v50 = vrot.slane %v460_v36, 4  ;;  %v528_v56 = vperm.slane %v520_v54, %v5720_v8  ;;  %v450_v57 = vsel %vm425_vm8, %v449_v21, %v432_v40  ;;  %v477_v58 = vrot.slane %v468_v45, 4 }
 0x252   :  { %v480_v59 = vsel %vm425_vm8, 0.0, %v479_v46  ;;  %v531_v61 = vrot.slane %v516_v49, 4  ;;  %v456_v60 = vperm.slane %v450_v57, %v5720_v8  ;;  %v533_v62 = vrot.slane %v524_v55, 4 }
 0x253   :  { %v535_v9 = vrot.slane %v528_v56, 4  ;;  %v595_v37 = vrot.slane %v480_v59, 4  ;;  %v512_v10 = vperm.slane %v506_v47, %v5720_v8  ;;  %v478_v38 = vsel %vm425_vm8, 0.0, %v477_v58 }
 0x254   :  { %v532_v39 = vsel %vm425_vm8, 0.0, %v531_v61  ;;  %v473_v11 = vrot.slane %v456_v60, 4  ;;  %v537_v12 = vsel %vm425_vm8, %v477_v58, %v456_v60  ;;  %v534_v40 = vsel %vm425_vm8, 0.0, %v533_v62 }
 0x255   :  { %v536_v13 = vsel %vm425_vm8, 0.0, %v535_v9  ;;  %v589_v14 = vrot.slane %v478_v38, 4  ;;  %v529_v15 = vrot.slane %v512_v10, 4  ;;  %v601_v16 = vrot.slane %v534_v40, 4 }
 0x256   :  { %v607_v17 = vrot.slane %v536_v13, 4  ;;  %v541_v18 = vperm.slane %v537_v12, %v5710_v48  ;;  %v542_v19 = vsel %vm425_vm8, %v479_v46, %v460_v36  ;;  %v547_v22 = vsel %vm425_vm8, %v533_v62, %v512_v10 }
 0x257   :  { %v546_v20 = vperm.slane %v542_v19, %v5710_v48  ;;  %v552_v23 = vsel %vm425_vm8, %v535_v9, %v516_v49  ;;  %v474_v25 = vsel %vm425_vm8, 0.0, %v473_v11  ;;  %v551_v51 = vperm.slane %v547_v22, %v5710_v48 }
 0x258   :  { %v556_v31 = vperm.slane %v552_v23, %v5710_v48  ;;  %v559_v52 = vrot.slane %v541_v18, 4  ;;  %v476_v53 = vsel %vm425_vm8, 0.0, %v475_v50  ;;  %v530_v21 = vsel %vm425_vm8, 0.0, %v529_v15 }
 0x259   :  { %v557_v54 = vrot.slane %v546_v20, 4  ;;  %v590_v32 = vsel %vm425_vm8, %v589_v14, %v474_v25  ;;  %v596_v24 = vsel %vm425_vm8, %v595_v37, %v476_v53  ;;  %v571_v42 = vrot.slane %v551_v51, 4 }
 0x25a   :  { %v569_v35 = vrot.slane %v556_v31, 4  ;;  %v560_v36 = vsel %vm425_vm8, %v546_v20, %v559_v52  ;;  %v594_v43 = vperm.slane %v590_v32, %v5710_v48  ;;  %v600_v46 = vperm.slane %v596_v24, %v5710_v48 }
 0x25b   :  { %v558_v44 = vsel %vm425_vm8, %v557_v54, %v541_v18  ;;  %v568_v45 = vperm.slane %v560_v36, %v5720_v8  ;;  %v602_v47 = vsel %vm425_vm8, %v601_v16, %v530_v21  ;;  %v572_v55 = vsel %vm425_vm8, %v556_v31, %v571_v42  ;;  %v5131_v36 = vpop.permute.xlu1 %5130 }
 0x25c   :  { %v564_v49 = vperm.slane %v558_v44, %v5720_v8  ;;  %v570_v50 = vsel %vm425_vm8, %v569_v35, %v551_v51  ;;  %v606_v56 = vperm.slane %v602_v47, %v5710_v48  ;;  %v580_v58 = vperm.slane %v572_v55, %v5720_v8 }
 0x25d   :  { %v576_v57 = vperm.slane %v570_v50, %v5720_v8  ;;  %v587_v59 = vrot.slane %v568_v45, 4  ;;  %v608_v61 = vsel %vm425_vm8, %v607_v17, %v532_v39  ;;  %v613_v9 = vrot.slane %v600_v46, 4 }
 0x25e   :  { %v583_v60 = vrot.slane %v564_v49, 4  ;;  %v612_v62 = vperm.slane %v608_v61, %v5710_v48  ;;  %v615_v37 = vrot.slane %v594_v43, 4  ;;  %v585_v38 = vrot.slane %v580_v58, 4 }
 0x25f   :  { %v581_v10 = vrot.slane %v576_v57, 4  ;;  %v5785_v11 = vsel %vm425_vm8, %v580_v58, %v587_v59  ;;  %v627_v12 = vrot.slane %v606_v56, 4  ;;  %v614_v13 = vsel %vm425_vm8, %v613_v9, %v594_v43 }
 0x260   :  { %v5788_v40 = vsel %vm425_vm8, %v576_v57, %v583_v60  ;;  %v625_v14 = vrot.slane %v612_v62, 4  ;;  %v5795_v39 = vsel %vm425_vm8, %v585_v38, %v568_v45  ;;  %v620_v16 = vperm.slane %v614_v13, %v5720_v8 }
 0x261   :  { %v5792_v15 = vsel %vm425_vm8, %v581_v10, %v564_v49  ;;  %v616_v18 = vsel %vm425_vm8, %v600_v46, %v615_v37  ;;  %v628_v23 = vsel %vm425_vm8, %v612_v62, %v627_v12  ;;  %v5132_v43 = vunpack.i.l.bf16 %v5131_v36 }
 0x262   :  { %v626_v17 = vsel %vm425_vm8, %v625_v14, %v606_v56  ;;  %v639_v20 = vrot.slane %v620_v16, 4  ;;  %v624_v22 = vperm.slane %v616_v18, %v5720_v8  ;;  %v636_v25 = vperm.slane %v628_v23, %v5720_v8 }
 0x263   :  { %v632_v19 = vperm.slane %v626_v17, %v5720_v8  ;;  %v5133_v45 = vunpack.i.h.bf16 %v5131_v36  ;;  %v679_v47 = vrot.slane %v5132_v43, 4 }
 0x264   :  { %v643_v52 = vrot.slane %v624_v22, 4  ;;  %v641_v53 = vrot.slane %v636_v25, 4 }
 0x265   :  { %v637_v51 = vrot.slane %v632_v19, 4  ;;  %v5805_v31 = vsel %vm425_vm8, %v632_v19, %v639_v20  ;;  %v735_v50 = vrot.slane %v5133_v45, 4 }
 0x266   :  { %v5811_v21 = vsel %vm425_vm8, %v636_v25, %v643_v52  ;;  %v5814_v32 = vsel %vm425_vm8, %v641_v53, %v624_v22 }
 0x267   :  { %v5808_v54 = vsel %vm425_vm8, %v637_v51, %v620_v16 }
 0x28a   :  { %v5136_v24 = vpop.permute.xlu2 %5135 }
 0x28b   :  { %v5138_v55 = vunpack.i.h.bf16 %v5136_v24  ;;  %v5137_v56 = vunpack.i.l.bf16 %v5136_v24 }
 0x28d   :  { %v747_v60 = vrot.slane %v5138_v55, 4  ;;  %v691_v62 = vrot.slane %v5137_v56, 4 }
 0x292   :  { %v5141_v35 = vpop.permute.xlu2 %5140 }
 0x293   :  { %v5142_v42 = vunpack.i.l.bf16 %v5141_v35  ;;  %v5143_v44 = vunpack.i.h.bf16 %v5141_v35 }
 0x295   :  { %v677_v46 = vrot.slane %v5142_v42, 4  ;;  %v733_v49 = vrot.slane %v5143_v44, 4  ;;  %v680_v57 = vsel %vm425_vm8, %v5142_v42, %v679_v47  ;;  %v736_v58 = vsel %vm425_vm8, %v5143_v44, %v735_v50 }
 0x296   :  { %v688_v9 = vperm.slane %v680_v57, %v5710_v48  ;;  %v744_v10 = vperm.slane %v736_v58, %v5710_v48 }
 0x297   :  { %v678_v59 = vsel %vm425_vm8, %v677_v46, %v5132_v43  ;;  %v734_v61 = vsel %vm425_vm8, %v733_v49, %v5133_v45 }
 0x298   :  { %v684_v38 = vperm.slane %v678_v59, %v5710_v48  ;;  %v740_v14 = vperm.slane %v734_v61, %v5710_v48  ;;  %v715_v20 = vrot.slane %v688_v9, 4  ;;  %v771_v25 = vrot.slane %v744_v10, 4 }
 0x29a   :  { %v703_v51 = vrot.slane %v684_v38, 4  ;;  %v759_v43 = vrot.slane %v740_v14, 4 }
 0x2a1   :  { %v5146_v37 = vpop.permute.xlu2 %5145 }
 0x2a2   :  { %v5148_v12 = vunpack.i.h.bf16 %v5146_v37  ;;  %v5147_v13 = vunpack.i.l.bf16 %v5146_v37 }
 0x2a4   :  { %v745_v16 = vrot.slane %v5148_v12, 4  ;;  %v689_v17 = vrot.slane %v5147_v13, 4  ;;  %v692_v18 = vsel %vm425_vm8, %v5147_v13, %v691_v62  ;;  %v748_v19 = vsel %vm425_vm8, %v5148_v12, %v747_v60 }
 0x2a5   :  { %v700_v22 = vperm.slane %v692_v18, %v5710_v48  ;;  %v756_v23 = vperm.slane %v748_v19, %v5710_v48 }
 0x2a6   :  { %v690_v52 = vsel %vm425_vm8, %v689_v17, %v5137_v56  ;;  %v746_v53 = vsel %vm425_vm8, %v745_v16, %v5138_v55 }
 0x2a7   :  { %v696_v24 = vperm.slane %v690_v52, %v5710_v48  ;;  %v713_v35 = vrot.slane %v700_v22, 4  ;;  %v716_v36 = vsel %vm425_vm8, %v700_v22, %v715_v20  ;;  %v752_v42 = vperm.slane %v746_v53, %v5710_v48 }
 0x2a8   :  { %v724_v44 = vperm.slane %v716_v36, %v5720_v8  ;;  %v769_v45 = vrot.slane %v756_v23, 4  ;;  %v772_v46 = vsel %vm425_vm8, %v756_v23, %v771_v25 }
 0x2a9   :  { %v701_v47 = vrot.slane %v696_v24, 4  ;;  %v704_v49 = vsel %vm425_vm8, %v696_v24, %v703_v51  ;;  %v714_v50 = vsel %vm425_vm8, %v713_v35, %v688_v9  ;;  %v757_v56 = vrot.slane %v752_v42, 4 }
 0x2aa   :  { %v712_v55 = vperm.slane %v704_v49, %v5720_v8  ;;  %v720_v57 = vperm.slane %v714_v50, %v5720_v8  ;;  %v731_v58 = vrot.slane %v724_v44, 4  ;;  %v760_v59 = vsel %vm425_vm8, %v752_v42, %v759_v43 }
 0x2ab   :  { %v702_v61 = vsel %vm425_vm8, %v701_v47, %v684_v38  ;;  %v758_v60 = vsel %vm425_vm8, %v757_v56, %v740_v14  ;;  %v768_v62 = vperm.slane %v760_v59, %v5720_v8  ;;  %v770_v37 = vsel %vm425_vm8, %v769_v45, %v744_v10 }
 0x2ac   :  { %v708_v12 = vperm.slane %v702_v61, %v5720_v8  ;;  %v727_v13 = vrot.slane %v712_v55, 4  ;;  %v729_v9 = vrot.slane %v720_v57, 4  ;;  %v732_v16 = vsel %vm425_vm8, 0.0, %v731_v58 }
 0x2ad   :  { %v764_v17 = vperm.slane %v758_v60, %v5720_v8  ;;  %v776_v18 = vperm.slane %v770_v37, %v5720_v8  ;;  %v780_v19 = vperm.slane %v772_v46, %v5720_v8  ;;  %v783_v20 = vrot.slane %v768_v62, 4 }
 0x2ae   :  { %v730_v38 = vsel %vm425_vm8, 0.0, %v729_v9  ;;  %v847_v14 = vrot.slane %v732_v16, 4  ;;  %v789_v22 = vsel %vm425_vm8, %v729_v9, %v708_v12  ;;  %v794_v10 = vsel %vm425_vm8, %v731_v58, %v712_v55 }
 0x2af   :  { %v781_v23 = vrot.slane %v764_v17, 4  ;;  %v784_v25 = vsel %vm425_vm8, 0.0, %v783_v20  ;;  %v785_v51 = vrot.slane %v776_v18, 4  ;;  %v787_v52 = vrot.slane %v780_v19, 4 }
 0x2b0   :  { %v841_v53 = vrot.slane %v730_v38, 4  ;;  %v793_v24 = vperm.slane %v789_v22, %v5710_v48  ;;  %v798_v35 = vperm.slane %v794_v10, %v5710_v48  ;;  %v725_v36 = vrot.slane %v708_v12, 4 }
 0x2b1   :  { %v786_v42 = vsel %vm425_vm8, 0.0, %v785_v51  ;;  %v788_v43 = vsel %vm425_vm8, 0.0, %v787_v52  ;;  %v799_v44 = vsel %vm425_vm8, %v785_v51, %v764_v17  ;;  %v804_v45 = vsel %vm425_vm8, %v787_v52, %v768_v62 }
 0x2b2   :  { %v853_v46 = vrot.slane %v786_v42, 4  ;;  %v859_v47 = vrot.slane %v788_v43, 4  ;;  %v803_v49 = vperm.slane %v799_v44, %v5710_v48  ;;  %v808_v50 = vperm.slane %v804_v45, %v5710_v48 }
 0x2b3   :  { %v809_v56 = vrot.slane %v798_v35, 4  ;;  %v811_v55 = vrot.slane %v793_v24, 4  ;;  %v726_v57 = vsel %vm425_vm8, 0.0, %v725_v36  ;;  %v728_v58 = vsel %vm425_vm8, 0.0, %v727_v13 }
 0x2b4   :  { %v821_v59 = vrot.slane %v808_v50, 4  ;;  %v823_v61 = vrot.slane %v803_v49, 4  ;;  %v782_v60 = vsel %vm425_vm8, 0.0, %v781_v23  ;;  %v842_v37 = vsel %vm425_vm8, %v841_v53, %v726_v57 }
 0x2b5   :  { %v810_v62 = vsel %vm425_vm8, %v809_v56, %v793_v24  ;;  %v812_v12 = vsel %vm425_vm8, %v798_v35, %v811_v55  ;;  %v846_v9 = vperm.slane %v842_v37, %v5710_v48  ;;  %v848_v16 = vsel %vm425_vm8, %v847_v14, %v728_v58 }
 0x2b6   :  { %v816_v17 = vperm.slane %v810_v62, %v5720_v8  ;;  %v822_v18 = vsel %vm425_vm8, %v821_v59, %v803_v49  ;;  %v820_v13 = vperm.slane %v812_v12, %v5720_v8  ;;  %v824_v19 = vsel %vm425_vm8, %v808_v50, %v823_v61 }
 0x2b7   :  { %v828_v20 = vperm.slane %v822_v18, %v5720_v8  ;;  %v832_v38 = vperm.slane %v824_v19, %v5720_v8  ;;  %v852_v22 = vperm.slane %v848_v16, %v5710_v48  ;;  %v854_v10 = vsel %vm425_vm8, %v853_v46, %v782_v60 }
 0x2b8   :  { %v835_v23 = vrot.slane %v816_v17, 4  ;;  %v839_v51 = vrot.slane %v820_v13, 4  ;;  %v858_v14 = vperm.slane %v854_v10, %v5710_v48  ;;  %v860_v52 = vsel %vm425_vm8, %v859_v47, %v784_v25 }
 0x2b9   :  { %v833_v53 = vrot.slane %v828_v20, 4  ;;  %v837_v24 = vrot.slane %v832_v38, 4  ;;  %v864_v35 = vperm.slane %v860_v52, %v5710_v48  ;;  %v865_v36 = vrot.slane %v852_v22, 4 }
 0x2ba   :  { %v836_v42 = vsel %vm425_vm8, %v828_v20, %v835_v23  ;;  %v840_v43 = vsel %vm425_vm8, %v832_v38, %v839_v51  ;;  %v867_v44 = vrot.slane %v846_v9, 4  ;;  %v879_v45 = vrot.slane %v858_v14, 4 }
 0x2bb   :  { %v834_v49 = vsel %vm425_vm8, %v833_v53, %v816_v17  ;;  %v898_v46 = vpack.c.bf16 %v836_v42, %v836_v42  ;;  %v838_v50 = vsel %vm425_vm8, %v837_v24, %v820_v13  ;;  %v900_v56 = vpack.c.bf16 %v840_v43, %v840_v43 }
 0x2bc   :  { %v897_v55 = vpack.c.bf16 %v834_v49, %v834_v49  ;;  %v899_v57 = vpack.c.bf16 %v838_v50, %v838_v50  ;;  %v866_v25 = vsel %vm425_vm8, %v865_v36, %v846_v9  ;;  %v877_v47 = vrot.slane %v864_v35, 4 }
 0x2bd   :  { %v1181_v58 = vsel %vm1157_vm9, %v898_v46, 0  ;;  %v1219_v59 = vsel %vm1157_vm9, %v900_v56, 0  ;;  %v872_v61 = vperm.slane %v866_v25, %v5720_v8  ;;  %v868_v60 = vsel %vm425_vm8, %v852_v22, %v867_v44 }
 0x2be   :  { %v1162_v37 = vsel %vm1157_vm9, %v897_v55, 0  ;;  %1190 = vmatpush.bf16.xpose.msra.mxu2 %v1181_v58  ;;  %v1200_v62 = vsel %vm1157_vm9, %v899_v57, 0  ;;  %1228 = vmatpush.bf16.xpose.msrb.mxu0 %v1219_v59  ;;  %v878_v12 = vsel %vm425_vm8, %v877_v47, %v858_v14  ;;  %v876_v16 = vperm.slane %v868_v60, %v5720_v8 }
 0x2bf   :  { %1171 = vmatpush.bf16.xpose.msra.mxu1 %v1162_v37  ;;  %1209 = vmatpush.bf16.xpose.msra.mxu3 %v1200_v62  ;;  %v884_v9 = vperm.slane %v878_v12, %v5720_v8  ;;  %v891_v17 = vrot.slane %v872_v61, 4  ;;  %v880_v18 = vsel %vm425_vm8, %v864_v35, %v879_v45  ;;  %v648_v52 = vpack.c.bf16 %v5785_v11, %v5785_v11 }
 0x2c0   :  { %v888_v13 = vperm.slane %v880_v18, %v5720_v8  ;;  %v895_v19 = vrot.slane %v876_v16, 4  ;;  %v645_v36 = vpack.c.bf16 %v5792_v15, %v5792_v15  ;;  %v646_v44 = vpack.c.bf16 %v5788_v40, %v5788_v40 }
 0x2c1   :  { %v889_v20 = vrot.slane %v884_v9, 4  ;;  %v892_v38 = vsel %vm425_vm8, %v884_v9, %v891_v17  ;;  %v647_v15 = vpack.c.bf16 %v5795_v39, %v5795_v39  ;;  %v652_v40 = vpack.c.bf16 %v5811_v21, %v5811_v21 }
 0x2c2   :  { %v902_v22 = vpack.c.bf16 %v892_v38, %v892_v38  ;;  %v893_v10 = vrot.slane %v888_v13, 4  ;;  %v896_v23 = vsel %vm425_vm8, %v888_v13, %v895_v19  ;;  %v649_v49 = vpack.c.bf16 %v5808_v54, %v5808_v54  ;;  %v393_v54 = vld [vmem:[%s7562_s0] sm:$0x3] }
 0x2c3   :  { %v890_v51 = vsel %vm425_vm8, %v889_v20, %v872_v61  ;;  %v904_v14 = vpack.c.bf16 %v896_v23, %v896_v23  ;;  %v650_v46 = vpack.c.bf16 %v5805_v31, %v5805_v31  ;;  %v651_v39 = vpack.c.bf16 %v5814_v32, %v5814_v32 }
 0x2c4   :  { %v901_v53 = vpack.c.bf16 %v890_v51, %v890_v51  ;;  %v1257_v24 = vsel %vm1157_vm9, %v902_v22, 0  ;;  %v894_v35 = vsel %vm425_vm8, %v893_v10, %v876_v16  ;;  %v388_v50 = vlaneseq }
 0x2c5   :  { %v903_v42 = vpack.c.bf16 %v894_v35, %v894_v35  ;;  %v1295_v43 = vsel %vm1157_vm9, %v904_v14, 0  ;;  %4988 = vmatmul.msk.bf16.vlgmr.msrb.gmra.mxu0 %vm1157_vm9, %v648_v52  ;;  %4986 = vmatmul.msk.bf16.vlgmr.msra.gmra.mxu2 %vm1157_vm9, %v646_v44  ;;  %v398_v55 = vperm.slane %v393_v54, 0  ;;  %v395_v61 = vrot.slane %v393_v54, 1 }
 0x2c6   :  { %1266 = vmatpush.bf16.xpose.msrb.mxu2 %v1257_v24  ;;  %v1238_v45 = vsel %vm1157_vm9, %v901_v53, 0  ;;  %1304 = vmatpush.bf16.xpose.msra.mxu0 %v1295_v43  ;;  %v389_v56 = vshrl.u32 %v388_v50, 7  ;;  %v391_v21 = vand.u32 127, %v388_v50 }
 0x2c7   :  { %4985 = vmatmul.msk.bf16.vlgmr.msra.gmra.mxu1 %vm1157_vm9, %v645_v36  ;;  %v1276_v11 = vsel %vm1157_vm9, %v903_v42, 0  ;;  %4987 = vmatmul.msk.bf16.vlgmr.msra.gmra.mxu3 %vm1157_vm9, %v647_v15  ;;  %v399_v17 = vperm.slane %v395_v61, 0 }
 0x2c8   :  { %1247 = vmatpush.bf16.xpose.msrb.mxu1 %v1238_v45  ;;  %1285 = vmatpush.bf16.xpose.msrb.mxu3 %v1276_v11  ;;  %vm392_vm10 = vcmp.gt.s32.totalorder %v391_v21, %v389_v56 }
 0x2c9   :  { %v402_v31 = vsel %vm392_vm10, -1e+18, %v398_v55  ;;  %v403_v19 = vsel %vm392_vm10, -1e+18, %v399_v17 }
 0x2d5   :  { %4992 = vmatmul.msk.bf16.vlgmr.msra.gmra.mxu0 %vm1157_vm9, %v652_v40  ;;  %4990 = vmatmul.msk.bf16.vlgmr.msrb.gmra.mxu2 %vm1157_vm9, %v650_v46 }
 0x2d7   :  { %4989 = vmatmul.msk.bf16.vlgmr.msrb.gmra.mxu1 %vm1157_vm9, %v649_v49  ;;  %4991 = vmatmul.msk.bf16.vlgmr.msrb.gmra.mxu3 %vm1157_vm9, %v651_v39 }
 0x342   :  { %v1230_v57 = vpop.f32.mrf.mxu0 }
 0x343   :  { %v1313_v47 = vadd.f32 %v1230_v57, %v402_v31 }
 0x344   :  { %v1173_v25 = vpop.f32.mrf.mxu1 }
 0x345   :  { %v1310_v58 = vadd.f32 %v1173_v25, %v402_v31  ;;  %v1327_v59 = vsel %vm1157_vm9, %v1313_v47, -inf }
 0x346   :  { %1328 = vmax.xlane.f32.xlu1 %v1327_v59 }
 0x347   :  { %v1318_v32 = vsel %vm1157_vm9, %v1310_v58, -inf }
 0x348   :  { %1319 = vmax.xlane.f32.xlu0 %v1318_v32  ;;  %v1192_v60 = vpop.f32.mrf.mxu2 }
 0x349   :  { %v1311_v62 = vadd.f32 %v1192_v60, %v402_v31 }
 0x34a   :  { %v1232_v37 = vpop.f32.mrf.mxu0  ;;  %v1211_v16 = vpop.f32.mrf.mxu3 }
 0x34b   :  { %v1312_v9 = vadd.f32 %v1211_v16, %v402_v31  ;;  %v1321_v18 = vsel %vm1157_vm9, %v1311_v62, -inf }
 0x34c   :  { %v1175_v12 = vpop.f32.mrf.mxu1 }
 0x34d   :  { %v1324_v13 = vsel %vm1157_vm9, %v1312_v9, -inf }
 0x34e   :  { %1325 = vmax.xlane.f32.xlu2 %v1324_v13 }
 0x350   :  { %1322 = vmax.xlane.f32.xlu0 %v1321_v18  ;;  %v1194_v20 = vpop.f32.mrf.mxu2 }
 0x352   :  { %v1306_v38 = vpop.f32.mrf.mxu0  ;;  %v1213_v23 = vpop.f32.mrf.mxu3 }
 0x353   :  { %v1317_v10 = vadd.f32 %v1306_v38, %v403_v19 }
 0x354   :  { %v1249_v22 = vpop.f32.mrf.mxu1 }
 0x355   :  { %v5937_v51 = vadd.f32 %v1249_v22, %v403_v19  ;;  %v1339_v14 = vsel %vm1157_vm9, %v1317_v10, -inf }
 0x357   :  { %v1330_v52 = vsel %vm1157_vm9, %v5937_v51, -inf }
 0x358   :  { %1340 = vmax.xlane.f32.xlu0 %v1339_v14  ;;  %1331 = vmax.xlane.f32.xlu2 %v1330_v52  ;;  %v1268_v53 = vpop.f32.mrf.mxu2 }
 0x359   :  { %v1315_v35 = vadd.f32 %v1268_v53, %v403_v19 }
 0x35a   :  { %v1308_v24 = vpop.f32.mrf.mxu0  ;;  %v1287_v42 = vpop.f32.mrf.mxu3 }
 0x35b   :  { %v1316_v43 = vadd.f32 %v1287_v42, %v403_v19  ;;  %v1333_v45 = vsel %vm1157_vm9, %v1315_v35, -inf }
 0x35c   :  { %v1251_v36 = vpop.f32.mrf.mxu1 }
 0x35d   :  { %v1336_v44 = vsel %vm1157_vm9, %v1316_v43, -inf }
 0x35e   :  { %1337 = vmax.xlane.f32.xlu1 %v1336_v44 }
 0x360   :  { %1334 = vmax.xlane.f32.xlu2 %v1333_v45  ;;  %v1270_v11 = vpop.f32.mrf.mxu2 }
 0x362   :  { %v1289_v15 = vpop.f32.mrf.mxu3 }
 0x36c   :  { %5155 = vrot.lane.b32.xlu0 %v5698_v34, %s5420_s23 }
 0x374   :  { %5165 = vrot.lane.b32.xlu0 %v5718_v63, %s5420_s23 }
 0x377   :  { %5150 = vrot.lane.b32.xlu1 %v5688_v33, %s5420_s23 }
 0x378   :  { %5160 = vrot.lane.b32.xlu2 %v5704_v41, %s5420_s23 }
 0x3b9   :  { %v1329_v40 = vpop.xlane.xlu1 %1328 }
 0x3ba   :  { %v1345_v46 = vsub.f32 %v1313_v47, %v1329_v40 }
 0x3bb   :  { %v1320_v49 = vpop.xlane.xlu0 %1319 }
 0x3bc   :  { %v1356_v39 = vmul.f32 1.442695, %v1345_v46  ;;  %v1342_v31 = vsub.f32 %v1310_v58, %v1320_v49 }
 0x3be   :  { %5299 = vpow2.f32 %v1356_v39  ;;  %v1350_v33 = vmul.f32 1.442695, %v1342_v31 }
 0x3c1   :  { %v1326_v56 = vpop.xlane.xlu2 %1325 }
 0x3c2   :  { %v1344_v55 = vsub.f32 %v1312_v9, %v1326_v56 }
 0x3c3   :  { %v1323_v50 = vpop.xlane.xlu0 %1322 }
 0x3c4   :  { %v1343_v21 = vsub.f32 %v1311_v62, %v1323_v50  ;;  %v5948_v54 = vpop.eup %5299  ;;  %v1354_v63 = vmul.f32 1.442695, %v1344_v55 }
 0x3c5   :  { %v1375_v34 = vsel %vm1157_vm9, %v5948_v54, 0.0 }
 0x3c6   :  { %v1352_v57 = vmul.f32 1.442695, %v1343_v21  ;;  %1376 = vadd.xlane.f32.xlu0 %v1375_v34 }
 0x3c8   :  { %5301 = vpow2.f32 %v1352_v57 }
 0x3c9   :  { %5303 = vpow2.f32 %v1354_v63 }
 0x3ca   :  { %5305 = vpow2.f32 %v1350_v33 }
 0x3cb   :  { %v1341_v41 = vpop.xlane.xlu0 %1340  ;;  %v1332_v25 = vpop.xlane.xlu2 %1331 }
 0x3cc   :  { %v1349_v59 = vsub.f32 %v1317_v10, %v1341_v41  ;;  %v1346_v17 = vsub.f32 %v5937_v51, %v1332_v25 }
 0x3ce   :  { %v5952_v47 = vpop.eup %5301  ;;  %v1364_v60 = vmul.f32 1.442695, %v1349_v59  ;;  %v1358_v20 = vmul.f32 1.442695, %v1346_v17 }
 0x3cf   :  { %v5954_v32 = vpop.eup %5303  ;;  %v1369_v58 = vsel %vm1157_vm9, %v5952_v47, 0.0 }
 0x3d0   :  { %1370 = vadd.xlane.f32.xlu1 %v1369_v58  ;;  %v1372_v61 = vsel %vm1157_vm9, %v5954_v32, 0.0  ;;  %v5960_v37 = vpop.eup %5305  ;;  %5307 = vpow2.f32 %v1364_v60 }
 0x3d1   :  { %1373 = vadd.xlane.f32.xlu2 %v1372_v61  ;;  %v1338_v62 = vpop.xlane.xlu1 %1337  ;;  %v1366_v19 = vsel %vm1157_vm9, %v5960_v37, 0.0 }
 0x3d2   :  { %v1348_v16 = vsub.f32 %v1316_v43, %v1338_v62 }
 0x3d3   :  { %v1335_v12 = vpop.xlane.xlu2 %1334 }
 0x3d4   :  { %v1347_v9 = vsub.f32 %v1315_v35, %v1335_v12  ;;  %v1362_v18 = vmul.f32 1.442695, %v1348_v16 }
 0x3d6   :  { %v1360_v13 = vmul.f32 1.442695, %v1347_v9  ;;  %5309 = vpow2.f32 %v1362_v18  ;;  %v5965_v38 = vpop.eup %5307 }
 0x3d7   :  { %v1387_v23 = vsel %vm1157_vm9, %v5965_v38, 0.0 }
 0x3d8   :  { %1367 = vadd.xlane.f32.xlu1 %v1366_v19  ;;  %5311 = vpow2.f32 %v1360_v13 }
 0x3d9   :  { %5313 = vpow2.f32 %v1358_v20 }
 0x3db   :  { %v5161_v35 = vpop.permute.xlu2 %5160 }
 0x3dc   :  { %v5967_v10 = vpop.eup %5309  ;;  %v5163_v45 = vunpack.i.h.bf16 %v5161_v35  ;;  %v5162_v40 = vunpack.i.l.bf16 %v5161_v35 }
 0x3dd   :  { %v1384_v51 = vsel %vm1157_vm9, %v5967_v10, 0.0 }
 0x3de   :  { %v5156_v22 = vpop.permute.xlu0 %5155  ;;  %v5971_v14 = vpop.eup %5311  ;;  %1385 = vadd.xlane.f32.xlu0 %v1384_v51  ;;  %v985_v31 = vrot.slane %v5163_v45, 4  ;;  %v929_v33 = vrot.slane %v5162_v40, 4 }
 0x3df   :  { %v1381_v52 = vsel %vm1157_vm9, %v5971_v14, 0.0  ;;  %v5157_v53 = vunpack.i.l.bf16 %v5156_v22  ;;  %v5977_v24 = vpop.eup %5313  ;;  %v5158_v36 = vunpack.i.h.bf16 %v5156_v22 }
 0x3e0   :  { %1388 = vadd.xlane.f32.xlu1 %v1387_v23  ;;  %1382 = vadd.xlane.f32.xlu2 %v1381_v52  ;;  %v1378_v15 = vsel %vm1157_vm9, %v5977_v24, 0.0 }
 0x3e1   :  { %v943_v11 = vrot.slane %v5157_v53, 4  ;;  %v999_v49 = vrot.slane %v5158_v36, 4 }
 0x3e6   :  { %v5166_v42 = vpop.permute.xlu0 %5165 }
 0x3e7   :  { %v5168_v43 = vunpack.i.h.bf16 %v5166_v42  ;;  %v5167_v44 = vunpack.i.l.bf16 %v5166_v42 }
 0x3e8   :  { %1379 = vadd.xlane.f32.xlu2 %v1378_v15 }
 0x3e9   :  { %v997_v46 = vrot.slane %v5168_v43, 4  ;;  %v941_v39 = vrot.slane %v5167_v44, 4  ;;  %v944_v50 = vsel %vm425_vm8, %v5167_v44, %v943_v11  ;;  %v1000_v55 = vsel %vm425_vm8, %v5168_v43, %v999_v49  ;;  %v5151_v63 = vpop.permute.xlu1 %5150 }
 0x3ea   :  { %v952_v41 = vperm.slane %v944_v50, %v5710_v48  ;;  %v5153_v25 = vunpack.i.h.bf16 %v5151_v63  ;;  %v5152_v59 = vunpack.i.l.bf16 %v5151_v63  ;;  %v1008_v61 = vperm.slane %v1000_v55, %v5710_v48 }
 0x3eb   :  { %v942_v56 = vsel %vm425_vm8, %v941_v39, %v5157_v53  ;;  %v998_v21 = vsel %vm425_vm8, %v997_v46, %v5158_v36 }
 0x3ec   :  { %v948_v57 = vperm.slane %v942_v56, %v5710_v48  ;;  %v1004_v34 = vperm.slane %v998_v21, %v5710_v48  ;;  %v987_v62 = vrot.slane %v5153_v25, 4  ;;  %v930_v12 = vsel %vm425_vm8, %v929_v33, %v5152_v59 }
 0x3ed   :  { %v931_v16 = vrot.slane %v5152_v59, 4  ;;  %v986_v9 = vsel %vm425_vm8, %v985_v31, %v5153_v25  ;;  %v936_v17 = vperm.slane %v930_v12, %v5710_v48  ;;  %v965_v13 = vrot.slane %v952_v41, 4 }
 0x3ee   :  { %v953_v58 = vrot.slane %v948_v57, 4  ;;  %v1009_v60 = vrot.slane %v1004_v34, 4  ;;  %v992_v18 = vperm.slane %v986_v9, %v5710_v48  ;;  %v988_v20 = vsel %vm425_vm8, %v5163_v45, %v987_v62 }
 0x3ef   :  { %v932_v19 = vsel %vm425_vm8, %v5162_v40, %v931_v16  ;;  %v955_v51 = vrot.slane %v936_v17, 4  ;;  %v996_v52 = vperm.slane %v988_v20, %v5710_v48  ;;  %v1021_v53 = vrot.slane %v1008_v61, 4 }
 0x3f0   :  { %v940_v22 = vperm.slane %v932_v19, %v5710_v48  ;;  %v954_v23 = vsel %vm425_vm8, %v953_v58, %v936_v17  ;;  %v1010_v36 = vsel %vm425_vm8, %v1009_v60, %v992_v18  ;;  %v1011_v42 = vrot.slane %v992_v18, 4 }
 0x3f1   :  { %v960_v35 = vperm.slane %v954_v23, %v5720_v8  ;;  %v956_v43 = vsel %vm425_vm8, %v948_v57, %v955_v51  ;;  %v1016_v45 = vperm.slane %v1010_v36, %v5720_v8  ;;  %v1022_v56 = vsel %vm425_vm8, %v1021_v53, %v996_v52 }
 0x3f2   :  { %v966_v44 = vsel %vm425_vm8, %v965_v13, %v940_v22  ;;  %v967_v11 = vrot.slane %v940_v22, 4  ;;  %v964_v15 = vperm.slane %v956_v43, %v5720_v8  ;;  %v1012_v46 = vsel %vm425_vm8, %v1004_v34, %v1011_v42 }
 0x3f3   :  { %v972_v40 = vperm.slane %v966_v44, %v5720_v8  ;;  %v977_v49 = vrot.slane %v960_v35, 4  ;;  %v1020_v50 = vperm.slane %v1012_v46, %v5720_v8  ;;  %v1023_v21 = vrot.slane %v996_v52, 4 }
 0x3f4   :  { %v968_v39 = vsel %vm425_vm8, %v952_v41, %v967_v11  ;;  %v979_v57 = vrot.slane %v964_v15, 4  ;;  %v1028_v25 = vperm.slane %v1022_v56, %v5720_v8  ;;  %v1033_v59 = vrot.slane %v1016_v45, 4 }
 0x3f5   :  { %v976_v55 = vperm.slane %v968_v39, %v5720_v8  ;;  %v978_v31 = vsel %vm425_vm8, 0.0, %v977_v49  ;;  %v981_v63 = vrot.slane %v972_v40, 4  ;;  %v1024_v33 = vsel %vm425_vm8, %v1008_v61, %v1023_v21 }
 0x3f6   :  { %v1035_v58 = vrot.slane %v1020_v50, 4  ;;  %v980_v34 = vsel %vm425_vm8, 0.0, %v979_v57  ;;  %v1032_v62 = vperm.slane %v1024_v33, %v5720_v8  ;;  %v1034_v12 = vsel %vm425_vm8, 0.0, %v1033_v59 }
 0x3f7   :  { %v982_v41 = vsel %vm425_vm8, 0.0, %v981_v63  ;;  %v983_v60 = vrot.slane %v976_v55, 4  ;;  %v1037_v9 = vrot.slane %v1028_v25, 4  ;;  %v1041_v17 = vsel %vm425_vm8, %v981_v63, %v960_v35 }
 0x3f8   :  { %v1036_v16 = vsel %vm425_vm8, 0.0, %v1035_v58  ;;  %v1039_v18 = vrot.slane %v1032_v62, 4  ;;  %v1093_v13 = vrot.slane %v982_v41, 4  ;;  %v1045_v19 = vperm.slane %v1041_v17, %v5710_v48 }
 0x3f9   :  { %v984_v61 = vsel %vm425_vm8, 0.0, %v983_v60  ;;  %v1038_v20 = vsel %vm425_vm8, 0.0, %v1037_v9  ;;  %v1051_v22 = vsel %vm425_vm8, %v1037_v9, %v1016_v45  ;;  %v1046_v51 = vsel %vm425_vm8, %v983_v60, %v964_v15 }
 0x3fa   :  { %v1099_v23 = vrot.slane %v984_v61, 4  ;;  %v1040_v52 = vsel %vm425_vm8, 0.0, %v1039_v18  ;;  %v1055_v53 = vperm.slane %v1051_v22, %v5710_v48  ;;  %v1105_v36 = vrot.slane %v1038_v20, 4 }
 0x3fb   :  { %v1050_v35 = vperm.slane %v1046_v51, %v5710_v48  ;;  %v1111_v42 = vrot.slane %v1040_v52, 4  ;;  %v1056_v43 = vsel %vm425_vm8, %v1039_v18, %v1020_v50  ;;  %v1063_v44 = vrot.slane %v1045_v19, 4 }
 0x3fc   :  { %v1094_v11 = vsel %vm425_vm8, %v1093_v13, %v978_v31  ;;  %v1106_v40 = vsel %vm425_vm8, %v1105_v36, %v1034_v12  ;;  %v1060_v45 = vperm.slane %v1056_v43, %v5710_v48  ;;  %v1075_v49 = vrot.slane %v1055_v53, 4 }
 0x3fd   :  { %v1061_v15 = vrot.slane %v1050_v35, 4  ;;  %v1064_v46 = vsel %vm425_vm8, %v1050_v35, %v1063_v44  ;;  %v1098_v39 = vperm.slane %v1094_v11, %v5710_v48  ;;  %v1100_v56 = vsel %vm425_vm8, %v1099_v23, %v980_v34 }
 0x3fe   :  { %v1110_v21 = vperm.slane %v1106_v40, %v5710_v48  ;;  %v1072_v55 = vperm.slane %v1064_v46, %v5720_v8  ;;  %v1076_v50 = vsel %vm425_vm8, %v1060_v45, %v1075_v49  ;;  %v1073_v57 = vrot.slane %v1060_v45, 4 }
 0x3ff   :  { %v1062_v31 = vsel %vm425_vm8, %v1061_v15, %v1045_v19  ;;  %v1084_v63 = vperm.slane %v1076_v50, %v5720_v8  ;;  %v1104_v25 = vperm.slane %v1100_v56, %v5710_v48  ;;  %v1112_v59 = vsel %vm425_vm8, %v1111_v42, %v1036_v16 }
 0x400   :  { %v1068_v33 = vperm.slane %v1062_v31, %v5720_v8  ;;  %v1091_v58 = vrot.slane %v1072_v55, 4  ;;  %v1074_v34 = vsel %vm425_vm8, %v1073_v57, %v1055_v53  ;;  %v1116_v41 = vperm.slane %v1112_v59, %v5710_v48 }
 0x401   :  { %v1119_v60 = vrot.slane %v1098_v39, 4  ;;  %v1089_v62 = vrot.slane %v1084_v63, 4  ;;  %v1080_v12 = vperm.slane %v1074_v34, %v5720_v8  ;;  %v1131_v17 = vrot.slane %v1110_v21, 4 }
 0x402   :  { %v1087_v9 = vrot.slane %v1068_v33, 4  ;;  %v1092_v61 = vsel %vm425_vm8, %v1084_v63, %v1091_v58  ;;  %v1117_v13 = vrot.slane %v1104_v25, 4  ;;  %v1129_v19 = vrot.slane %v1116_v41, 4 }
 0x403   :  { %v1120_v18 = vsel %vm425_vm8, %v1104_v25, %v1119_v60  ;;  %v1090_v20 = vsel %vm425_vm8, %v1089_v62, %v1072_v55  ;;  %v1152_v16 = vpack.c.bf16 %v1092_v61, %v1092_v61  ;;  %v1085_v22 = vrot.slane %v1080_v12, 4 }
 0x404   :  { %v1088_v23 = vsel %vm425_vm8, %v1080_v12, %v1087_v9  ;;  %v1151_v51 = vpack.c.bf16 %v1090_v20, %v1090_v20  ;;  %v1128_v53 = vperm.slane %v1120_v18, %v5720_v8  ;;  %v1132_v36 = vsel %vm425_vm8, %v1116_v41, %v1131_v17 }
 0x405   :  { %v1150_v52 = vpack.c.bf16 %v1088_v23, %v1088_v23  ;;  %v1476_v35 = vsel %vm1417_vm11, %v1152_v16, 0  ;;  %v1086_v42 = vsel %vm425_vm8, %v1085_v22, %v1068_v33  ;;  %v1140_v43 = vperm.slane %v1132_v36, %v5720_v8 }
 0x406   :  { %v1118_v44 = vsel %vm425_vm8, %v1117_v13, %v1098_v39  ;;  %v1457_v11 = vsel %vm1417_vm11, %v1151_v51, 0  ;;  %1485 = vmatpush.bf16.msrb.mxu0 %v1476_v35  ;;  %v1149_v40 = vpack.c.bf16 %v1086_v42, %v1086_v42  ;;  %v1147_v49 = vrot.slane %v1128_v53, 4 }
 0x407   :  { %v1438_v45 = vsel %vm1417_vm11, %v1150_v52, 0  ;;  %1466 = vmatpush.bf16.msra.mxu3 %v1457_v11  ;;  %v1145_v15 = vrot.slane %v1140_v43, 4  ;;  %v1124_v46 = vperm.slane %v1118_v44, %v5720_v8  ;;  %v1130_v56 = vsel %vm425_vm8, %v1129_v19, %v1110_v21 }
 0x408   :  { %1447 = vmatpush.bf16.msra.mxu2 %v1438_v45  ;;  %v1419_v55 = vsel %vm1417_vm11, %v1149_v40, 0  ;;  %v1148_v50 = vsel %vm425_vm8, %v1140_v43, %v1147_v49  ;;  %v1136_v39 = vperm.slane %v1130_v56, %v5720_v8 }
 0x409   :  { %1428 = vmatpush.bf16.msra.mxu1 %v1419_v55  ;;  %v1146_v31 = vsel %vm425_vm8, %v1145_v15, %v1128_v53  ;;  %v1156_v57 = vpack.c.bf16 %v1148_v50, %v1148_v50  ;;  %v1143_v63 = vrot.slane %v1124_v46, 4 }
 0x40a   :  { %v1155_v33 = vpack.c.bf16 %v1146_v31, %v1146_v31  ;;  %v1141_v25 = vrot.slane %v1136_v39, 4 }
 0x40b   :  { %v1552_v59 = vsel %vm1417_vm11, %v1156_v57, 0  ;;  %v1144_v58 = vsel %vm425_vm8, %v1136_v39, %v1143_v63 }
 0x40c   :  { %v1533_v34 = vsel %vm1417_vm11, %v1155_v33, 0  ;;  %1561 = vmatpush.bf16.msra.mxu0 %v1552_v59  ;;  %v1142_v21 = vsel %vm425_vm8, %v1141_v25, %v1124_v46  ;;  %v1154_v41 = vpack.c.bf16 %v1144_v58, %v1144_v58 }
 0x40d   :  { %1542 = vmatpush.bf16.msrb.mxu3 %v1533_v34  ;;  %v1153_v60 = vpack.c.bf16 %v1142_v21, %v1142_v21 }
 0x40e   :  { %v1514_v62 = vsel %vm1417_vm11, %v1154_v41, 0 }
 0x40f   :  { %v1495_v12 = vsel %vm1417_vm11, %v1153_v60, 0  ;;  %1523 = vmatpush.bf16.msrb.mxu2 %v1514_v62  ;;  %vm4673_vm11 = vcmask 523264  }
 0x410   :  { %1504 = vmatpush.bf16.msrb.mxu1 %v1495_v12 }
 0x439   :  { %v1377_v9 = vpop.xlane.xlu0 %1376 }
 0x43a   :  { %5315 = vrcp.f32 %v1377_v9 }
 0x440   :  { %v5316_v17 = vpop.eup %5315 }
 0x441   :  { %v1401_v61 = vmul.f32 %v5316_v17, %v5948_v54 }
 0x443   :  { %v1371_v18 = vpop.xlane.xlu1 %1370  ;;  %v1409_v13 = vpack.c.bf16 %v1401_v61, %v1401_v61 }
 0x444   :  { %5317 = vrcp.f32 %v1371_v18  ;;  %v1374_v19 = vpop.xlane.xlu2 %1373 }
 0x445   :  { %5319 = vrcp.f32 %v1374_v19  ;;  %4996 = vmatmul.msk.bf16.vlgmr.msrb.gmra.mxu0 %vm1157_vm9, %v1409_v13 }
 0x44a   :  { %v5318_v20 = vpop.eup %5317 }
 0x44b   :  { %v5320_v16 = vpop.eup %5319  ;;  %v1399_v22 = vmul.f32 %v5318_v20, %v5952_v47  ;;  %v1368_v23 = vpop.xlane.xlu1 %1367 }
 0x44c   :  { %v1400_v51 = vmul.f32 %v5320_v16, %v5954_v32  ;;  %5321 = vrcp.f32 %v1368_v23 }
 0x44d   :  { %v1407_v52 = vpack.c.bf16 %v1399_v22, %v1399_v22 }
 0x44e   :  { %v1408_v53 = vpack.c.bf16 %v1400_v51, %v1400_v51 }
 0x44f   :  { %4994 = vmatmul.msk.bf16.vlgmr.msra.gmra.mxu2 %vm1157_vm9, %v1407_v52 }
 0x450   :  { %4995 = vmatmul.msk.bf16.vlgmr.msra.gmra.mxu3 %vm1157_vm9, %v1408_v53 }
 0x451   :  { %v1386_v42 = vpop.xlane.xlu0 %1385 }
 0x452   :  { %v5322_v54 = vpop.eup %5321 }
 0x453   :  { %v1398_v36 = vmul.f32 %v5322_v54, %v5960_v37  ;;  %v1389_v35 = vpop.xlane.xlu1 %1388  ;;  %v1383_v44 = vpop.xlane.xlu2 %1382 }
 0x454   :  { %5323 = vrcp.f32 %v1389_v35 }
 0x455   :  { %v1406_v43 = vpack.c.bf16 %v1398_v36, %v1398_v36  ;;  %5325 = vrcp.f32 %v1386_v42 }
 0x456   :  { %5327 = vrcp.f32 %v1383_v44 }
 0x457   :  { %4993 = vmatmul.msk.bf16.vlgmr.msra.gmra.mxu1 %vm1157_vm9, %v1406_v43 }
 0x45a   :  { %v5324_v47 = vpop.eup %5323 }
 0x45b   :  { %v5326_v32 = vpop.eup %5325  ;;  %v1405_v11 = vmul.f32 %v5324_v47, %v5965_v38  ;;  %v1380_v37 = vpop.xlane.xlu2 %1379 }
 0x45c   :  { %v5328_v40 = vpop.eup %5327  ;;  %v1404_v45 = vmul.f32 %v5326_v32, %v5967_v10  ;;  %5329 = vrcp.f32 %v1380_v37 }
 0x45d   :  { %v1413_v49 = vpack.c.bf16 %v1405_v11, %v1405_v11  ;;  %v1403_v15 = vmul.f32 %v5328_v40, %v5971_v14 }
 0x45e   :  { %v1412_v46 = vpack.c.bf16 %v1404_v45, %v1404_v45 }
 0x45f   :  { %v1411_v56 = vpack.c.bf16 %v1403_v15, %v1403_v15  ;;  %5000 = vmatmul.msk.bf16.vlgmr.msra.gmra.mxu0 %vm1157_vm9, %v1413_v49 }
 0x460   :  { %4999 = vmatmul.msk.bf16.vlgmr.msrb.gmra.mxu3 %vm1157_vm9, %v1412_v46 }
 0x461   :  { %4998 = vmatmul.msk.bf16.vlgmr.msrb.gmra.mxu2 %vm1157_vm9, %v1411_v56 }
 0x462   :  { %v5330_v55 = vpop.eup %5329 }
 0x463   :  { %v1402_v50 = vmul.f32 %v5330_v55, %v5977_v24 }
 0x465   :  { %v1410_v38 = vpack.c.bf16 %v1402_v50, %v1402_v50 }
 0x467   :  { %4997 = vmatmul.msk.bf16.vlgmr.msrb.gmra.mxu1 %vm1157_vm9, %v1410_v38 }
 0x4c2   :  { %v1487_v10 = vpop.f32.mrf.mxu0 }
 0x4c3   :  { %v1579_v31 = vrot.slane %v1487_v10, 4 }
 0x4ca   :  { %v1489_v39 = vpop.f32.mrf.mxu0 }
 0x4d2   :  { %v1449_v14 = vpop.f32.mrf.mxu2 }
 0x4d3   :  { %v1580_v57 = vsel %vm425_vm8, %v1579_v31, %v1449_v14  ;;  %v1581_v63 = vrot.slane %v1449_v14, 4  ;;  %v1468_v33 = vpop.f32.mrf.mxu3 }
 0x4d4   :  { %v1586_v25 = vperm.slane %v1580_v57, %v5710_v48  ;;  %v1567_v59 = vrot.slane %v1468_v33, 4  ;;  %v1430_v58 = vpop.f32.mrf.mxu1 }
 0x4d5   :  { %v1582_v34 = vsel %vm425_vm8, %v1487_v10, %v1581_v63  ;;  %v1569_v21 = vrot.slane %v1430_v58, 4 }
 0x4d6   :  { %v1590_v24 = vperm.slane %v1582_v34, %v5710_v48  ;;  %v1591_v41 = vrot.slane %v1586_v25, 4  ;;  %v1568_v60 = vsel %vm425_vm8, %v1567_v59, %v1430_v58 }
 0x4d7   :  { %v1570_v62 = vsel %vm425_vm8, %v1468_v33, %v1569_v21  ;;  %v1574_v12 = vperm.slane %v1568_v60, %v5710_v48 }
 0x4d8   :  { %v1603_v9 = vrot.slane %v1590_v24, 4  ;;  %v1578_v17 = vperm.slane %v1570_v62, %v5710_v48 }
 0x4d9   :  { %v1592_v61 = vsel %vm425_vm8, %v1591_v41, %v1574_v12  ;;  %v1593_v18 = vrot.slane %v1574_v12, 4 }
 0x4da   :  { %v1604_v13 = vsel %vm425_vm8, %v1603_v9, %v1578_v17  ;;  %v1605_v19 = vrot.slane %v1578_v17, 4  ;;  %v1451_v20 = vpop.f32.mrf.mxu2  ;;  %v1598_v22 = vperm.slane %v1592_v61, %v5720_v8 }
 0x4db   :  { %v1594_v16 = vsel %vm425_vm8, %v1586_v25, %v1593_v18  ;;  %v1470_v23 = vpop.f32.mrf.mxu3  ;;  %v1610_v52 = vperm.slane %v1604_v13, %v5720_v8 }
 0x4dc   :  { %v1606_v51 = vsel %vm425_vm8, %v1590_v24, %v1605_v19  ;;  %v1432_v53 = vpop.f32.mrf.mxu1  ;;  %v1563_v54 = vpop.f32.mrf.mxu0  ;;  %v1602_v36 = vperm.slane %v1594_v16, %v5720_v8  ;;  %v1615_v42 = vrot.slane %v1598_v22, 4 }
 0x4dd   :  { %v1614_v35 = vperm.slane %v1606_v51, %v5720_v8  ;;  %v1619_v43 = vrot.slane %v1610_v52, 4  ;;  %v1635_v11 = vrot.slane %v1563_v54, 4 }
 0x4de   :  { %v1617_v44 = vrot.slane %v1602_v36, 4  ;;  %v1616_v32 = vsel %vm425_vm8, 0.0, %v1615_v42 }
 0x4df   :  { %v1621_v47 = vrot.slane %v1614_v35, 4  ;;  %v1620_v45 = vsel %vm425_vm8, 0.0, %v1619_v43  ;;  %v1679_v38 = vrot.slane %v1616_v32, 4 }
 0x4e0   :  { %v1618_v55 = vsel %vm425_vm8, 0.0, %v1617_v44  ;;  %v1735_v31 = vrot.slane %v1620_v45, 4 }
 0x4e1   :  { %v1622_v50 = vsel %vm425_vm8, 0.0, %v1621_v47  ;;  %v1691_v58 = vrot.slane %v1618_v55, 4  ;;  %v1680_v12 = vsel %vm425_vm8, %v1679_v38, %v1598_v22 }
 0x4e2   :  { %v1747_v34 = vrot.slane %v1622_v50, 4  ;;  %v1736_v9 = vsel %vm425_vm8, %v1735_v31, %v1610_v52  ;;  %v1684_v22 = vperm.slane %v1680_v12, %v5710_v48 }
 0x4e3   :  { %v1544_v40 = vpop.f32.mrf.mxu3  ;;  %v1692_v16 = vsel %vm425_vm8, %v1691_v58, %v1602_v36  ;;  %v1740_v52 = vperm.slane %v1736_v9, %v5710_v48 }
 0x4e4   :  { %v1525_v49 = vpop.f32.mrf.mxu2  ;;  %v1623_v15 = vrot.slane %v1544_v40, 4  ;;  %v1565_v37 = vpop.f32.mrf.mxu0  ;;  %v1748_v43 = vsel %vm425_vm8, %v1747_v34, %v1614_v35  ;;  %v1705_v55 = vrot.slane %v1684_v22, 4 }
 0x4e5   :  { %v1636_v46 = vsel %vm425_vm8, %v1635_v11, %v1525_v49  ;;  %v1637_v56 = vrot.slane %v1525_v49, 4  ;;  %v1506_v39 = vpop.f32.mrf.mxu1  ;;  %v1696_v11 = vperm.slane %v1692_v16, %v5710_v48  ;;  %v1752_v35 = vperm.slane %v1748_v43, %v5710_v48 }
 0x4e6   :  { %v1642_v10 = vperm.slane %v1636_v46, %v5710_v48  ;;  %v1624_v57 = vsel %vm425_vm8, %v1623_v15, %v1506_v39  ;;  %v1625_v63 = vrot.slane %v1506_v39, 4 }
 0x4e7   :  { %v1638_v14 = vsel %vm425_vm8, %v1563_v54, %v1637_v56  ;;  %v1630_v59 = vperm.slane %v1624_v57, %v5710_v48  ;;  %v1717_v57 = vrot.slane %v1696_v11, 4 }
 0x4e8   :  { %v1646_v33 = vperm.slane %v1638_v14, %v5710_v48  ;;  %v1647_v25 = vrot.slane %v1642_v10, 4  ;;  %v1626_v21 = vsel %vm425_vm8, %v1544_v40, %v1625_v63 }
 0x4e9   :  { %v1634_v41 = vperm.slane %v1626_v21, %v5710_v48  ;;  %v1649_v62 = vrot.slane %v1630_v59, 4  ;;  %v1773_v21 = vrot.slane %v1752_v35, 4 }
 0x4ea   :  { %v1659_v24 = vrot.slane %v1646_v33, 4  ;;  %v1648_v60 = vsel %vm425_vm8, %v1647_v25, %v1630_v59 }
 0x4eb   :  { %v1654_v17 = vperm.slane %v1648_v60, %v5720_v8  ;;  %v1546_v61 = vpop.f32.mrf.mxu3  ;;  %v1650_v18 = vsel %vm425_vm8, %v1642_v10, %v1649_v62  ;;  %v1661_v19 = vrot.slane %v1634_v41, 4  ;;  %v1761_v10 = vrot.slane %v1740_v52, 4 }
 0x4ec   :  { %v1660_v13 = vsel %vm425_vm8, %v1659_v24, %v1634_v41  ;;  %v1527_v20 = vpop.f32.mrf.mxu2  ;;  %v1658_v23 = vperm.slane %v1650_v18, %v5720_v8 }
 0x4ed   :  { %v1666_v51 = vperm.slane %v1660_v13, %v5720_v8  ;;  %v1671_v53 = vrot.slane %v1654_v17, 4  ;;  %v1662_v54 = vsel %vm425_vm8, %v1646_v33, %v1661_v19  ;;  %v1508_v42 = vpop.f32.mrf.mxu1 }
 0x4ee   :  { %v1670_v44 = vperm.slane %v1662_v54, %v5720_v8  ;;  %v1673_v32 = vrot.slane %v1658_v23, 4 }
 0x4ef   :  { %v1672_v47 = vsel %vm425_vm8, 0.0, %v1671_v53  ;;  %v1675_v36 = vrot.slane %v1666_v51, 4 }
 0x4f0   :  { %v1685_v40 = vrot.slane %v1672_v47, 4  ;;  %v1674_v45 = vsel %vm425_vm8, 0.0, %v1673_v32  ;;  %v1677_v15 = vrot.slane %v1670_v44, 4 }
 0x4f1   :  { %v1676_v49 = vsel %vm425_vm8, 0.0, %v1675_v36  ;;  %v1697_v46 = vrot.slane %v1674_v45, 4 }
 0x4f2   :  { %v1686_v37 = vsel %vm425_vm8, %v1685_v40, %v1654_v17  ;;  %v1741_v56 = vrot.slane %v1676_v49, 4  ;;  %v1678_v50 = vsel %vm425_vm8, 0.0, %v1677_v15 }
 0x4f3   :  { %v1690_v38 = vperm.slane %v1686_v37, %v5710_v48  ;;  %v1698_v39 = vsel %vm425_vm8, %v1697_v46, %v1658_v23  ;;  %v1753_v14 = vrot.slane %v1678_v50, 4 }
 0x4f4   :  { %v1742_v31 = vsel %vm425_vm8, %v1741_v56, %v1666_v51  ;;  %v1702_v33 = vperm.slane %v1698_v39, %v5710_v48  ;;  %v5082_v39 = vld [vmem:[%s7513_s8] sm:$0xff] }
 0x4f5   :  { %v1703_v63 = vrot.slane %v1690_v38, 4  ;;  %v1706_v25 = vsel %vm425_vm8, %v1690_v38, %v1705_v55  ;;  %v1746_v59 = vperm.slane %v1742_v31, %v5710_v48  ;;  %v1754_v34 = vsel %vm425_vm8, %v1753_v14, %v1670_v44 }
 0x4f6   :  { %v1714_v58 = vperm.slane %v1706_v25, %v5720_v8  ;;  %v1718_v24 = vsel %vm425_vm8, %v1702_v33, %v1717_v57  ;;  %v1758_v41 = vperm.slane %v1754_v34, %v5710_v48  ;;  %v1715_v13 = vrot.slane %v1702_v33, 4 }
 0x4f7   :  { %v1762_v60 = vsel %vm425_vm8, %v1746_v59, %v1761_v10  ;;  %v1704_v62 = vsel %vm425_vm8, %v1703_v63, %v1684_v22  ;;  %v1726_v12 = vperm.slane %v1718_v24, %v5720_v8  ;;  %v1759_v19 = vrot.slane %v1746_v59, 4  ;;  %v5083_v10 = vld [vmem:[%s7513_s8 + $0x8] sm:$0xff] }
 0x4f8   :  { %v1733_v9 = vrot.slane %v1714_v58, 4  ;;  %v1770_v17 = vperm.slane %v1762_v60, %v5720_v8  ;;  %v1710_v61 = vperm.slane %v1704_v62, %v5720_v8  ;;  %v1774_v18 = vsel %vm425_vm8, %v1758_v41, %v1773_v21  ;;  %1853 = vmatpush.bf16.msra.mxu1 %v5083_v10 }
 0x4f9   :  { %v1771_v20 = vrot.slane %v1758_v41, 4  ;;  %v1782_v16 = vperm.slane %v1774_v18, %v5720_v8  ;;  %v1731_v51 = vrot.slane %v1726_v12, 4  ;;  %v1716_v53 = vsel %vm425_vm8, %v1715_v13, %v1696_v11 }
 0x4fa   :  { %v1789_v23 = vrot.slane %v1770_v17, 4  ;;  %v1760_v22 = vsel %vm425_vm8, %v1759_v19, %v1740_v52  ;;  %v1734_v42 = vsel %vm425_vm8, %v1726_v12, %v1733_v9  ;;  %v1722_v47 = vperm.slane %v1716_v53, %v5720_v8 }
 0x4fb   :  { %v1772_v54 = vsel %vm425_vm8, %v1771_v20, %v1752_v35  ;;  %v1787_v44 = vrot.slane %v1782_v16, 4  ;;  %v1729_v36 = vrot.slane %v1710_v61, 4  ;;  %v1766_v40 = vperm.slane %v1760_v22, %v5720_v8 }
 0x4fc   :  { %v1790_v43 = vsel %vm425_vm8, %v1782_v16, %v1789_v23  ;;  %v1778_v45 = vperm.slane %v1772_v54, %v5720_v8  ;;  %v1732_v49 = vsel %vm425_vm8, %v1731_v51, %v1714_v58  ;;  %v1727_v52 = vrot.slane %v1722_v47, 4  ;;  %1854 = vmatpush.bf16.msra.mxu1 %v5082_v39 }
 0x4fd   :  { %v5179_v32 = vpack.i.bf16 %v1790_v43, %v1734_v42  ;;  %v1788_v11 = vsel %vm425_vm8, %v1787_v44, %v1770_v17  ;;  %v1785_v46 = vrot.slane %v1766_v40, 4  ;;  %v1730_v35 = vsel %vm425_vm8, %v1722_v47, %v1729_v36  ;;  %v5285_v17 = vld [vmem:[%s7514_s9] ss:$0 sm:$0xff] }
 0x4fe   :  { %v5174_v15 = vpack.i.bf16 %v1788_v11, %v1732_v49  ;;  %v1783_v37 = vrot.slane %v1778_v45, 4  ;;  %v1728_v56 = vsel %vm425_vm8, %v1727_v52, %v1710_v61 }
 0x4ff   :  { %5180 = vrot.lane.b32.xlu2 %v5179_v32, %s5421_s5  ;;  %v1786_v55 = vsel %vm425_vm8, %v1778_v45, %v1785_v46 }
 0x500   :  { %5175 = vrot.lane.b32.xlu1 %v5174_v15, %s5422_s24  ;;  %v1784_v50 = vsel %vm425_vm8, %v1783_v37, %v1766_v40  ;;  %v5169_v38 = vpack.i.bf16 %v1786_v55, %v1730_v35 }
 0x502   :  { %5170 = vrot.lane.b32.xlu0 %v5169_v38, %s5423_s6 }
 0x559   :  { %v5181_v14 = vpop.permute.xlu2 %5180 }
 0x55a   :  { %v5183_v58 = vunpack.i.h.bf16 %v5181_v14  ;;  %v5182_v34 = vunpack.i.l.bf16 %v5181_v14 }
 0x572   :  { %v5176_v31 = vpop.permute.xlu1 %5175 }
 0x573   :  { %v5178_v57 = vunpack.i.h.bf16 %v5176_v31  ;;  %v5177_v63 = vunpack.i.l.bf16 %v5176_v31 }
 0x574   :  { %v5171_v33 = vpop.permute.xlu0 %5170 }
 0x575   :  { %v5173_v25 = vunpack.i.h.bf16 %v5171_v33  ;;  %v5172_v59 = vunpack.i.l.bf16 %v5171_v33 }
 0x577   :  { %v1816_v21 = vsel %vm1157_vm9, %v1784_v50, %v5173_v25  ;;  %v1815_v24 = vsel %vm1157_vm9, %v1728_v56, %v5172_v59 }
 0x578   :  { %v1819_v41 = vsel %vm1817_vm12, %v1816_v21, %v5178_v57  ;;  %v1818_v60 = vsel %vm1817_vm12, %v1815_v24, %v5177_v63 }
 0x579   :  { %v1822_v62 = vsel %vm1820_vm13, %v1819_v41, %v5183_v58  ;;  %v1821_v12 = vsel %vm1820_vm13, %v1818_v60, %v5182_v34 }
 0x57a   :  { %v1823_v9 = vpack.c.bf16 %v1822_v62, %v1821_v12 }
 0x57c   :  { %5009 = vmatmul.msk.bf16.vlgmr.msra.gmra.mxu1 %vm110_vm0, %v1823_v9 }
 0x5f9   :  { %v1856_v61 = vpop.f32.mrf.mxu1 }
 0x5fa   :  { %v1857_v18 = vadd.f32 %v5285_v17, %v1856_v61 }
 0x5fc   :  { %v1863_v13 = vrot.slane %v1857_v18, 2  ;;  %v1864_v19 = vrot.slane %v1857_v18, 4  ;;  %v1865_v20 = vrot.slane %v1857_v18, 6  ;;  %v6185_v16 = vadd.f32 %v1857_v18, %v5545_v0 }
 0x5fe   :  { %v6188_v23 = vadd.f32 %v1863_v13, %v5550_v1  ;;  %v6191_v51 = vadd.f32 %v1864_v19, %v5555_v2  ;;  %v6194_v53 = vadd.f32 %v1865_v20, %v5560_v3  ;;  %1891 = vst [vmem:[#allocation1] ss:$4 sm:$0xff] %v6185_v16 }
 0x600   :  { %1893 = vst [vmem:[#allocation1 + $0x1] ss:$4 sm:$0xff] %v6188_v23 }
 0x601   :  { %1895 = vst [vmem:[#allocation1 + $0x2] ss:$4 sm:$0xff] %v6191_v51  ;;  %v1858_v22 = vpop.f32.mrf.mxu1 }
 0x602   :  { %1897 = vst [vmem:[#allocation1 + $0x3] ss:$4 sm:$0xff] %v6194_v53  ;;  %v1859_v0 = vadd.f32 %v5285_v17, %v1858_v22 }
 0x604   :  { %v1866_v54 = vrot.slane %v1859_v0, 2  ;;  %v1867_v42 = vrot.slane %v1859_v0, 4  ;;  %v1868_v1 = vrot.slane %v1859_v0, 6  ;;  %v6201_v43 = vadd.f32 %v1859_v0, %v5567_v4 }
 0x606   :  { %v6204_v2 = vadd.f32 %v1866_v54, %v5573_v5  ;;  %v6207_v3 = vadd.f32 %v1867_v42, %v5579_v6  ;;  %v6210_v44 = vadd.f32 %v1868_v1, %v5584_v7  ;;  %1899 = vst [vmem:[#allocation1 + $0x20] ss:$4 sm:$0xff] %v6201_v43  ;;  %v5379_v54 = vld [vmem:[%s7560_s1] sm:$0x7] }
 0x607   :  { %v6275_v42 = vperm.slane %v5379_v54, 1 }
 0x608   :  { %7563 = vst [vmem:[#allocation10_spill] sm:$0xff] %v6210_v44 }
 0x609   :  { %1901 = vst [vmem:[#allocation1 + $0x21] ss:$4 sm:$0xff] %v6204_v2  ;;  %v1906_v47 = vld.sshfl [vmem:[#allocation1] sm:$0xff pattern:$0x73625140] }
 0x60a   :  { %1903 = vst [vmem:[#allocation1 + $0x22] ss:$4 sm:$0xff] %v6207_v3  ;;  %v1910_v4 = vsel %vm110_vm0, %v1906_v47, 0.0  ;;  %v5085_v47 = vld [vmem:[%s7515_s10 + $0x8] sm:$0xff] }
 0x60b   :  { %1905 = vst [vmem:[#allocation1 + $0x23] ss:$4 sm:$0xff] %v6210_v44  ;;  %1911 = vadd.xlane.f32.xlu0 %v1910_v4  ;;  %2172 = vmatpush.bf16.msra.mxu2 %v5085_v47 }
 0x612   :  { %v1907_v5 = vld.sshfl [vmem:[#allocation1 + $0x20] sm:$0xff pattern:$0x73625140] }
 0x613   :  { %v1913_v32 = vsel %vm110_vm0, %v1907_v5, 0.0  ;;  %v5380_v5 = vld [vmem:[%s7561_s26] sm:$0x7] }
 0x614   :  { %1914 = vadd.xlane.f32.xlu1 %v1913_v32  ;;  %v6283_v32 = vperm.slane %v5380_v5, 1 }
 0x67e   :  { %v1912_v6 = vpop.xlane.xlu0 %1911 }
 0x67f   :  { %v1916_v7 = vmul.f32 %v1912_v6, %v5592_v26 }
 0x681   :  { %v1923_v36 = vperm.slane %v1916_v7, %v5594_v27  ;;  %v1927_v40 = vperm.slane %v1916_v7, %v5596_v28  ;;  %v1931_v45 = vperm.slane %v1916_v7, %v5598_v29  ;;  %v1935_v49 = vperm.slane %v1916_v7, %v5600_v30 }
 0x683   :  { %v6224_v11 = vsub.f32 %v6185_v16, %v1923_v36  ;;  %v6227_v52 = vsub.f32 %v6188_v23, %v1927_v40  ;;  %v6230_v15 = vsub.f32 %v6191_v51, %v1931_v45  ;;  %v6233_v37 = vsub.f32 %v6194_v53, %v1935_v49 }
 0x684   :  { %v2085_v36 = vrot.slane %v6275_v42, 2  ;;  %v2086_v40 = vrot.slane %v6275_v42, 4  ;;  %v2087_v45 = vrot.slane %v6275_v42, 6 }
 0x685   :  { %v1968_v46 = vmul.f32 %v6224_v11, %v6224_v11  ;;  %v1969_v56 = vmul.f32 %v6227_v52, %v6227_v52  ;;  %v1970_v35 = vmul.f32 %v6230_v15, %v6230_v15  ;;  %v1971_v55 = vmul.f32 %v6233_v37, %v6233_v37 }
 0x687   :  { %v1915_v50 = vpop.xlane.xlu1 %1914  ;;  %1984 = vst [vmem:[#allocation1] ss:$4 sm:$0xff] %v1968_v46 }
 0x688   :  { %v1917_v38 = vmul.f32 %v1915_v50, %v5592_v26  ;;  %1986 = vst [vmem:[#allocation1 + $0x1] ss:$4 sm:$0xff] %v1969_v56  ;;  %v5084_v50 = vld [vmem:[%s7515_s10] sm:$0xff] }
 0x689   :  { %1988 = vst [vmem:[#allocation1 + $0x2] ss:$4 sm:$0xff] %v1970_v35  ;;  %2173 = vmatpush.bf16.msra.mxu2 %v5084_v50  ;;  %v2187_v50 = vld [vmem:[%s7564_s25 + $0x7] sm:$0x1] }
 0x68a   :  { %v1939_v10 = vperm.slane %v1917_v38, %v5594_v27  ;;  %v1943_v39 = vperm.slane %v1917_v38, %v5596_v28  ;;  %v1947_v31 = vperm.slane %v1917_v38, %v5598_v29  ;;  %v1951_v14 = vperm.slane %v1917_v38, %v5600_v30  ;;  %1990 = vst [vmem:[#allocation1 + $0x3] ss:$4 sm:$0xff] %v1971_v55 }
 0x68b   :  { %v2101_v38 = vrot.slane %v6283_v32, 2 }
 0x68c   :  { %v6249_v57 = vsub.f32 %v6201_v43, %v1939_v10  ;;  %v6252_v63 = vsub.f32 %v6204_v2, %v1943_v39  ;;  %v6255_v33 = vsub.f32 %v6207_v3, %v1947_v31  ;;  %v6258_v25 = vsub.f32 %v6210_v44, %v1951_v14 }
 0x68d   :  { %v2102_v10 = vrot.slane %v6283_v32, 4 }
 0x68e   :  { %v1972_v59 = vmul.f32 %v6249_v57, %v6249_v57  ;;  %v1973_v58 = vmul.f32 %v6252_v63, %v6252_v63  ;;  %v1974_v34 = vmul.f32 %v6255_v33, %v6255_v33  ;;  %v1975_v21 = vmul.f32 %v6258_v25, %v6258_v25 }
 0x690   :  { %1992 = vst [vmem:[#allocation1 + $0x20] ss:$4 sm:$0xff] %v1972_v59 }
 0x691   :  { %1994 = vst [vmem:[#allocation1 + $0x21] ss:$4 sm:$0xff] %v1973_v58  ;;  %v1999_v24 = vld.sshfl [vmem:[#allocation1] sm:$0xff pattern:$0x73625140] }
 0x692   :  { %1996 = vst [vmem:[#allocation1 + $0x22] ss:$4 sm:$0xff] %v1974_v34  ;;  %v2003_v41 = vsel %vm110_vm0, %v1999_v24, 0.0  ;;  %v5087_v34 = vld [vmem:[%s7517_s12 + $0x8] sm:$0xff] }
 0x693   :  { %1998 = vst [vmem:[#allocation1 + $0x23] ss:$4 sm:$0xff] %v1975_v21  ;;  %2004 = vadd.xlane.f32.xlu2 %v2003_v41  ;;  %v2103_v21 = vrot.slane %v6283_v32, 6  ;;  %2267 = vmatpush.bf16.msra.mxu3 %v5087_v34  ;;  %v2194_v34 = vld [vmem:[%s7564_s25 + $0xe] sm:$0x1] }
 0x69a   :  { %v2000_v60 = vld.sshfl [vmem:[#allocation1 + $0x20] sm:$0xff pattern:$0x73625140] }
 0x69b   :  { %v2006_v62 = vsel %vm110_vm0, %v2000_v60, 0.0 }
 0x69c   :  { %2007 = vadd.xlane.f32.xlu0 %v2006_v62 }
 0x706   :  { %v2005_v12 = vpop.xlane.xlu2 %2004 }
 0x707   :  { %v2009_v9 = vmul.f32 %v2005_v12, %v5592_v26 }
 0x709   :  { %v2011_v17 = vadd.f32 1e-06, %v2009_v9  ;;  %v5086_v9 = vld [vmem:[%s7517_s12] sm:$0xff] }
 0x70a   :  { %2268 = vmatpush.bf16.msra.mxu3 %v5086_v9 }
 0x70b   :  { %5331 = vrsqrt.f32 %v2011_v17  ;;  %vm2019_vm15 = vweird.f32 %v2011_v17 }
 0x70f   :  { %v2008_v61 = vpop.xlane.xlu0 %2007 }
 0x710   :  { %v2010_v18 = vmul.f32 %v2008_v61, %v5592_v26 }
 0x711   :  { %v5332_v13 = vpop.eup %5331 }
 0x712   :  { %v2014_v19 = vmul.f32 %v5332_v13, %v2011_v17  ;;  %v2012_v20 = vadd.f32 1e-06, %v2010_v18  ;;  %vm2020_vm14 = vweird.f32 %v5332_v13 }
 0x713   :  { %vm2021_vm1 = vmor %vm2019_vm15, %vm2020_vm14  ;;  %vm4949_vm15 = vcmask 254976  }
 0x714   :  { %v2015_v22 = vmul.f32 %v5332_v13, %v2014_v19  ;;  %5333 = vrsqrt.f32 %v2012_v20  ;;  %vm2029_vm3 = vweird.f32 %v2012_v20 }
 0x716   :  { %v2016_v0 = vmul.f32 0.5, %v2015_v22 }
 0x718   :  { %v2017_v1 = vsub.f32 1.5, %v2016_v0 }
 0x71a   :  { %v5334_v4 = vpop.eup %5333  ;;  %v2018_v6 = vmul.f32 %v5332_v13, %v2017_v1 }
 0x71b   :  { %v2024_v7 = vmul.f32 %v5334_v4, %v2012_v20  ;;  %vm2030_vm2 = vweird.f32 %v5334_v4 }
 0x71c   :  { %v2022_v49 = vsel %vm2021_vm1, %v5332_v13, %v2018_v6  ;;  %vm2031_vm4 = vmor %vm2029_vm3, %vm2030_vm2 }
 0x71d   :  { %v2038_v46 = vperm.slane %v2022_v49, %v5594_v27  ;;  %v2042_v56 = vperm.slane %v2022_v49, %v5596_v28  ;;  %v2046_v35 = vperm.slane %v2022_v49, %v5598_v29  ;;  %v2050_v55 = vperm.slane %v2022_v49, %v5600_v30 }
 0x71e   :  { %v2025_v39 = vmul.f32 %v5334_v4, %v2024_v7 }
 0x71f   :  { %v2075_v31 = vmul.f32 %v2038_v46, %v6224_v11  ;;  %v2076_v14 = vmul.f32 %v2042_v56, %v6227_v52  ;;  %v2077_v59 = vmul.f32 %v2046_v35, %v6230_v15  ;;  %v2078_v58 = vmul.f32 %v2050_v55, %v6233_v37  ;;  %v2186_v55 = vld [vmem:[%s7564_s25 + $0x6] sm:$0x1] }
 0x720   :  { %v2026_v24 = vmul.f32 0.5, %v2025_v39 }
 0x721   :  { %v2091_v41 = vmul.f32 %v6275_v42, %v2075_v31  ;;  %v2092_v60 = vmul.f32 %v2085_v36, %v2076_v14  ;;  %v2093_v62 = vmul.f32 %v2086_v40, %v2077_v59  ;;  %v2094_v12 = vmul.f32 %v2087_v45, %v2078_v58  ;;  %v2189_v31 = vld [vmem:[%s7564_s25 + $0x9] sm:$0x1]  ;;  %v2190_v14 = vld [vmem:[%s7564_s25 + $0xa] sm:$0x1]  ;;  %v2191_v59 = vld [vmem:[%s7564_s25 + $0xb] sm:$0x1] }
 0x722   :  { %v2027_v11 = vsub.f32 1.5, %v2026_v24  ;;  %v2193_v58 = vld [vmem:[%s7564_s25 + $0xd] sm:$0x1] }
 0x723   :  { %v2107_v52 = vadd.f32 %v6283_v32, %v2091_v41  ;;  %v2108_v15 = vadd.f32 %v2101_v38, %v2092_v60  ;;  %v2109_v37 = vadd.f32 %v2102_v10, %v2093_v62  ;;  %v2110_v17 = vadd.f32 %v2103_v21, %v2094_v12  ;;  %v5287_v62 = vld [vmem:[%s7518_s13] ss:$0 sm:$0xff] }
 0x724   :  { %v2028_v61 = vmul.f32 %v5334_v4, %v2027_v11 }
 0x725   :  { %2123 = vst [vmem:[#allocation1] ss:$4 sm:$0xff] %v2107_v52 }
 0x726   :  { %2125 = vst [vmem:[#allocation1 + $0x1] ss:$4 sm:$0xff] %v2108_v15  ;;  %v2032_v18 = vsel %vm2031_vm4, %v5334_v4, %v2028_v61 }
 0x727   :  { %2127 = vst [vmem:[#allocation1 + $0x2] ss:$4 sm:$0xff] %v2109_v37  ;;  %v2054_v13 = vperm.slane %v2032_v18, %v5594_v27  ;;  %v2058_v19 = vperm.slane %v2032_v18, %v5596_v28  ;;  %v2062_v22 = vperm.slane %v2032_v18, %v5598_v29  ;;  %v2066_v0 = vperm.slane %v2032_v18, %v5600_v30 }
 0x728   :  { %2129 = vst [vmem:[#allocation1 + $0x3] ss:$4 sm:$0xff] %v2110_v17 }
 0x729   :  { %v2079_v54 = vmul.f32 %v2054_v13, %v6249_v57  ;;  %v2080_v1 = vmul.f32 %v2058_v19, %v6252_v63  ;;  %v2081_v20 = vmul.f32 %v2062_v22, %v6255_v33  ;;  %v2082_v47 = vmul.f32 %v2066_v0, %v6258_v25  ;;  %v2184_v57 = vld [vmem:[%s7564_s25 + $0x4] sm:$0x1]  ;;  %v2180_v33 = vld [vmem:[%s7564_s25] sm:$0x1]  ;;  %v2181_v25 = vld [vmem:[%s7564_s25 + $0x1] sm:$0x1] }
 0x72a   :  { %v5286_v19 = vld [vmem:[%s7516_s11] ss:$0 sm:$0xff] }
 0x72b   :  { %v2095_v4 = vmul.f32 %v6275_v42, %v2079_v54  ;;  %v2096_v5 = vmul.f32 %v2085_v36, %v2080_v1  ;;  %v2097_v6 = vmul.f32 %v2086_v40, %v2081_v20  ;;  %v2098_v7 = vmul.f32 %v2087_v45, %v2082_v47  ;;  %v2182_v42 = vld [vmem:[%s7564_s25 + $0x2] sm:$0x1]  ;;  %v2183_v36 = vld [vmem:[%s7564_s25 + $0x3] sm:$0x1]  ;;  %v2185_v45 = vld [vmem:[%s7564_s25 + $0x5] sm:$0x1] }
 0x72d   :  { %v2111_v49 = vadd.f32 %v6283_v32, %v2095_v4  ;;  %v2112_v46 = vadd.f32 %v2101_v38, %v2096_v5  ;;  %v2113_v56 = vadd.f32 %v2102_v10, %v2097_v6  ;;  %v2114_v35 = vadd.f32 %v2103_v21, %v2098_v7  ;;  %v2192_v38 = vld [vmem:[%s7564_s25 + $0xc] sm:$0x1]  ;;  %v2188_v10 = vld [vmem:[%s7564_s25 + $0x8] sm:$0x1]  ;;  %v2195_v21 = vld [vmem:[%s7564_s25 + $0xf] sm:$0x1] }
 0x72f   :  { %2131 = vst [vmem:[#allocation1 + $0x20] ss:$4 sm:$0xff] %v2111_v49  ;;  %v2138_v63 = vld.sshfl [vmem:[#allocation1] sm:$0xff pattern:$0x73625140] }
 0x730   :  { %2133 = vst [vmem:[#allocation1 + $0x21] ss:$4 sm:$0xff] %v2112_v46 }
 0x731   :  { %2135 = vst [vmem:[#allocation1 + $0x22] ss:$4 sm:$0xff] %v2113_v56 }
 0x732   :  { %2137 = vst [vmem:[#allocation1 + $0x23] ss:$4 sm:$0xff] %v2114_v35 }
 0x733   :  { %2217 = vst [vmem:[#allocation1 + $0x4] ss:$9 sm:$0xff] %v2184_v57 }
 0x739   :  { %v2139_v32 = vld.sshfl [vmem:[#allocation1 + $0x20] sm:$0xff pattern:$0x73625140] }
 0x73a   :  { %2205 = vst [vmem:[#allocation1] ss:$9 sm:$0xff] %v2180_v33  ;;  %v2142_v40 = vpack.c.bf16 %v2139_v32, %v2138_v63 }
 0x73b   :  { %2208 = vst [vmem:[#allocation1 + $0x1] ss:$9 sm:$0xff] %v2181_v25 }
 0x73c   :  { %2211 = vst [vmem:[#allocation1 + $0x2] ss:$9 sm:$0xff] %v2182_v42  ;;  %5018 = vmatmul.msk.bf16.vlgmr.msra.gmra.mxu2 %vm110_vm0, %v2142_v40 }
 0x73d   :  { %2214 = vst [vmem:[#allocation1 + $0x3] ss:$9 sm:$0xff] %v2183_v36 }
 0x73e   :  { %2220 = vst [vmem:[#allocation1 + $0x5] ss:$9 sm:$0xff] %v2185_v45 }
 0x73f   :  { %2223 = vst [vmem:[#allocation1 + $0x6] ss:$9 sm:$0xff] %v2186_v55 }
 0x740   :  { %2226 = vst [vmem:[#allocation1 + $0x7] ss:$9 sm:$0xff] %v2187_v50 }
 0x747   :  { %v2227_v39 = vld [vmem:[#allocation1] sm:$0xff] }
 0x748   :  { %2237 = vst [vmem:[#allocation1 + $0x4] ss:$9 sm:$0xff] %v2192_v38  ;;  %5027 = vmatmul.msk.bf16.vlgmr.msra.gmra.mxu3 %vm110_vm0, %v2227_v39 }
 0x749   :  { %2229 = vst [vmem:[#allocation1] ss:$9 sm:$0xff] %v2188_v10 }
 0x74a   :  { %2231 = vst [vmem:[#allocation1 + $0x1] ss:$9 sm:$0xff] %v2189_v31 }
 0x74b   :  { %2233 = vst [vmem:[#allocation1 + $0x2] ss:$9 sm:$0xff] %v2190_v14 }
 0x74c   :  { %2235 = vst [vmem:[#allocation1 + $0x3] ss:$9 sm:$0xff] %v2191_v59 }
 0x74d   :  { %2239 = vst [vmem:[#allocation1 + $0x5] ss:$9 sm:$0xff] %v2193_v58 }
 0x74e   :  { %2241 = vst [vmem:[#allocation1 + $0x6] ss:$9 sm:$0xff] %v2194_v34 }
 0x74f   :  { %2243 = vst [vmem:[#allocation1 + $0x7] ss:$9 sm:$0xff] %v2195_v21 }
 0x756   :  { %v2244_v24 = vld [vmem:[#allocation1] sm:$0xff] }
 0x758   :  { %5028 = vmatmul.msk.bf16.gmra.mxu3 %vm110_vm0, %v2244_v24 }
 0x7bf   :  { %v2175_v15 = vpop.f32.mrf.mxu2 }
 0x7c0   :  { %v6389_v0 = vadd.f32 %v5286_v19, %v2175_v15 }
 0x7c7   :  { %v2177_v13 = vpop.f32.mrf.mxu2 }
 0x7c8   :  { %v6387_v22 = vadd.f32 %v5286_v19, %v2177_v13 }
 0x7ca   :  { %v5224_v54 = vpack.i.bf16 %v6389_v0, %v6387_v22 }
 0x7cb   :  { %v2270_v41 = vpop.f32.mrf.mxu3 }
 0x7cc   :  { %v6374_v11 = vadd.f32 %v5287_v62, %v2270_v41 }
 0x7d3   :  { %v2272_v60 = vpop.f32.mrf.mxu3 }
 0x7d4   :  { %v2273_v17 = vadd.f32 %v5287_v62, %v2272_v60 }
 0x7d6   :  { %v2627_v25 = vrot.slane %v2273_v17, 4 }
 0x7db   :  { %v2275_v12 = vpop.f32.mrf.mxu3 }
 0x7dc   :  { %v6376_v52 = vadd.f32 %v5287_v62, %v2275_v12 }
 0x7de   :  { %v5184_v37 = vpack.i.bf16 %v6376_v52, %v6374_v11 }
 0x7e0   :  { %5185 = vrot.lane.b32.xlu2 %v5184_v37, %s5416_s29 }
 0x7e3   :  { %v2277_v9 = vpop.f32.mrf.mxu3 }
 0x7e4   :  { %v2278_v61 = vadd.f32 %v5287_v62, %v2277_v9 }
 0x7e6   :  { %v5194_v18 = vpack.i.bf16 %v2278_v61, %v2273_v17  ;;  %v2739_v38 = vrot.slane %v2278_v61, 4 }
 0x7e8   :  { %5195 = vrot.lane.b32.xlu0 %v5194_v18, %s5417_s30  ;;  %5190 = vrot.lane.b32.xlu1 %v5194_v18, %s5416_s29 }
 0x7e9   :  { %5210 = vrot.lane.b32.xlu2 %v5184_v37, %s5415_s28 }
 0x7f0   :  { %5205 = vrot.lane.b32.xlu1 %v5194_v18, %s5415_s28  ;;  %5200 = vrot.lane.b32.xlu0 %v5184_v37, %s5417_s30 }
 0x7f1   :  { %5225 = vrot.lane.b32.xlu2 %v5224_v54, %s5415_s28 }
 0x7f8   :  { %5220 = vrot.lane.b32.xlu1 %v5224_v54, %s5417_s30  ;;  %5215 = vrot.lane.b32.xlu0 %v5224_v54, %s5416_s29  ;;  %v2683_v54 = vrot.slane %v6376_v52, 4  ;;  %s7580_s29 = sld [smem:[#allocation14_spill]] }
 0x7f9   :  { %5230 = vrot.lane.b32.xlu2 %v5184_v37, %s5414_s3 }
 0x800   :  { %5235 = vrot.lane.b32.xlu0 %v5194_v18, %s5414_s3 }
 0x83a   :  { %v5186_v1 = vpop.permute.xlu2 %5185 }
 0x83b   :  { %v5187_v5 = vunpack.i.l.bf16 %v5186_v1  ;;  %v5188_v6 = vunpack.i.h.bf16 %v5186_v1 }
 0x83d   :  { %v2583_v46 = vrot.slane %v5187_v5, 4  ;;  %v2695_v56 = vrot.slane %v5188_v6, 4 }
 0x843   :  { %v5211_v20 = vpop.permute.xlu2 %5210 }
 0x844   :  { %v6400_v47 = vunpack.i.h.bf16 %v5211_v20  ;;  %v6402_v4 = vunpack.i.l.bf16 %v5211_v20 }
 0x846   :  { %v2693_v7 = vrot.slane %v6400_v47, 4  ;;  %v2581_v49 = vrot.slane %v6402_v4, 4  ;;  %v2584_v35 = vsel %vm425_vm8, %v6402_v4, %v2583_v46  ;;  %v2696_v33 = vsel %vm425_vm8, %v6400_v47, %v2695_v56 }
 0x847   :  { %v6417_v50 = vperm.slane %v2584_v35, %v5710_v48  ;;  %v6420_v10 = vperm.slane %v2696_v33, %v5710_v48 }
 0x848   :  { %v2582_v57 = vsel %vm425_vm8, %v2581_v49, %v5187_v5  ;;  %v2694_v63 = vsel %vm425_vm8, %v2693_v7, %v5188_v6 }
 0x849   :  { %v6426_v58 = vperm.slane %v2582_v57, %v5710_v48  ;;  %v6429_v34 = vperm.slane %v2694_v63, %v5710_v48  ;;  %v2605_v13 = vrot.slane %v6417_v50, 4  ;;  %v2717_v19 = vrot.slane %v6420_v10, 4 }
 0x84b   :  { %v6422_v39 = vpop.permute.xlu2 %5225  ;;  %v2593_v1 = vrot.slane %v6426_v58, 4  ;;  %v2705_v35 = vrot.slane %v6429_v34, 4 }
 0x84c   :  { %v7534_v15 = vunpack.i.h.bf16 %v6422_v39  ;;  %v7533_v37 = vunpack.i.l.bf16 %v6422_v39  ;;  %v7568_v29 = vunpack.i.l.bf16 %v6422_v39 }
 0x84e   :  { %v6456_v57 = vrot.slane %v7534_v15, 4  ;;  %v6460_v63 = vrot.slane %v7533_v37, 4 }
 0x85a   :  { %v6412_v42 = vpop.permute.xlu0 %5195  ;;  %v5191_v32 = vpop.permute.xlu1 %5190 }
 0x85b   :  { %v5198_v36 = vunpack.i.h.bf16 %v6412_v42  ;;  %v5197_v40 = vunpack.i.l.bf16 %v6412_v42  ;;  %v5193_v45 = vunpack.i.h.bf16 %v5191_v32  ;;  %v5192_v55 = vunpack.i.l.bf16 %v5191_v32 }
 0x85d   :  { %v2737_v31 = vrot.slane %v5198_v36, 4  ;;  %v2625_v14 = vrot.slane %v5197_v40, 4  ;;  %v2628_v59 = vsel %vm425_vm8, %v5197_v40, %v2627_v25  ;;  %v2740_v60 = vsel %vm425_vm8, %v5198_v36, %v2739_v38 }
 0x85e   :  { %v5239_v62 = vpack.i.bf16 %v5192_v55, %v5187_v5  ;;  %v5249_v12 = vpack.i.bf16 %v5193_v45, %v5188_v6  ;;  %v2636_v18 = vperm.slane %v2628_v59, %v5710_v48  ;;  %v2751_v5 = vrot.slane %v5193_v45, 4 }
 0x85f   :  { %v2738_v41 = vsel %vm425_vm8, %v2737_v31, %v2278_v61  ;;  %v2626_v9 = vsel %vm425_vm8, %v2625_v14, %v2273_v17  ;;  %v2571_v61 = vrot.slane %v6374_v11, 4  ;;  %v2748_v17 = vperm.slane %v2740_v60, %v5710_v48 }
 0x860   :  { %5240 = vrot.lane.b32.xlu1 %v5239_v62, %s5414_s3  ;;  %5250 = vrot.lane.b32.xlu0 %v5249_v12, %s5414_s3  ;;  %v2744_v20 = vperm.slane %v2738_v41, %v5710_v48  ;;  %v2632_v7 = vperm.slane %v2626_v9, %v5710_v48  ;;  %v2639_v49 = vrot.slane %v5192_v55, 4  ;;  %v2663_v33 = vrot.slane %v2636_v18, 4 }
 0x861   :  { %v2775_v14 = vrot.slane %v2748_v17, 4 }
 0x862   :  { %v5206_v6 = vpop.permute.xlu1 %5205  ;;  %v6462_v25 = vpop.permute.xlu0 %5200  ;;  %v2763_v31 = vrot.slane %v2744_v20, 4  ;;  %v2651_v60 = vrot.slane %v2632_v7, 4 }
 0x863   :  { %v6449_v46 = vunpack.i.h.bf16 %v5206_v6  ;;  %v6451_v56 = vunpack.i.l.bf16 %v5206_v6  ;;  %v5203_v9 = vunpack.i.h.bf16 %v6462_v25  ;;  %5245 = vrot.lane.b32.xlu2 %v6462_v25, %s5414_s3 }
 0x865   :  { %v2749_v32 = vrot.slane %v6449_v46, 4  ;;  %v2637_v36 = vrot.slane %v6451_v56, 4  ;;  %v2640_v40 = vsel %vm425_vm8, %v6451_v56, %v2639_v49  ;;  %v2752_v38 = vsel %vm425_vm8, %v6449_v46, %v2751_v5 }
 0x866   :  { %v2648_v59 = vperm.slane %v2640_v40, %v5710_v48  ;;  %v2760_v41 = vperm.slane %v2752_v38, %v5710_v48  ;;  %v5202_v38 = vunpack.i.l.bf16 %v6462_v25 }
 0x867   :  { %v2638_v62 = vsel %vm425_vm8, %v2637_v36, %v5192_v55  ;;  %v2750_v12 = vsel %vm425_vm8, %v2749_v32, %v5193_v45 }
 0x868   :  { %v2644_v6 = vperm.slane %v2638_v62, %v5710_v48  ;;  %v2661_v37 = vrot.slane %v2648_v59, 4  ;;  %v2664_v49 = vsel %vm425_vm8, %v2648_v59, %v2663_v33  ;;  %v2756_v5 = vperm.slane %v2750_v12, %v5710_v48 }
 0x869   :  { %v2672_v15 = vperm.slane %v2664_v49, %v5720_v8  ;;  %v2773_v21 = vrot.slane %v2760_v41, 4  ;;  %v2776_v40 = vsel %vm425_vm8, %v2760_v41, %v2775_v14 }
 0x86a   :  { %v2649_v24 = vrot.slane %v2644_v6, 4  ;;  %v2652_v55 = vsel %vm425_vm8, %v2644_v6, %v2651_v60  ;;  %v2662_v45 = vsel %vm425_vm8, %v2661_v37, %v2636_v18  ;;  %v2761_v32 = vrot.slane %v2756_v5, 4 }
 0x86b   :  { %v2660_v36 = vperm.slane %v2652_v55, %v5720_v8  ;;  %v2668_v62 = vperm.slane %v2662_v45, %v5720_v8  ;;  %v2679_v33 = vrot.slane %v2672_v15, 4  ;;  %v2764_v59 = vsel %vm425_vm8, %v2756_v5, %v2763_v31 }
 0x86c   :  { %v2650_v12 = vsel %vm425_vm8, %v2649_v24, %v2632_v7  ;;  %v2762_v49 = vsel %vm425_vm8, %v2761_v32, %v2744_v20  ;;  %v2772_v14 = vperm.slane %v2764_v59, %v5720_v8  ;;  %v2774_v41 = vsel %vm425_vm8, %v2773_v21, %v2748_v17 }
 0x86d   :  { %v2656_v60 = vperm.slane %v2650_v12, %v5720_v8  ;;  %v2675_v6 = vrot.slane %v2660_v36, 4  ;;  %v2677_v37 = vrot.slane %v2668_v62, 4  ;;  %v2681_v18 = vrot.slane %v5203_v9, 4 }
 0x86e   :  { %v2768_v55 = vperm.slane %v2762_v49, %v5720_v8  ;;  %v2780_v45 = vperm.slane %v2774_v41, %v5720_v8  ;;  %v2784_v15 = vperm.slane %v2776_v40, %v5720_v8  ;;  %v2787_v31 = vrot.slane %v2772_v14, 4 }
 0x86f   :  { %v2673_v5 = vrot.slane %v2656_v60, 4  ;;  %v2680_v24 = vsel %vm425_vm8, 0.0, %v2679_v33  ;;  %v2569_v20 = vrot.slane %v5202_v38, 4  ;;  %v2572_v7 = vsel %vm425_vm8, %v5202_v38, %v2571_v61 }
 0x870   :  { %v6497_v21 = vsel %vm425_vm8, 0.0, %v2677_v37  ;;  %v2785_v17 = vrot.slane %v2768_v55, 4  ;;  %v2789_v32 = vrot.slane %v2780_v45, 4  ;;  %v2791_v62 = vrot.slane %v2784_v15, 4 }
 0x871   :  { %v2676_v59 = vsel %vm425_vm8, 0.0, %v2675_v6  ;;  %v2808_v12 = vsel %vm425_vm8, %v2679_v33, %v2660_v36  ;;  %v2682_v40 = vsel %vm425_vm8, %v2681_v18, %v6376_v52  ;;  %v2684_v49 = vsel %vm425_vm8, %v5203_v9, %v2683_v54 }
 0x872   :  { %v2788_v41 = vsel %vm425_vm8, 0.0, %v2787_v31  ;;  %v2792_v61 = vsel %vm425_vm8, 0.0, %v2791_v62  ;;  %v6509_v38 = vsel %vm425_vm8, %v2677_v37, %v2656_v60  ;;  %v2915_v45 = vrot.slane %v2680_v24, 4 }
 0x873   :  { %v6512_v15 = vsel %vm425_vm8, 0.0, %v2673_v5  ;;  %v6515_v36 = vsel %vm425_vm8, 0.0, %v2785_v17  ;;  %v6518_v33 = vsel %vm425_vm8, 0.0, %v2789_v32  ;;  %v6522_v54 = vperm.slane %v2808_v12, %v5710_v48 }
 0x874   :  { %v2860_v9 = vsel %vm425_vm8, %v2791_v62, %v2772_v14  ;;  %v2971_v6 = vrot.slane %v2792_v61, 4  ;;  %v2688_v60 = vperm.slane %v2682_v40, %v5710_v48  ;;  %v2570_v37 = vsel %vm425_vm8, %v2569_v20, %v6374_v11 }
 0x875   :  { %v2580_v18 = vperm.slane %v2572_v7, %v5710_v48  ;;  %v2692_v31 = vperm.slane %v2684_v49, %v5710_v48  ;;  %v2916_v5 = vsel %vm425_vm8, %v2915_v45, %v2676_v59  ;;  %v2576_v17 = vperm.slane %v2570_v37, %v5710_v48 }
 0x876   :  { %v2707_v24 = vrot.slane %v2688_v60, 4  ;;  %v2706_v12 = vsel %vm425_vm8, %v2705_v35, %v2688_v60  ;;  %v2972_v14 = vsel %vm425_vm8, %v2971_v6, %v2788_v41 }
 0x877   :  { %v2606_v62 = vsel %vm425_vm8, %v2605_v13, %v2580_v18  ;;  %v2607_v11 = vrot.slane %v2580_v18, 4  ;;  %v2712_v20 = vperm.slane %v2706_v12, %v5720_v8  ;;  %v2594_v7 = vsel %vm425_vm8, %v2593_v1, %v2576_v17 }
 0x878   :  { %v2595_v59 = vrot.slane %v2576_v17, 4  ;;  %v2612_v40 = vperm.slane %v2606_v62, %v5720_v8  ;;  %v2708_v35 = vsel %vm425_vm8, %v6429_v34, %v2707_v24  ;;  %v2600_v49 = vperm.slane %v2594_v7, %v5720_v8 }
 0x879   :  { %v2608_v13 = vsel %vm425_vm8, %v6417_v50, %v2607_v11  ;;  %v6552_v41 = vperm.slane %v2708_v35, %v5720_v8  ;;  %v2718_v25 = vsel %vm425_vm8, %v2717_v19, %v2692_v31  ;;  %v2719_v6 = vrot.slane %v2692_v31, 4  ;;  %v5221_v11 = vpop.permute.xlu1 %5220 }
 0x87a   :  { %v2596_v1 = vsel %vm425_vm8, %v6426_v58, %v2595_v59  ;;  %v2616_v61 = vperm.slane %v2608_v13, %v5720_v8  ;;  %v2621_v45 = vrot.slane %v2612_v40, 4  ;;  %v2617_v60 = vrot.slane %v2600_v49, 4 }
 0x87b   :  { %v2604_v34 = vperm.slane %v2596_v1, %v5720_v8  ;;  %v2724_v37 = vperm.slane %v2718_v25, %v5720_v8  ;;  %v2729_v50 = vrot.slane %v2712_v20, 4  ;;  %v6563_v18 = vsel %vm425_vm8, %v2789_v32, %v2768_v55 }
 0x87c   :  { %v2623_v24 = vrot.slane %v2616_v61, 4  ;;  %v2720_v19 = vsel %vm425_vm8, %v6420_v10, %v2719_v6  ;;  %v2731_v17 = vrot.slane %v6552_v41, 4  ;;  %v6569_v58 = vperm.slane %v2860_v9, %v5710_v48 }
 0x87d   :  { %v2619_v12 = vrot.slane %v2604_v34, 4  ;;  %v2728_v62 = vperm.slane %v2720_v19, %v5720_v8  ;;  %v6574_v7 = vperm.slane %v2916_v5, %v5710_v48  ;;  %v6577_v55 = vperm.slane %v2972_v14, %v5710_v48  ;;  %v5216_v5 = vpop.permute.xlu0 %5215 }
 0x87e   :  { %v6580_v32 = vsel %vm425_vm8, 0.0, %v2621_v45  ;;  %v2733_v10 = vrot.slane %v2724_v37, 4  ;;  %v6583_v59 = vsel %vm425_vm8, 0.0, %v2617_v60  ;;  %v6586_v9 = vsel %vm425_vm8, 0.0, %v2623_v24 }
 0x87f   :  { %v6589_v40 = vsel %vm425_vm8, 0.0, %v2729_v50  ;;  %v6592_v35 = vsel %vm425_vm8, 0.0, %v2731_v17  ;;  %v6595_v14 = vsel %vm425_vm8, 0.0, %v2619_v12  ;;  %v2735_v13 = vrot.slane %v2728_v62, 4 }
 0x880   :  { %v6598_v25 = vsel %vm425_vm8, %v2621_v45, %v2600_v49  ;;  %v5223_v1 = vunpack.i.h.bf16 %v5221_v11  ;;  %v6601_v61 = vsel %vm425_vm8, 0.0, %v2733_v10  ;;  %v6604_v6 = vsel %vm425_vm8, %v2623_v24, %v2604_v34 }
 0x881   :  { %v5222_v37 = vunpack.i.l.bf16 %v5221_v11  ;;  %v6608_v50 = vsel %vm425_vm8, %v2733_v10, %v2712_v20  ;;  %v7565_v17 = vrot.slane %v6389_v0, 4  ;;  %v5218_v49 = vunpack.i.h.bf16 %v5216_v5 }
 0x882   :  { %v2301_v19 = vrot.slane %v5223_v1, 4  ;;  %v7566_v31 = vrot.slane %v6387_v22, 4  ;;  %v5217_v24 = vunpack.i.l.bf16 %v5216_v5 }
 0x883   :  { %v2304_v12 = vsel %vm425_vm8, %v5223_v1, %v7565_v17  ;;  %v2357_v62 = vrot.slane %v5222_v37, 4  ;;  %v2314_v10 = vsel %vm425_vm8, %v6456_v57, %v5218_v49  ;;  %v2315_v52 = vrot.slane %v5218_v49, 4 }
 0x884   :  { %v2312_v45 = vperm.slane %v2304_v12, %v5710_v48  ;;  %v2360_v34 = vsel %vm425_vm8, %v5222_v37, %v7566_v31  ;;  %v2302_v11 = vsel %vm425_vm8, %v2301_v19, %v6389_v0  ;;  %v2320_v60 = vperm.slane %v2314_v10, %v5710_v48 }
 0x885   :  { %v2368_v20 = vperm.slane %v2360_v34, %v5710_v48  ;;  %v2308_v1 = vperm.slane %v2302_v11, %v5710_v48  ;;  %v2358_v12 = vsel %vm425_vm8, %v2357_v62, %v6387_v22  ;;  %v7567_v0 = vunpack.i.h.bf16 %v6422_v39 }
 0x886   :  { %v2339_v17 = vrot.slane %v2312_v45, 4  ;;  %v2364_v5 = vperm.slane %v2358_v12, %v5710_v48  ;;  %v2370_v57 = vsel %vm425_vm8, %v6460_v63, %v5217_v24  ;;  %v2325_v34 = vrot.slane %v2320_v60, 4 }
 0x887   :  { %v2316_v37 = vsel %vm425_vm8, %v7567_v0, %v2315_v52  ;;  %v2327_v19 = vrot.slane %v2308_v1, 4  ;;  %v2371_v11 = vrot.slane %v5217_v24, 4  ;;  %v6635_v22 = vsel %vm425_vm8, 0.0, %v2735_v13 }
 0x888   :  { %v2324_v49 = vperm.slane %v2316_v37, %v5710_v48  ;;  %v2383_v62 = vrot.slane %v2364_v5, 4  ;;  %v2395_v10 = vrot.slane %v2368_v20, 4  ;;  %v2376_v31 = vperm.slane %v2370_v57, %v5710_v48 }
 0x889   :  { %v2326_v12 = vsel %vm425_vm8, %v2325_v34, %v2308_v1  ;;  %v2328_v30 = vsel %vm425_vm8, %v2320_v60, %v2327_v19  ;;  %v2372_v28 = vsel %vm425_vm8, %v7568_v29, %v2371_v11 }
 0x88a   :  { %v2337_v52 = vrot.slane %v2324_v49, 4  ;;  %v2340_v0 = vsel %vm425_vm8, %v2324_v49, %v2339_v17  ;;  %v2332_v63 = vperm.slane %v2326_v12, %v5720_v8  ;;  %v2336_v37 = vperm.slane %v2328_v30, %v5720_v8 }
 0x88b   :  { %v2348_v24 = vperm.slane %v2340_v0, %v5720_v8  ;;  %v2380_v57 = vperm.slane %v2372_v28, %v5710_v48  ;;  %v2381_v1 = vrot.slane %v2376_v31, 4  ;;  %v2384_v60 = vsel %vm425_vm8, %v2376_v31, %v2383_v62 }
 0x88c   :  { %v2338_v27 = vsel %vm425_vm8, %v2337_v52, %v2312_v45  ;;  %v2850_v17 = vsel %vm425_vm8, %v2735_v13, %v6552_v41  ;;  %v2351_v19 = vrot.slane %v2336_v37, 4  ;;  %v2392_v39 = vperm.slane %v2384_v60, %v5720_v8 }
 0x88d   :  { %v2344_v49 = vperm.slane %v2338_v27, %v5720_v8  ;;  %v2355_v30 = vrot.slane %v2348_v24, 4  ;;  %v2382_v34 = vsel %vm425_vm8, %v2381_v1, %v2364_v5  ;;  %v2393_v12 = vrot.slane %v2380_v57, 4 }
 0x88e   :  { %v2396_v29 = vsel %vm425_vm8, %v2380_v57, %v2395_v10  ;;  %v2349_v28 = vrot.slane %v2332_v63, 4  ;;  %v2388_v62 = vperm.slane %v2382_v34, %v5720_v8  ;;  %v2407_v13 = vrot.slane %v2392_v39, 4 }
 0x88f   :  { %v2353_v11 = vrot.slane %v2344_v49, 4  ;;  %v2356_v31 = vsel %vm425_vm8, 0.0, %v2355_v30  ;;  %v2394_v41 = vsel %vm425_vm8, %v2393_v12, %v2368_v20  ;;  %v2404_v27 = vperm.slane %v2396_v29, %v5720_v8 }
 0x890   :  { %v2400_v0 = vperm.slane %v2394_v41, %v5720_v8  ;;  %v2418_v10 = vsel %vm425_vm8, %v2355_v30, %v2336_v37  ;;  %v2352_v24 = vsel %vm425_vm8, 0.0, %v2351_v19  ;;  %v2405_v57 = vrot.slane %v2388_v62, 4 }
 0x891   :  { %v2354_v52 = vsel %vm425_vm8, 0.0, %v2353_v11  ;;  %v2411_v1 = vrot.slane %v2404_v27, 4  ;;  %v2413_v60 = vsel %vm425_vm8, %v2353_v11, %v2332_v63  ;;  %v6668_v20 = vperm.slane %v2418_v10, %v5710_v48 }
 0x892   :  { %v2409_v49 = vrot.slane %v2400_v0, 4  ;;  %v2465_v34 = vrot.slane %v2354_v52, 4  ;;  %v2471_v12 = vrot.slane %v2356_v31, 4  ;;  %v2350_v29 = vsel %vm425_vm8, 0.0, %v2349_v28 }
 0x893   :  { %v2408_v5 = vsel %vm425_vm8, 0.0, %v2407_v13  ;;  %v2412_v41 = vsel %vm425_vm8, 0.0, %v2411_v1  ;;  %v2428_v37 = vsel %vm425_vm8, %v2411_v1, %v2392_v39  ;;  %v6676_v30 = vperm.slane %v2413_v60, %v5710_v48 }
 0x894   :  { %v2410_v19 = vsel %vm425_vm8, 0.0, %v2409_v49  ;;  %v2423_v63 = vsel %vm425_vm8, %v2409_v49, %v2388_v62  ;;  %v6680_v11 = vperm.slane %v2428_v37, %v5710_v48  ;;  %v2466_v28 = vsel %vm425_vm8, %v2465_v34, %v2350_v29 }
 0x895   :  { %v6683_v31 = vperm.slane %v2423_v63, %v5710_v48  ;;  %v2472_v27 = vsel %vm425_vm8, %v2471_v12, %v2352_v24  ;;  %v2477_v13 = vrot.slane %v2410_v19, 4  ;;  %v2406_v39 = vsel %vm425_vm8, 0.0, %v2405_v57 }
 0x896   :  { %v2483_v10 = vrot.slane %v2412_v41, 4  ;;  %v6691_v62 = vperm.slane %v2466_v28, %v5710_v48  ;;  %v6694_v1 = vperm.slane %v2472_v27, %v5710_v48  ;;  %v2797_v49 = vperm.slane %v6598_v25, %v5710_v48 }
 0x897   :  { %v2478_v60 = vsel %vm425_vm8, %v2477_v13, %v2406_v39  ;;  %v2802_v12 = vperm.slane %v6604_v6, %v5710_v48  ;;  %v2807_v41 = vperm.slane %v6509_v38, %v5710_v48  ;;  %v2825_v37 = vrot.slane %v6522_v54, 4 }
 0x898   :  { %v6701_v57 = vperm.slane %v2478_v60, %v5710_v48  ;;  %v2484_v34 = vsel %vm425_vm8, %v2483_v10, %v2408_v5  ;;  %v2849_v25 = vperm.slane %v6608_v50, %v5710_v48  ;;  %v2854_v28 = vperm.slane %v2850_v17, %v5710_v48 }
 0x899   :  { %v6707_v29 = vperm.slane %v2484_v34, %v5710_v48  ;;  %v2813_v63 = vrot.slane %v2802_v12, 4  ;;  %v2859_v5 = vperm.slane %v6563_v18, %v5710_v48  ;;  %v2826_v27 = vsel %vm425_vm8, %v2825_v37, %v2807_v41 }
 0x89a   :  { %v2877_v13 = vrot.slane %v6569_v58, 4  ;;  %v2815_v38 = vrot.slane %v2797_v49, 4  ;;  %v2832_v10 = vperm.slane %v2826_v27, %v5720_v8  ;;  %v2865_v50 = vrot.slane %v2854_v28, 4 }
 0x89b   :  { %v2814_v39 = vsel %vm425_vm8, %v2813_v63, %v2797_v49  ;;  %v2827_v60 = vrot.slane %v2807_v41, 4  ;;  %v2867_v18 = vrot.slane %v2849_v25, 4  ;;  %v2879_v27 = vrot.slane %v2859_v5, 4 }
 0x89c   :  { %v2820_v34 = vperm.slane %v2814_v39, %v5720_v8  ;;  %v2878_v17 = vsel %vm425_vm8, %v2877_v13, %v2859_v5  ;;  %v2816_v19 = vsel %vm425_vm8, %v2802_v12, %v2815_v38  ;;  %v2837_v24 = vrot.slane %v2832_v10, 4 }
 0x89d   :  { %v2866_v6 = vsel %vm425_vm8, %v2865_v50, %v2849_v25  ;;  %v2884_v37 = vperm.slane %v2878_v17, %v5720_v8  ;;  %v2824_v0 = vperm.slane %v2816_v19, %v5720_v8  ;;  %v2828_v63 = vsel %vm425_vm8, %v6522_v54, %v2827_v60 }
 0x89e   :  { %v2872_v49 = vperm.slane %v2866_v6, %v5720_v8  ;;  %v2868_v41 = vsel %vm425_vm8, %v2854_v28, %v2867_v18  ;;  %v2838_v13 = vsel %vm425_vm8, %v2837_v24, %v2820_v34  ;;  %v2836_v12 = vperm.slane %v2828_v63, %v5720_v8 }
 0x89f   :  { %v2889_v39 = vrot.slane %v2884_v37, 4  ;;  %v2843_v38 = vrot.slane %v2824_v0, 4  ;;  %v3009_v52 = vpack.c.bf16 %v2838_v13, %v2838_v13  ;;  %v2876_v25 = vperm.slane %v2868_v41, %v5720_v8 }
 0x8a0   :  { %v2880_v19 = vsel %vm425_vm8, %v6569_v58, %v2879_v27  ;;  %v2839_v50 = vrot.slane %v2820_v34, 4  ;;  %v2891_v5 = vrot.slane %v2872_v49, 4  ;;  %v2841_v41 = vrot.slane %v2836_v12, 4 }
 0x8a1   :  { %v2890_v6 = vsel %vm425_vm8, %v2889_v39, %v2872_v49  ;;  %v2844_v54 = vsel %vm425_vm8, %v2836_v12, %v2843_v38  ;;  %v2888_v28 = vperm.slane %v2880_v19, %v5720_v8  ;;  %v3531_v24 = vunpack.c.l.b16 %v3009_v52 }
 0x8a2   :  { %v3010_v60 = vpack.c.bf16 %v2890_v6, %v2890_v6  ;;  %v2895_v17 = vrot.slane %v2876_v25, 4  ;;  %v3015_v18 = vpack.c.bf16 %v2844_v54, %v2844_v54  ;;  %v2840_v63 = vsel %vm425_vm8, %v2832_v10, %v2839_v50 }
 0x8a3   :  { %v2892_v13 = vsel %vm425_vm8, %v2884_v37, %v2891_v5  ;;  %v2893_v45 = vrot.slane %v2888_v28, 4  ;;  %v3011_v27 = vpack.c.bf16 %v2840_v63, %v2840_v63  ;;  %v2842_v19 = vsel %vm425_vm8, %v2841_v41, %v2824_v0 }
 0x8a4   :  { %v3532_v26 = vunpack.c.l.b16 %v3010_v60  ;;  %v2896_v58 = vsel %vm425_vm8, %v2888_v28, %v2895_v17  ;;  %v3603_v34 = vunpack.c.l.b16 %v3015_v18  ;;  %v3012_v38 = vpack.c.bf16 %v2892_v13, %v2892_v13 }
 0x8a5   :  { %v3016_v39 = vpack.c.bf16 %v2896_v58, %v2896_v58  ;;  %v2894_v49 = vsel %vm425_vm8, %v2893_v45, %v2876_v25  ;;  %v3555_v6 = vunpack.c.l.b16 %v3011_v27  ;;  %v3013_v54 = vpack.c.bf16 %v2842_v19, %v2842_v19 }
 0x8a6   :  { %v3533_v52 = vpack.c.b16 %v3532_v26, %v3531_v24  ;;  %v3014_v44 = vpack.c.bf16 %v2894_v49, %v2894_v49  ;;  %v3556_v50 = vunpack.c.l.b16 %v3012_v38  ;;  %v7569_v37 = vrot.slane %v6580_v32, 4 }
 0x8a7   :  { %v3604_v10 = vunpack.c.l.b16 %v3016_v39  ;;  %v7570_v28 = vrot.slane %v6586_v9, 4  ;;  %v3579_v60 = vunpack.c.l.b16 %v3013_v54  ;;  %v7571_v32 = vrot.slane %v6497_v21, 4 }
 0x8a8   :  { %v2898_v12 = vsel %vm425_vm8, %v7569_v37, %v6583_v59  ;;  %v3538_v0 = vsel %vm1157_vm9, %v3533_v52, 0  ;;  %v3580_v45 = vunpack.c.l.b16 %v3014_v44  ;;  %v3557_v24 = vpack.c.b16 %v3556_v50, %v3555_v6 }
 0x8a9   :  { %v2904_v5 = vsel %vm425_vm8, %v7570_v28, %v6595_v14  ;;  %v2902_v26 = vperm.slane %v2898_v12, %v5710_v48  ;;  %3547 = vmatpush.bf16.xpose.msrb.mxu0 %v3538_v0  ;;  %v3605_v25 = vpack.c.b16 %v3604_v10, %v3603_v34  ;;  %v2910_v59 = vsel %vm425_vm8, %v7571_v32, %v6512_v15 }
 0x8aa   :  { %v2908_v17 = vperm.slane %v2904_v5, %v5710_v48  ;;  %v3581_v18 = vpack.c.b16 %v3580_v45, %v3579_v60  ;;  %v2914_v9 = vperm.slane %v2910_v59, %v5710_v48  ;;  %v2933_v14 = vrot.slane %v6574_v7, 4 }
 0x8ab   :  { %v7572_v44 = vrot.slane %v6601_v61, 4  ;;  %v3610_v13 = vsel %vm1157_vm9, %v3605_v25, 0  ;;  %v3562_v41 = vsel %vm1157_vm9, %v3557_v24, 0  ;;  %v7573_v27 = vrot.slane %v6635_v22, 4 }
 0x8ac   :  { %v2921_v58 = vrot.slane %v2908_v17, 4  ;;  %3571 = vmatpush.bf16.xpose.msrb.mxu1 %v3562_v41  ;;  %v3586_v21 = vsel %vm1157_vm9, %v3581_v18, 0  ;;  %v2934_v15 = vsel %vm425_vm8, %v2933_v14, %v2914_v9  ;;  %v2989_v22 = vrot.slane %v6577_v55, 4 }
 0x8ad   :  { %v2954_v63 = vsel %vm425_vm8, %v7572_v44, %v6589_v40  ;;  %v2960_v61 = vsel %vm425_vm8, %v7573_v27, %v6592_v35  ;;  %v7574_v40 = vrot.slane %v6518_v33, 4  ;;  %3595 = vmatpush.bf16.xpose.msrb.mxu2 %v3586_v21  ;;  %v2940_v19 = vperm.slane %v2934_v15, %v5720_v8 }
 0x8ae   :  { %v2958_v34 = vperm.slane %v2954_v63, %v5710_v48  ;;  %v2922_v38 = vsel %vm425_vm8, %v2921_v58, %v2902_v26  ;;  %v2964_v49 = vperm.slane %v2960_v61, %v5710_v48  ;;  %v2923_v54 = vrot.slane %v2902_v26, 4 }
 0x8af   :  { %v2966_v39 = vsel %vm425_vm8, %v7574_v40, %v6515_v36  ;;  %v2928_v6 = vperm.slane %v2922_v38, %v5720_v8  ;;  %v2935_v35 = vrot.slane %v2914_v9, 4  ;;  %v2945_v10 = vrot.slane %v2940_v19, 4 }
 0x8b0   :  { %v2970_v52 = vperm.slane %v2966_v39, %v5710_v48  ;;  %v2977_v50 = vrot.slane %v2964_v49, 4  ;;  %v2979_v33 = vrot.slane %v2958_v34, 4  ;;  %v2924_v28 = vsel %vm425_vm8, %v2908_v17, %v2923_v54 }
 0x8b1   :  { %3619 = vmatpush.bf16.xpose.msra.mxu0 %v3610_v13  ;;  %v2947_v12 = vrot.slane %v2928_v6, 4  ;;  %v2936_v5 = vsel %vm425_vm8, %v6574_v7, %v2935_v35  ;;  %v2946_v0 = vsel %vm425_vm8, %v2945_v10, %v2928_v6  ;;  %v2932_v26 = vperm.slane %v2924_v28, %v5720_v8 }
 0x8b2   :  { %v2991_v37 = vrot.slane %v2970_v52, 4  ;;  %v2990_v36 = vsel %vm425_vm8, %v2989_v22, %v2970_v52  ;;  %v2978_v60 = vsel %vm425_vm8, %v2977_v50, %v2958_v34  ;;  %v3017_v24 = vpack.c.bf16 %v2946_v0, %v2946_v0 }
 0x8b3   :  { %v2996_v45 = vperm.slane %v2990_v36, %v5720_v8  ;;  %v2984_v25 = vperm.slane %v2978_v60, %v5720_v8  ;;  %v2948_v32 = vsel %vm425_vm8, %v2940_v19, %v2947_v12  ;;  %v2944_v59 = vperm.slane %v2936_v5, %v5720_v8 }
 0x8b4   :  { %v3019_v17 = vpack.c.bf16 %v2948_v32, %v2948_v32  ;;  %v2980_v9 = vsel %vm425_vm8, %v2964_v49, %v2979_v33  ;;  %v2992_v7 = vsel %vm425_vm8, %v6577_v55, %v2991_v37  ;;  %v3627_v14 = vunpack.c.l.b16 %v3017_v24 }
 0x8b5   :  { %v3001_v18 = vrot.slane %v2996_v45, 4  ;;  %v3003_v44 = vrot.slane %v2984_v25, 4  ;;  %v2949_v63 = vrot.slane %v2944_v59, 4  ;;  %v2988_v13 = vperm.slane %v2980_v9, %v5720_v8 }
 0x8b6   :  { %v3651_v58 = vunpack.c.l.b16 %v3019_v17  ;;  %v3000_v34 = vperm.slane %v2992_v7, %v5720_v8  ;;  %v7575_v21 = vrot.slane %v6668_v20, 4  ;;  %v7576_v49 = vrot.slane %v6680_v11, 4 }
 0x8b7   :  { %v3002_v41 = vsel %vm425_vm8, %v3001_v18, %v2984_v25  ;;  %v3004_v61 = vsel %vm425_vm8, %v2996_v45, %v3003_v44  ;;  %v2950_v55 = vsel %vm425_vm8, %v2949_v63, %v2932_v26  ;;  %v2951_v54 = vrot.slane %v2932_v26, 4 }
 0x8b8   :  { %v2434_v15 = vsel %vm425_vm8, %v7575_v21, %v6676_v30  ;;  %v3018_v27 = vpack.c.bf16 %v3002_v41, %v3002_v41  ;;  %v3020_v39 = vpack.c.bf16 %v3004_v61, %v3004_v61  ;;  %v3005_v38 = vrot.slane %v3000_v34, 4 }
 0x8b9   :  { %v2440_v40 = vperm.slane %v2434_v15, %v5720_v8  ;;  %v3021_v19 = vpack.c.bf16 %v2950_v55, %v2950_v55  ;;  %v2446_v52 = vsel %vm425_vm8, %v7576_v49, %v6683_v31  ;;  %v3007_v35 = vrot.slane %v2988_v13, 4 }
 0x8ba   :  { %v3628_v6 = vunpack.c.l.b16 %v3018_v27  ;;  %v2452_v22 = vperm.slane %v2446_v52, %v5720_v8  ;;  %v3652_v10 = vunpack.c.l.b16 %v3020_v39  ;;  %v3006_v50 = vsel %vm425_vm8, %v3005_v38, %v2988_v13 }
 0x8bb   :  { %v3675_v33 = vunpack.c.l.b16 %v3021_v19  ;;  %v2459_v37 = vrot.slane %v2440_v40, 4  ;;  %v3022_v12 = vpack.c.bf16 %v3006_v50, %v3006_v50  ;;  %v2952_v5 = vsel %vm425_vm8, %v2944_v59, %v2951_v54 }
 0x8bc   :  { %v3629_v36 = vpack.c.b16 %v3628_v6, %v3627_v14  ;;  %v2457_v28 = vrot.slane %v2452_v22, 4  ;;  %v3653_v0 = vpack.c.b16 %v3652_v10, %v3651_v58  ;;  %v3008_v60 = vsel %vm425_vm8, %v3000_v34, %v3007_v35 }
 0x8bd   :  { %v3023_v45 = vpack.c.bf16 %v2952_v5, %v2952_v5  ;;  %v2460_v25 = vsel %vm425_vm8, %v2452_v22, %v2459_v37  ;;  %v3676_v26 = vunpack.c.l.b16 %v3022_v12  ;;  %v3024_v18 = vpack.c.bf16 %v3008_v60, %v3008_v60 }
 0x8be   :  { %v3634_v24 = vsel %vm1157_vm9, %v3629_v36, 0  ;;  %v2458_v32 = vsel %vm425_vm8, %v2457_v28, %v2440_v40  ;;  %v3658_v17 = vsel %vm1157_vm9, %v3653_v0, 0  ;;  %v2522_v14 = vpack.c.bf16 %v2460_v25, %v2460_v25  ;;  %v2280_v25 = vld [vmem:[%s7580_s29] sm:$0x3] }
 0x8bf   :  { %3643 = vmatpush.bf16.xpose.msra.mxu1 %v3634_v24  ;;  %v2521_v9 = vpack.c.bf16 %v2458_v32, %v2458_v32  ;;  %v3699_v7 = vunpack.c.l.b16 %v3023_v45  ;;  %3667 = vmatpush.bf16.xpose.msra.mxu2 %v3658_v17  ;;  %v3677_v59 = vpack.c.b16 %v3676_v26, %v3675_v33  ;;  %v3700_v44 = vunpack.c.l.b16 %v3024_v18 }
 0x8c0   :  { %v2435_v63 = vrot.slane %v6676_v30, 4  ;;  %v7577_v13 = vrot.slane %v6683_v31, 4  ;;  %5030 = vmatmul.msk.bf16.vlgmr.msrb.gmra.mxu1 %vm1157_vm9, %v2522_v14  ;;  %v2491_v34 = vrot.slane %v6691_v62, 4  ;;  %v7578_v21 = vrot.slane %v6701_v57, 4 }
 0x8c1   :  { %5029 = vmatmul.msk.bf16.vlgmr.msrb.gmra.mxu0 %vm1157_vm9, %v2521_v9  ;;  %v3682_v30 = vsel %vm1157_vm9, %v3677_v59, 0  ;;  %v3701_v27 = vpack.c.b16 %v3700_v44, %v3699_v7  ;;  %v2489_v61 = vrot.slane %v6694_v1, 4  ;;  %v7579_v52 = vrot.slane %v6707_v29, 4 }
 0x8c2   :  { %v2448_v41 = vsel %vm425_vm8, %v6680_v11, %v7577_v13  ;;  %v2504_v15 = vsel %vm425_vm8, %v6707_v29, %v7578_v21  ;;  %v2436_v31 = vsel %vm425_vm8, %v6668_v20, %v2435_v63  ;;  %3691 = vmatpush.bf16.xpose.msrb.mxu3 %v3682_v30  ;;  %v2492_v39 = vsel %vm425_vm8, %v6694_v1, %v2491_v34 }
 0x8c3   :  { %v2456_v58 = vperm.slane %v2448_v41, %v5720_v8  ;;  %v2512_v11 = vperm.slane %v2504_v15, %v5720_v8  ;;  %v2444_v55 = vperm.slane %v2436_v31, %v5720_v8  ;;  %v3706_v38 = vsel %vm1157_vm9, %v3701_v27, 0 }
 0x8c4   :  { %v2500_v19 = vperm.slane %v2492_v39, %v5720_v8  ;;  %v2502_v20 = vsel %vm425_vm8, %v7579_v52, %v6701_v57  ;;  %3715 = vmatpush.bf16.xpose.msrb.mxu0 %v3706_v38  ;;  %v2490_v1 = vsel %vm425_vm8, %v2489_v61, %v6691_v62  ;;  %v3723_v24 = vperm.slane %v2280_v25, 0 }
 0x8c5   :  { %v2461_v40 = vrot.slane %v2456_v58, 4  ;;  %v2517_v49 = vrot.slane %v2512_v11, 4  ;;  %v2508_v22 = vperm.slane %v2502_v20, %v5720_v8  ;;  %v2463_v50 = vrot.slane %v2444_v55, 4 }
 0x8c6   :  { %v2496_v57 = vperm.slane %v2490_v1, %v5720_v8  ;;  %v2519_v0 = vrot.slane %v2500_v19, 4  ;;  %v3722_v59 = vrot.slane %v2280_v25, 1 }
 0x8c7   :  { %v2462_v6 = vsel %vm425_vm8, %v2461_v40, %v2444_v55  ;;  %v2518_v35 = vsel %vm425_vm8, %v2517_v49, %v2500_v19  ;;  %v2513_v33 = vrot.slane %v2508_v22, 4  ;;  %v2464_v29 = vsel %vm425_vm8, %v2456_v58, %v2463_v50 }
 0x8c8   :  { %v2523_v54 = vpack.c.bf16 %v2462_v6, %v2462_v6  ;;  %v2527_v10 = vpack.c.bf16 %v2518_v35, %v2518_v35  ;;  %v2524_v36 = vpack.c.bf16 %v2464_v29, %v2464_v29  ;;  %v2515_v28 = vrot.slane %v2496_v57, 4  ;;  %v6897_v29 = vpop.permute.xlu2 %5230 }
 0x8c9   :  { %v2514_v37 = vsel %vm425_vm8, %v2513_v33, %v2496_v57  ;;  %v2520_v60 = vsel %vm425_vm8, %v2512_v11, %v2519_v0  ;;  %v3724_v63 = vperm.slane %v3722_v59, 0  ;;  %v5264_v50 = vpack.i.bf16 %v6449_v46, %v6400_v47  ;;  %v6893_v33 = vpop.permute.xlu0 %5235 }
 0x8ca   :  { %5031 = vmatmul.msk.bf16.vlgmr.msrb.gmra.mxu2 %vm1157_vm9, %v2523_v54  ;;  %5035 = vmatmul.msk.bf16.vlgmr.msrb.gmra.mxu3 %vm1157_vm9, %v2527_v10  ;;  %v2525_v12 = vpack.c.bf16 %v2514_v37, %v2514_v37  ;;  %v2516_v62 = vsel %vm425_vm8, %v2508_v22, %v2515_v28  ;;  %v2528_v45 = vpack.c.bf16 %v2520_v60, %v2520_v60 }
 0x8cb   :  { %v2526_v5 = vpack.c.bf16 %v2516_v62, %v2516_v62  ;;  %v5259_v10 = vpack.i.bf16 %v6451_v56, %v6402_v4 }
 0x8d0   :  { %5033 = vmatmul.msk.bf16.vlgmr.msra.gmra.mxu1 %vm1157_vm9, %v2525_v12  ;;  %v6901_v56 = vpop.permute.xlu2 %5245 }
 0x8d1   :  { %5032 = vmatmul.msk.bf16.vlgmr.msra.gmra.mxu0 %vm1157_vm9, %v2524_v36  ;;  %v5247_v25 = vunpack.i.l.bf16 %v6901_v56 }
 0x8d2   :  { %v6895_v57 = vpop.permute.xlu0 %5250  ;;  %v6899_v4 = vpop.permute.xlu1 %5240 }
 0x8da   :  { %5034 = vmatmul.msk.bf16.vlgmr.msra.gmra.mxu2 %vm1157_vm9, %v2526_v5 }
 0x8e1   :  { %5036 = vmatmul.msk.bf16.vlgmr.msrb.gmra.mxu0 %vm1157_vm9, %v2528_v45 }
 0x93d   :  { %v3573_v32 = vpop.f32.mrf.mxu1 }
 0x93e   :  { %v3549_v26 = vpop.f32.mrf.mxu0  ;;  %v3728_v18 = vadd.f32 %v3723_v24, %v3573_v32 }
 0x93f   :  { %v3727_v9 = vadd.f32 %v3723_v24, %v3549_v26  ;;  %v5232_v26 = vunpack.i.l.bf16 %v6897_v29 }
 0x940   :  { %v3738_v17 = vsel %vm1817_vm12, %v3728_v18, -inf }
 0x941   :  { %3739 = vmax.xlane.f32.xlu0 %v3738_v17  ;;  %v3735_v44 = vsel %vm1817_vm12, %v3727_v9, -inf }
 0x945   :  { %v3575_v14 = vpop.f32.mrf.mxu1 }
 0x946   :  { %v3551_v7 = vpop.f32.mrf.mxu0 }
 0x947   :  { %v3073_v7 = vrot.slane %v5247_v25, 4 }
 0x949   :  { %3736 = vmax.xlane.f32.xlu0 %v3735_v44 }
 0x94d   :  { %v3597_v13 = vpop.f32.mrf.mxu2  ;;  %v3693_v58 = vpop.f32.mrf.mxu3 }
 0x94e   :  { %v3729_v41 = vadd.f32 %v3723_v24, %v3597_v13  ;;  %v6870_v34 = vadd.f32 %v3724_v63, %v3693_v58  ;;  %v3621_v15 = vpop.f32.mrf.mxu0  ;;  %v3645_v30 = vpop.f32.mrf.mxu1 }
 0x94f   :  { %v6875_v31 = vadd.f32 %v3724_v63, %v3645_v30  ;;  %v3730_v61 = vadd.f32 %v3723_v24, %v3621_v15 }
 0x950   :  { %v3741_v21 = vsel %vm1817_vm12, %v3729_v41, -inf  ;;  %v3753_v27 = vsel %vm1817_vm12, %v6870_v34, -inf }
 0x951   :  { %3742 = vmax.xlane.f32.xlu1 %v3741_v21  ;;  %3754 = vmax.xlane.f32.xlu2 %v3753_v27  ;;  %v3747_v55 = vsel %vm1817_vm12, %v6875_v31, -inf  ;;  %v3744_v19 = vsel %vm1817_vm12, %v3730_v61, -inf }
 0x955   :  { %v3599_v11 = vpop.f32.mrf.mxu2  ;;  %v3695_v40 = vpop.f32.mrf.mxu3 }
 0x956   :  { %v3623_v39 = vpop.f32.mrf.mxu0  ;;  %v3647_v38 = vpop.f32.mrf.mxu1 }
 0x959   :  { %3748 = vmax.xlane.f32.xlu1 %v3747_v55  ;;  %3745 = vmax.xlane.f32.xlu2 %v3744_v19 }
 0x95d   :  { %v3669_v49 = vpop.f32.mrf.mxu2 }
 0x95e   :  { %v3732_v52 = vadd.f32 %v3724_v63, %v3669_v49  ;;  %v3717_v6 = vpop.f32.mrf.mxu0 }
 0x95f   :  { %v6881_v22 = vadd.f32 %v3724_v63, %v3717_v6  ;;  %v3074_v63 = vsel %vm425_vm8, %v3073_v7, %v5232_v26 }
 0x960   :  { %v3750_v20 = vsel %vm1817_vm12, %v3732_v52, -inf  ;;  %v3080_v11 = vperm.slane %v3074_v63, %v5710_v48 }
 0x961   :  { %3751 = vmax.xlane.f32.xlu1 %v3750_v20  ;;  %v3756_v54 = vsel %vm1817_vm12, %v6881_v22, -inf }
 0x962   :  { %3757 = vmax.xlane.f32.xlu0 %v3756_v54 }
 0x965   :  { %v3671_v35 = vpop.f32.mrf.mxu2 }
 0x966   :  { %v3719_v1 = vpop.f32.mrf.mxu0 }
 0x971   :  { %5260 = vrot.lane.b32.xlu2 %v5259_v10, %s5414_s3 }
 0x976   :  { %5255 = vrot.lane.b32.xlu0 %v6412_v42, %s5414_s3 }
 0x97a   :  { %5265 = vrot.lane.b32.xlu1 %v5264_v50, %s5414_s3 }
 0x9b4   :  { %v3740_v37 = vpop.xlane.xlu0 %3739 }
 0x9b5   :  { %v3760_v36 = vsub.f32 %v3728_v18, %v3740_v37 }
 0x9b7   :  { %v3769_v12 = vmul.f32 1.442695, %v3760_v36 }
 0x9b9   :  { %5335 = vpow2.f32 %v3769_v12 }
 0x9bc   :  { %v3737_v28 = vpop.xlane.xlu0 %3736 }
 0x9bd   :  { %v3759_v60 = vsub.f32 %v3727_v9, %v3737_v28  ;;  %v3075_v9 = vrot.slane %v5232_v26, 4 }
 0x9bf   :  { %v6903_v47 = vpop.eup %5335  ;;  %v3767_v45 = vmul.f32 1.442695, %v3759_v60  ;;  %v3076_v13 = vsel %vm425_vm8, %v5247_v25, %v3075_v9 }
 0x9c0   :  { %v3786_v42 = vsel %vm1817_vm12, %v6903_v47, 0.0 }
 0x9c1   :  { %3787 = vadd.xlane.f32.xlu0 %v3786_v42  ;;  %v5243_v42 = vunpack.i.h.bf16 %v6899_v4 }
 0x9c4   :  { %v3743_v46 = vpop.xlane.xlu1 %3742  ;;  %v3755_v5 = vpop.xlane.xlu2 %3754 }
 0x9c5   :  { %v3761_v62 = vsub.f32 %v3729_v41, %v3743_v46  ;;  %v3765_v14 = vsub.f32 %v6870_v34, %v3755_v5  ;;  %v5242_v41 = vunpack.i.l.bf16 %v6899_v4 }
 0x9c7   :  { %v3771_v0 = vmul.f32 1.442695, %v3761_v62  ;;  %v3779_v58 = vmul.f32 1.442695, %v3765_v14  ;;  %v3087_v38 = vrot.slane %v5242_v41, 4 }
 0x9c9   :  { %5337 = vpow2.f32 %v3771_v0 }
 0x9ca   :  { %5339 = vpow2.f32 %v3767_v45 }
 0x9cc   :  { %v3749_v24 = vpop.xlane.xlu1 %3748  ;;  %v3746_v32 = vpop.xlane.xlu2 %3745 }
 0x9cd   :  { %v3762_v17 = vsub.f32 %v3730_v61, %v3746_v32  ;;  %v3763_v34 = vsub.f32 %v6875_v31, %v3749_v24  ;;  %v3084_v61 = vperm.slane %v3076_v13, %v5710_v48  ;;  %v5248_v31 = vunpack.i.h.bf16 %v6901_v56 }
 0x9cf   :  { %v6909_v18 = vpop.eup %5337  ;;  %v3773_v44 = vmul.f32 1.442695, %v3762_v17  ;;  %v3775_v54 = vmul.f32 1.442695, %v3763_v34  ;;  %v3111_v50 = vrot.slane %v3084_v61, 4  ;;  %v3185_v25 = vrot.slane %v5248_v31, 4 }
 0x9d0   :  { %v3789_v59 = vsel %vm1817_vm12, %v6909_v18, 0.0  ;;  %v6917_v15 = vpop.eup %5339 }
 0x9d1   :  { %3790 = vadd.xlane.f32.xlu2 %v3789_v59  ;;  %5341 = vpow2.f32 %v3773_v44  ;;  %v3783_v19 = vsel %vm1817_vm12, %v6917_v15, 0.0  ;;  %v5238_v59 = vunpack.i.h.bf16 %v6893_v33  ;;  %v3143_v44 = vrot.slane %v5243_v42, 4 }
 0x9d2   :  { %5343 = vpow2.f32 %v3779_v58 }
 0x9d4   :  { %v3752_v21 = vpop.xlane.xlu1 %3751  ;;  %v5261_v27 = vpop.permute.xlu2 %5260 }
 0x9d5   :  { %v3764_v30 = vsub.f32 %v3732_v52, %v3752_v21  ;;  %v5262_v40 = vunpack.i.l.bf16 %v5261_v27  ;;  %v3758_v39 = vpop.xlane.xlu0 %3757  ;;  %v5233_v52 = vunpack.i.h.bf16 %v6897_v29  ;;  %v5263_v37 = vunpack.i.h.bf16 %v5261_v27 }
 0x9d6   :  { %v3766_v49 = vsub.f32 %v6881_v22, %v3758_v39  ;;  %v3099_v29 = vrot.slane %v3080_v11, 4 }
 0x9d7   :  { %v3777_v55 = vmul.f32 1.442695, %v3764_v30  ;;  %v6925_v20 = vpop.eup %5341  ;;  %v3085_v6 = vrot.slane %v5262_v40, 4  ;;  %v3088_v35 = vsel %vm425_vm8, %v5262_v40, %v3087_v38  ;;  %v3187_v56 = vrot.slane %v5233_v52, 4 }
 0x9d8   :  { %v3781_v1 = vmul.f32 1.442695, %v3766_v49  ;;  %v3792_v10 = vsel %vm1817_vm12, %v6925_v20, 0.0  ;;  %v3096_v36 = vperm.slane %v3088_v35, %v5710_v48  ;;  %v6937_v62 = vpop.eup %5343  ;;  %v3141_v24 = vrot.slane %v5263_v37, 4 }
 0x9d9   :  { %5345 = vpow2.f32 %v3777_v55  ;;  %3784 = vadd.xlane.f32.xlu2 %v3783_v19  ;;  %v3086_v22 = vsel %vm425_vm8, %v3085_v6, %v5242_v41  ;;  %3793 = vadd.xlane.f32.xlu1 %v3792_v10  ;;  %v3801_v63 = vsel %vm1817_vm12, %v6937_v62, 0.0  ;;  %v3186_v34 = vsel %vm425_vm8, %v3185_v25, %v5233_v52 }
 0x9da   :  { %v3092_v12 = vperm.slane %v3086_v22, %v5710_v48  ;;  %5347 = vpow2.f32 %v3781_v1  ;;  %v3109_v46 = vrot.slane %v3096_v36, 4  ;;  %v3112_v28 = vsel %vm425_vm8, %v3096_v36, %v3111_v50 }
 0x9db   :  { %5349 = vpow2.f32 %v3775_v54  ;;  %v3120_v60 = vperm.slane %v3112_v28, %v5720_v8  ;;  %v3188_v27 = vsel %vm425_vm8, %v5248_v31, %v3187_v56  ;;  %v3142_v40 = vsel %vm425_vm8, %v3141_v24, %v5243_v42 }
 0x9dc   :  { %v3097_v5 = vrot.slane %v3092_v12, 4  ;;  %v3100_v0 = vsel %vm425_vm8, %v3092_v12, %v3099_v29  ;;  %v3110_v32 = vsel %vm425_vm8, %v3109_v46, %v3084_v61  ;;  %v5237_v54 = vunpack.i.l.bf16 %v6893_v33 }
 0x9dd   :  { %v3108_v26 = vperm.slane %v3100_v0, %v5720_v8  ;;  %v3116_v17 = vperm.slane %v3110_v32, %v5720_v8  ;;  %v3127_v7 = vrot.slane %v3120_v60, 4  ;;  %v3196_v35 = vperm.slane %v3188_v27, %v5710_v48 }
 0x9de   :  { %v3098_v4 = vsel %vm425_vm8, %v3097_v5, %v3080_v11  ;;  %v3144_v11 = vsel %vm425_vm8, %v5263_v37, %v3143_v44  ;;  %v5253_v1 = vunpack.i.h.bf16 %v6895_v57  ;;  %v3192_v50 = vperm.slane %v3186_v34, %v5710_v48 }
 0x9df   :  { %v6941_v45 = vpop.eup %5345  ;;  %v3104_v9 = vperm.slane %v3098_v4, %v5720_v8  ;;  %v3123_v41 = vrot.slane %v3108_v26, 4  ;;  %v3125_v58 = vrot.slane %v3116_v17, 4  ;;  %v3128_v21 = vsel %vm425_vm8, 0.0, %v3127_v7 }
 0x9e0   :  { %v3798_v14 = vsel %vm1817_vm12, %v6941_v45, 0.0  ;;  %v6953_v13 = vpop.eup %5347  ;;  %v3302_v30 = vsel %vm425_vm8, %v3127_v7, %v3108_v26  ;;  %v3407_v6 = vrot.slane %v3128_v21, 4  ;;  %v5252_v37 = vunpack.i.l.bf16 %v6895_v57 }
 0x9e1   :  { %3799 = vadd.xlane.f32.xlu0 %v3798_v14  ;;  %v6961_v61 = vperm.slane %v3302_v30, %v5710_v48  ;;  %3802 = vadd.xlane.f32.xlu1 %v3801_v63  ;;  %v6963_v55 = vpop.eup %5349  ;;  %v3121_v39 = vrot.slane %v3104_v9, 4  ;;  %v3297_v38 = vsel %vm425_vm8, %v3125_v58, %v3104_v9  ;;  %v3804_v19 = vsel %vm1817_vm12, %v6953_v13, 0.0 }
 0x9e2   :  { %v3126_v49 = vsel %vm425_vm8, 0.0, %v3125_v58  ;;  %v6971_v52 = vperm.slane %v3297_v38, %v5710_v48  ;;  %3805 = vadd.xlane.f32.xlu2 %v3804_v19  ;;  %v3124_v10 = vsel %vm425_vm8, 0.0, %v3123_v41  ;;  %v3795_v22 = vsel %vm1817_vm12, %v6963_v55, 0.0 }
 0x9e3   :  { %v3317_v31 = vrot.slane %v6961_v61, 4  ;;  %v6983_v36 = vperm.slane %v3142_v40, %v5710_v48  ;;  %v6986_v29 = vperm.slane %v3144_v11, %v5710_v48  ;;  %v3401_v12 = vrot.slane %v3126_v49, 4 }
 0x9e4   :  { %v3243_v42 = vrot.slane %v5238_v59, 4  ;;  %v3122_v46 = vsel %vm425_vm8, 0.0, %v3121_v39  ;;  %v3408_v57 = vsel %vm425_vm8, %v3407_v6, %v3124_v10  ;;  %v3131_v28 = vrot.slane %v5237_v54, 4 }
 0x9e5   :  { %v3318_v56 = vsel %vm425_vm8, %v3317_v31, %v6971_v52  ;;  %v3223_v5 = vrot.slane %v3196_v35, 4  ;;  %v3255_v0 = vrot.slane %v5253_v1, 4  ;;  %v3211_v24 = vrot.slane %v3192_v50, 4 }
 0x9e6   :  { %v6995_v25 = vperm.slane %v3318_v56, %v5720_v8  ;;  %v3199_v26 = vrot.slane %v5252_v37, 4  ;;  %v3153_v17 = vrot.slane %v6983_v36, 4  ;;  %v3165_v7 = vrot.slane %v6986_v29, 4 }
 0x9e7   :  { %v7000_v14 = vsel %vm425_vm8, %v3401_v12, %v3122_v46  ;;  %v7003_v44 = vperm.slane %v3408_v57, %v5710_v48 }
 0x9e8   :  { %v5256_v60 = vpop.permute.xlu0 %5255  ;;  %v3343_v11 = vrot.slane %v6995_v25, 4 }
 0x9e9   :  { %3796 = vadd.xlane.f32.xlu0 %v3795_v22  ;;  %v5258_v32 = vunpack.i.h.bf16 %v5256_v60  ;;  %v5257_v4 = vunpack.i.l.bf16 %v5256_v60 }
 0x9eb   :  { %v3241_v58 = vrot.slane %v5258_v32, 4  ;;  %v3244_v21 = vsel %vm425_vm8, %v5258_v32, %v3243_v42  ;;  %v3129_v34 = vrot.slane %v5257_v4, 4  ;;  %v3132_v27 = vsel %vm425_vm8, %v5257_v4, %v3131_v28 }
 0x9ec   :  { %v5266_v9 = vpop.permute.xlu1 %5265  ;;  %v7007_v30 = vperm.slane %v3244_v21, %v5710_v48 }
 0x9ed   :  { %v5268_v63 = vunpack.i.h.bf16 %v5266_v9  ;;  %v5267_v41 = vunpack.i.l.bf16 %v5266_v9  ;;  %v3242_v6 = vsel %vm425_vm8, %v3241_v58, %v5238_v59  ;;  %v3130_v42 = vsel %vm425_vm8, %v3129_v34, %v5237_v54 }
 0x9ee   :  { %v3279_v10 = vrot.slane %v7007_v30, 4  ;;  %v3248_v56 = vperm.slane %v3242_v6, %v5710_v48  ;;  %v3136_v60 = vperm.slane %v3130_v42, %v5710_v48 }
 0x9ef   :  { %v3253_v40 = vrot.slane %v5268_v63, 4  ;;  %v3256_v39 = vsel %vm425_vm8, %v5268_v63, %v3255_v0  ;;  %v3197_v38 = vrot.slane %v5267_v41, 4  ;;  %v3200_v19 = vsel %vm425_vm8, %v5267_v41, %v3199_v26 }
 0x9f0   :  { %v7014_v49 = vperm.slane %v3256_v39, %v5710_v48  ;;  %v3208_v31 = vperm.slane %v3200_v19, %v5710_v48  ;;  %v3267_v59 = vrot.slane %v3248_v56, 4  ;;  %v3154_v41 = vsel %vm425_vm8, %v3153_v17, %v3136_v60 }
 0x9f1   :  { %v3254_v22 = vsel %vm425_vm8, %v3253_v40, %v5253_v1  ;;  %v3198_v12 = vsel %vm425_vm8, %v3197_v38, %v5252_v37  ;;  %v3140_v1 = vperm.slane %v3132_v27, %v5710_v48  ;;  %v3155_v58 = vrot.slane %v3136_v60, 4 }
 0x9f2   :  { %v3260_v46 = vperm.slane %v3254_v22, %v5710_v48  ;;  %v3277_v57 = vrot.slane %v7014_v49, 4  ;;  %v3204_v28 = vperm.slane %v3198_v12, %v5710_v48  ;;  %v3221_v0 = vrot.slane %v3208_v31, 4 }
 0x9f3   :  { %v3224_v33 = vsel %vm425_vm8, %v3208_v31, %v3223_v5  ;;  %v3160_v21 = vperm.slane %v3154_v41, %v5720_v8  ;;  %v3166_v34 = vsel %vm425_vm8, %v3165_v7, %v3140_v1  ;;  %v3156_v39 = vsel %vm425_vm8, %v6983_v36, %v3155_v58 }
 0x9f4   :  { %v3265_v26 = vrot.slane %v3260_v46, 4  ;;  %v3209_v37 = vrot.slane %v3204_v28, 4  ;;  %v3212_v32 = vsel %vm425_vm8, %v3204_v28, %v3211_v24  ;;  %v3222_v54 = vsel %vm425_vm8, %v3221_v0, %v3196_v35 }
 0x9f5   :  { %v3220_v4 = vperm.slane %v3212_v32, %v5720_v8  ;;  %v3228_v9 = vperm.slane %v3222_v54, %v5720_v8  ;;  %v3232_v63 = vperm.slane %v3224_v33, %v5720_v8  ;;  %v3167_v38 = vrot.slane %v3140_v1, 4 }
 0x9f6   :  { %v3210_v5 = vsel %vm425_vm8, %v3209_v37, %v3192_v50  ;;  %v3172_v19 = vperm.slane %v3166_v34, %v5720_v8  ;;  %v3177_v31 = vrot.slane %v3160_v21, 4  ;;  %v3164_v60 = vperm.slane %v3156_v39, %v5720_v8 }
 0x9f7   :  { %v3216_v27 = vperm.slane %v3210_v5, %v5720_v8  ;;  %v3235_v24 = vrot.slane %v3220_v4, 4  ;;  %v3237_v40 = vrot.slane %v3228_v9, 4  ;;  %v3239_v35 = vrot.slane %v3232_v63, 4 }
 0x9f8   :  { %v3168_v32 = vsel %vm425_vm8, %v6986_v29, %v3167_v38  ;;  %v3178_v54 = vsel %vm425_vm8, 0.0, %v3177_v31  ;;  %v3179_v41 = vrot.slane %v3164_v60, 4  ;;  %v3181_v5 = vrot.slane %v3172_v19, 4 }
 0x9f9   :  { %v3233_v17 = vrot.slane %v3216_v27, 4  ;;  %v3236_v50 = vsel %vm425_vm8, 0.0, %v3235_v24  ;;  %v3238_v6 = vsel %vm425_vm8, 0.0, %v3237_v40  ;;  %v3240_v22 = vsel %vm425_vm8, 0.0, %v3239_v35 }
 0x9fa   :  { %v3349_v7 = vsel %vm425_vm8, %v3237_v40, %v3216_v27  ;;  %v3354_v12 = vsel %vm425_vm8, %v3239_v35, %v3220_v4  ;;  %v3457_v42 = vrot.slane %v3238_v6, 4  ;;  %v3463_v28 = vrot.slane %v3240_v22, 4 }
 0x9fb   :  { %v3234_v0 = vsel %vm425_vm8, 0.0, %v3233_v17  ;;  %v7051_v36 = vperm.slane %v3349_v7, %v5710_v48  ;;  %v7054_v33 = vperm.slane %v3354_v12, %v5710_v48  ;;  %v3176_v63 = vperm.slane %v3168_v32, %v5720_v8 }
 0x9fc   :  { %v7058_v1 = vsel %vm425_vm8, %v3457_v42, %v3234_v0  ;;  %v3464_v37 = vsel %vm425_vm8, %v3463_v28, %v3236_v50  ;;  %v3266_v58 = vsel %vm425_vm8, %v3265_v26, %v3248_v56  ;;  %v3268_v34 = vsel %vm425_vm8, %v3260_v46, %v3267_v59 }
 0x9fd   :  { %v3369_v4 = vrot.slane %v7054_v33, 4  ;;  %v7066_v9 = vperm.slane %v3464_v37, %v5710_v48  ;;  %v3278_v27 = vsel %vm425_vm8, %v3277_v57, %v7007_v30  ;;  %v3180_v29 = vsel %vm425_vm8, 0.0, %v3179_v41 }
 0x9fe   :  { %v3183_v24 = vrot.slane %v3176_v63, 4  ;;  %v3272_v40 = vperm.slane %v3266_v58, %v5720_v8  ;;  %v3276_v35 = vperm.slane %v3268_v34, %v5720_v8  ;;  %v3182_v39 = vsel %vm425_vm8, 0.0, %v3181_v5 }
 0x9ff   :  { %v3280_v38 = vsel %vm425_vm8, %v7014_v49, %v3279_v10  ;;  %v3284_v56 = vperm.slane %v3278_v27, %v5720_v8  ;;  %v3307_v46 = vsel %vm425_vm8, %v3181_v5, %v3160_v21  ;;  %v3413_v6 = vrot.slane %v3182_v39, 4 }
 0xa00   :  { %v3184_v57 = vsel %vm425_vm8, 0.0, %v3183_v24  ;;  %v3288_v59 = vperm.slane %v3280_v38, %v5720_v8  ;;  %v3289_v26 = vrot.slane %v3272_v40, 4  ;;  %v3291_v19 = vrot.slane %v3276_v35, 4 }
 0xa01   :  { %v3293_v31 = vrot.slane %v3284_v56, 4  ;;  %v3311_v17 = vperm.slane %v3307_v46, %v5710_v48  ;;  %v3312_v50 = vsel %vm425_vm8, %v3183_v24, %v3164_v60  ;;  %v3414_v42 = vsel %vm425_vm8, %v3413_v6, %v3178_v54 }
 0xa02   :  { %v3290_v30 = vsel %vm425_vm8, 0.0, %v3289_v26  ;;  %v3292_v49 = vsel %vm425_vm8, 0.0, %v3291_v19  ;;  %v3295_v10 = vrot.slane %v3288_v59, 4  ;;  %v3316_v22 = vperm.slane %v3312_v50, %v5710_v48 }
 0xa03   :  { %v3294_v21 = vsel %vm425_vm8, 0.0, %v3293_v31  ;;  %v3331_v7 = vrot.slane %v3311_v17, 4  ;;  %v3359_v12 = vsel %vm425_vm8, %v3293_v31, %v3272_v40  ;;  %v3419_v37 = vrot.slane %v3184_v57, 4 }
 0xa04   :  { %v3296_v28 = vsel %vm425_vm8, 0.0, %v3295_v10  ;;  %v3363_v0 = vperm.slane %v3359_v12, %v5710_v48  ;;  %v3364_v60 = vsel %vm425_vm8, %v3295_v10, %v3276_v35  ;;  %v3469_v63 = vrot.slane %v3294_v21, 4 }
 0xa05   :  { %v3368_v32 = vperm.slane %v3364_v60, %v5710_v48  ;;  %v3475_v41 = vrot.slane %v3296_v28, 4  ;;  %v3329_v5 = vrot.slane %v3316_v22, 4  ;;  %v3420_v34 = vsel %vm425_vm8, %v3419_v37, %v3180_v29 }
 0xa06   :  { %v3383_v58 = vrot.slane %v3363_v0, 4  ;;  %v3370_v27 = vsel %vm425_vm8, %v3369_v4, %v7051_v36  ;;  %v3319_v54 = vrot.slane %v6971_v52, 4  ;;  %v3470_v24 = vsel %vm425_vm8, %v3469_v63, %v3290_v30 }
 0xa07   :  { %v3476_v40 = vsel %vm425_vm8, %v3475_v41, %v3292_v49  ;;  %v3330_v35 = vsel %vm425_vm8, %v3329_v5, %v3311_v17  ;;  %v3376_v39 = vperm.slane %v3370_v27, %v5720_v8  ;;  %v3381_v56 = vrot.slane %v3368_v32, 4 }
 0xa08   :  { %v3336_v38 = vperm.slane %v3330_v35, %v5720_v8  ;;  %v3320_v46 = vsel %vm425_vm8, %v6961_v61, %v3319_v54  ;;  %v3332_v29 = vsel %vm425_vm8, %v3316_v22, %v3331_v7  ;;  %v3371_v59 = vrot.slane %v7051_v36, 4 }
 0xa09   :  { %v3395_v57 = vrot.slane %v3376_v39, 4  ;;  %v3328_v4 = vperm.slane %v3320_v46, %v5720_v8  ;;  %v3340_v52 = vperm.slane %v3332_v29, %v5720_v8  ;;  %v3382_v19 = vsel %vm425_vm8, %v3381_v56, %v3363_v0 }
 0xa0a   :  { %v3344_v26 = vsel %vm425_vm8, %v3336_v38, %v3343_v11  ;;  %v3384_v31 = vsel %vm425_vm8, %v3368_v32, %v3383_v58  ;;  %v3341_v17 = vrot.slane %v3336_v38, 4  ;;  %v3388_v61 = vperm.slane %v3382_v19, %v5720_v8 }
 0xa0b   :  { %v3515_v50 = vpack.c.bf16 %v3344_v26, %v3344_v26  ;;  %v3345_v6 = vrot.slane %v3340_v52, 4  ;;  %v3372_v30 = vsel %vm425_vm8, %v7054_v33, %v3371_v59  ;;  %v3392_v36 = vperm.slane %v3384_v31, %v5720_v8 }
 0xa0c   :  { %v3380_v49 = vperm.slane %v3372_v30, %v5720_v8  ;;  %v3347_v10 = vrot.slane %v3328_v4, 4  ;;  %v3342_v11 = vsel %vm425_vm8, %v3341_v17, %v6995_v25  ;;  %v3396_v22 = vsel %vm425_vm8, %v3388_v61, %v3395_v57 }
 0xa0d   :  { %v3855_v21 = vunpack.c.l.b16 %v3515_v50  ;;  %v3346_v7 = vsel %vm425_vm8, %v3345_v6, %v3328_v4  ;;  %v3393_v12 = vrot.slane %v3388_v61, 4  ;;  %v3516_v28 = vpack.c.bf16 %v3396_v22, %v3396_v22 }
 0xa0e   :  { %v3397_v0 = vrot.slane %v3392_v36, 4  ;;  %v3517_v60 = vpack.c.bf16 %v3346_v7, %v3346_v7  ;;  %v3348_v37 = vsel %vm425_vm8, %v3340_v52, %v3347_v10  ;;  %v3399_v33 = vrot.slane %v3380_v49, 4 }
 0xa0f   :  { %v3519_v32 = vpack.c.bf16 %v3348_v37, %v3348_v37  ;;  %v3394_v63 = vsel %vm425_vm8, %v3393_v12, %v3376_v39  ;;  %v3513_v41 = vpack.c.bf16 %v3342_v11, %v3342_v11  ;;  %v3856_v5 = vunpack.c.l.b16 %v3516_v28 }
 0xa10   :  { %v3398_v58 = vsel %vm425_vm8, %v3397_v0, %v3380_v49  ;;  %v3877_v25 = vunpack.c.l.b16 %v3517_v60  ;;  %v3514_v27 = vpack.c.bf16 %v3394_v63, %v3394_v63  ;;  %v3400_v35 = vsel %vm425_vm8, %v3392_v36, %v3399_v33 }
 0xa11   :  { %v3518_v54 = vpack.c.bf16 %v3398_v58, %v3398_v58  ;;  %v3899_v38 = vunpack.c.l.b16 %v3519_v32  ;;  %v3833_v56 = vunpack.c.l.b16 %v3513_v41  ;;  %v3857_v46 = vpack.c.b16 %v3856_v5, %v3855_v21 }
 0xa12   :  { %v3520_v29 = vpack.c.bf16 %v3400_v35, %v3400_v35  ;;  %v3834_v57 = vunpack.c.l.b16 %v3514_v27  ;;  %v3406_v4 = vperm.slane %v7000_v14, %v5710_v48  ;;  %v3418_v39 = vperm.slane %v3414_v42, %v5710_v48 }
 0xa13   :  { %v3878_v52 = vunpack.c.l.b16 %v3518_v54  ;;  %v3424_v59 = vperm.slane %v3420_v34, %v5710_v48  ;;  %v3425_v26 = vrot.slane %v7003_v44, 4  ;;  %3869 = vmatpush.bf16.msrb.mxu2 %v3857_v46  ;;  %v3462_v17 = vperm.slane %v7058_v1, %v5710_v48 }
 0xa14   :  { %v3900_v19 = vunpack.c.l.b16 %v3520_v29  ;;  %v3835_v31 = vpack.c.b16 %v3834_v57, %v3833_v56  ;;  %v3474_v61 = vperm.slane %v3470_v24, %v5710_v48  ;;  %v3480_v14 = vperm.slane %v3476_v40, %v5710_v48 }
 0xa15   :  { %v3879_v50 = vpack.c.b16 %v3878_v52, %v3877_v25  ;;  %v3426_v6 = vsel %vm425_vm8, %v3425_v26, %v3406_v4  ;;  %v3437_v30 = vrot.slane %v3424_v59, 4  ;;  %v3481_v34 = vrot.slane %v7066_v9, 4 }
 0xa16   :  { %v3901_v49 = vpack.c.b16 %v3900_v19, %v3899_v38  ;;  %3847 = vmatpush.bf16.msrb.mxu1 %v3835_v31  ;;  %v3432_v42 = vperm.slane %v3426_v6, %v5720_v8  ;;  %v3427_v36 = vrot.slane %v3406_v4, 4  ;;  %v3493_v11 = vrot.slane %v3480_v14, 4 }
 0xa17   :  { %3891 = vmatpush.bf16.msra.mxu3 %v3879_v50  ;;  %v3438_v10 = vsel %vm425_vm8, %v3437_v30, %v3418_v39  ;;  %v3439_v1 = vrot.slane %v3418_v39, 4  ;;  %v3483_v22 = vrot.slane %v3462_v17, 4  ;;  %v3482_v7 = vsel %vm425_vm8, %v3481_v34, %v3462_v17 }
 0xa18   :  { %3913 = vmatpush.bf16.msra.mxu0 %v3901_v49  ;;  %v3444_v24 = vperm.slane %v3438_v10, %v5720_v8  ;;  %v3451_v21 = vrot.slane %v3432_v42, 4  ;;  %v3428_v40 = vsel %vm425_vm8, %v7003_v44, %v3427_v36  ;;  %v3488_v12 = vperm.slane %v3482_v7, %v5720_v8 }
 0xa19   :  { %v3494_v28 = vsel %vm425_vm8, %v3493_v11, %v3474_v61  ;;  %v3436_v0 = vperm.slane %v3428_v40, %v5720_v8  ;;  %v3440_v60 = vsel %vm425_vm8, %v3424_v59, %v3439_v1  ;;  %v3484_v63 = vsel %vm425_vm8, %v7066_v9, %v3483_v22 }
 0xa1a   :  { %v3452_v37 = vsel %vm425_vm8, %v3444_v24, %v3451_v21  ;;  %v3500_v33 = vperm.slane %v3494_v28, %v5720_v8  ;;  %v3448_v32 = vperm.slane %v3440_v60, %v5720_v8  ;;  %v3507_v41 = vrot.slane %v3488_v12, 4 }
 0xa1b   :  { %v3523_v5 = vpack.c.bf16 %v3452_v37, %v3452_v37  ;;  %v3492_v44 = vperm.slane %v3484_v63, %v5720_v8  ;;  %v3495_v58 = vrot.slane %v3474_v61, 4  ;;  %v3455_v27 = vrot.slane %v3436_v0, 4 }
 0xa1c   :  { %v3453_v25 = vrot.slane %v3448_v32, 4  ;;  %v3449_v54 = vrot.slane %v3444_v24, 4  ;;  %v3505_v35 = vrot.slane %v3500_v33, 4  ;;  %v3508_v38 = vsel %vm425_vm8, %v3500_v33, %v3507_v41 }
 0xa1d   :  { %v3943_v56 = vunpack.c.l.b16 %v3523_v5  ;;  %v3496_v46 = vsel %vm425_vm8, %v3480_v14, %v3495_v58  ;;  %v3511_v29 = vrot.slane %v3492_v44, 4  ;;  %v3524_v57 = vpack.c.bf16 %v3508_v38, %v3508_v38 }
 0xa1e   :  { %v3454_v4 = vsel %vm425_vm8, %v3453_v25, %v3436_v0  ;;  %v3504_v9 = vperm.slane %v3496_v46, %v5720_v8  ;;  %v3456_v52 = vsel %vm425_vm8, %v3448_v32, %v3455_v27  ;;  %v3450_v26 = vsel %vm425_vm8, %v3449_v54, %v3432_v42 }
 0xa1f   :  { %v3525_v39 = vpack.c.bf16 %v3454_v4, %v3454_v4  ;;  %v3527_v59 = vpack.c.bf16 %v3456_v52, %v3456_v52  ;;  %v3506_v19 = vsel %vm425_vm8, %v3505_v35, %v3488_v12  ;;  %v3944_v31 = vunpack.c.l.b16 %v3524_v57 }
 0xa20   :  { %v3509_v17 = vrot.slane %v3504_v9, 4  ;;  %v3512_v61 = vsel %vm425_vm8, %v3504_v9, %v3511_v29  ;;  %v3521_v50 = vpack.c.bf16 %v3450_v26, %v3450_v26  ;;  %v3522_v30 = vpack.c.bf16 %v3506_v19, %v3506_v19 }
 0xa21   :  { %v3528_v6 = vpack.c.bf16 %v3512_v61, %v3512_v61  ;;  %v3945_v14 = vpack.c.b16 %v3944_v31, %v3943_v56  ;;  %v3965_v34 = vunpack.c.l.b16 %v3525_v39  ;;  %v3987_v11 = vunpack.c.l.b16 %v3527_v59 }
 0xa22   :  { %v3510_v49 = vsel %vm425_vm8, %v3509_v17, %v3492_v44  ;;  %v3921_v36 = vunpack.c.l.b16 %v3521_v50  ;;  %v3922_v22 = vunpack.c.l.b16 %v3522_v30 }
 0xa23   :  { %v3526_v10 = vpack.c.bf16 %v3510_v49, %v3510_v49  ;;  %v3988_v1 = vunpack.c.l.b16 %v3528_v6  ;;  %3957 = vmatpush.bf16.msra.mxu2 %v3945_v14 }
 0xa24   :  { %v3923_v21 = vpack.c.b16 %v3922_v22, %v3921_v36 }
 0xa25   :  { %v3966_v42 = vunpack.c.l.b16 %v3526_v10  ;;  %v3989_v24 = vpack.c.b16 %v3988_v1, %v3987_v11 }
 0xa26   :  { %3935 = vmatpush.bf16.msra.mxu1 %v3923_v21 }
 0xa27   :  { %v3967_v7 = vpack.c.b16 %v3966_v42, %v3965_v34  ;;  %4001 = vmatpush.bf16.msrb.mxu0 %v3989_v24 }
 0xa29   :  { %3979 = vmatpush.bf16.msrb.mxu3 %v3967_v7 }
 0xa34   :  { %v3788_v40 = vpop.xlane.xlu0 %3787 }
 0xa35   :  { %5351 = vrcp.f32 %v3788_v40 }
 0xa3b   :  { %v5352_v12 = vpop.eup %5351 }
 0xa3c   :  { %v3816_v28 = vmul.f32 %v5352_v12, %v6903_v47 }
 0xa3e   :  { %v3824_v0 = vpack.c.bf16 %v3816_v28, %v3816_v28 }
 0xa40   :  { %5038 = vmatmul.msk.bf16.vlgmr.msrb.gmra.mxu2 %vm1817_vm12, %v3824_v0 }
 0xa44   :  { %v3791_v60 = vpop.xlane.xlu2 %3790 }
 0xa45   :  { %5353 = vrcp.f32 %v3791_v60 }
 0xa4b   :  { %v5354_v37 = vpop.eup %5353 }
 0xa4c   :  { %v3817_v33 = vmul.f32 %v5354_v37, %v6909_v18  ;;  %v3785_v32 = vpop.xlane.xlu2 %3784  ;;  %v3794_v41 = vpop.xlane.xlu1 %3793 }
 0xa4d   :  { %5355 = vrcp.f32 %v3785_v32 }
 0xa4e   :  { %v3825_v63 = vpack.c.bf16 %v3817_v33, %v3817_v33  ;;  %5357 = vrcp.f32 %v3794_v41 }
 0xa50   :  { %5039 = vmatmul.msk.bf16.vlgmr.msra.gmra.mxu3 %vm1817_vm12, %v3825_v63 }
 0xa53   :  { %v5356_v5 = vpop.eup %5355 }
 0xa54   :  { %v3815_v44 = vmul.f32 %v5356_v5, %v6917_v15  ;;  %v3800_v58 = vpop.xlane.xlu0 %3799  ;;  %v5358_v47 = vpop.eup %5357 }
 0xa55   :  { %5359 = vrcp.f32 %v3800_v58  ;;  %v3818_v27 = vmul.f32 %v5358_v47, %v6925_v20  ;;  %v3803_v54 = vpop.xlane.xlu1 %3802  ;;  %v3806_v18 = vpop.xlane.xlu2 %3805 }
 0xa56   :  { %v3823_v25 = vpack.c.bf16 %v3815_v44, %v3815_v44  ;;  %5361 = vrcp.f32 %v3803_v54 }
 0xa57   :  { %v3826_v35 = vpack.c.bf16 %v3818_v27, %v3818_v27  ;;  %5363 = vrcp.f32 %v3806_v18 }
 0xa58   :  { %5037 = vmatmul.msk.bf16.vlgmr.msrb.gmra.mxu1 %vm1817_vm12, %v3823_v25 }
 0xa59   :  { %5040 = vmatmul.msk.bf16.vlgmr.msra.gmra.mxu0 %vm1817_vm12, %v3826_v35 }
 0xa5b   :  { %v5360_v38 = vpop.eup %5359 }
 0xa5c   :  { %v3820_v56 = vmul.f32 %v5360_v38, %v6941_v45  ;;  %v3797_v46 = vpop.xlane.xlu0 %3796  ;;  %v5362_v15 = vpop.eup %5361 }
 0xa5d   :  { %5365 = vrcp.f32 %v3797_v46  ;;  %v3821_v57 = vmul.f32 %v5362_v15, %v6937_v62  ;;  %v5364_v20 = vpop.eup %5363 }
 0xa5e   :  { %v3828_v29 = vpack.c.bf16 %v3820_v56, %v3820_v56  ;;  %v3822_v52 = vmul.f32 %v5364_v20, %v6953_v13 }
 0xa5f   :  { %v3829_v4 = vpack.c.bf16 %v3821_v57, %v3821_v57 }
 0xa60   :  { %5042 = vmatmul.msk.bf16.vlgmr.msra.gmra.mxu2 %vm1817_vm12, %v3828_v29  ;;  %v3830_v26 = vpack.c.bf16 %v3822_v52, %v3822_v52 }
 0xa61   :  { %5043 = vmatmul.msk.bf16.vlgmr.msrb.gmra.mxu3 %vm1817_vm12, %v3829_v4 }
 0xa63   :  { %v5366_v9 = vpop.eup %5365 }
 0xa64   :  { %v3819_v39 = vmul.f32 %v5366_v9, %v6963_v55 }
 0xa66   :  { %v3827_v59 = vpack.c.bf16 %v3819_v39, %v3819_v39 }
 0xa68   :  { %5041 = vmatmul.msk.bf16.vlgmr.msra.gmra.mxu1 %vm1817_vm12, %v3827_v59 }
 0xa69   :  { %5044 = vmatmul.msk.bf16.vlgmr.msrb.gmra.mxu0 %vm1817_vm12, %v3830_v26 }
 0xac3   :  { %v3871_v45 = vpop.f32.mrf.mxu2 }
 0xac4   :  { %v4021_v61 = vrot.slane %v3871_v45, 4 }
 0xacb   :  { %v3873_v19 = vpop.f32.mrf.mxu2 }
 0xad3   :  { %v3893_v62 = vpop.f32.mrf.mxu3 }
 0xad4   :  { %v4007_v31 = vrot.slane %v3893_v62, 4 }
 0xad5   :  { %v3849_v17 = vpop.f32.mrf.mxu1 }
 0xad6   :  { %v4008_v50 = vsel %vm425_vm8, %v4007_v31, %v3849_v17  ;;  %v4009_v6 = vrot.slane %v3849_v17, 4  ;;  %v3915_v13 = vpop.f32.mrf.mxu0 }
 0xad7   :  { %v4014_v30 = vperm.slane %v4008_v50, %v5710_v48  ;;  %v4019_v14 = vrot.slane %v3915_v13, 4  ;;  %v4022_v49 = vsel %vm425_vm8, %v3915_v13, %v4021_v61 }
 0xad8   :  { %v4010_v55 = vsel %vm425_vm8, %v3893_v62, %v4009_v6  ;;  %v4030_v36 = vperm.slane %v4022_v49, %v5710_v48 }
 0xad9   :  { %v4018_v34 = vperm.slane %v4010_v55, %v5710_v48  ;;  %v4020_v10 = vsel %vm425_vm8, %v4019_v14, %v3871_v45  ;;  %v4033_v11 = vrot.slane %v4014_v30, 4 }
 0xada   :  { %v4026_v22 = vperm.slane %v4020_v10, %v5710_v48  ;;  %v4043_v42 = vrot.slane %v4030_v36, 4 }
 0xadb   :  { %v4045_v1 = vrot.slane %v4018_v34, 4  ;;  %v3895_v24 = vpop.f32.mrf.mxu3 }
 0xadc   :  { %v4031_v21 = vrot.slane %v4026_v22, 4  ;;  %v4034_v7 = vsel %vm425_vm8, %v4026_v22, %v4033_v11  ;;  %v4044_v40 = vsel %vm425_vm8, %v4043_v42, %v4018_v34 }
 0xadd   :  { %v4046_v12 = vsel %vm425_vm8, %v4030_v36, %v4045_v1  ;;  %v3851_v28 = vpop.f32.mrf.mxu1  ;;  %v4042_v0 = vperm.slane %v4034_v7, %v5720_v8  ;;  %v4050_v37 = vperm.slane %v4044_v40, %v5720_v8 }
 0xade   :  { %v4032_v60 = vsel %vm425_vm8, %v4031_v21, %v4014_v30  ;;  %v4054_v33 = vperm.slane %v4046_v12, %v5720_v8  ;;  %v3917_v32 = vpop.f32.mrf.mxu0 }
 0xadf   :  { %v4038_v63 = vperm.slane %v4032_v60, %v5720_v8  ;;  %v4057_v41 = vrot.slane %v4042_v0, 4  ;;  %v4059_v5 = vrot.slane %v4050_v37, 4 }
 0xae0   :  { %v4061_v44 = vrot.slane %v4054_v33, 4 }
 0xae1   :  { %v4055_v25 = vrot.slane %v4038_v63, 4  ;;  %v4058_v27 = vsel %vm425_vm8, 0.0, %v4057_v41  ;;  %v4060_v38 = vsel %vm425_vm8, 0.0, %v4059_v5 }
 0xae2   :  { %v4062_v56 = vsel %vm425_vm8, 0.0, %v4061_v44  ;;  %v4131_v29 = vrot.slane %v4058_v27, 4  ;;  %v4175_v26 = vrot.slane %v4060_v38, 4 }
 0xae3   :  { %v3959_v58 = vpop.f32.mrf.mxu2  ;;  %v4056_v9 = vsel %vm425_vm8, 0.0, %v4055_v25  ;;  %v4187_v62 = vrot.slane %v4062_v56, 4 }
 0xae4   :  { %v4077_v47 = vrot.slane %v3959_v58, 4  ;;  %v3981_v54 = vpop.f32.mrf.mxu3  ;;  %v4119_v6 = vrot.slane %v4056_v9, 4  ;;  %v4132_v13 = vsel %vm425_vm8, %v4131_v29, %v4042_v0  ;;  %v4176_v10 = vsel %vm425_vm8, %v4175_v26, %v4050_v37 }
 0xae5   :  { %v3937_v35 = vpop.f32.mrf.mxu1  ;;  %v4063_v18 = vrot.slane %v3981_v54, 4  ;;  %v4188_v42 = vsel %vm425_vm8, %v4187_v62, %v4054_v33  ;;  %v4136_v60 = vperm.slane %v4132_v13, %v5710_v48  ;;  %v4180_v37 = vperm.slane %v4176_v10, %v5710_v48 }
 0xae6   :  { %v4065_v46 = vrot.slane %v3937_v35, 4  ;;  %v4003_v15 = vpop.f32.mrf.mxu0  ;;  %v4120_v0 = vsel %vm425_vm8, %v4119_v6, %v4038_v63  ;;  %v4192_v41 = vperm.slane %v4188_v42, %v5710_v48 }
 0xae7   :  { %v4064_v57 = vsel %vm425_vm8, %v4063_v18, %v3937_v35  ;;  %v4075_v4 = vrot.slane %v4003_v15, 4  ;;  %v4078_v20 = vsel %vm425_vm8, %v4003_v15, %v4077_v47  ;;  %v4124_v27 = vperm.slane %v4120_v0, %v5710_v48 }
 0xae8   :  { %v4066_v52 = vsel %vm425_vm8, %v3981_v54, %v4065_v46  ;;  %v4070_v39 = vperm.slane %v4064_v57, %v5710_v48  ;;  %v4086_v59 = vperm.slane %v4078_v20, %v5710_v48  ;;  %v4157_v56 = vrot.slane %v4136_v60, 4 }
 0xae9   :  { %v4074_v45 = vperm.slane %v4066_v52, %v5710_v48  ;;  %v4076_v19 = vsel %vm425_vm8, %v4075_v4, %v3959_v58  ;;  %v4201_v57 = vrot.slane %v4180_v37, 4  ;;  %v4213_v4 = vrot.slane %v4192_v41, 4 }
 0xaea   :  { %v4089_v31 = vrot.slane %v4070_v39, 4  ;;  %v4082_v17 = vperm.slane %v4076_v19, %v5710_v48  ;;  %v4099_v61 = vrot.slane %v4086_v59, 4  ;;  %v4145_v52 = vrot.slane %v4124_v27, 4 }
 0xaeb   :  { %v3961_v50 = vpop.f32.mrf.mxu2  ;;  %v4101_v30 = vrot.slane %v4074_v45, 4 }
 0xaec   :  { %v4087_v55 = vrot.slane %v4082_v17, 4  ;;  %v4090_v14 = vsel %vm425_vm8, %v4082_v17, %v4089_v31  ;;  %v4100_v49 = vsel %vm425_vm8, %v4099_v61, %v4074_v45  ;;  %v3983_v34 = vpop.f32.mrf.mxu3 }
 0xaed   :  { %v3939_v36 = vpop.f32.mrf.mxu1  ;;  %v4098_v11 = vperm.slane %v4090_v14, %v5720_v8  ;;  %v4102_v1 = vsel %vm425_vm8, %v4086_v59, %v4101_v30  ;;  %v4106_v22 = vperm.slane %v4100_v49, %v5720_v8 }
 0xaee   :  { %v4088_v24 = vsel %vm425_vm8, %v4087_v55, %v4070_v39  ;;  %v4110_v21 = vperm.slane %v4102_v1, %v5720_v8  ;;  %v4005_v7 = vpop.f32.mrf.mxu0 }
 0xaef   :  { %v4094_v40 = vperm.slane %v4088_v24, %v5720_v8  ;;  %v4113_v12 = vrot.slane %v4098_v11, 4  ;;  %v4115_v28 = vrot.slane %v4106_v22, 4 }
 0xaf0   :  { %v4117_v32 = vrot.slane %v4110_v21, 4 }
 0xaf1   :  { %v4111_v5 = vrot.slane %v4094_v40, 4  ;;  %v4114_v33 = vsel %vm425_vm8, 0.0, %v4113_v12  ;;  %v4116_v44 = vsel %vm425_vm8, 0.0, %v4115_v28 }
 0xaf2   :  { %v4118_v58 = vsel %vm425_vm8, 0.0, %v4117_v32  ;;  %v4137_v47 = vrot.slane %v4114_v33, 4  ;;  %v4181_v25 = vrot.slane %v4116_v44, 4 }
 0xaf3   :  { %v4112_v63 = vsel %vm425_vm8, 0.0, %v4111_v5  ;;  %v4193_v54 = vrot.slane %v4118_v58, 4 }
 0xaf4   :  { %v4125_v35 = vrot.slane %v4112_v63, 4  ;;  %v4138_v18 = vsel %vm425_vm8, %v4137_v47, %v4098_v11  ;;  %v4182_v38 = vsel %vm425_vm8, %v4181_v25, %v4106_v22  ;;  %v5088_v25 = vld [vmem:[%s7519_s14] sm:$0xff] }
 0xaf5   :  { %v4194_v46 = vsel %vm425_vm8, %v4193_v54, %v4110_v21  ;;  %v4142_v15 = vperm.slane %v4138_v18, %v5710_v48  ;;  %v4186_v29 = vperm.slane %v4182_v38, %v5710_v48 }
 0xaf6   :  { %v4198_v20 = vperm.slane %v4194_v46, %v5710_v48  ;;  %v4126_v9 = vsel %vm425_vm8, %v4125_v35, %v4094_v40 }
 0xaf7   :  { %v4130_v39 = vperm.slane %v4126_v9, %v5710_v48  ;;  %v4158_v59 = vsel %vm425_vm8, %v4142_v15, %v4157_v56  ;;  %v4202_v26 = vsel %vm425_vm8, %v4186_v29, %v4201_v57  ;;  %v4155_v45 = vrot.slane %v4142_v15, 4 }
 0xaf8   :  { %v4166_v19 = vperm.slane %v4158_v59, %v5720_v8  ;;  %v4210_v62 = vperm.slane %v4202_v26, %v5720_v8  ;;  %v4214_v31 = vsel %vm425_vm8, %v4198_v20, %v4213_v4  ;;  %v4199_v17 = vrot.slane %v4186_v29, 4  ;;  %v5288_v59 = vld [vmem:[%s7520_s15] ss:$0 sm:$0xff]  ;;  %s5426_s15 = smov 2  }
 0xaf9   :  { %v4146_v61 = vsel %vm425_vm8, %v4130_v39, %v4145_v52  ;;  %v4222_v50 = vperm.slane %v4214_v31, %v5720_v8  ;;  %v4143_v6 = vrot.slane %v4130_v39, 4  ;;  %v4156_v30 = vsel %vm425_vm8, %v4155_v45, %v4136_v60 }
 0xafa   :  { %v4154_v48 = vperm.slane %v4146_v61, %v5720_v8  ;;  %v4171_v13 = vrot.slane %v4166_v19, 4  ;;  %v4229_v55 = vrot.slane %v4210_v62, 4  ;;  %v4200_v34 = vsel %vm425_vm8, %v4199_v17, %v4180_v37 }
 0xafb   :  { %v4227_v14 = vrot.slane %v4222_v50, 4  ;;  %v4144_v49 = vsel %vm425_vm8, %v4143_v6, %v4124_v27  ;;  %v4211_v36 = vrot.slane %v4198_v20, 4  ;;  %v4162_v22 = vperm.slane %v4156_v30, %v5720_v8 }
 0xafc   :  { %v4172_v10 = vsel %vm425_vm8, %v4171_v13, %v4154_v48  ;;  %v4173_v11 = vrot.slane %v4154_v48, 4  ;;  %v4150_v1 = vperm.slane %v4144_v49, %v5720_v8  ;;  %v4230_v24 = vsel %vm425_vm8, %v4222_v50, %v4229_v55 }
 0xafd   :  { %v4228_v42 = vsel %vm425_vm8, %v4227_v14, %v4210_v62  ;;  %v4206_v21 = vperm.slane %v4200_v34, %v5720_v8  ;;  %v4212_v7 = vsel %vm425_vm8, %v4211_v36, %v4192_v41  ;;  %v4167_v41 = vrot.slane %v4162_v22, 4  ;;  %v7581_v14 = vld [vmem:[#allocation10_spill] sm:$0xff] }
 0xafe   :  { %v5274_v40 = vpack.i.bf16 %v4228_v42, %v4172_v10  ;;  %v4174_v12 = vsel %vm425_vm8, %v4166_v19, %v4173_v11  ;;  %v4169_v28 = vrot.slane %v4150_v1, 4  ;;  %v4218_v0 = vperm.slane %v4212_v7, %v5720_v8  ;;  %v5089_v8 = vld [vmem:[%s7519_s14 + $0x8] sm:$0xff]  ;;  %v7582_v10 = vld [vmem:[#allocation5_spill] sm:$0xff]  ;;  %s4964_s14 = sshll.u32 %s7527_s22, 4  ;;  %s4965_s14 = int_to_ptr.hbm [resolvable:$true] %s4964_s14 }
 0xaff   :  { %v5279_v60 = vpack.i.bf16 %v4230_v24, %v4174_v12  ;;  %v4225_v37 = vrot.slane %v4206_v21, 4  ;;  %v4168_v58 = vsel %vm425_vm8, %v4167_v41, %v4150_v1  ;;  %4291 = vmatpush.bf16.msrb.mxu1 %v5089_v8  ;;  %v7583_v1 = vld [vmem:[#allocation6_spill] sm:$0xff]  ;;  %v7584_v42 = vld [vmem:[#allocation7_spill] sm:$0xff] }
 0xb00   :  { %5275 = vrot.lane.b32.xlu2 %v5274_v40, %s5422_s24  ;;  %v4170_v32 = vsel %vm425_vm8, %v4162_v22, %v4169_v28  ;;  %v4223_v44 = vrot.slane %v4218_v0, 4  ;;  %v7586_v40 = vld [vmem:[#allocation9_spill] sm:$0xff] }
 0xb01   :  { %5280 = vrot.lane.b32.xlu0 %v5279_v60, %s5421_s5  ;;  %v4226_v5 = vsel %vm425_vm8, %v4218_v0, %v4225_v37  ;;  %s5425_s5 = smov 32  }
 0xb02   :  { %v5269_v33 = vpack.i.bf16 %v4226_v5, %v4170_v32  ;;  %v4224_v47 = vsel %vm425_vm8, %v4223_v44, %v4206_v21  ;;  %v7585_v21 = vld [vmem:[#allocation8_spill] sm:$0xff] }
 0xb03   :  { %4292 = vmatpush.bf16.msrb.mxu1 %v5088_v25 }
 0xb04   :  { %5270 = vrot.lane.b32.xlu1 %v5269_v33, %s5423_s6 }
 0xb5a   :  { %v5276_v27 = vpop.permute.xlu2 %5275 }
 0xb5b   :  { %v5278_v38 = vunpack.i.h.bf16 %v5276_v27  ;;  %v5277_v56 = vunpack.i.l.bf16 %v5276_v27 }
 0xb73   :  { %v5281_v63 = vpop.permute.xlu0 %5280 }
 0xb74   :  { %v5283_v46 = vunpack.i.h.bf16 %v5281_v63  ;;  %v5282_v15 = vunpack.i.l.bf16 %v5281_v63 }
 0xb76   :  { %v5271_v54 = vpop.permute.xlu1 %5270 }
 0xb77   :  { %v5273_v35 = vunpack.i.h.bf16 %v5271_v54  ;;  %v5272_v18 = vunpack.i.l.bf16 %v5271_v54 }
 0xb79   :  { %v4256_v29 = vsel %vm1157_vm9, %v4224_v47, %v5273_v35  ;;  %v4255_v57 = vsel %vm1157_vm9, %v4168_v58, %v5272_v18 }
 0xb7a   :  { %v4258_v4 = vsel %vm1817_vm12, %v4256_v29, %v5278_v38  ;;  %v4257_v20 = vsel %vm1817_vm12, %v4255_v57, %v5277_v56 }
 0xb7b   :  { %v4260_v9 = vsel %vm1820_vm13, %v4258_v4, %v5283_v46  ;;  %v4259_v52 = vsel %vm1820_vm13, %v4257_v20, %v5282_v15 }
 0xb7c   :  { %v4261_v39 = vpack.c.bf16 %v4260_v9, %v4259_v52 }
 0xb7e   :  { %5053 = vmatmul.msk.bf16.vlgmr.msrb.gmra.mxu1 %vm110_vm0, %v4261_v39 }
 0xbfb   :  { %v4294_v26 = vpop.f32.mrf.mxu1 }
 0xbfc   :  { %v4295_v45 = vadd.f32 %v5288_v59, %v4294_v26 }
 0xbfe   :  { %v4301_v19 = vrot.slane %v4295_v45, 2  ;;  %v4302_v62 = vrot.slane %v4295_v45, 4  ;;  %v4303_v31 = vrot.slane %v4295_v45, 6  ;;  %v7282_v17 = vadd.f32 %v4295_v45, %v6185_v16  ;;  %v5091_v45 = vld [vmem:[%s7521_s16 + $0x8] sm:$0xff] }
 0xbff   :  { %4610 = vmatpush.bf16.msrb.mxu2 %v5091_v45 }
 0xc00   :  { %v7285_v61 = vadd.f32 %v4301_v19, %v6188_v23  ;;  %v7288_v50 = vadd.f32 %v4302_v62, %v6191_v51  ;;  %v7291_v6 = vadd.f32 %v4303_v31, %v6194_v53  ;;  %4329 = vst [vmem:[#allocation1] ss:$4 sm:$0xff] %v7282_v17 }
 0xc02   :  { %4331 = vst [vmem:[#allocation1 + $0x1] ss:$4 sm:$0xff] %v7285_v61 }
 0xc03   :  { %4333 = vst [vmem:[#allocation1 + $0x2] ss:$4 sm:$0xff] %v7288_v50  ;;  %v4296_v30 = vpop.f32.mrf.mxu1 }
 0xc04   :  { %4335 = vst [vmem:[#allocation1 + $0x3] ss:$4 sm:$0xff] %v7291_v6  ;;  %v4297_v16 = vadd.f32 %v5288_v59, %v4296_v30  ;;  %v5090_v30 = vld [vmem:[%s7521_s16] sm:$0xff] }
 0xc05   :  { %4611 = vmatpush.bf16.msrb.mxu2 %v5090_v30 }
 0xc06   :  { %v4304_v48 = vrot.slane %v4297_v16, 2  ;;  %v4305_v13 = vrot.slane %v4297_v16, 4  ;;  %v4306_v23 = vrot.slane %v4297_v16, 6  ;;  %v7298_v55 = vadd.f32 %v4297_v16, %v6201_v43 }
 0xc08   :  { %v7301_v51 = vadd.f32 %v4304_v48, %v6204_v2  ;;  %v7304_v53 = vadd.f32 %v4305_v13, %v6207_v3  ;;  %v7307_v49 = vadd.f32 %v4306_v23, %v7581_v14  ;;  %4337 = vst [vmem:[#allocation1 + $0x20] ss:$4 sm:$0xff] %v7298_v55  ;;  %v5381_v13 = vld [vmem:[%s7560_s1] sm:$0x7] }
 0xc09   :  { %v4521_v23 = vperm.slane %v5381_v13, 2 }
 0xc0a   :  { %4339 = vst [vmem:[#allocation1 + $0x21] ss:$4 sm:$0xff] %v7301_v51 }
 0xc0b   :  { %4341 = vst [vmem:[#allocation1 + $0x22] ss:$4 sm:$0xff] %v7304_v53  ;;  %v4344_v34 = vld.sshfl [vmem:[#allocation1] sm:$0xff pattern:$0x73625140] }
 0xc0c   :  { %4343 = vst [vmem:[#allocation1 + $0x23] ss:$4 sm:$0xff] %v7307_v49  ;;  %v4348_v43 = vsel %vm110_vm0, %v4344_v34, 0.0 }
 0xc0d   :  { %4349 = vadd.xlane.f32.xlu1 %v4348_v43  ;;  %v5382_v43 = vld [vmem:[%s7561_s26] sm:$0x7] }
 0xc13   :  { %v4345_v2 = vld.sshfl [vmem:[#allocation1 + $0x20] sm:$0xff pattern:$0x73625140] }
 0xc14   :  { %v4351_v36 = vsel %vm110_vm0, %v4345_v2, 0.0  ;;  %v4537_v2 = vperm.slane %v5382_v43, 2 }
 0xc15   :  { %4352 = vadd.xlane.f32.xlu0 %v4351_v36 }
 0xc80   :  { %v4350_v3 = vpop.xlane.xlu1 %4349 }
 0xc81   :  { %v4354_v11 = vmul.f32 %v4350_v3, %v7582_v10 }
 0xc83   :  { %v4361_v22 = vperm.slane %v4354_v11, %v7583_v1  ;;  %v4365_v24 = vperm.slane %v4354_v11, %v7584_v42  ;;  %v4369_v7 = vperm.slane %v4354_v11, %v7585_v21  ;;  %v4373_v12 = vperm.slane %v4354_v11, %v7586_v40 }
 0xc84   :  { %v4523_v11 = vrot.slane %v4521_v23, 2 }
 0xc85   :  { %v7321_v28 = vsub.f32 %v7282_v17, %v4361_v22  ;;  %v7324_v0 = vsub.f32 %v7285_v61, %v4365_v24  ;;  %v7327_v60 = vsub.f32 %v7288_v50, %v4369_v7  ;;  %v7330_v37 = vsub.f32 %v7291_v6, %v4373_v12 }
 0xc86   :  { %v4524_v22 = vrot.slane %v4521_v23, 4  ;;  %v4525_v24 = vrot.slane %v4521_v23, 6 }
 0xc87   :  { %v4406_v32 = vmul.f32 %v7321_v28, %v7321_v28  ;;  %v4407_v5 = vmul.f32 %v7324_v0, %v7324_v0  ;;  %v4408_v33 = vmul.f32 %v7327_v60, %v7327_v60  ;;  %v4409_v41 = vmul.f32 %v7330_v37, %v7330_v37 }
 0xc88   :  { %v4353_v44 = vpop.xlane.xlu0 %4352 }
 0xc89   :  { %4422 = vst [vmem:[#allocation1] ss:$4 sm:$0xff] %v4406_v32  ;;  %v4355_v58 = vmul.f32 %v4353_v44, %v7582_v10  ;;  %v4539_v44 = vrot.slane %v4537_v2, 2 }
 0xc8a   :  { %4424 = vst [vmem:[#allocation1 + $0x1] ss:$4 sm:$0xff] %v4407_v5 }
 0xc8b   :  { %4426 = vst [vmem:[#allocation1 + $0x2] ss:$4 sm:$0xff] %v4408_v33  ;;  %v4377_v47 = vperm.slane %v4355_v58, %v7583_v1  ;;  %v4381_v8 = vperm.slane %v4355_v58, %v7584_v42  ;;  %v4385_v25 = vperm.slane %v4355_v58, %v7585_v21  ;;  %v4389_v27 = vperm.slane %v4355_v58, %v7586_v40 }
 0xc8c   :  { %4428 = vst [vmem:[#allocation1 + $0x3] ss:$4 sm:$0xff] %v4409_v41  ;;  %v4540_v58 = vrot.slane %v4537_v2, 4 }
 0xc8d   :  { %v7346_v63 = vsub.f32 %v7298_v55, %v4377_v47  ;;  %v7349_v54 = vsub.f32 %v7301_v51, %v4381_v8  ;;  %v7352_v35 = vsub.f32 %v7304_v53, %v4385_v25  ;;  %v7355_v18 = vsub.f32 %v7307_v49, %v4389_v27 }
 0xc8f   :  { %v4410_v38 = vmul.f32 %v7346_v63, %v7346_v63  ;;  %v4411_v56 = vmul.f32 %v7349_v54, %v7349_v54  ;;  %v4412_v46 = vmul.f32 %v7352_v35, %v7352_v35  ;;  %v4413_v15 = vmul.f32 %v7355_v18, %v7355_v18 }
 0xc91   :  { %4430 = vst [vmem:[#allocation1 + $0x20] ss:$4 sm:$0xff] %v4410_v38 }
 0xc92   :  { %4432 = vst [vmem:[#allocation1 + $0x21] ss:$4 sm:$0xff] %v4411_v56  ;;  %v4541_v56 = vrot.slane %v4537_v2, 6 }
 0xc93   :  { %4434 = vst [vmem:[#allocation1 + $0x22] ss:$4 sm:$0xff] %v4412_v46  ;;  %v4437_v29 = vld.sshfl [vmem:[#allocation1] sm:$0xff pattern:$0x73625140] }
 0xc94   :  { %4436 = vst [vmem:[#allocation1 + $0x23] ss:$4 sm:$0xff] %v4413_v15  ;;  %v4441_v57 = vsel %vm110_vm0, %v4437_v29, 0.0 }
 0xc95   :  { %4442 = vadd.xlane.f32.xlu2 %v4441_v57 }
 0xc9b   :  { %v4438_v4 = vld.sshfl [vmem:[#allocation1 + $0x20] sm:$0xff pattern:$0x73625140] }
 0xc9c   :  { %v4444_v20 = vsel %vm110_vm0, %v4438_v4, 0.0 }
 0xc9d   :  { %4445 = vadd.xlane.f32.xlu1 %v4444_v20 }
 0xd08   :  { %v4443_v9 = vpop.xlane.xlu2 %4442 }
 0xd09   :  { %v4447_v52 = vmul.f32 %v4443_v9, %v7582_v10 }
 0xd0b   :  { %v4449_v39 = vadd.f32 1e-06, %v4447_v52 }
 0xd0d   :  { %5367 = vrsqrt.f32 %v4449_v39  ;;  %vm4457_vm6 = vweird.f32 %v4449_v39 }
 0xd10   :  { %v4446_v59 = vpop.xlane.xlu1 %4445 }
 0xd11   :  { %v4448_v26 = vmul.f32 %v4446_v59, %v7582_v10 }
 0xd13   :  { %v5368_v19 = vpop.eup %5367  ;;  %v4450_v62 = vadd.f32 1e-06, %v4448_v26 }
 0xd14   :  { %v4452_v31 = vmul.f32 %v5368_v19, %v4449_v39  ;;  %vm4458_vm5 = vweird.f32 %v5368_v19 }
 0xd15   :  { %5369 = vrsqrt.f32 %v4450_v62  ;;  %vm4459_vm7 = vmor %vm4457_vm6, %vm4458_vm5  ;;  %vm4467_vm9 = vweird.f32 %v4450_v62 }
 0xd16   :  { %v4453_v16 = vmul.f32 %v5368_v19, %v4452_v31 }
 0xd18   :  { %v4454_v48 = vmul.f32 0.5, %v4453_v16 }
 0xd1a   :  { %v4455_v14 = vsub.f32 1.5, %v4454_v48 }
 0xd1b   :  { %v5370_v34 = vpop.eup %5369 }
 0xd1c   :  { %v4456_v36 = vmul.f32 %v5368_v19, %v4455_v14  ;;  %v4462_v3 = vmul.f32 %v5370_v34, %v4450_v62  ;;  %vm4468_vm8 = vweird.f32 %v5370_v34 }
 0xd1d   :  { %vm4469_vm10 = vmor %vm4467_vm9, %vm4468_vm8 }
 0xd1e   :  { %v4460_v7 = vsel %vm4459_vm7, %v5368_v19, %v4456_v36  ;;  %v4463_v12 = vmul.f32 %v5370_v34, %v4462_v3 }
 0xd1f   :  { %v4476_v32 = vperm.slane %v4460_v7, %v7583_v1  ;;  %v4480_v5 = vperm.slane %v4460_v7, %v7584_v42  ;;  %v4484_v33 = vperm.slane %v4460_v7, %v7585_v21  ;;  %v4488_v41 = vperm.slane %v4460_v7, %v7586_v40 }
 0xd20   :  { %v4464_v47 = vmul.f32 0.5, %v4463_v12  ;;  %v5092_v12 = vld [vmem:[%s7523_s18] sm:$0xff] }
 0xd21   :  { %v4513_v8 = vmul.f32 %v4476_v32, %v7321_v28  ;;  %v4514_v25 = vmul.f32 %v4480_v5, %v7324_v0  ;;  %v4515_v27 = vmul.f32 %v4484_v33, %v7327_v60  ;;  %v4516_v38 = vmul.f32 %v4488_v41, %v7330_v37 }
 0xd22   :  { %v4465_v46 = vsub.f32 1.5, %v4464_v47 }
 0xd23   :  { %v4529_v15 = vmul.f32 %v4521_v23, %v4513_v8  ;;  %v4530_v29 = vmul.f32 %v4523_v11, %v4514_v25  ;;  %v4531_v57 = vmul.f32 %v4524_v22, %v4515_v27  ;;  %v4532_v4 = vmul.f32 %v4525_v24, %v4516_v38 }
 0xd24   :  { %v4466_v20 = vmul.f32 %v5370_v34, %v4465_v46 }
 0xd25   :  { %v4545_v9 = vadd.f32 %v4537_v2, %v4529_v15  ;;  %v4546_v52 = vadd.f32 %v4539_v44, %v4530_v29  ;;  %v4547_v39 = vadd.f32 %v4540_v58, %v4531_v57  ;;  %v4548_v28 = vadd.f32 %v4541_v56, %v4532_v4 }
 0xd26   :  { %v4470_v59 = vsel %vm4469_vm10, %v5370_v34, %v4466_v20 }
 0xd27   :  { %4561 = vst [vmem:[#allocation1] ss:$4 sm:$0xff] %v4545_v9  ;;  %v4492_v0 = vperm.slane %v4470_v59, %v7583_v1  ;;  %v4496_v60 = vperm.slane %v4470_v59, %v7584_v42  ;;  %v4500_v37 = vperm.slane %v4470_v59, %v7585_v21  ;;  %v4504_v26 = vperm.slane %v4470_v59, %v7586_v40 }
 0xd28   :  { %4563 = vst [vmem:[#allocation1 + $0x1] ss:$4 sm:$0xff] %v4546_v52  ;;  %v5290_v52 = vld [vmem:[%s7524_s19] ss:$0 sm:$0xff] }
 0xd29   :  { %4565 = vst [vmem:[#allocation1 + $0x2] ss:$4 sm:$0xff] %v4547_v39  ;;  %v4517_v45 = vmul.f32 %v4492_v0, %v7346_v63  ;;  %v4518_v19 = vmul.f32 %v4496_v60, %v7349_v54  ;;  %v4519_v62 = vmul.f32 %v4500_v37, %v7352_v35  ;;  %v4520_v31 = vmul.f32 %v4504_v26, %v7355_v18  ;;  %v5095_v35 = vld [vmem:[%s7523_s18 + $0x18] sm:$0xff]  ;;  %v5289_v18 = vld [vmem:[%s7522_s17] ss:$0 sm:$0xff] }
 0xd2a   :  { %4567 = vst [vmem:[#allocation1 + $0x3] ss:$4 sm:$0xff] %v4548_v28  ;;  %4681 = vmatpush.bf16.msra.mxu3 %v5095_v35 }
 0xd2b   :  { %v4533_v30 = vmul.f32 %v4521_v23, %v4517_v45  ;;  %v4534_v16 = vmul.f32 %v4523_v11, %v4518_v19  ;;  %v4535_v48 = vmul.f32 %v4524_v22, %v4519_v62  ;;  %v4536_v13 = vmul.f32 %v4525_v24, %v4520_v31  ;;  %v5094_v23 = vld [vmem:[%s7523_s18 + $0x10] sm:$0xff]  ;;  %v5093_v22 = vld [vmem:[%s7523_s18 + $0x8] sm:$0xff] }
 0xd2d   :  { %v4549_v14 = vadd.f32 %v4537_v2, %v4533_v30  ;;  %v4550_v34 = vadd.f32 %v4539_v44, %v4534_v16  ;;  %v4551_v43 = vadd.f32 %v4540_v58, %v4535_v48  ;;  %v4552_v36 = vadd.f32 %v4541_v56, %v4536_v13 }
 0xd2e   :  { %4682 = vmatpush.bf16.msra.mxu3 %v5094_v23 }
 0xd2f   :  { %4569 = vst [vmem:[#allocation1 + $0x20] ss:$4 sm:$0xff] %v4549_v14 }
 0xd30   :  { %4571 = vst [vmem:[#allocation1 + $0x21] ss:$4 sm:$0xff] %v4550_v34 }
 0xd31   :  { %4573 = vst [vmem:[#allocation1 + $0x22] ss:$4 sm:$0xff] %v4551_v43  ;;  %v4576_v63 = vld.sshfl [vmem:[#allocation1] sm:$0xff pattern:$0x73625140] }
 0xd32   :  { %4575 = vst [vmem:[#allocation1 + $0x23] ss:$4 sm:$0xff] %v4552_v36  ;;  %4683 = vmatpush.bf16.msra.mxu3 %v5093_v22 }
 0xd36   :  { %4684 = vmatpush.bf16.msra.mxu3 %v5092_v12 }
 0xd39   :  { %v4577_v3 = vld.sshfl [vmem:[#allocation1 + $0x20] sm:$0xff pattern:$0x73625140] }
 0xd3a   :  { %v4580_v54 = vpack.c.bf16 %v4577_v3, %v4576_v63 }
 0xd3c   :  { %5062 = vmatmul.msk.bf16.vlgmr.msrb.gmra.mxu2 %vm110_vm0, %v4580_v54 }
 0xdbf   :  { %v4613_v2 = vpop.f32.mrf.mxu2 }
 0xdc0   :  { %v4614_v11 = vadd.f32 %v5289_v18, %v4613_v2 }
 0xdc2   :  { %v4620_v24 = vmul.f32 0.044715, %v4614_v11  ;;  %v4618_v15 = vmul.f32 0.5, %v4614_v11 }
 0xdc4   :  { %v4622_v7 = vmul.f32 %v4620_v24, %v4614_v11 }
 0xdc6   :  { %v4624_v32 = vmul.f32 %v4622_v7, %v4614_v11 }
 0xdc7   :  { %v4615_v5 = vpop.f32.mrf.mxu2 }
 0xdc8   :  { %v4626_v33 = vadd.f32 %v4624_v32, %v4614_v11  ;;  %v4616_v41 = vadd.f32 %v5289_v18, %v4615_v5 }
 0xdca   :  { %v4621_v44 = vmul.f32 0.044715, %v4616_v41  ;;  %v4628_v58 = vmul.f32 0.7978846, %v4626_v33  ;;  %v4619_v29 = vmul.f32 0.5, %v4616_v41 }
 0xdcc   :  { %v4623_v47 = vmul.f32 %v4621_v44, %v4616_v41  ;;  %5371 = vtanh.f32 %v4628_v58 }
 0xdce   :  { %v4625_v8 = vmul.f32 %v4623_v47, %v4616_v41 }
 0xdd0   :  { %v4627_v25 = vadd.f32 %v4625_v8, %v4616_v41 }
 0xdd2   :  { %v4629_v27 = vmul.f32 0.7978846, %v4627_v25  ;;  %v5372_v38 = vpop.eup %5371 }
 0xdd3   :  { %v4632_v56 = vadd.f32 1.0, %v5372_v38 }
 0xdd4   :  { %5373 = vtanh.f32 %v4629_v27 }
 0xdd5   :  { %v4634_v4 = vmul.f32 %v4632_v56, %v4618_v15 }
 0xdda   :  { %v5374_v46 = vpop.eup %5373 }
 0xddb   :  { %v4633_v57 = vadd.f32 1.0, %v5374_v46 }
 0xddd   :  { %v4635_v20 = vmul.f32 %v4633_v57, %v4619_v29 }
 0xddf   :  { %v4636_v9 = vpack.c.bf16 %v4635_v20, %v4634_v4 }
 0xde1   :  { %5079 = vmatmul.msk.bf16.vlgmr.msra.gmra.mxu3 %vm4673_vm11, %v4636_v9 }
 0xe64   :  { %v4686_v39 = vpop.f32.mrf.mxu3 }
 0xe65   :  { %v4687_v28 = vadd.f32 %v5290_v52, %v4686_v39 }
 0xe67   :  { %v4693_v59 = vrot.slane %v4687_v28, 2  ;;  %v4694_v0 = vrot.slane %v4687_v28, 4  ;;  %v4695_v60 = vrot.slane %v4687_v28, 6  ;;  %v4705_v37 = vadd.f32 %v4687_v28, %v7282_v17 }
 0xe69   :  { %v4706_v26 = vadd.f32 %v4693_v59, %v7285_v61  ;;  %v4707_v45 = vadd.f32 %v4694_v0, %v7288_v50  ;;  %v4708_v19 = vadd.f32 %v4695_v60, %v7291_v6  ;;  %4723 = vst [vmem:[#allocation1] ss:$4 sm:$0xff] %v4705_v37 }
 0xe6b   :  { %4725 = vst [vmem:[#allocation1 + $0x1] ss:$4 sm:$0xff] %v4706_v26 }
 0xe6c   :  { %4727 = vst [vmem:[#allocation1 + $0x2] ss:$4 sm:$0xff] %v4707_v45  ;;  %v4688_v62 = vpop.f32.mrf.mxu3 }
 0xe6d   :  { %4729 = vst [vmem:[#allocation1 + $0x3] ss:$4 sm:$0xff] %v4708_v19  ;;  %v4689_v31 = vadd.f32 %v5290_v52, %v4688_v62 }
 0xe6f   :  { %v4696_v30 = vrot.slane %v4689_v31, 2  ;;  %v4697_v16 = vrot.slane %v4689_v31, 4  ;;  %v4698_v48 = vrot.slane %v4689_v31, 6  ;;  %v4709_v13 = vadd.f32 %v4689_v31, %v7298_v55 }
 0xe71   :  { %v4710_v14 = vadd.f32 %v4696_v30, %v7301_v51  ;;  %v4711_v17 = vadd.f32 %v4697_v16, %v7304_v53  ;;  %v4712_v61 = vadd.f32 %v4698_v48, %v7307_v49  ;;  %4731 = vst [vmem:[#allocation1 + $0x20] ss:$4 sm:$0xff] %v4709_v13 }
 0xe73   :  { %4733 = vst [vmem:[#allocation1 + $0x21] ss:$4 sm:$0xff] %v4710_v14 }
 0xe74   :  { %4735 = vst [vmem:[#allocation1 + $0x22] ss:$4 sm:$0xff] %v4711_v17  ;;  %v4738_v50 = vld.sshfl [vmem:[#allocation1] sm:$0xff pattern:$0x73625140] }
 0xe75   :  { %4737 = vst [vmem:[#allocation1 + $0x23] ss:$4 sm:$0xff] %v4712_v61  ;;  %v4742_v6 = vsel %vm110_vm0, %v4738_v50, 0.0 }
 0xe76   :  { %4743 = vadd.xlane.f32.xlu0 %v4742_v6 }
 0xe7c   :  { %v4739_v34 = vld.sshfl [vmem:[#allocation1 + $0x20] sm:$0xff pattern:$0x73625140] }
 0xe7d   :  { %v4745_v43 = vsel %vm110_vm0, %v4739_v34, 0.0 }
 0xe7e   :  { %4746 = vadd.xlane.f32.xlu2 %v4745_v43 }
 0xee9   :  { %v4744_v36 = vpop.xlane.xlu0 %4743 }
 0xeea   :  { %v4748_v55 = vmul.f32 %v4744_v36, %v7582_v10 }
 0xeec   :  { %v4755_v51 = vperm.slane %v4748_v55, %v7583_v1  ;;  %v4759_v53 = vperm.slane %v4748_v55, %v7584_v42  ;;  %v4763_v49 = vperm.slane %v4748_v55, %v7585_v21  ;;  %v4767_v63 = vperm.slane %v4748_v55, %v7586_v40 }
 0xeee   :  { %v7431_v3 = vsub.f32 %v4705_v37, %v4755_v51  ;;  %v7433_v54 = vsub.f32 %v4706_v26, %v4759_v53  ;;  %v7435_v35 = vsub.f32 %v4707_v45, %v4763_v49  ;;  %v7437_v18 = vsub.f32 %v4708_v19, %v4767_v63  ;;  %v5291_v37 = vld [vmem:[%s7525_s20] ss:$0 sm:$0xff]  ;;  %s5424_s20 = smov [#allocation2]  }
 0xeef   :  { %v5292_v19 = vld [vmem:[%s7526_s21] ss:$0 sm:$0xff]  ;;  %v4918_v31 = vrot.slane %v5291_v37, 2  ;;  %v4919_v30 = vrot.slane %v5291_v37, 4  ;;  %v4920_v16 = vrot.slane %v5291_v37, 6  ;;  %s4962_s21 = sshll.u32 %s5424_s20, 4  ;;  %s4963_s21 = int_to_ptr.vmem [resolvable:$true] %s4962_s21 }
 0xef0   :  { %v4800_v23 = vmul.f32 %v7431_v3, %v7431_v3  ;;  %v4801_v2 = vmul.f32 %v7433_v54, %v7433_v54  ;;  %v4802_v11 = vmul.f32 %v7435_v35, %v7435_v35  ;;  %v4803_v22 = vmul.f32 %v7437_v18, %v7437_v18 }
 0xef1   :  { %v4747_v24 = vpop.xlane.xlu2 %4746  ;;  %v4935_v6 = vrot.slane %v5292_v19, 2  ;;  %v4936_v34 = vrot.slane %v5292_v19, 4  ;;  %v4937_v49 = vrot.slane %v5292_v19, 6 }
 0xef2   :  { %4816 = vst [vmem:[#allocation1] ss:$4 sm:$0xff] %v4800_v23  ;;  %v4749_v7 = vmul.f32 %v4747_v24, %v7582_v10 }
 0xef3   :  { %4818 = vst [vmem:[#allocation1 + $0x1] ss:$4 sm:$0xff] %v4801_v2 }
 0xef4   :  { %4820 = vst [vmem:[#allocation1 + $0x2] ss:$4 sm:$0xff] %v4802_v11  ;;  %v4771_v12 = vperm.slane %v4749_v7, %v7583_v1  ;;  %v4775_v32 = vperm.slane %v4749_v7, %v7584_v42  ;;  %v4779_v5 = vperm.slane %v4749_v7, %v7585_v21  ;;  %v4783_v33 = vperm.slane %v4749_v7, %v7586_v40 }
 0xef5   :  { %4822 = vst [vmem:[#allocation1 + $0x3] ss:$4 sm:$0xff] %v4803_v22 }
 0xef6   :  { %v7452_v41 = vsub.f32 %v4709_v13, %v4771_v12  ;;  %v7454_v44 = vsub.f32 %v4710_v14, %v4775_v32  ;;  %v7456_v58 = vsub.f32 %v4711_v17, %v4779_v5  ;;  %v7458_v47 = vsub.f32 %v4712_v61, %v4783_v33 }
 0xef8   :  { %v4804_v8 = vmul.f32 %v7452_v41, %v7452_v41  ;;  %v4805_v25 = vmul.f32 %v7454_v44, %v7454_v44  ;;  %v4806_v27 = vmul.f32 %v7456_v58, %v7456_v58  ;;  %v4807_v38 = vmul.f32 %v7458_v47, %v7458_v47 }
 0xefa   :  { %4824 = vst [vmem:[#allocation1 + $0x20] ss:$4 sm:$0xff] %v4804_v8 }
 0xefb   :  { %4826 = vst [vmem:[#allocation1 + $0x21] ss:$4 sm:$0xff] %v4805_v25 }
 0xefc   :  { %4828 = vst [vmem:[#allocation1 + $0x22] ss:$4 sm:$0xff] %v4806_v27  ;;  %v4831_v56 = vld.sshfl [vmem:[#allocation1] sm:$0xff pattern:$0x73625140] }
 0xefd   :  { %4830 = vst [vmem:[#allocation1 + $0x23] ss:$4 sm:$0xff] %v4807_v38  ;;  %v4835_v46 = vsel %vm110_vm0, %v4831_v56, 0.0 }
 0xefe   :  { %4836 = vadd.xlane.f32.xlu1 %v4835_v46 }
 0xf04   :  { %v4832_v15 = vld.sshfl [vmem:[#allocation1 + $0x20] sm:$0xff pattern:$0x73625140] }
 0xf05   :  { %v4838_v29 = vsel %vm110_vm0, %v4832_v15, 0.0 }
 0xf06   :  { %4839 = vadd.xlane.f32.xlu0 %v4838_v29 }
 0xf71   :  { %v4837_v57 = vpop.xlane.xlu1 %4836 }
 0xf72   :  { %v4841_v4 = vmul.f32 %v4837_v57, %v7582_v10 }
 0xf74   :  { %v4843_v20 = vadd.f32 1e-06, %v4841_v4 }
 0xf76   :  { %5375 = vrsqrt.f32 %v4843_v20  ;;  %vm4851_vm12 = vweird.f32 %v4843_v20 }
 0xf79   :  { %v4840_v9 = vpop.xlane.xlu0 %4839 }
 0xf7a   :  { %v4842_v52 = vmul.f32 %v4840_v9, %v7582_v10 }
 0xf7c   :  { %v5376_v39 = vpop.eup %5375  ;;  %v4844_v28 = vadd.f32 1e-06, %v4842_v52 }
 0xf7d   :  { %v4846_v59 = vmul.f32 %v5376_v39, %v4843_v20  ;;  %vm4852_vm0 = vweird.f32 %v5376_v39 }
 0xf7e   :  { %5377 = vrsqrt.f32 %v4844_v28  ;;  %vm4853_vm13 = vmor %vm4851_vm12, %vm4852_vm0  ;;  %vm4861_vm1 = vweird.f32 %v4844_v28 }
 0xf7f   :  { %v4847_v0 = vmul.f32 %v5376_v39, %v4846_v59 }
 0xf81   :  { %v4848_v60 = vmul.f32 0.5, %v4847_v0 }
 0xf83   :  { %v4849_v26 = vsub.f32 1.5, %v4848_v60 }
 0xf84   :  { %v5378_v45 = vpop.eup %5377 }
 0xf85   :  { %v4850_v62 = vmul.f32 %v5376_v39, %v4849_v26  ;;  %v4856_v10 = vmul.f32 %v5378_v45, %v4844_v28  ;;  %vm4862_vm14 = vweird.f32 %v5378_v45 }
 0xf86   :  { %vm4863_vm2 = vmor %vm4861_vm1, %vm4862_vm14 }
 0xf87   :  { %v4854_v48 = vsel %vm4853_vm13, %v5376_v39, %v4850_v62  ;;  %v4857_v13 = vmul.f32 %v5378_v45, %v4856_v10 }
 0xf88   :  { %v4870_v14 = vperm.slane %v4854_v48, %v7583_v1  ;;  %v4874_v17 = vperm.slane %v4854_v48, %v7584_v42  ;;  %v4878_v61 = vperm.slane %v4854_v48, %v7585_v21  ;;  %v4882_v50 = vperm.slane %v4854_v48, %v7586_v40 }
 0xf89   :  { %v4858_v43 = vmul.f32 0.5, %v4857_v13 }
 0xf8a   :  { %v4907_v36 = vmul.f32 %v4870_v14, %v7431_v3  ;;  %v4908_v55 = vmul.f32 %v4874_v17, %v7433_v54  ;;  %v4909_v51 = vmul.f32 %v4878_v61, %v7435_v35  ;;  %v4910_v53 = vmul.f32 %v4882_v50, %v7437_v18 }
 0xf8b   :  { %v4859_v63 = vsub.f32 1.5, %v4858_v43 }
 0xf8c   :  { %v4924_v23 = vmul.f32 %v5291_v37, %v4907_v36  ;;  %v4925_v2 = vmul.f32 %v4918_v31, %v4908_v55  ;;  %v4926_v11 = vmul.f32 %v4919_v30, %v4909_v51  ;;  %v4927_v22 = vmul.f32 %v4920_v16, %v4910_v53 }
 0xf8d   :  { %v4860_v24 = vmul.f32 %v5378_v45, %v4859_v63 }
 0xf8e   :  { %v4941_v7 = vadd.f32 %v5292_v19, %v4924_v23  ;;  %v4942_v12 = vadd.f32 %v4935_v6, %v4925_v2  ;;  %v4943_v32 = vadd.f32 %v4936_v34, %v4926_v11  ;;  %v4944_v3 = vadd.f32 %v4937_v49, %v4927_v22 }
 0xf8f   :  { %v4864_v54 = vsel %vm4863_vm2, %v5378_v45, %v4860_v24 }
 0xf90   :  { %4950 = vst.msk [vmem:[#allocation2] sm:$0x3] %vm4949_vm15, %v4941_v7  ;;  %v4886_v35 = vperm.slane %v4864_v54, %v7583_v1  ;;  %v4890_v18 = vperm.slane %v4864_v54, %v7584_v42  ;;  %v4894_v5 = vperm.slane %v4864_v54, %v7585_v21  ;;  %v4898_v33 = vperm.slane %v4864_v54, %v7586_v40 }
 0xf91   :  { %4951 = vst.msk [vmem:[#allocation2 + $0x2] sm:$0x3] %vm4949_vm15, %v4942_v12 }
 0xf92   :  { %4952 = vst.msk [vmem:[#allocation2 + $0x4] sm:$0x3] %vm4949_vm15, %v4943_v32  ;;  %v4911_v8 = vmul.f32 %v4886_v35, %v7452_v41  ;;  %v4912_v25 = vmul.f32 %v4890_v18, %v7454_v44  ;;  %v4913_v27 = vmul.f32 %v4894_v5, %v7456_v58  ;;  %v4914_v38 = vmul.f32 %v4898_v33, %v7458_v47 }
 0xf93   :  { %4953 = vst.msk [vmem:[#allocation2 + $0x6] sm:$0x3] %vm4949_vm15, %v4944_v3 }
 0xf94   :  { %v4928_v1 = vmul.f32 %v5291_v37, %v4911_v8  ;;  %v4929_v42 = vmul.f32 %v4918_v31, %v4912_v25  ;;  %v4930_v56 = vmul.f32 %v4919_v30, %v4913_v27  ;;  %v4931_v21 = vmul.f32 %v4920_v16, %v4914_v38 }
 0xf96   :  { %v4945_v40 = vadd.f32 %v5292_v19, %v4928_v1  ;;  %v4946_v41 = vadd.f32 %v4935_v6, %v4929_v42  ;;  %v4947_v46 = vadd.f32 %v4936_v34, %v4930_v56  ;;  %v4948_v44 = vadd.f32 %v4937_v49, %v4931_v21 }
 0xf98   :  { %4954 = vst.msk [vmem:[#allocation2 + $0x8] sm:$0x3] %vm4949_vm15, %v4945_v40 }
 0xf99   :  { %4955 = vst.msk [vmem:[#allocation2 + $0xa] sm:$0x3] %vm4949_vm15, %v4946_v41 }
 0xf9a   :  { %4956 = vst.msk [vmem:[#allocation2 + $0xc] sm:$0x3] %vm4949_vm15, %v4947_v46 }
 0xf9b   :  { %4957 = vst.msk [vmem:[#allocation2 + $0xe] sm:$0x3] %vm4949_vm15, %v4948_v44 }
 0xf9c   :  { %4970 = dma.vmem_to_hbm [thread:$0]  %s4963_s21, 256, %s4965_s14, [#allocation3], %s5425_s5, %s5425_s5, %s5426_s15  }
 0xf9d   :  { %5407 = dma.done.wait [#allocation3], 256  }
 0xf9e   :  { %5408 = vsyncadd [#allocation3], 4294967040 }
 0xf9f   :  { %4975 = vsyncpa [#allocation3], 1 }

</bundles_post_ra>
